<compile_context>
chip_gen: v7x
topology: tpu7x:2x2x1
jax: 0.10.0
libtpu: 0.0.40
codegen_flags: <defaults>
</compile_context>

<pallas_src>
import functools

import jax
import jax.numpy as jnp
from jax.experimental import pallas as pl
from jax.experimental.pallas import tpu as pltpu


def _trans_lower_kernel(*refs, num_res, H, W, b_tile):
    """One grid step == one batch tile of b_tile images; activations in VMEM."""
    HW = H * W
    halo = W + 1
    pad_l = ((halo + 127) // 128) * 128      # left pad so window writes are lane-aligned
    n_conv = 4 + 2 * num_res

    x_ref = refs[0]
    w_refs = refs[1:1 + n_conv]
    out_ref = refs[1 + n_conv]
    act_a, act_b, col_ref = refs[2 + n_conv:]

    f32 = jnp.float32
    bf16 = jnp.bfloat16

    # ---- per-grid-step setup (shared by every image in the batch tile) ----

    # Zero ONLY the +-(W+1) lane halos read by the shifted-tap conv; lanes
    # [0, pad_l-halo) exist purely for store alignment and are never read.
    # Unconditional each step: with ("parallel",) semantics scratch is
    # per-core (v7x megacore), so a one-time program_id==0 init is unsafe.
    zero_halo_a = jnp.zeros((act_a.shape[0], halo), bf16)
    act_a[:, pad_l - halo:pad_l] = zero_halo_a
    act_a[:, pad_l + HW:pad_l + HW + halo] = zero_halo_a
    if num_res > 0:
        zero_halo_b = jnp.zeros((act_b.shape[0], halo), bf16)
        act_b[:, pad_l - halo:pad_l] = zero_halo_b
        act_b[:, pad_l + HW:pad_l + HW + halo] = zero_halo_b

    # Bias block of the im2col buffer: row 0 == 1.0 so the packed bias column
    # falls out of the MXU accumulator; rows 1..15 are zero padding that keeps
    # the tap blocks 16-sublane aligned in bf16.
    row_idx = jax.lax.broadcasted_iota(jnp.int32, (16, HW), 0)
    col_ref[0:16, :] = (row_idx == 0).astype(bf16)

    # Lane masks (pre-cast to bf16 so tap multiplies stay bf16) zeroing the
    # columns that would wrap across image rows for the dx = -1 / +1 taps.
    col_idx = jax.lax.broadcasted_iota(jnp.int32, (1, HW), 1) % W
    mask_l = (col_idx != 0).astype(bf16)          # tap at dx = -1
    mask_r = (col_idx != W - 1).astype(bf16)      # tap at dx = +1

    def conv3x3(src, w_ref, *, inorm=False, leaky=False):
        """3x3 same-pad conv of src's (cin_p, HW) window as ONE MXU matmul."""
        cout, kp = w_ref.shape
        cin_p = (kp - 16) // 9
        t = 0
        for dy in (-1, 0, 1):
            for dx in (-1, 0, 1):
                off = dy * W + dx
                piece = src[0:cin_p, pad_l + off:pad_l + off + HW]   # bf16 load
                if dx == -1:
                    piece = piece * mask_l
                elif dx == 1:
                    piece = piece * mask_r
                col_ref[16 + t * cin_p:16 + (t + 1) * cin_p, :] = piece
                t += 1
        acc = jnp.dot(w_ref[...], col_ref[0:kp, :],
                      preferred_element_type=f32)     # (cout, HW) f32, bias folded in
        if inorm:  # nn.InstanceNorm2d defaults: biased var, eps=1e-5, no affine
            mean = jnp.mean(acc, axis=1, keepdims=True)
            var = jnp.mean(jnp.square(acc - mean), axis=1, keepdims=True)
            acc = (acc - mean) * jax.lax.rsqrt(var + 1e-5)
        if leaky:  # nn.LeakyReLU default negative_slope = 0.01
            acc = jnp.where(acc > 0, acc, 0.01 * acc)
        return acc

    def store_act(dst, val):
        # Single f32 -> bf16 cast per layer output (the only activation cast).
        dst[0:val.shape[0], pad_l:pad_l + HW] = val.astype(bf16)

    cin0 = x_ref.shape[1]

    # ---- per-image loop (static; reuses weights / masks / scratch) ----
    for bi in range(b_tile):
        # x -> rows 0..cin0-1 of act_a's window; rows cin0..15 must be freshly
        # zeroed every image so conv0's zero-padded input channels stay zero.
        act_a[0:cin0, pad_l:pad_l + HW] = x_ref[bi].astype(bf16)
        act_a[cin0:16, pad_l:pad_l + HW] = jnp.zeros((16 - cin0, HW), bf16)
        x_f32 = x_ref[bi].astype(f32)

        # Conv(3->16) + InstanceNorm + LeakyReLU
        store_act(act_a, conv3x3(act_a, w_refs[0], inorm=True, leaky=True))

        # Conv(16->64) + LeakyReLU
        store_act(act_a, conv3x3(act_a, w_refs[1], leaky=True))

        # Residual blocks: h = h + conv(leaky(conv(h)))
        li = 2
        for _ in range(num_res):
            store_act(act_b, conv3x3(act_a, w_refs[li], leaky=True))
            li += 1
            h = conv3x3(act_b, w_refs[li]) \
                + act_a[0:64, pad_l:pad_l + HW].astype(f32)
            li += 1
            store_act(act_a, h)

        # Conv(64->16) + LeakyReLU
        store_act(act_a, conv3x3(act_a, w_refs[li], leaky=True))
        li += 1

        # Conv(16->3), then out = tanh(x + model(x)); lane-dense (3, HW) store.
        h = conv3x3(act_a, w_refs[li])
        out_ref[bi] = jnp.tanh(h + x_f32).astype(out_ref.dtype)


def _pack_conv(w, b):
    """(3,3,cin,cout) HWIO weight + (cout,) bias -> (cout, 16 + 9*cin_p) bf16.

    cin is zero-padded to a multiple of 16 so the im2col tap blocks stay
    16-sublane aligned in bf16; the bias is folded into column 0 of a leading
    16-wide block that multiplies the constant-1 row of the im2col buffer."""
    cin, cout = w.shape[2], w.shape[3]
    cin_p = ((cin + 15) // 16) * 16
    wp = jnp.zeros((3, 3, cin_p, cout), jnp.float32).at[:, :, :cin, :].set(w)
    wp = jnp.transpose(wp, (3, 0, 1, 2)).reshape(cout, 9 * cin_p)
    bias_block = jnp.zeros((cout, 16), jnp.float32).at[:, 0].set(b)
    return jnp.concatenate([bias_block, wp], axis=1).astype(jnp.bfloat16)


def _pick_batch_tile(n):
    """Largest divisor of n that still leaves >= 2 grid steps (v7x megacore)."""
    best = 1
    for d in range(1, n + 1):
        if n % d == 0 and n // d >= 2:
            best = d
    return best


def trans_lower_forward(x_nchw, params, batch_tile=None):
    """Matches Trans_lower.forward: out = tanh(x + model(x)). x: (N,3,H,W)."""
    N, C, H, W = x_nchw.shape
    HW = H * W
    num_res = len(params["res"])

    weights = [_pack_conv(*params["conv0"]), _pack_conv(*params["conv1"])]
    for blk_a, blk_b in params["res"]:
        weights.append(_pack_conv(*blk_a))
        weights.append(_pack_conv(*blk_b))
    weights.append(_pack_conv(*params["conv2"]))
    weights.append(_pack_conv(*params["conv3"]))

    if batch_tile is None:
        batch_tile = _pick_batch_tile(N)
    assert N % batch_tile == 0

    c_max = max(max(w.shape[0], (w.shape[1] - 16) // 9) for w in weights)
    k_max = max(w.shape[1] for w in weights)
    halo = W + 1
    pad_l = ((halo + 127) // 128) * 128
    buf_lanes = pad_l + HW + halo

    in_specs = [pl.BlockSpec((batch_tile, C, HW), lambda n: (n, 0, 0))]
    in_specs += [pl.BlockSpec(w.shape, lambda n: (0, 0)) for w in weights]

    kernel = functools.partial(_trans_lower_kernel, num_res=num_res,
                               H=H, W=W, b_tile=batch_tile)

    out_flat = pl.pallas_call(
        kernel,
        out_shape=jax.ShapeDtypeStruct((N, C, HW), x_nchw.dtype),
        grid=(N // batch_tile,),
        in_specs=in_specs,
        out_specs=pl.BlockSpec((batch_tile, C, HW), lambda n: (n, 0, 0)),
        scratch_shapes=[
            pltpu.VMEM((c_max, buf_lanes), jnp.bfloat16),   # main activation (bf16)
            pltpu.VMEM((c_max, buf_lanes), jnp.bfloat16),   # resblock temp (bf16)
            pltpu.VMEM((k_max, HW), jnp.bfloat16),          # im2col + bias-ones block
        ],
        compiler_params=pltpu.CompilerParams(
            dimension_semantics=("parallel",)),
    )(x_nchw.reshape(N, C, HW), *weights)

    return out_flat.reshape(N, C, H, W)


def init_params(key, num_residual_blocks):
    """Deterministic synthetic weights; conv weights stored as (3,3,Cin,Cout)."""
    def conv_p(k, cin, cout, scale=0.05):
        kw, kb = jax.random.split(k)
        w = jax.random.normal(kw, (3, 3, cin, cout), jnp.float32) * scale
        b = jax.random.normal(kb, (cout,), jnp.float32) * scale
        return w, b

    keys = jax.random.split(key, 4 + 2 * num_residual_blocks)
    params = {
        "conv0": conv_p(keys[0], 3, 16),
        "conv1": conv_p(keys[1], 16, 64),
        "res": [],
        "conv2": conv_p(keys[2], 64, 16),
        "conv3": conv_p(keys[3], 16, 3),
    }
    for i in range(num_residual_blocks):
        wa, ba = conv_p(keys[4 + 2 * i], 64, 64)
        wb, bb = conv_p(keys[5 + 2 * i], 64, 64)
        params["res"].append(((wa, ba), (wb, bb)))
    return params


def _ref_forward(x, params):
    """Pure-JAX reference of Trans_lower.forward (f32)."""
    def conv(h, wb):
        w, b = wb
        y = jax.lax.conv_general_dilated(
            h, w, window_strides=(1, 1), padding="SAME",
            dimension_numbers=("NCHW", "HWIO", "NCHW"))
        return y + b.reshape(1, -1, 1, 1)

    def leaky(h):
        return jnp.where(h > 0, h, 0.01 * h)

    def inorm(h):
        m = jnp.mean(h, axis=(2, 3), keepdims=True)
        v = jnp.mean(jnp.square(h - m), axis=(2, 3), keepdims=True)
        return (h - m) * jax.lax.rsqrt(v + 1e-5)

    h = leaky(inorm(conv(x, params["conv0"])))
    h = leaky(conv(h, params["conv1"]))
    for blk_a, blk_b in params["res"]:
        h = h + conv(leaky(conv(h, blk_a)), blk_b)
    h = leaky(conv(h, params["conv2"]))
    h = conv(h, params["conv3"])
    return jnp.tanh(x + h)


if __name__ == "__main__":
    key = jax.random.PRNGKey(0)
    k_x, k_p = jax.random.split(key)

    num_residual_blocks = 2
    x = jax.random.normal(k_x, (2, 3, 16, 16), jnp.float32)   # NCHW, like PyTorch
    params = init_params(k_p, num_residual_blocks)

    fwd = jax.jit(trans_lower_forward)
    out = jax.block_until_ready(fwd(x, params))

    assert out.shape == (2, 3, 16, 16)
    assert bool(jnp.all(jnp.isfinite(out)))

    # Loose correctness check vs a pure-JAX f32 reference (kernel uses bf16
    # MXU inputs / bf16 inter-layer activations with f32 accumulation).
    ref = _ref_forward(x, params)
    err = float(jnp.max(jnp.abs(out - ref)))
    assert err < 5e-2, f"max abs err vs reference: {err}"

    print("KERNEL_OK")
</pallas_src>

<mosaic_0001>
module attributes {stable_mosaic.version = 11 : i64} {
  func.func @_trans_lower_kernel(%arg0: i32, %arg1: memref<1x3x256xf32, #tpu.memory_space<vmem>>, %arg2: memref<16x160xbf16, #tpu.memory_space<vmem>>, %arg3: memref<64x160xbf16, #tpu.memory_space<vmem>>, %arg4: memref<64x592xbf16, #tpu.memory_space<vmem>>, %arg5: memref<64x592xbf16, #tpu.memory_space<vmem>>, %arg6: memref<64x592xbf16, #tpu.memory_space<vmem>>, %arg7: memref<64x592xbf16, #tpu.memory_space<vmem>>, %arg8: memref<16x592xbf16, #tpu.memory_space<vmem>>, %arg9: memref<3x160xbf16, #tpu.memory_space<vmem>>, %arg10: memref<1x3x256xf32, #tpu.memory_space<vmem>>, %arg11: memref<64x401xbf16, #tpu.memory_space<vmem>>, %arg12: memref<64x401xbf16, #tpu.memory_space<vmem>>, %arg13: memref<592x256xbf16, #tpu.memory_space<vmem>>) attributes {dimension_semantics = [#tpu.dimension_semantics<parallel>], iteration_bounds = array<i64: 2>, scalar_prefetch = 0 : i64, scratch_operands = 3 : i64, tpu.core_type = #tpu.core_type<tc>, window_params = [{transform_indices = @transform_0, window_bounds = array<i64: 1, 3, 256>}, {pipeline_mode = #tpu.pipeline_mode<synchronous>, transform_indices = @transform_1, window_bounds = array<i64: 16, 160>}, {pipeline_mode = #tpu.pipeline_mode<synchronous>, transform_indices = @transform_2, window_bounds = array<i64: 64, 160>}, {pipeline_mode = #tpu.pipeline_mode<synchronous>, transform_indices = @transform_3, window_bounds = array<i64: 64, 592>}, {pipeline_mode = #tpu.pipeline_mode<synchronous>, transform_indices = @transform_4, window_bounds = array<i64: 64, 592>}, {pipeline_mode = #tpu.pipeline_mode<synchronous>, transform_indices = @transform_5, window_bounds = array<i64: 64, 592>}, {pipeline_mode = #tpu.pipeline_mode<synchronous>, transform_indices = @transform_6, window_bounds = array<i64: 64, 592>}, {pipeline_mode = #tpu.pipeline_mode<synchronous>, transform_indices = @transform_7, window_bounds = array<i64: 16, 592>}, {pipeline_mode = #tpu.pipeline_mode<synchronous>, transform_indices = @transform_8, window_bounds = array<i64: 3, 160>}, {transform_indices = @transform_9, window_bounds = array<i64: 1, 3, 256>}]} {
    %cst = arith.constant 0.000000e+00 : bf16
    %0 = vector.broadcast %cst : bf16 to vector<64x17xbf16>
    %c0 = arith.constant 0 : index
    %c111 = arith.constant 111 : index
    %1 = vector.load %arg11[%c0, %c111] : memref<64x401xbf16, #tpu.memory_space<vmem>>, vector<64x17xbf16>
    tpu.vector_store %arg11[%c0, %c111], %0 {strides = array<i32>} : memref<64x401xbf16, #tpu.memory_space<vmem>>, vector<64x17xbf16>,
    %c0_0 = arith.constant 0 : index
    %c384 = arith.constant 384 : index
    %2 = vector.load %arg11[%c0_0, %c384] : memref<64x401xbf16, #tpu.memory_space<vmem>>, vector<64x17xbf16>
    tpu.vector_store %arg11[%c0_0, %c384], %0 {strides = array<i32>} : memref<64x401xbf16, #tpu.memory_space<vmem>>, vector<64x17xbf16>,
    %cst_1 = arith.constant 0.000000e+00 : bf16
    %3 = vector.broadcast %cst_1 : bf16 to vector<64x17xbf16>
    %c0_2 = arith.constant 0 : index
    %c111_3 = arith.constant 111 : index
    %4 = vector.load %arg12[%c0_2, %c111_3] : memref<64x401xbf16, #tpu.memory_space<vmem>>, vector<64x17xbf16>
    tpu.vector_store %arg12[%c0_2, %c111_3], %3 {strides = array<i32>} : memref<64x401xbf16, #tpu.memory_space<vmem>>, vector<64x17xbf16>,
    %c0_4 = arith.constant 0 : index
    %c384_5 = arith.constant 384 : index
    %5 = vector.load %arg12[%c0_4, %c384_5] : memref<64x401xbf16, #tpu.memory_space<vmem>>, vector<64x17xbf16>
    tpu.vector_store %arg12[%c0_4, %c384_5], %3 {strides = array<i32>} : memref<64x401xbf16, #tpu.memory_space<vmem>>, vector<64x17xbf16>,
    %6 = tpu.iota {dimensions = array<i32: 0>} : vector<16x256xi32>
    %c0_i32 = arith.constant 0 : i32
    %7 = vector.broadcast %c0_i32 : i32 to vector<16x256xi32>
    %8 = arith.cmpi eq, %6, %7 : vector<16x256xi32>
    %9 = arith.extui %8 : vector<16x256xi1> to vector<16x256xi32>
    %10 = arith.sitofp %9 : vector<16x256xi32> to vector<16x256xf32>
    %11 = arith.truncf %10 : vector<16x256xf32> to vector<16x256xbf16>
    %c0_6 = arith.constant 0 : index
    %c0_7 = arith.constant 0 : index
    %12 = vector.load %arg13[%c0_6, %c0_7] : memref<592x256xbf16, #tpu.memory_space<vmem>>, vector<16x256xbf16>
    tpu.vector_store %arg13[%c0_6, %c0_7], %11 {strides = array<i32>} : memref<592x256xbf16, #tpu.memory_space<vmem>>, vector<16x256xbf16>,
    %13 = tpu.iota {dimensions = array<i32: 1>} : vector<1x256xi32>
    %c16_i32 = arith.constant 16 : i32
    %c0_i32_8 = arith.constant 0 : i32
    %14 = arith.cmpi eq, %c16_i32, %c0_i32_8 : i32
    %c1_i32 = arith.constant 1 : i32
    %15 = arith.select %14, %c1_i32, %c16_i32 : i32
    %16 = vector.broadcast %15 : i32 to vector<1x256xi32>
    %17 = arith.remsi %13, %16 : vector<1x256xi32>
    %c0_i32_9 = arith.constant 0 : i32
    %18 = vector.broadcast %c0_i32_9 : i32 to vector<1x256xi32>
    %19 = arith.cmpi ne, %17, %18 : vector<1x256xi32>
    %c0_i32_10 = arith.constant 0 : i32
    %20 = vector.broadcast %c0_i32_10 : i32 to vector<1x256xi32>
    %21 = arith.cmpi slt, %17, %20 : vector<1x256xi32>
    %c0_i32_11 = arith.constant 0 : i32
    %22 = arith.cmpi slt, %15, %c0_i32_11 : i32
    %23 = vector.broadcast %22 : i1 to vector<1x256xi1>
    %24 = vector.broadcast %23 : vector<1x256xi1> to vector<1x256xi1>
    %25 = arith.xori %21, %24 : vector<1x256xi1>
    %26 = arith.andi %25, %19 : vector<1x256xi1>
    %27 = vector.broadcast %15 : i32 to vector<1x256xi32>
    %28 = arith.addi %17, %27 : vector<1x256xi32>
    %29 = arith.select %26, %28, %17 : vector<1x256xi1>, vector<1x256xi32>
    %c0_i32_12 = arith.constant 0 : i32
    %30 = vector.broadcast %c0_i32_12 : i32 to vector<1x256xi32>
    %31 = arith.cmpi ne, %29, %30 : vector<1x256xi32>
    %32 = arith.extui %31 : vector<1x256xi1> to vector<1x256xi32>
    %33 = arith.sitofp %32 : vector<1x256xi32> to vector<1x256xf32>
    %34 = arith.truncf %33 : vector<1x256xf32> to vector<1x256xbf16>
    %c15_i32 = arith.constant 15 : i32
    %35 = vector.broadcast %c15_i32 : i32 to vector<1x256xi32>
    %36 = arith.cmpi ne, %29, %35 : vector<1x256xi32>
    %37 = arith.extui %36 : vector<1x256xi1> to vector<1x256xi32>
    %38 = arith.sitofp %37 : vector<1x256xi32> to vector<1x256xf32>
    %39 = arith.truncf %38 : vector<1x256xf32> to vector<1x256xbf16>
    %c0_13 = arith.constant 0 : index
    %c0_14 = arith.constant 0 : index
    %c0_15 = arith.constant 0 : index
    %40 = vector.load %arg1[%c0_13, %c0_14, %c0_15] : memref<1x3x256xf32, #tpu.memory_space<vmem>>, vector<1x3x256xf32>
    %41 = vector.shape_cast %40 : vector<1x3x256xf32> to vector<3x256xf32>
    %42 = arith.truncf %41 : vector<3x256xf32> to vector<3x256xbf16>
    %c0_16 = arith.constant 0 : index
    %c128 = arith.constant 128 : index
    %43 = vector.load %arg11[%c0_16, %c128] : memref<64x401xbf16, #tpu.memory_space<vmem>>, vector<3x256xbf16>
    tpu.vector_store %arg11[%c0_16, %c128], %42 {strides = array<i32>} : memref<64x401xbf16, #tpu.memory_space<vmem>>, vector<3x256xbf16>,
    %cst_17 = arith.constant 0.000000e+00 : bf16
    %44 = vector.broadcast %cst_17 : bf16 to vector<13x256xbf16>
    %c3 = arith.constant 3 : index
    %c128_18 = arith.constant 128 : index
    %45 = vector.load %arg11[%c3, %c128_18] : memref<64x401xbf16, #tpu.memory_space<vmem>>, vector<13x256xbf16>
    tpu.vector_store %arg11[%c3, %c128_18], %44 {strides = array<i32>} : memref<64x401xbf16, #tpu.memory_space<vmem>>, vector<13x256xbf16>,
    %c0_19 = arith.constant 0 : index
    %c0_20 = arith.constant 0 : index
    %c0_21 = arith.constant 0 : index
    %46 = vector.load %arg1[%c0_19, %c0_20, %c0_21] : memref<1x3x256xf32, #tpu.memory_space<vmem>>, vector<1x3x256xf32>
    %47 = vector.shape_cast %46 : vector<1x3x256xf32> to vector<3x256xf32>
    %c0_22 = arith.constant 0 : index
    %c111_23 = arith.constant 111 : index
    %48 = vector.load %arg11[%c0_22, %c111_23] : memref<64x401xbf16, #tpu.memory_space<vmem>>, vector<16x256xbf16>
    %49 = vector.broadcast %34 : vector<1x256xbf16> to vector<16x256xbf16>
    %50 = arith.mulf %48, %49 : vector<16x256xbf16>
    %c16 = arith.constant 16 : index
    %c0_24 = arith.constant 0 : index
    %51 = vector.load %arg13[%c16, %c0_24] : memref<592x256xbf16, #tpu.memory_space<vmem>>, vector<16x256xbf16>
    tpu.vector_store %arg13[%c16, %c0_24], %50 {strides = array<i32>} : memref<592x256xbf16, #tpu.memory_space<vmem>>, vector<16x256xbf16>,
    %c0_25 = arith.constant 0 : index
    %c112 = arith.constant 112 : index
    %52 = vector.load %arg11[%c0_25, %c112] : memref<64x401xbf16, #tpu.memory_space<vmem>>, vector<16x256xbf16>
    %c32 = arith.constant 32 : index
    %c0_26 = arith.constant 0 : index
    %53 = vector.load %arg13[%c32, %c0_26] : memref<592x256xbf16, #tpu.memory_space<vmem>>, vector<16x256xbf16>
    tpu.vector_store %arg13[%c32, %c0_26], %52 {strides = array<i32>} : memref<592x256xbf16, #tpu.memory_space<vmem>>, vector<16x256xbf16>,
    %c0_27 = arith.constant 0 : index
    %c113 = arith.constant 113 : index
    %54 = vector.load %arg11[%c0_27, %c113] : memref<64x401xbf16, #tpu.memory_space<vmem>>, vector<16x256xbf16>
    %55 = vector.broadcast %39 : vector<1x256xbf16> to vector<16x256xbf16>
    %56 = arith.mulf %54, %55 : vector<16x256xbf16>
    %c48 = arith.constant 48 : index
    %c0_28 = arith.constant 0 : index
    %57 = vector.load %arg13[%c48, %c0_28] : memref<592x256xbf16, #tpu.memory_space<vmem>>, vector<16x256xbf16>
    tpu.vector_store %arg13[%c48, %c0_28], %56 {strides = array<i32>} : memref<592x256xbf16, #tpu.memory_space<vmem>>, vector<16x256xbf16>,
    %c0_29 = arith.constant 0 : index
    %c127 = arith.constant 127 : index
    %58 = vector.load %arg11[%c0_29, %c127] : memref<64x401xbf16, #tpu.memory_space<vmem>>, vector<16x256xbf16>
    %59 = vector.broadcast %34 : vector<1x256xbf16> to vector<16x256xbf16>
    %60 = arith.mulf %58, %59 : vector<16x256xbf16>
    %c64 = arith.constant 64 : index
    %c0_30 = arith.constant 0 : index
    %61 = vector.load %arg13[%c64, %c0_30] : memref<592x256xbf16, #tpu.memory_space<vmem>>, vector<16x256xbf16>
    tpu.vector_store %arg13[%c64, %c0_30], %60 {strides = array<i32>} : memref<592x256xbf16, #tpu.memory_space<vmem>>, vector<16x256xbf16>,
    %c0_31 = arith.constant 0 : index
    %c128_32 = arith.constant 128 : index
    %62 = vector.load %arg11[%c0_31, %c128_32] : memref<64x401xbf16, #tpu.memory_space<vmem>>, vector<16x256xbf16>
    %c80 = arith.constant 80 : index
    %c0_33 = arith.constant 0 : index
    %63 = vector.load %arg13[%c80, %c0_33] : memref<592x256xbf16, #tpu.memory_space<vmem>>, vector<16x256xbf16>
    tpu.vector_store %arg13[%c80, %c0_33], %62 {strides = array<i32>} : memref<592x256xbf16, #tpu.memory_space<vmem>>, vector<16x256xbf16>,
    %c0_34 = arith.constant 0 : index
    %c129 = arith.constant 129 : index
    %64 = vector.load %arg11[%c0_34, %c129] : memref<64x401xbf16, #tpu.memory_space<vmem>>, vector<16x256xbf16>
    %65 = vector.broadcast %39 : vector<1x256xbf16> to vector<16x256xbf16>
    %66 = arith.mulf %64, %65 : vector<16x256xbf16>
    %c96 = arith.constant 96 : index
    %c0_35 = arith.constant 0 : index
    %67 = vector.load %arg13[%c96, %c0_35] : memref<592x256xbf16, #tpu.memory_space<vmem>>, vector<16x256xbf16>
    tpu.vector_store %arg13[%c96, %c0_35], %66 {strides = array<i32>} : memref<592x256xbf16, #tpu.memory_space<vmem>>, vector<16x256xbf16>,
    %c0_36 = arith.constant 0 : index
    %c143 = arith.constant 143 : index
    %68 = vector.load %arg11[%c0_36, %c143] : memref<64x401xbf16, #tpu.memory_space<vmem>>, vector<16x256xbf16>
    %69 = vector.broadcast %34 : vector<1x256xbf16> to vector<16x256xbf16>
    %70 = arith.mulf %68, %69 : vector<16x256xbf16>
    %c112_37 = arith.constant 112 : index
    %c0_38 = arith.constant 0 : index
    %71 = vector.load %arg13[%c112_37, %c0_38] : memref<592x256xbf16, #tpu.memory_space<vmem>>, vector<16x256xbf16>
    tpu.vector_store %arg13[%c112_37, %c0_38], %70 {strides = array<i32>} : memref<592x256xbf16, #tpu.memory_space<vmem>>, vector<16x256xbf16>,
    %c0_39 = arith.constant 0 : index
    %c144 = arith.constant 144 : index
    %72 = vector.load %arg11[%c0_39, %c144] : memref<64x401xbf16, #tpu.memory_space<vmem>>, vector<16x256xbf16>
    %c128_40 = arith.constant 128 : index
    %c0_41 = arith.constant 0 : index
    %73 = vector.load %arg13[%c128_40, %c0_41] : memref<592x256xbf16, #tpu.memory_space<vmem>>, vector<16x256xbf16>
    tpu.vector_store %arg13[%c128_40, %c0_41], %72 {strides = array<i32>} : memref<592x256xbf16, #tpu.memory_space<vmem>>, vector<16x256xbf16>,
    %c0_42 = arith.constant 0 : index
    %c145 = arith.constant 145 : index
    %74 = vector.load %arg11[%c0_42, %c145] : memref<64x401xbf16, #tpu.memory_space<vmem>>, vector<16x256xbf16>
    %75 = vector.broadcast %39 : vector<1x256xbf16> to vector<16x256xbf16>
    %76 = arith.mulf %74, %75 : vector<16x256xbf16>
    %c144_43 = arith.constant 144 : index
    %c0_44 = arith.constant 0 : index
    %77 = vector.load %arg13[%c144_43, %c0_44] : memref<592x256xbf16, #tpu.memory_space<vmem>>, vector<16x256xbf16>
    tpu.vector_store %arg13[%c144_43, %c0_44], %76 {strides = array<i32>} : memref<592x256xbf16, #tpu.memory_space<vmem>>, vector<16x256xbf16>,
    %c0_45 = arith.constant 0 : index
    %c0_46 = arith.constant 0 : index
    %78 = vector.load %arg2[%c0_45, %c0_46] : memref<16x160xbf16, #tpu.memory_space<vmem>>, vector<16x160xbf16>
    %c0_47 = arith.constant 0 : index
    %c0_48 = arith.constant 0 : index
    %79 = vector.load %arg13[%c0_47, %c0_48] : memref<592x256xbf16, #tpu.memory_space<vmem>>, vector<160x256xbf16>
    %cst_49 = arith.constant dense<0.000000e+00> : vector<16x256xf32>
    %80 = tpu.matmul %78, %79, %cst_49 {dimension_numbers = #tpu.dot_dimension_numbers<[1], [0], [0], [1], [0, 0, 1, 1], [], []>} : vector<16x160xbf16>, vector<160x256xbf16>, vector<16x256xf32> -> vector<16x256xf32>
    %cst_50 = arith.constant dense<0.000000e+00> : vector<16xf32>
    %81 = vector.multi_reduction <add>, %80, %cst_50 [1] : vector<16x256xf32> to vector<16xf32>
    %82 = vector.shape_cast %81 : vector<16xf32> to vector<16x1xf32>
    %cst_51 = arith.constant 2.560000e+02 : f32
    %83 = vector.broadcast %cst_51 : f32 to vector<16x1xf32>
    %84 = arith.divf %82, %83 : vector<16x1xf32>
    %85 = vector.broadcast %84 : vector<16x1xf32> to vector<16x256xf32>
    %86 = arith.subf %80, %85 : vector<16x256xf32>
    %87 = arith.mulf %86, %86 : vector<16x256xf32>
    %cst_52 = arith.constant dense<0.000000e+00> : vector<16xf32>
    %88 = vector.multi_reduction <add>, %87, %cst_52 [1] : vector<16x256xf32> to vector<16xf32>
    %89 = vector.shape_cast %88 : vector<16xf32> to vector<16x1xf32>
    %cst_53 = arith.constant 2.560000e+02 : f32
    %90 = vector.broadcast %cst_53 : f32 to vector<16x1xf32>
    %91 = arith.divf %89, %90 : vector<16x1xf32>
    %92 = vector.broadcast %84 : vector<16x1xf32> to vector<16x256xf32>
    %93 = arith.subf %80, %92 : vector<16x256xf32>
    %cst_54 = arith.constant 9.99999974E-6 : f32
    %94 = vector.broadcast %cst_54 : f32 to vector<16x1xf32>
    %95 = arith.addf %91, %94 : vector<16x1xf32>
    %96 = math.rsqrt %95 : vector<16x1xf32>
    %97 = vector.broadcast %96 : vector<16x1xf32> to vector<16x256xf32>
    %98 = arith.mulf %93, %97 : vector<16x256xf32>
    %cst_55 = arith.constant 0.000000e+00 : f32
    %99 = vector.broadcast %cst_55 : f32 to vector<16x256xf32>
    %100 = arith.cmpf ogt, %98, %99 : vector<16x256xf32>
    %cst_56 = arith.constant 0.00999999977 : f32
    %101 = vector.broadcast %cst_56 : f32 to vector<16x256xf32>
    %102 = arith.mulf %101, %98 : vector<16x256xf32>
    %103 = arith.select %100, %98, %102 : vector<16x256xi1>, vector<16x256xf32>
    %104 = arith.truncf %103 : vector<16x256xf32> to vector<16x256xbf16>
    %c0_57 = arith.constant 0 : index
    %c128_58 = arith.constant 128 : index
    %105 = vector.load %arg11[%c0_57, %c128_58] : memref<64x401xbf16, #tpu.memory_space<vmem>>, vector<16x256xbf16>
    tpu.vector_store %arg11[%c0_57, %c128_58], %104 {strides = array<i32>} : memref<64x401xbf16, #tpu.memory_space<vmem>>, vector<16x256xbf16>,
    %c0_59 = arith.constant 0 : index
    %c111_60 = arith.constant 111 : index
    %106 = vector.load %arg11[%c0_59, %c111_60] : memref<64x401xbf16, #tpu.memory_space<vmem>>, vector<16x256xbf16>
    %107 = vector.broadcast %34 : vector<1x256xbf16> to vector<16x256xbf16>
    %108 = arith.mulf %106, %107 : vector<16x256xbf16>
    %c16_61 = arith.constant 16 : index
    %c0_62 = arith.constant 0 : index
    %109 = vector.load %arg13[%c16_61, %c0_62] : memref<592x256xbf16, #tpu.memory_space<vmem>>, vector<16x256xbf16>
    tpu.vector_store %arg13[%c16_61, %c0_62], %108 {strides = array<i32>} : memref<592x256xbf16, #tpu.memory_space<vmem>>, vector<16x256xbf16>,
    %c0_63 = arith.constant 0 : index
    %c112_64 = arith.constant 112 : index
    %110 = vector.load %arg11[%c0_63, %c112_64] : memref<64x401xbf16, #tpu.memory_space<vmem>>, vector<16x256xbf16>
    %c32_65 = arith.constant 32 : index
    %c0_66 = arith.constant 0 : index
    %111 = vector.load %arg13[%c32_65, %c0_66] : memref<592x256xbf16, #tpu.memory_space<vmem>>, vector<16x256xbf16>
    tpu.vector_store %arg13[%c32_65, %c0_66], %110 {strides = array<i32>} : memref<592x256xbf16, #tpu.memory_space<vmem>>, vector<16x256xbf16>,
    %c0_67 = arith.constant 0 : index
    %c113_68 = arith.constant 113 : index
    %112 = vector.load %arg11[%c0_67, %c113_68] : memref<64x401xbf16, #tpu.memory_space<vmem>>, vector<16x256xbf16>
    %113 = vector.broadcast %39 : vector<1x256xbf16> to vector<16x256xbf16>
    %114 = arith.mulf %112, %113 : vector<16x256xbf16>
    %c48_69 = arith.constant 48 : index
    %c0_70 = arith.constant 0 : index
    %115 = vector.load %arg13[%c48_69, %c0_70] : memref<592x256xbf16, #tpu.memory_space<vmem>>, vector<16x256xbf16>
    tpu.vector_store %arg13[%c48_69, %c0_70], %114 {strides = array<i32>} : memref<592x256xbf16, #tpu.memory_space<vmem>>, vector<16x256xbf16>,
    %c0_71 = arith.constant 0 : index
    %c127_72 = arith.constant 127 : index
    %116 = vector.load %arg11[%c0_71, %c127_72] : memref<64x401xbf16, #tpu.memory_space<vmem>>, vector<16x256xbf16>
    %117 = vector.broadcast %34 : vector<1x256xbf16> to vector<16x256xbf16>
    %118 = arith.mulf %116, %117 : vector<16x256xbf16>
    %c64_73 = arith.constant 64 : index
    %c0_74 = arith.constant 0 : index
    %119 = vector.load %arg13[%c64_73, %c0_74] : memref<592x256xbf16, #tpu.memory_space<vmem>>, vector<16x256xbf16>
    tpu.vector_store %arg13[%c64_73, %c0_74], %118 {strides = array<i32>} : memref<592x256xbf16, #tpu.memory_space<vmem>>, vector<16x256xbf16>,
    %c0_75 = arith.constant 0 : index
    %c128_76 = arith.constant 128 : index
    %120 = vector.load %arg11[%c0_75, %c128_76] : memref<64x401xbf16, #tpu.memory_space<vmem>>, vector<16x256xbf16>
    %c80_77 = arith.constant 80 : index
    %c0_78 = arith.constant 0 : index
    %121 = vector.load %arg13[%c80_77, %c0_78] : memref<592x256xbf16, #tpu.memory_space<vmem>>, vector<16x256xbf16>
    tpu.vector_store %arg13[%c80_77, %c0_78], %120 {strides = array<i32>} : memref<592x256xbf16, #tpu.memory_space<vmem>>, vector<16x256xbf16>,
    %c0_79 = arith.constant 0 : index
    %c129_80 = arith.constant 129 : index
    %122 = vector.load %arg11[%c0_79, %c129_80] : memref<64x401xbf16, #tpu.memory_space<vmem>>, vector<16x256xbf16>
    %123 = vector.broadcast %39 : vector<1x256xbf16> to vector<16x256xbf16>
    %124 = arith.mulf %122, %123 : vector<16x256xbf16>
    %c96_81 = arith.constant 96 : index
    %c0_82 = arith.constant 0 : index
    %125 = vector.load %arg13[%c96_81, %c0_82] : memref<592x256xbf16, #tpu.memory_space<vmem>>, vector<16x256xbf16>
    tpu.vector_store %arg13[%c96_81, %c0_82], %124 {strides = array<i32>} : memref<592x256xbf16, #tpu.memory_space<vmem>>, vector<16x256xbf16>,
    %c0_83 = arith.constant 0 : index
    %c143_84 = arith.constant 143 : index
    %126 = vector.load %arg11[%c0_83, %c143_84] : memref<64x401xbf16, #tpu.memory_space<vmem>>, vector<16x256xbf16>
    %127 = vector.broadcast %34 : vector<1x256xbf16> to vector<16x256xbf16>
    %128 = arith.mulf %126, %127 : vector<16x256xbf16>
    %c112_85 = arith.constant 112 : index
    %c0_86 = arith.constant 0 : index
    %129 = vector.load %arg13[%c112_85, %c0_86] : memref<592x256xbf16, #tpu.memory_space<vmem>>, vector<16x256xbf16>
    tpu.vector_store %arg13[%c112_85, %c0_86], %128 {strides = array<i32>} : memref<592x256xbf16, #tpu.memory_space<vmem>>, vector<16x256xbf16>,
    %c0_87 = arith.constant 0 : index
    %c144_88 = arith.constant 144 : index
    %130 = vector.load %arg11[%c0_87, %c144_88] : memref<64x401xbf16, #tpu.memory_space<vmem>>, vector<16x256xbf16>
    %c128_89 = arith.constant 128 : index
    %c0_90 = arith.constant 0 : index
    %131 = vector.load %arg13[%c128_89, %c0_90] : memref<592x256xbf16, #tpu.memory_space<vmem>>, vector<16x256xbf16>
    tpu.vector_store %arg13[%c128_89, %c0_90], %130 {strides = array<i32>} : memref<592x256xbf16, #tpu.memory_space<vmem>>, vector<16x256xbf16>,
    %c0_91 = arith.constant 0 : index
    %c145_92 = arith.constant 145 : index
    %132 = vector.load %arg11[%c0_91, %c145_92] : memref<64x401xbf16, #tpu.memory_space<vmem>>, vector<16x256xbf16>
    %133 = vector.broadcast %39 : vector<1x256xbf16> to vector<16x256xbf16>
    %134 = arith.mulf %132, %133 : vector<16x256xbf16>
    %c144_93 = arith.constant 144 : index
    %c0_94 = arith.constant 0 : index
    %135 = vector.load %arg13[%c144_93, %c0_94] : memref<592x256xbf16, #tpu.memory_space<vmem>>, vector<16x256xbf16>
    tpu.vector_store %arg13[%c144_93, %c0_94], %134 {strides = array<i32>} : memref<592x256xbf16, #tpu.memory_space<vmem>>, vector<16x256xbf16>,
    %c0_95 = arith.constant 0 : index
    %c0_96 = arith.constant 0 : index
    %136 = vector.load %arg3[%c0_95, %c0_96] : memref<64x160xbf16, #tpu.memory_space<vmem>>, vector<64x160xbf16>
    %c0_97 = arith.constant 0 : index
    %c0_98 = arith.constant 0 : index
    %137 = vector.load %arg13[%c0_97, %c0_98] : memref<592x256xbf16, #tpu.memory_space<vmem>>, vector<160x256xbf16>
    %cst_99 = arith.constant dense<0.000000e+00> : vector<64x256xf32>
    %138 = tpu.matmul %136, %137, %cst_99 {dimension_numbers = #tpu.dot_dimension_numbers<[1], [0], [0], [1], [0, 0, 1, 1], [], []>} : vector<64x160xbf16>, vector<160x256xbf16>, vector<64x256xf32> -> vector<64x256xf32>
    %cst_100 = arith.constant 0.000000e+00 : f32
    %139 = vector.broadcast %cst_100 : f32 to vector<64x256xf32>
    %140 = arith.cmpf ogt, %138, %139 : vector<64x256xf32>
    %cst_101 = arith.constant 0.00999999977 : f32
    %141 = vector.broadcast %cst_101 : f32 to vector<64x256xf32>
    %142 = arith.mulf %141, %138 : vector<64x256xf32>
    %143 = arith.select %140, %138, %142 : vector<64x256xi1>, vector<64x256xf32>
    %144 = arith.truncf %143 : vector<64x256xf32> to vector<64x256xbf16>
    %c0_102 = arith.constant 0 : index
    %c128_103 = arith.constant 128 : index
    %145 = vector.load %arg11[%c0_102, %c128_103] : memref<64x401xbf16, #tpu.memory_space<vmem>>, vector<64x256xbf16>
    tpu.vector_store %arg11[%c0_102, %c128_103], %144 {strides = array<i32>} : memref<64x401xbf16, #tpu.memory_space<vmem>>, vector<64x256xbf16>,
    %c0_104 = arith.constant 0 : index
    %c111_105 = arith.constant 111 : index
    %146 = vector.load %arg11[%c0_104, %c111_105] : memref<64x401xbf16, #tpu.memory_space<vmem>>, vector<64x256xbf16>
    %147 = vector.broadcast %34 : vector<1x256xbf16> to vector<64x256xbf16>
    %148 = arith.mulf %146, %147 : vector<64x256xbf16>
    %c16_106 = arith.constant 16 : index
    %c0_107 = arith.constant 0 : index
    %149 = vector.load %arg13[%c16_106, %c0_107] : memref<592x256xbf16, #tpu.memory_space<vmem>>, vector<64x256xbf16>
    tpu.vector_store %arg13[%c16_106, %c0_107], %148 {strides = array<i32>} : memref<592x256xbf16, #tpu.memory_space<vmem>>, vector<64x256xbf16>,
    %c0_108 = arith.constant 0 : index
    %c112_109 = arith.constant 112 : index
    %150 = vector.load %arg11[%c0_108, %c112_109] : memref<64x401xbf16, #tpu.memory_space<vmem>>, vector<64x256xbf16>
    %c80_110 = arith.constant 80 : index
    %c0_111 = arith.constant 0 : index
    %151 = vector.load %arg13[%c80_110, %c0_111] : memref<592x256xbf16, #tpu.memory_space<vmem>>, vector<64x256xbf16>
    tpu.vector_store %arg13[%c80_110, %c0_111], %150 {strides = array<i32>} : memref<592x256xbf16, #tpu.memory_space<vmem>>, vector<64x256xbf16>,
    %c0_112 = arith.constant 0 : index
    %c113_113 = arith.constant 113 : index
    %152 = vector.load %arg11[%c0_112, %c113_113] : memref<64x401xbf16, #tpu.memory_space<vmem>>, vector<64x256xbf16>
    %153 = vector.broadcast %39 : vector<1x256xbf16> to vector<64x256xbf16>
    %154 = arith.mulf %152, %153 : vector<64x256xbf16>
    %c144_114 = arith.constant 144 : index
    %c0_115 = arith.constant 0 : index
    %155 = vector.load %arg13[%c144_114, %c0_115] : memref<592x256xbf16, #tpu.memory_space<vmem>>, vector<64x256xbf16>
    tpu.vector_store %arg13[%c144_114, %c0_115], %154 {strides = array<i32>} : memref<592x256xbf16, #tpu.memory_space<vmem>>, vector<64x256xbf16>,
    %c0_116 = arith.constant 0 : index
    %c127_117 = arith.constant 127 : index
    %156 = vector.load %arg11[%c0_116, %c127_117] : memref<64x401xbf16, #tpu.memory_space<vmem>>, vector<64x256xbf16>
    %157 = vector.broadcast %34 : vector<1x256xbf16> to vector<64x256xbf16>
    %158 = arith.mulf %156, %157 : vector<64x256xbf16>
    %c208 = arith.constant 208 : index
    %c0_118 = arith.constant 0 : index
    %159 = vector.load %arg13[%c208, %c0_118] : memref<592x256xbf16, #tpu.memory_space<vmem>>, vector<64x256xbf16>
    tpu.vector_store %arg13[%c208, %c0_118], %158 {strides = array<i32>} : memref<592x256xbf16, #tpu.memory_space<vmem>>, vector<64x256xbf16>,
    %c0_119 = arith.constant 0 : index
    %c128_120 = arith.constant 128 : index
    %160 = vector.load %arg11[%c0_119, %c128_120] : memref<64x401xbf16, #tpu.memory_space<vmem>>, vector<64x256xbf16>
    %c272 = arith.constant 272 : index
    %c0_121 = arith.constant 0 : index
    %161 = vector.load %arg13[%c272, %c0_121] : memref<592x256xbf16, #tpu.memory_space<vmem>>, vector<64x256xbf16>
    tpu.vector_store %arg13[%c272, %c0_121], %160 {strides = array<i32>} : memref<592x256xbf16, #tpu.memory_space<vmem>>, vector<64x256xbf16>,
    %c0_122 = arith.constant 0 : index
    %c129_123 = arith.constant 129 : index
    %162 = vector.load %arg11[%c0_122, %c129_123] : memref<64x401xbf16, #tpu.memory_space<vmem>>, vector<64x256xbf16>
    %163 = vector.broadcast %39 : vector<1x256xbf16> to vector<64x256xbf16>
    %164 = arith.mulf %162, %163 : vector<64x256xbf16>
    %c336 = arith.constant 336 : index
    %c0_124 = arith.constant 0 : index
    %165 = vector.load %arg13[%c336, %c0_124] : memref<592x256xbf16, #tpu.memory_space<vmem>>, vector<64x256xbf16>
    tpu.vector_store %arg13[%c336, %c0_124], %164 {strides = array<i32>} : memref<592x256xbf16, #tpu.memory_space<vmem>>, vector<64x256xbf16>,
    %c0_125 = arith.constant 0 : index
    %c143_126 = arith.constant 143 : index
    %166 = vector.load %arg11[%c0_125, %c143_126] : memref<64x401xbf16, #tpu.memory_space<vmem>>, vector<64x256xbf16>
    %167 = vector.broadcast %34 : vector<1x256xbf16> to vector<64x256xbf16>
    %168 = arith.mulf %166, %167 : vector<64x256xbf16>
    %c400 = arith.constant 400 : index
    %c0_127 = arith.constant 0 : index
    %169 = vector.load %arg13[%c400, %c0_127] : memref<592x256xbf16, #tpu.memory_space<vmem>>, vector<64x256xbf16>
    tpu.vector_store %arg13[%c400, %c0_127], %168 {strides = array<i32>} : memref<592x256xbf16, #tpu.memory_space<vmem>>, vector<64x256xbf16>,
    %c0_128 = arith.constant 0 : index
    %c144_129 = arith.constant 144 : index
    %170 = vector.load %arg11[%c0_128, %c144_129] : memref<64x401xbf16, #tpu.memory_space<vmem>>, vector<64x256xbf16>
    %c464 = arith.constant 464 : index
    %c0_130 = arith.constant 0 : index
    %171 = vector.load %arg13[%c464, %c0_130] : memref<592x256xbf16, #tpu.memory_space<vmem>>, vector<64x256xbf16>
    tpu.vector_store %arg13[%c464, %c0_130], %170 {strides = array<i32>} : memref<592x256xbf16, #tpu.memory_space<vmem>>, vector<64x256xbf16>,
    %c0_131 = arith.constant 0 : index
    %c145_132 = arith.constant 145 : index
    %172 = vector.load %arg11[%c0_131, %c145_132] : memref<64x401xbf16, #tpu.memory_space<vmem>>, vector<64x256xbf16>
    %173 = vector.broadcast %39 : vector<1x256xbf16> to vector<64x256xbf16>
    %174 = arith.mulf %172, %173 : vector<64x256xbf16>
    %c528 = arith.constant 528 : index
    %c0_133 = arith.constant 0 : index
    %175 = vector.load %arg13[%c528, %c0_133] : memref<592x256xbf16, #tpu.memory_space<vmem>>, vector<64x256xbf16>
    tpu.vector_store %arg13[%c528, %c0_133], %174 {strides = array<i32>} : memref<592x256xbf16, #tpu.memory_space<vmem>>, vector<64x256xbf16>,
    %c0_134 = arith.constant 0 : index
    %c0_135 = arith.constant 0 : index
    %176 = vector.load %arg4[%c0_134, %c0_135] : memref<64x592xbf16, #tpu.memory_space<vmem>>, vector<64x592xbf16>
    %c0_136 = arith.constant 0 : index
    %c0_137 = arith.constant 0 : index
    %177 = vector.load %arg13[%c0_136, %c0_137] : memref<592x256xbf16, #tpu.memory_space<vmem>>, vector<592x256xbf16>
    %cst_138 = arith.constant dense<0.000000e+00> : vector<64x256xf32>
    %178 = tpu.matmul %176, %177, %cst_138 {dimension_numbers = #tpu.dot_dimension_numbers<[1], [0], [0], [1], [0, 0, 1, 1], [], []>} : vector<64x592xbf16>, vector<592x256xbf16>, vector<64x256xf32> -> vector<64x256xf32>
    %cst_139 = arith.constant 0.000000e+00 : f32
    %179 = vector.broadcast %cst_139 : f32 to vector<64x256xf32>
    %180 = arith.cmpf ogt, %178, %179 : vector<64x256xf32>
    %cst_140 = arith.constant 0.00999999977 : f32
    %181 = vector.broadcast %cst_140 : f32 to vector<64x256xf32>
    %182 = arith.mulf %181, %178 : vector<64x256xf32>
    %183 = arith.select %180, %178, %182 : vector<64x256xi1>, vector<64x256xf32>
    %184 = arith.truncf %183 : vector<64x256xf32> to vector<64x256xbf16>
    %c0_141 = arith.constant 0 : index
    %c128_142 = arith.constant 128 : index
    %185 = vector.load %arg12[%c0_141, %c128_142] : memref<64x401xbf16, #tpu.memory_space<vmem>>, vector<64x256xbf16>
    tpu.vector_store %arg12[%c0_141, %c128_142], %184 {strides = array<i32>} : memref<64x401xbf16, #tpu.memory_space<vmem>>, vector<64x256xbf16>,
    %c0_143 = arith.constant 0 : index
    %c111_144 = arith.constant 111 : index
    %186 = vector.load %arg12[%c0_143, %c111_144] : memref<64x401xbf16, #tpu.memory_space<vmem>>, vector<64x256xbf16>
    %187 = vector.broadcast %34 : vector<1x256xbf16> to vector<64x256xbf16>
    %188 = arith.mulf %186, %187 : vector<64x256xbf16>
    %c16_145 = arith.constant 16 : index
    %c0_146 = arith.constant 0 : index
    %189 = vector.load %arg13[%c16_145, %c0_146] : memref<592x256xbf16, #tpu.memory_space<vmem>>, vector<64x256xbf16>
    tpu.vector_store %arg13[%c16_145, %c0_146], %188 {strides = array<i32>} : memref<592x256xbf16, #tpu.memory_space<vmem>>, vector<64x256xbf16>,
    %c0_147 = arith.constant 0 : index
    %c112_148 = arith.constant 112 : index
    %190 = vector.load %arg12[%c0_147, %c112_148] : memref<64x401xbf16, #tpu.memory_space<vmem>>, vector<64x256xbf16>
    %c80_149 = arith.constant 80 : index
    %c0_150 = arith.constant 0 : index
    %191 = vector.load %arg13[%c80_149, %c0_150] : memref<592x256xbf16, #tpu.memory_space<vmem>>, vector<64x256xbf16>
    tpu.vector_store %arg13[%c80_149, %c0_150], %190 {strides = array<i32>} : memref<592x256xbf16, #tpu.memory_space<vmem>>, vector<64x256xbf16>,
    %c0_151 = arith.constant 0 : index
    %c113_152 = arith.constant 113 : index
    %192 = vector.load %arg12[%c0_151, %c113_152] : memref<64x401xbf16, #tpu.memory_space<vmem>>, vector<64x256xbf16>
    %193 = vector.broadcast %39 : vector<1x256xbf16> to vector<64x256xbf16>
    %194 = arith.mulf %192, %193 : vector<64x256xbf16>
    %c144_153 = arith.constant 144 : index
    %c0_154 = arith.constant 0 : index
    %195 = vector.load %arg13[%c144_153, %c0_154] : memref<592x256xbf16, #tpu.memory_space<vmem>>, vector<64x256xbf16>
    tpu.vector_store %arg13[%c144_153, %c0_154], %194 {strides = array<i32>} : memref<592x256xbf16, #tpu.memory_space<vmem>>, vector<64x256xbf16>,
    %c0_155 = arith.constant 0 : index
    %c127_156 = arith.constant 127 : index
    %196 = vector.load %arg12[%c0_155, %c127_156] : memref<64x401xbf16, #tpu.memory_space<vmem>>, vector<64x256xbf16>
    %197 = vector.broadcast %34 : vector<1x256xbf16> to vector<64x256xbf16>
    %198 = arith.mulf %196, %197 : vector<64x256xbf16>
    %c208_157 = arith.constant 208 : index
    %c0_158 = arith.constant 0 : index
    %199 = vector.load %arg13[%c208_157, %c0_158] : memref<592x256xbf16, #tpu.memory_space<vmem>>, vector<64x256xbf16>
    tpu.vector_store %arg13[%c208_157, %c0_158], %198 {strides = array<i32>} : memref<592x256xbf16, #tpu.memory_space<vmem>>, vector<64x256xbf16>,
    %c0_159 = arith.constant 0 : index
    %c128_160 = arith.constant 128 : index
    %200 = vector.load %arg12[%c0_159, %c128_160] : memref<64x401xbf16, #tpu.memory_space<vmem>>, vector<64x256xbf16>
    %c272_161 = arith.constant 272 : index
    %c0_162 = arith.constant 0 : index
    %201 = vector.load %arg13[%c272_161, %c0_162] : memref<592x256xbf16, #tpu.memory_space<vmem>>, vector<64x256xbf16>
    tpu.vector_store %arg13[%c272_161, %c0_162], %200 {strides = array<i32>} : memref<592x256xbf16, #tpu.memory_space<vmem>>, vector<64x256xbf16>,
    %c0_163 = arith.constant 0 : index
    %c129_164 = arith.constant 129 : index
    %202 = vector.load %arg12[%c0_163, %c129_164] : memref<64x401xbf16, #tpu.memory_space<vmem>>, vector<64x256xbf16>
    %203 = vector.broadcast %39 : vector<1x256xbf16> to vector<64x256xbf16>
    %204 = arith.mulf %202, %203 : vector<64x256xbf16>
    %c336_165 = arith.constant 336 : index
    %c0_166 = arith.constant 0 : index
    %205 = vector.load %arg13[%c336_165, %c0_166] : memref<592x256xbf16, #tpu.memory_space<vmem>>, vector<64x256xbf16>
    tpu.vector_store %arg13[%c336_165, %c0_166], %204 {strides = array<i32>} : memref<592x256xbf16, #tpu.memory_space<vmem>>, vector<64x256xbf16>,
    %c0_167 = arith.constant 0 : index
    %c143_168 = arith.constant 143 : index
    %206 = vector.load %arg12[%c0_167, %c143_168] : memref<64x401xbf16, #tpu.memory_space<vmem>>, vector<64x256xbf16>
    %207 = vector.broadcast %34 : vector<1x256xbf16> to vector<64x256xbf16>
    %208 = arith.mulf %206, %207 : vector<64x256xbf16>
    %c400_169 = arith.constant 400 : index
    %c0_170 = arith.constant 0 : index
    %209 = vector.load %arg13[%c400_169, %c0_170] : memref<592x256xbf16, #tpu.memory_space<vmem>>, vector<64x256xbf16>
    tpu.vector_store %arg13[%c400_169, %c0_170], %208 {strides = array<i32>} : memref<592x256xbf16, #tpu.memory_space<vmem>>, vector<64x256xbf16>,
    %c0_171 = arith.constant 0 : index
    %c144_172 = arith.constant 144 : index
    %210 = vector.load %arg12[%c0_171, %c144_172] : memref<64x401xbf16, #tpu.memory_space<vmem>>, vector<64x256xbf16>
    %c464_173 = arith.constant 464 : index
    %c0_174 = arith.constant 0 : index
    %211 = vector.load %arg13[%c464_173, %c0_174] : memref<592x256xbf16, #tpu.memory_space<vmem>>, vector<64x256xbf16>
    tpu.vector_store %arg13[%c464_173, %c0_174], %210 {strides = array<i32>} : memref<592x256xbf16, #tpu.memory_space<vmem>>, vector<64x256xbf16>,
    %c0_175 = arith.constant 0 : index
    %c145_176 = arith.constant 145 : index
    %212 = vector.load %arg12[%c0_175, %c145_176] : memref<64x401xbf16, #tpu.memory_space<vmem>>, vector<64x256xbf16>
    %213 = vector.broadcast %39 : vector<1x256xbf16> to vector<64x256xbf16>
    %214 = arith.mulf %212, %213 : vector<64x256xbf16>
    %c528_177 = arith.constant 528 : index
    %c0_178 = arith.constant 0 : index
    %215 = vector.load %arg13[%c528_177, %c0_178] : memref<592x256xbf16, #tpu.memory_space<vmem>>, vector<64x256xbf16>
    tpu.vector_store %arg13[%c528_177, %c0_178], %214 {strides = array<i32>} : memref<592x256xbf16, #tpu.memory_space<vmem>>, vector<64x256xbf16>,
    %c0_179 = arith.constant 0 : index
    %c0_180 = arith.constant 0 : index
    %216 = vector.load %arg5[%c0_179, %c0_180] : memref<64x592xbf16, #tpu.memory_space<vmem>>, vector<64x592xbf16>
    %c0_181 = arith.constant 0 : index
    %c0_182 = arith.constant 0 : index
    %217 = vector.load %arg13[%c0_181, %c0_182] : memref<592x256xbf16, #tpu.memory_space<vmem>>, vector<592x256xbf16>
    %cst_183 = arith.constant dense<0.000000e+00> : vector<64x256xf32>
    %218 = tpu.matmul %216, %217, %cst_183 {dimension_numbers = #tpu.dot_dimension_numbers<[1], [0], [0], [1], [0, 0, 1, 1], [], []>} : vector<64x592xbf16>, vector<592x256xbf16>, vector<64x256xf32> -> vector<64x256xf32>
    %c0_184 = arith.constant 0 : index
    %c128_185 = arith.constant 128 : index
    %219 = vector.load %arg11[%c0_184, %c128_185] : memref<64x401xbf16, #tpu.memory_space<vmem>>, vector<64x256xbf16>
    %220 = arith.extf %219 : vector<64x256xbf16> to vector<64x256xf32>
    %221 = arith.addf %218, %220 : vector<64x256xf32>
    %222 = arith.truncf %221 : vector<64x256xf32> to vector<64x256xbf16>
    %c0_186 = arith.constant 0 : index
    %c128_187 = arith.constant 128 : index
    %223 = vector.load %arg11[%c0_186, %c128_187] : memref<64x401xbf16, #tpu.memory_space<vmem>>, vector<64x256xbf16>
    tpu.vector_store %arg11[%c0_186, %c128_187], %222 {strides = array<i32>} : memref<64x401xbf16, #tpu.memory_space<vmem>>, vector<64x256xbf16>,
    %c0_188 = arith.constant 0 : index
    %c111_189 = arith.constant 111 : index
    %224 = vector.load %arg11[%c0_188, %c111_189] : memref<64x401xbf16, #tpu.memory_space<vmem>>, vector<64x256xbf16>
    %225 = vector.broadcast %34 : vector<1x256xbf16> to vector<64x256xbf16>
    %226 = arith.mulf %224, %225 : vector<64x256xbf16>
    %c16_190 = arith.constant 16 : index
    %c0_191 = arith.constant 0 : index
    %227 = vector.load %arg13[%c16_190, %c0_191] : memref<592x256xbf16, #tpu.memory_space<vmem>>, vector<64x256xbf16>
    tpu.vector_store %arg13[%c16_190, %c0_191], %226 {strides = array<i32>} : memref<592x256xbf16, #tpu.memory_space<vmem>>, vector<64x256xbf16>,
    %c0_192 = arith.constant 0 : index
    %c112_193 = arith.constant 112 : index
    %228 = vector.load %arg11[%c0_192, %c112_193] : memref<64x401xbf16, #tpu.memory_space<vmem>>, vector<64x256xbf16>
    %c80_194 = arith.constant 80 : index
    %c0_195 = arith.constant 0 : index
    %229 = vector.load %arg13[%c80_194, %c0_195] : memref<592x256xbf16, #tpu.memory_space<vmem>>, vector<64x256xbf16>
    tpu.vector_store %arg13[%c80_194, %c0_195], %228 {strides = array<i32>} : memref<592x256xbf16, #tpu.memory_space<vmem>>, vector<64x256xbf16>,
    %c0_196 = arith.constant 0 : index
    %c113_197 = arith.constant 113 : index
    %230 = vector.load %arg11[%c0_196, %c113_197] : memref<64x401xbf16, #tpu.memory_space<vmem>>, vector<64x256xbf16>
    %231 = vector.broadcast %39 : vector<1x256xbf16> to vector<64x256xbf16>
    %232 = arith.mulf %230, %231 : vector<64x256xbf16>
    %c144_198 = arith.constant 144 : index
    %c0_199 = arith.constant 0 : index
    %233 = vector.load %arg13[%c144_198, %c0_199] : memref<592x256xbf16, #tpu.memory_space<vmem>>, vector<64x256xbf16>
    tpu.vector_store %arg13[%c144_198, %c0_199], %232 {strides = array<i32>} : memref<592x256xbf16, #tpu.memory_space<vmem>>, vector<64x256xbf16>,
    %c0_200 = arith.constant 0 : index
    %c127_201 = arith.constant 127 : index
    %234 = vector.load %arg11[%c0_200, %c127_201] : memref<64x401xbf16, #tpu.memory_space<vmem>>, vector<64x256xbf16>
    %235 = vector.broadcast %34 : vector<1x256xbf16> to vector<64x256xbf16>
    %236 = arith.mulf %234, %235 : vector<64x256xbf16>
    %c208_202 = arith.constant 208 : index
    %c0_203 = arith.constant 0 : index
    %237 = vector.load %arg13[%c208_202, %c0_203] : memref<592x256xbf16, #tpu.memory_space<vmem>>, vector<64x256xbf16>
    tpu.vector_store %arg13[%c208_202, %c0_203], %236 {strides = array<i32>} : memref<592x256xbf16, #tpu.memory_space<vmem>>, vector<64x256xbf16>,
    %c0_204 = arith.constant 0 : index
    %c128_205 = arith.constant 128 : index
    %238 = vector.load %arg11[%c0_204, %c128_205] : memref<64x401xbf16, #tpu.memory_space<vmem>>, vector<64x256xbf16>
    %c272_206 = arith.constant 272 : index
    %c0_207 = arith.constant 0 : index
    %239 = vector.load %arg13[%c272_206, %c0_207] : memref<592x256xbf16, #tpu.memory_space<vmem>>, vector<64x256xbf16>
    tpu.vector_store %arg13[%c272_206, %c0_207], %238 {strides = array<i32>} : memref<592x256xbf16, #tpu.memory_space<vmem>>, vector<64x256xbf16>,
    %c0_208 = arith.constant 0 : index
    %c129_209 = arith.constant 129 : index
    %240 = vector.load %arg11[%c0_208, %c129_209] : memref<64x401xbf16, #tpu.memory_space<vmem>>, vector<64x256xbf16>
    %241 = vector.broadcast %39 : vector<1x256xbf16> to vector<64x256xbf16>
    %242 = arith.mulf %240, %241 : vector<64x256xbf16>
    %c336_210 = arith.constant 336 : index
    %c0_211 = arith.constant 0 : index
    %243 = vector.load %arg13[%c336_210, %c0_211] : memref<592x256xbf16, #tpu.memory_space<vmem>>, vector<64x256xbf16>
    tpu.vector_store %arg13[%c336_210, %c0_211], %242 {strides = array<i32>} : memref<592x256xbf16, #tpu.memory_space<vmem>>, vector<64x256xbf16>,
    %c0_212 = arith.constant 0 : index
    %c143_213 = arith.constant 143 : index
    %244 = vector.load %arg11[%c0_212, %c143_213] : memref<64x401xbf16, #tpu.memory_space<vmem>>, vector<64x256xbf16>
    %245 = vector.broadcast %34 : vector<1x256xbf16> to vector<64x256xbf16>
    %246 = arith.mulf %244, %245 : vector<64x256xbf16>
    %c400_214 = arith.constant 400 : index
    %c0_215 = arith.constant 0 : index
    %247 = vector.load %arg13[%c400_214, %c0_215] : memref<592x256xbf16, #tpu.memory_space<vmem>>, vector<64x256xbf16>
    tpu.vector_store %arg13[%c400_214, %c0_215], %246 {strides = array<i32>} : memref<592x256xbf16, #tpu.memory_space<vmem>>, vector<64x256xbf16>,
    %c0_216 = arith.constant 0 : index
    %c144_217 = arith.constant 144 : index
    %248 = vector.load %arg11[%c0_216, %c144_217] : memref<64x401xbf16, #tpu.memory_space<vmem>>, vector<64x256xbf16>
    %c464_218 = arith.constant 464 : index
    %c0_219 = arith.constant 0 : index
    %249 = vector.load %arg13[%c464_218, %c0_219] : memref<592x256xbf16, #tpu.memory_space<vmem>>, vector<64x256xbf16>
    tpu.vector_store %arg13[%c464_218, %c0_219], %248 {strides = array<i32>} : memref<592x256xbf16, #tpu.memory_space<vmem>>, vector<64x256xbf16>,
    %c0_220 = arith.constant 0 : index
    %c145_221 = arith.constant 145 : index
    %250 = vector.load %arg11[%c0_220, %c145_221] : memref<64x401xbf16, #tpu.memory_space<vmem>>, vector<64x256xbf16>
    %251 = vector.broadcast %39 : vector<1x256xbf16> to vector<64x256xbf16>
    %252 = arith.mulf %250, %251 : vector<64x256xbf16>
    %c528_222 = arith.constant 528 : index
    %c0_223 = arith.constant 0 : index
    %253 = vector.load %arg13[%c528_222, %c0_223] : memref<592x256xbf16, #tpu.memory_space<vmem>>, vector<64x256xbf16>
    tpu.vector_store %arg13[%c528_222, %c0_223], %252 {strides = array<i32>} : memref<592x256xbf16, #tpu.memory_space<vmem>>, vector<64x256xbf16>,
    %c0_224 = arith.constant 0 : index
    %c0_225 = arith.constant 0 : index
    %254 = vector.load %arg6[%c0_224, %c0_225] : memref<64x592xbf16, #tpu.memory_space<vmem>>, vector<64x592xbf16>
    %c0_226 = arith.constant 0 : index
    %c0_227 = arith.constant 0 : index
    %255 = vector.load %arg13[%c0_226, %c0_227] : memref<592x256xbf16, #tpu.memory_space<vmem>>, vector<592x256xbf16>
    %cst_228 = arith.constant dense<0.000000e+00> : vector<64x256xf32>
    %256 = tpu.matmul %254, %255, %cst_228 {dimension_numbers = #tpu.dot_dimension_numbers<[1], [0], [0], [1], [0, 0, 1, 1], [], []>} : vector<64x592xbf16>, vector<592x256xbf16>, vector<64x256xf32> -> vector<64x256xf32>
    %cst_229 = arith.constant 0.000000e+00 : f32
    %257 = vector.broadcast %cst_229 : f32 to vector<64x256xf32>
    %258 = arith.cmpf ogt, %256, %257 : vector<64x256xf32>
    %cst_230 = arith.constant 0.00999999977 : f32
    %259 = vector.broadcast %cst_230 : f32 to vector<64x256xf32>
    %260 = arith.mulf %259, %256 : vector<64x256xf32>
    %261 = arith.select %258, %256, %260 : vector<64x256xi1>, vector<64x256xf32>
    %262 = arith.truncf %261 : vector<64x256xf32> to vector<64x256xbf16>
    %c0_231 = arith.constant 0 : index
    %c128_232 = arith.constant 128 : index
    %263 = vector.load %arg12[%c0_231, %c128_232] : memref<64x401xbf16, #tpu.memory_space<vmem>>, vector<64x256xbf16>
    tpu.vector_store %arg12[%c0_231, %c128_232], %262 {strides = array<i32>} : memref<64x401xbf16, #tpu.memory_space<vmem>>, vector<64x256xbf16>,
    %c0_233 = arith.constant 0 : index
    %c111_234 = arith.constant 111 : index
    %264 = vector.load %arg12[%c0_233, %c111_234] : memref<64x401xbf16, #tpu.memory_space<vmem>>, vector<64x256xbf16>
    %265 = vector.broadcast %34 : vector<1x256xbf16> to vector<64x256xbf16>
    %266 = arith.mulf %264, %265 : vector<64x256xbf16>
    %c16_235 = arith.constant 16 : index
    %c0_236 = arith.constant 0 : index
    %267 = vector.load %arg13[%c16_235, %c0_236] : memref<592x256xbf16, #tpu.memory_space<vmem>>, vector<64x256xbf16>
    tpu.vector_store %arg13[%c16_235, %c0_236], %266 {strides = array<i32>} : memref<592x256xbf16, #tpu.memory_space<vmem>>, vector<64x256xbf16>,
    %c0_237 = arith.constant 0 : index
    %c112_238 = arith.constant 112 : index
    %268 = vector.load %arg12[%c0_237, %c112_238] : memref<64x401xbf16, #tpu.memory_space<vmem>>, vector<64x256xbf16>
    %c80_239 = arith.constant 80 : index
    %c0_240 = arith.constant 0 : index
    %269 = vector.load %arg13[%c80_239, %c0_240] : memref<592x256xbf16, #tpu.memory_space<vmem>>, vector<64x256xbf16>
    tpu.vector_store %arg13[%c80_239, %c0_240], %268 {strides = array<i32>} : memref<592x256xbf16, #tpu.memory_space<vmem>>, vector<64x256xbf16>,
    %c0_241 = arith.constant 0 : index
    %c113_242 = arith.constant 113 : index
    %270 = vector.load %arg12[%c0_241, %c113_242] : memref<64x401xbf16, #tpu.memory_space<vmem>>, vector<64x256xbf16>
    %271 = vector.broadcast %39 : vector<1x256xbf16> to vector<64x256xbf16>
    %272 = arith.mulf %270, %271 : vector<64x256xbf16>
    %c144_243 = arith.constant 144 : index
    %c0_244 = arith.constant 0 : index
    %273 = vector.load %arg13[%c144_243, %c0_244] : memref<592x256xbf16, #tpu.memory_space<vmem>>, vector<64x256xbf16>
    tpu.vector_store %arg13[%c144_243, %c0_244], %272 {strides = array<i32>} : memref<592x256xbf16, #tpu.memory_space<vmem>>, vector<64x256xbf16>,
    %c0_245 = arith.constant 0 : index
    %c127_246 = arith.constant 127 : index
    %274 = vector.load %arg12[%c0_245, %c127_246] : memref<64x401xbf16, #tpu.memory_space<vmem>>, vector<64x256xbf16>
    %275 = vector.broadcast %34 : vector<1x256xbf16> to vector<64x256xbf16>
    %276 = arith.mulf %274, %275 : vector<64x256xbf16>
    %c208_247 = arith.constant 208 : index
    %c0_248 = arith.constant 0 : index
    %277 = vector.load %arg13[%c208_247, %c0_248] : memref<592x256xbf16, #tpu.memory_space<vmem>>, vector<64x256xbf16>
    tpu.vector_store %arg13[%c208_247, %c0_248], %276 {strides = array<i32>} : memref<592x256xbf16, #tpu.memory_space<vmem>>, vector<64x256xbf16>,
    %c0_249 = arith.constant 0 : index
    %c128_250 = arith.constant 128 : index
    %278 = vector.load %arg12[%c0_249, %c128_250] : memref<64x401xbf16, #tpu.memory_space<vmem>>, vector<64x256xbf16>
    %c272_251 = arith.constant 272 : index
    %c0_252 = arith.constant 0 : index
    %279 = vector.load %arg13[%c272_251, %c0_252] : memref<592x256xbf16, #tpu.memory_space<vmem>>, vector<64x256xbf16>
    tpu.vector_store %arg13[%c272_251, %c0_252], %278 {strides = array<i32>} : memref<592x256xbf16, #tpu.memory_space<vmem>>, vector<64x256xbf16>,
    %c0_253 = arith.constant 0 : index
    %c129_254 = arith.constant 129 : index
    %280 = vector.load %arg12[%c0_253, %c129_254] : memref<64x401xbf16, #tpu.memory_space<vmem>>, vector<64x256xbf16>
    %281 = vector.broadcast %39 : vector<1x256xbf16> to vector<64x256xbf16>
    %282 = arith.mulf %280, %281 : vector<64x256xbf16>
    %c336_255 = arith.constant 336 : index
    %c0_256 = arith.constant 0 : index
    %283 = vector.load %arg13[%c336_255, %c0_256] : memref<592x256xbf16, #tpu.memory_space<vmem>>, vector<64x256xbf16>
    tpu.vector_store %arg13[%c336_255, %c0_256], %282 {strides = array<i32>} : memref<592x256xbf16, #tpu.memory_space<vmem>>, vector<64x256xbf16>,
    %c0_257 = arith.constant 0 : index
    %c143_258 = arith.constant 143 : index
    %284 = vector.load %arg12[%c0_257, %c143_258] : memref<64x401xbf16, #tpu.memory_space<vmem>>, vector<64x256xbf16>
    %285 = vector.broadcast %34 : vector<1x256xbf16> to vector<64x256xbf16>
    %286 = arith.mulf %284, %285 : vector<64x256xbf16>
    %c400_259 = arith.constant 400 : index
    %c0_260 = arith.constant 0 : index
    %287 = vector.load %arg13[%c400_259, %c0_260] : memref<592x256xbf16, #tpu.memory_space<vmem>>, vector<64x256xbf16>
    tpu.vector_store %arg13[%c400_259, %c0_260], %286 {strides = array<i32>} : memref<592x256xbf16, #tpu.memory_space<vmem>>, vector<64x256xbf16>,
    %c0_261 = arith.constant 0 : index
    %c144_262 = arith.constant 144 : index
    %288 = vector.load %arg12[%c0_261, %c144_262] : memref<64x401xbf16, #tpu.memory_space<vmem>>, vector<64x256xbf16>
    %c464_263 = arith.constant 464 : index
    %c0_264 = arith.constant 0 : index
    %289 = vector.load %arg13[%c464_263, %c0_264] : memref<592x256xbf16, #tpu.memory_space<vmem>>, vector<64x256xbf16>
    tpu.vector_store %arg13[%c464_263, %c0_264], %288 {strides = array<i32>} : memref<592x256xbf16, #tpu.memory_space<vmem>>, vector<64x256xbf16>,
    %c0_265 = arith.constant 0 : index
    %c145_266 = arith.constant 145 : index
    %290 = vector.load %arg12[%c0_265, %c145_266] : memref<64x401xbf16, #tpu.memory_space<vmem>>, vector<64x256xbf16>
    %291 = vector.broadcast %39 : vector<1x256xbf16> to vector<64x256xbf16>
    %292 = arith.mulf %290, %291 : vector<64x256xbf16>
    %c528_267 = arith.constant 528 : index
    %c0_268 = arith.constant 0 : index
    %293 = vector.load %arg13[%c528_267, %c0_268] : memref<592x256xbf16, #tpu.memory_space<vmem>>, vector<64x256xbf16>
    tpu.vector_store %arg13[%c528_267, %c0_268], %292 {strides = array<i32>} : memref<592x256xbf16, #tpu.memory_space<vmem>>, vector<64x256xbf16>,
    %c0_269 = arith.constant 0 : index
    %c0_270 = arith.constant 0 : index
    %294 = vector.load %arg7[%c0_269, %c0_270] : memref<64x592xbf16, #tpu.memory_space<vmem>>, vector<64x592xbf16>
    %c0_271 = arith.constant 0 : index
    %c0_272 = arith.constant 0 : index
    %295 = vector.load %arg13[%c0_271, %c0_272] : memref<592x256xbf16, #tpu.memory_space<vmem>>, vector<592x256xbf16>
    %cst_273 = arith.constant dense<0.000000e+00> : vector<64x256xf32>
    %296 = tpu.matmul %294, %295, %cst_273 {dimension_numbers = #tpu.dot_dimension_numbers<[1], [0], [0], [1], [0, 0, 1, 1], [], []>} : vector<64x592xbf16>, vector<592x256xbf16>, vector<64x256xf32> -> vector<64x256xf32>
    %c0_274 = arith.constant 0 : index
    %c128_275 = arith.constant 128 : index
    %297 = vector.load %arg11[%c0_274, %c128_275] : memref<64x401xbf16, #tpu.memory_space<vmem>>, vector<64x256xbf16>
    %298 = arith.extf %297 : vector<64x256xbf16> to vector<64x256xf32>
    %299 = arith.addf %296, %298 : vector<64x256xf32>
    %300 = arith.truncf %299 : vector<64x256xf32> to vector<64x256xbf16>
    %c0_276 = arith.constant 0 : index
    %c128_277 = arith.constant 128 : index
    %301 = vector.load %arg11[%c0_276, %c128_277] : memref<64x401xbf16, #tpu.memory_space<vmem>>, vector<64x256xbf16>
    tpu.vector_store %arg11[%c0_276, %c128_277], %300 {strides = array<i32>} : memref<64x401xbf16, #tpu.memory_space<vmem>>, vector<64x256xbf16>,
    %c0_278 = arith.constant 0 : index
    %c111_279 = arith.constant 111 : index
    %302 = vector.load %arg11[%c0_278, %c111_279] : memref<64x401xbf16, #tpu.memory_space<vmem>>, vector<64x256xbf16>
    %303 = vector.broadcast %34 : vector<1x256xbf16> to vector<64x256xbf16>
    %304 = arith.mulf %302, %303 : vector<64x256xbf16>
    %c16_280 = arith.constant 16 : index
    %c0_281 = arith.constant 0 : index
    %305 = vector.load %arg13[%c16_280, %c0_281] : memref<592x256xbf16, #tpu.memory_space<vmem>>, vector<64x256xbf16>
    tpu.vector_store %arg13[%c16_280, %c0_281], %304 {strides = array<i32>} : memref<592x256xbf16, #tpu.memory_space<vmem>>, vector<64x256xbf16>,
    %c0_282 = arith.constant 0 : index
    %c112_283 = arith.constant 112 : index
    %306 = vector.load %arg11[%c0_282, %c112_283] : memref<64x401xbf16, #tpu.memory_space<vmem>>, vector<64x256xbf16>
    %c80_284 = arith.constant 80 : index
    %c0_285 = arith.constant 0 : index
    %307 = vector.load %arg13[%c80_284, %c0_285] : memref<592x256xbf16, #tpu.memory_space<vmem>>, vector<64x256xbf16>
    tpu.vector_store %arg13[%c80_284, %c0_285], %306 {strides = array<i32>} : memref<592x256xbf16, #tpu.memory_space<vmem>>, vector<64x256xbf16>,
    %c0_286 = arith.constant 0 : index
    %c113_287 = arith.constant 113 : index
    %308 = vector.load %arg11[%c0_286, %c113_287] : memref<64x401xbf16, #tpu.memory_space<vmem>>, vector<64x256xbf16>
    %309 = vector.broadcast %39 : vector<1x256xbf16> to vector<64x256xbf16>
    %310 = arith.mulf %308, %309 : vector<64x256xbf16>
    %c144_288 = arith.constant 144 : index
    %c0_289 = arith.constant 0 : index
    %311 = vector.load %arg13[%c144_288, %c0_289] : memref<592x256xbf16, #tpu.memory_space<vmem>>, vector<64x256xbf16>
    tpu.vector_store %arg13[%c144_288, %c0_289], %310 {strides = array<i32>} : memref<592x256xbf16, #tpu.memory_space<vmem>>, vector<64x256xbf16>,
    %c0_290 = arith.constant 0 : index
    %c127_291 = arith.constant 127 : index
    %312 = vector.load %arg11[%c0_290, %c127_291] : memref<64x401xbf16, #tpu.memory_space<vmem>>, vector<64x256xbf16>
    %313 = vector.broadcast %34 : vector<1x256xbf16> to vector<64x256xbf16>
    %314 = arith.mulf %312, %313 : vector<64x256xbf16>
    %c208_292 = arith.constant 208 : index
    %c0_293 = arith.constant 0 : index
    %315 = vector.load %arg13[%c208_292, %c0_293] : memref<592x256xbf16, #tpu.memory_space<vmem>>, vector<64x256xbf16>
    tpu.vector_store %arg13[%c208_292, %c0_293], %314 {strides = array<i32>} : memref<592x256xbf16, #tpu.memory_space<vmem>>, vector<64x256xbf16>,
    %c0_294 = arith.constant 0 : index
    %c128_295 = arith.constant 128 : index
    %316 = vector.load %arg11[%c0_294, %c128_295] : memref<64x401xbf16, #tpu.memory_space<vmem>>, vector<64x256xbf16>
    %c272_296 = arith.constant 272 : index
    %c0_297 = arith.constant 0 : index
    %317 = vector.load %arg13[%c272_296, %c0_297] : memref<592x256xbf16, #tpu.memory_space<vmem>>, vector<64x256xbf16>
    tpu.vector_store %arg13[%c272_296, %c0_297], %316 {strides = array<i32>} : memref<592x256xbf16, #tpu.memory_space<vmem>>, vector<64x256xbf16>,
    %c0_298 = arith.constant 0 : index
    %c129_299 = arith.constant 129 : index
    %318 = vector.load %arg11[%c0_298, %c129_299] : memref<64x401xbf16, #tpu.memory_space<vmem>>, vector<64x256xbf16>
    %319 = vector.broadcast %39 : vector<1x256xbf16> to vector<64x256xbf16>
    %320 = arith.mulf %318, %319 : vector<64x256xbf16>
    %c336_300 = arith.constant 336 : index
    %c0_301 = arith.constant 0 : index
    %321 = vector.load %arg13[%c336_300, %c0_301] : memref<592x256xbf16, #tpu.memory_space<vmem>>, vector<64x256xbf16>
    tpu.vector_store %arg13[%c336_300, %c0_301], %320 {strides = array<i32>} : memref<592x256xbf16, #tpu.memory_space<vmem>>, vector<64x256xbf16>,
    %c0_302 = arith.constant 0 : index
    %c143_303 = arith.constant 143 : index
    %322 = vector.load %arg11[%c0_302, %c143_303] : memref<64x401xbf16, #tpu.memory_space<vmem>>, vector<64x256xbf16>
    %323 = vector.broadcast %34 : vector<1x256xbf16> to vector<64x256xbf16>
    %324 = arith.mulf %322, %323 : vector<64x256xbf16>
    %c400_304 = arith.constant 400 : index
    %c0_305 = arith.constant 0 : index
    %325 = vector.load %arg13[%c400_304, %c0_305] : memref<592x256xbf16, #tpu.memory_space<vmem>>, vector<64x256xbf16>
    tpu.vector_store %arg13[%c400_304, %c0_305], %324 {strides = array<i32>} : memref<592x256xbf16, #tpu.memory_space<vmem>>, vector<64x256xbf16>,
    %c0_306 = arith.constant 0 : index
    %c144_307 = arith.constant 144 : index
    %326 = vector.load %arg11[%c0_306, %c144_307] : memref<64x401xbf16, #tpu.memory_space<vmem>>, vector<64x256xbf16>
    %c464_308 = arith.constant 464 : index
    %c0_309 = arith.constant 0 : index
    %327 = vector.load %arg13[%c464_308, %c0_309] : memref<592x256xbf16, #tpu.memory_space<vmem>>, vector<64x256xbf16>
    tpu.vector_store %arg13[%c464_308, %c0_309], %326 {strides = array<i32>} : memref<592x256xbf16, #tpu.memory_space<vmem>>, vector<64x256xbf16>,
    %c0_310 = arith.constant 0 : index
    %c145_311 = arith.constant 145 : index
    %328 = vector.load %arg11[%c0_310, %c145_311] : memref<64x401xbf16, #tpu.memory_space<vmem>>, vector<64x256xbf16>
    %329 = vector.broadcast %39 : vector<1x256xbf16> to vector<64x256xbf16>
    %330 = arith.mulf %328, %329 : vector<64x256xbf16>
    %c528_312 = arith.constant 528 : index
    %c0_313 = arith.constant 0 : index
    %331 = vector.load %arg13[%c528_312, %c0_313] : memref<592x256xbf16, #tpu.memory_space<vmem>>, vector<64x256xbf16>
    tpu.vector_store %arg13[%c528_312, %c0_313], %330 {strides = array<i32>} : memref<592x256xbf16, #tpu.memory_space<vmem>>, vector<64x256xbf16>,
    %c0_314 = arith.constant 0 : index
    %c0_315 = arith.constant 0 : index
    %332 = vector.load %arg8[%c0_314, %c0_315] : memref<16x592xbf16, #tpu.memory_space<vmem>>, vector<16x592xbf16>
    %c0_316 = arith.constant 0 : index
    %c0_317 = arith.constant 0 : index
    %333 = vector.load %arg13[%c0_316, %c0_317] : memref<592x256xbf16, #tpu.memory_space<vmem>>, vector<592x256xbf16>
    %cst_318 = arith.constant dense<0.000000e+00> : vector<16x256xf32>
    %334 = tpu.matmul %332, %333, %cst_318 {dimension_numbers = #tpu.dot_dimension_numbers<[1], [0], [0], [1], [0, 0, 1, 1], [], []>} : vector<16x592xbf16>, vector<592x256xbf16>, vector<16x256xf32> -> vector<16x256xf32>
    %cst_319 = arith.constant 0.000000e+00 : f32
    %335 = vector.broadcast %cst_319 : f32 to vector<16x256xf32>
    %336 = arith.cmpf ogt, %334, %335 : vector<16x256xf32>
    %cst_320 = arith.constant 0.00999999977 : f32
    %337 = vector.broadcast %cst_320 : f32 to vector<16x256xf32>
    %338 = arith.mulf %337, %334 : vector<16x256xf32>
    %339 = arith.select %336, %334, %338 : vector<16x256xi1>, vector<16x256xf32>
    %340 = arith.truncf %339 : vector<16x256xf32> to vector<16x256xbf16>
    %c0_321 = arith.constant 0 : index
    %c128_322 = arith.constant 128 : index
    %341 = vector.load %arg11[%c0_321, %c128_322] : memref<64x401xbf16, #tpu.memory_space<vmem>>, vector<16x256xbf16>
    tpu.vector_store %arg11[%c0_321, %c128_322], %340 {strides = array<i32>} : memref<64x401xbf16, #tpu.memory_space<vmem>>, vector<16x256xbf16>,
    %c0_323 = arith.constant 0 : index
    %c111_324 = arith.constant 111 : index
    %342 = vector.load %arg11[%c0_323, %c111_324] : memref<64x401xbf16, #tpu.memory_space<vmem>>, vector<16x256xbf16>
    %343 = vector.broadcast %34 : vector<1x256xbf16> to vector<16x256xbf16>
    %344 = arith.mulf %342, %343 : vector<16x256xbf16>
    %c16_325 = arith.constant 16 : index
    %c0_326 = arith.constant 0 : index
    %345 = vector.load %arg13[%c16_325, %c0_326] : memref<592x256xbf16, #tpu.memory_space<vmem>>, vector<16x256xbf16>
    tpu.vector_store %arg13[%c16_325, %c0_326], %344 {strides = array<i32>} : memref<592x256xbf16, #tpu.memory_space<vmem>>, vector<16x256xbf16>,
    %c0_327 = arith.constant 0 : index
    %c112_328 = arith.constant 112 : index
    %346 = vector.load %arg11[%c0_327, %c112_328] : memref<64x401xbf16, #tpu.memory_space<vmem>>, vector<16x256xbf16>
    %c32_329 = arith.constant 32 : index
    %c0_330 = arith.constant 0 : index
    %347 = vector.load %arg13[%c32_329, %c0_330] : memref<592x256xbf16, #tpu.memory_space<vmem>>, vector<16x256xbf16>
    tpu.vector_store %arg13[%c32_329, %c0_330], %346 {strides = array<i32>} : memref<592x256xbf16, #tpu.memory_space<vmem>>, vector<16x256xbf16>,
    %c0_331 = arith.constant 0 : index
    %c113_332 = arith.constant 113 : index
    %348 = vector.load %arg11[%c0_331, %c113_332] : memref<64x401xbf16, #tpu.memory_space<vmem>>, vector<16x256xbf16>
    %349 = vector.broadcast %39 : vector<1x256xbf16> to vector<16x256xbf16>
    %350 = arith.mulf %348, %349 : vector<16x256xbf16>
    %c48_333 = arith.constant 48 : index
    %c0_334 = arith.constant 0 : index
    %351 = vector.load %arg13[%c48_333, %c0_334] : memref<592x256xbf16, #tpu.memory_space<vmem>>, vector<16x256xbf16>
    tpu.vector_store %arg13[%c48_333, %c0_334], %350 {strides = array<i32>} : memref<592x256xbf16, #tpu.memory_space<vmem>>, vector<16x256xbf16>,
    %c0_335 = arith.constant 0 : index
    %c127_336 = arith.constant 127 : index
    %352 = vector.load %arg11[%c0_335, %c127_336] : memref<64x401xbf16, #tpu.memory_space<vmem>>, vector<16x256xbf16>
    %353 = vector.broadcast %34 : vector<1x256xbf16> to vector<16x256xbf16>
    %354 = arith.mulf %352, %353 : vector<16x256xbf16>
    %c64_337 = arith.constant 64 : index
    %c0_338 = arith.constant 0 : index
    %355 = vector.load %arg13[%c64_337, %c0_338] : memref<592x256xbf16, #tpu.memory_space<vmem>>, vector<16x256xbf16>
    tpu.vector_store %arg13[%c64_337, %c0_338], %354 {strides = array<i32>} : memref<592x256xbf16, #tpu.memory_space<vmem>>, vector<16x256xbf16>,
    %c0_339 = arith.constant 0 : index
    %c128_340 = arith.constant 128 : index
    %356 = vector.load %arg11[%c0_339, %c128_340] : memref<64x401xbf16, #tpu.memory_space<vmem>>, vector<16x256xbf16>
    %c80_341 = arith.constant 80 : index
    %c0_342 = arith.constant 0 : index
    %357 = vector.load %arg13[%c80_341, %c0_342] : memref<592x256xbf16, #tpu.memory_space<vmem>>, vector<16x256xbf16>
    tpu.vector_store %arg13[%c80_341, %c0_342], %356 {strides = array<i32>} : memref<592x256xbf16, #tpu.memory_space<vmem>>, vector<16x256xbf16>,
    %c0_343 = arith.constant 0 : index
    %c129_344 = arith.constant 129 : index
    %358 = vector.load %arg11[%c0_343, %c129_344] : memref<64x401xbf16, #tpu.memory_space<vmem>>, vector<16x256xbf16>
    %359 = vector.broadcast %39 : vector<1x256xbf16> to vector<16x256xbf16>
    %360 = arith.mulf %358, %359 : vector<16x256xbf16>
    %c96_345 = arith.constant 96 : index
    %c0_346 = arith.constant 0 : index
    %361 = vector.load %arg13[%c96_345, %c0_346] : memref<592x256xbf16, #tpu.memory_space<vmem>>, vector<16x256xbf16>
    tpu.vector_store %arg13[%c96_345, %c0_346], %360 {strides = array<i32>} : memref<592x256xbf16, #tpu.memory_space<vmem>>, vector<16x256xbf16>,
    %c0_347 = arith.constant 0 : index
    %c143_348 = arith.constant 143 : index
    %362 = vector.load %arg11[%c0_347, %c143_348] : memref<64x401xbf16, #tpu.memory_space<vmem>>, vector<16x256xbf16>
    %363 = vector.broadcast %34 : vector<1x256xbf16> to vector<16x256xbf16>
    %364 = arith.mulf %362, %363 : vector<16x256xbf16>
    %c112_349 = arith.constant 112 : index
    %c0_350 = arith.constant 0 : index
    %365 = vector.load %arg13[%c112_349, %c0_350] : memref<592x256xbf16, #tpu.memory_space<vmem>>, vector<16x256xbf16>
    tpu.vector_store %arg13[%c112_349, %c0_350], %364 {strides = array<i32>} : memref<592x256xbf16, #tpu.memory_space<vmem>>, vector<16x256xbf16>,
    %c0_351 = arith.constant 0 : index
    %c144_352 = arith.constant 144 : index
    %366 = vector.load %arg11[%c0_351, %c144_352] : memref<64x401xbf16, #tpu.memory_space<vmem>>, vector<16x256xbf16>
    %c128_353 = arith.constant 128 : index
    %c0_354 = arith.constant 0 : index
    %367 = vector.load %arg13[%c128_353, %c0_354] : memref<592x256xbf16, #tpu.memory_space<vmem>>, vector<16x256xbf16>
    tpu.vector_store %arg13[%c128_353, %c0_354], %366 {strides = array<i32>} : memref<592x256xbf16, #tpu.memory_space<vmem>>, vector<16x256xbf16>,
    %c0_355 = arith.constant 0 : index
    %c145_356 = arith.constant 145 : index
    %368 = vector.load %arg11[%c0_355, %c145_356] : memref<64x401xbf16, #tpu.memory_space<vmem>>, vector<16x256xbf16>
    %369 = vector.broadcast %39 : vector<1x256xbf16> to vector<16x256xbf16>
    %370 = arith.mulf %368, %369 : vector<16x256xbf16>
    %c144_357 = arith.constant 144 : index
    %c0_358 = arith.constant 0 : index
    %371 = vector.load %arg13[%c144_357, %c0_358] : memref<592x256xbf16, #tpu.memory_space<vmem>>, vector<16x256xbf16>
    tpu.vector_store %arg13[%c144_357, %c0_358], %370 {strides = array<i32>} : memref<592x256xbf16, #tpu.memory_space<vmem>>, vector<16x256xbf16>,
    %c0_359 = arith.constant 0 : index
    %c0_360 = arith.constant 0 : index
    %372 = vector.load %arg9[%c0_359, %c0_360] : memref<3x160xbf16, #tpu.memory_space<vmem>>, vector<3x160xbf16>
    %c0_361 = arith.constant 0 : index
    %c0_362 = arith.constant 0 : index
    %373 = vector.load %arg13[%c0_361, %c0_362] : memref<592x256xbf16, #tpu.memory_space<vmem>>, vector<160x256xbf16>
    %cst_363 = arith.constant dense<0.000000e+00> : vector<3x256xf32>
    %374 = tpu.matmul %372, %373, %cst_363 {dimension_numbers = #tpu.dot_dimension_numbers<[1], [0], [0], [1], [0, 0, 1, 1], [], []>} : vector<3x160xbf16>, vector<160x256xbf16>, vector<3x256xf32> -> vector<3x256xf32>
    %375 = arith.addf %374, %47 : vector<3x256xf32>
    %376 = math.tanh %375 : vector<3x256xf32>
    %c0_364 = arith.constant 0 : index
    %c0_365 = arith.constant 0 : index
    %c0_366 = arith.constant 0 : index
    %377 = vector.load %arg10[%c0_364, %c0_365, %c0_366] : memref<1x3x256xf32, #tpu.memory_space<vmem>>, vector<1x3x256xf32>
    %378 = vector.shape_cast %377 : vector<1x3x256xf32> to vector<3x256xf32>
    %379 = vector.shape_cast %376 : vector<3x256xf32> to vector<1x3x256xf32>
    tpu.vector_store %arg10[%c0_364, %c0_365, %c0_366], %379 {strides = array<i32>} : memref<1x3x256xf32, #tpu.memory_space<vmem>>, vector<1x3x256xf32>,
    return
  }
  func.func @transform_0(%arg0: i32) -> (i32, i32, i32) {
    %c0_i32 = arith.constant 0 : i32
    %c0_i32_0 = arith.constant 0 : i32
    %c0_i32_1 = arith.constant 0 : i32
    return %arg0, %c0_i32, %c0_i32_0 : i32, i32, i32
  }
  func.func @transform_1(%arg0: i32) -> (i32, i32) {
    %c0_i32 = arith.constant 0 : i32
    %c0_i32_0 = arith.constant 0 : i32
    %c0_i32_1 = arith.constant 0 : i32
    return %c0_i32, %c0_i32_0 : i32, i32
  }
  func.func @transform_2(%arg0: i32) -> (i32, i32) {
    %c0_i32 = arith.constant 0 : i32
    %c0_i32_0 = arith.constant 0 : i32
    %c0_i32_1 = arith.constant 0 : i32
    return %c0_i32, %c0_i32_0 : i32, i32
  }
  func.func @transform_3(%arg0: i32) -> (i32, i32) {
    %c0_i32 = arith.constant 0 : i32
    %c0_i32_0 = arith.constant 0 : i32
    %c0_i32_1 = arith.constant 0 : i32
    return %c0_i32, %c0_i32_0 : i32, i32
  }
  func.func @transform_4(%arg0: i32) -> (i32, i32) {
    %c0_i32 = arith.constant 0 : i32
    %c0_i32_0 = arith.constant 0 : i32
    %c0_i32_1 = arith.constant 0 : i32
    return %c0_i32, %c0_i32_0 : i32, i32
  }
  func.func @transform_5(%arg0: i32) -> (i32, i32) {
    %c0_i32 = arith.constant 0 : i32
    %c0_i32_0 = arith.constant 0 : i32
    %c0_i32_1 = arith.constant 0 : i32
    return %c0_i32, %c0_i32_0 : i32, i32
  }
  func.func @transform_6(%arg0: i32) -> (i32, i32) {
    %c0_i32 = arith.constant 0 : i32
    %c0_i32_0 = arith.constant 0 : i32
    %c0_i32_1 = arith.constant 0 : i32
    return %c0_i32, %c0_i32_0 : i32, i32
  }
  func.func @transform_7(%arg0: i32) -> (i32, i32) {
    %c0_i32 = arith.constant 0 : i32
    %c0_i32_0 = arith.constant 0 : i32
    %c0_i32_1 = arith.constant 0 : i32
    return %c0_i32, %c0_i32_0 : i32, i32
  }
  func.func @transform_8(%arg0: i32) -> (i32, i32) {
    %c0_i32 = arith.constant 0 : i32
    %c0_i32_0 = arith.constant 0 : i32
    %c0_i32_1 = arith.constant 0 : i32
    return %c0_i32, %c0_i32_0 : i32, i32
  }
  func.func @transform_9(%arg0: i32) -> (i32, i32, i32) {
    %c0_i32 = arith.constant 0 : i32
    %c0_i32_0 = arith.constant 0 : i32
    %c0_i32_1 = arith.constant 0 : i32
    return %arg0, %c0_i32, %c0_i32_0 : i32, i32, i32
  }
}

</mosaic_0001>

<bundles_post_ra>
// kernel: trans_lower_forward.1
= control target key start
LH: loop header
LB: loop body
LE: loop exit
PB: predicated region body
PF: predicated region fallthrough
CT: control target
= control target key end

     0   :  { %s7555_s30 = smov 0   ;;  %s10569_s0 = inlined_call_operand.vmem [shape: f32[2,3,256], index: 0, kind: input, shape index: {}]   ;;  %s10570_s1 = inlined_call_operand.vmem [shape: bf16[16,160], index: 1, kind: input, shape index: {}]   ;;  %s10571_s2 = inlined_call_operand.vmem [shape: bf16[64,160], index: 2, kind: input, shape index: {}]   ;;  %s10572_s3 = inlined_call_operand.vmem [shape: bf16[64,592], index: 3, kind: input, shape index: {}]   ;;  %s10573_s4 = inlined_call_operand.vmem [shape: bf16[64,592], index: 4, kind: input, shape index: {}]   ;;  %s10574_s5 = inlined_call_operand.vmem [shape: bf16[64,592], index: 5, kind: input, shape index: {}]   ;;  %s10575_s6 = inlined_call_operand.vmem [shape: bf16[64,592], index: 6, kind: input, shape index: {}]   ;;  %s10576_s7 = inlined_call_operand.vmem [shape: bf16[16,592], index: 7, kind: input, shape index: {}]   ;;  %s10577_s8 = inlined_call_operand.vmem [shape: bf16[3,160], index: 8, kind: input, shape index: {}]   ;;  %s10578_s9 = inlined_call_operand.vmem [shape: f32[2,3,256], index: 9, kind: output, shape index: {}]  }
   0x1 LB: > { %s6968_s10 = sadd.s32 4294967295, %s7491_s30   ;;  %p6972_p0 = scmp.ge.s32.totalorder %s7491_s30, 1  ;;  %s7491_s30 = sphi %s7555_s30, %s19_s30  }
   0x2   : > { %p287_p1 = scmp.lt.s32.totalorder %s7491_s30, 3 }
   0x4   : > { %p288_p2 = pnand %p6972_p0, %p287_p1 }
   0x6   : > { %291 = sbr.rel (%p288_p2) target bundleno = 4142 (0x102e), region = 56 }
   0xd   : > { %v352_v0 = vlaneseq  ;;  %v7493_v2 = vmov 0.0   ;;  %v7494_v3 = vmov 1.0   ;;  %p323_p3 = scmp.lt.s32.totalorder %s6968_s10, 1  ;;  %vm413_vm0 = vcmask 1041408   ;;  %v416_v13 = vld [vmem:[#allocation2 + $0x8] sm:$0x3] }
   0xe   : > { %v7563_v4 = vpack.c.bf16 %v7493_v2, %v7494_v3  ;;  %vm334_vm2 = vcmask 1048440   ;;  %vm7495_vm3 = vmmov 1   ;;  %vm414_vm5 = vsmask.f32 1280  ;;  %s7497_s15 = smov 113   ;;  %s7498_s16 = smov 111  }
   0xf   : > { %v365_v1 = vand.u32 127, %v352_v0  ;;  %v353_v5 = vshrl.u32 %v352_v0, 7  ;;  %s10643_s10 = smov (!%p323_p3, %s6968_s10), 1  ;;  %v10579_v10 = vmov 0   ;;  %vm7610_vm10 = vmand %vm413_vm0, %vm414_vm5  ;;  %vm339_vm11 = vcmask 138240   ;;  %s7499_s17 = smov 127  }
  0x10   : > { %335 = vst.msk [vmem:[#allocation2] sm:$0xff] %vm334_vm2, %v10579_v10  ;;  %336 = vst.msk [vmem:[#allocation2 + $0x20] sm:$0xff] %vm334_vm2, %v10579_v10  ;;  %s7103_s11 = sshll.u32 %s10643_s10, 3  ;;  %v419_v23 = vld [vmem:[#allocation2 + $0x10] sm:$0x3]  ;;  %vm422_vm12 = vcmask 1047553  }
  0x11   : > { %v371_v6 = vand.u32 15, %v365_v1  ;;  %vm355_vm1 = vcmp.eq.s32.totalorder %v353_v5, 0  ;;  %v366_v7 = vadd.s32 128, %v365_v1  ;;  %337 = vst.msk [vmem:[#allocation2 + $0x40] sm:$0xff] %vm334_vm2, %v10579_v10  ;;  %338 = vst.msk [vmem:[#allocation2 + $0x60] sm:$0xff] %vm334_vm2, %v10579_v10  ;;  %s7605_s14 = scalar_lea.vmem %s10569_s0, %s7103_s11  ;;  %s7500_s18 = smov 1  }
  0x12   : > { %vm7565_vm4 = vmpackc.low %vm7495_vm3, %vm355_vm1  ;;  %344 = vst.msk [vmem:[#allocation3] sm:$0xff] %vm334_vm2, %v10579_v10  ;;  %v407_v18 = vld [vmem:[%s7605_s14] sm:$0x77]  ;;  %vm423_vm13 = vsmask.f32 7942  ;;  %s7501_s19 = smov 15  }
  0x13   : > { %vm399_vm6 = vcmp.ne.s32.totalorder %v371_v6, 15  ;;  %vm391_vm7 = vcmp.ne.s32.totalorder %v371_v6, 0  ;;  %v378_v9 = vand.u32 15, %v366_v7  ;;  %345 = vst.msk [vmem:[#allocation3 + $0x20] sm:$0xff] %vm334_vm2, %v10579_v10  ;;  %346 = vst.msk [vmem:[#allocation3 + $0x40] sm:$0xff] %vm334_vm2, %v10579_v10  ;;  %7107 = vmatprep.subr.msk.bf16.mxu0 %vm7565_vm4, %v7563_v4  ;;  %7113 = vmatprep.subr.msk.bf16.mxu1 %vm7565_vm4, %v7563_v4  ;;  %v411_v22 = vpack.c.bf16 %v407_v18, %v407_v18  ;;  %s7502_s20 = smov 17  }
  0x14   : > { %347 = vst.msk [vmem:[#allocation3 + $0x60] sm:$0xff] %vm334_vm2, %v10579_v10  ;;  %v6980_v11 = vsel %vm399_vm6, 1.0, %v7493_v2  ;;  %v6978_v12 = vsel %vm391_vm7, 1.0, %v7493_v2  ;;  %7110 = vmatpush1.bf16.msk.msra.mxu0 %vm7565_vm4, %v7563_v4  ;;  %7116 = vmatpush1.bf16.msk.msra.mxu1 %vm7565_vm4, %v7563_v4  ;;  %v409_v24 = vcombine.high %v407_v18, %v407_v18  ;;  %vm424_vm14 = vmand %vm422_vm12, %vm423_vm13  ;;  %s7503_s21 = smov 16   ;;  %vm441_vm15 = vcmask 908288   ;;  %s7504_s24 = smov 112  }
  0x15   : > { %v405_v14 = vpack.c.bf16 %v6980_v11, %v6980_v11  ;;  %v397_v15 = vpack.c.bf16 %v6978_v12, %v6978_v12  ;;  %vm400_vm8 = vcmp.ne.s32.totalorder %v378_v9, 15  ;;  %vm392_vm9 = vcmp.ne.s32.totalorder %v378_v9, 0  ;;  %340 = vst.msk [vmem:[#allocation2 + $0x18] sm:$0xff] %vm339_vm11, %v10579_v10  ;;  %341 = vst.msk [vmem:[#allocation2 + $0x38] sm:$0xff] %vm339_vm11, %v10579_v10  ;;  %v7344_v6 = vld [vmem:[%s10570_s1 + $0x4] ss:$8 sps:$4 sm:$0xff]  }
  0x16   : > { %v6981_v16 = vsel %vm400_vm8, 1.0, %v7493_v2  ;;  %v6979_v17 = vsel %vm392_vm9, 1.0, %v7493_v2  ;;  %342 = vst.msk [vmem:[#allocation2 + $0x58] sm:$0xff] %vm339_vm11, %v10579_v10  ;;  %343 = vst.msk [vmem:[#allocation2 + $0x78] sm:$0xff] %vm339_vm11, %v10579_v10  ;;  %v417_v25 = vsel %vm7610_vm10, %v411_v22, %v416_v13  ;;  %v412_v26 = vpack.c.bf16 %v409_v24, %v409_v24 }
  0x17   : > { %489 = vrot.lane.b32.xlu1 %v405_v14, %s7497_s15  ;;  %437 = vrot.lane.b32.xlu0 %v397_v15, %s7498_s16  ;;  %v406_v20 = vpack.c.bf16 %v6981_v16, %v6981_v16  ;;  %v398_v21 = vpack.c.bf16 %v6979_v17, %v6979_v17  ;;  %348 = vst.msk [vmem:[#allocation3 + $0x18] sm:$0xff] %vm339_vm11, %v10579_v10  ;;  %349 = vst.msk [vmem:[#allocation3 + $0x38] sm:$0xff] %vm339_vm11, %v10579_v10  ;;  %v7654_v34 = vld [vmem:[#allocation2] sm:$0xff]  ;;  %vm493_vm0 = vcmask 924672   ;;  %vm524_vm1 = vcmask 1039360  }
  0x18   : > { %350 = vst.msk [vmem:[#allocation3 + $0x58] sm:$0xff] %vm339_vm11, %v10579_v10  ;;  %351 = vst.msk [vmem:[#allocation3 + $0x78] sm:$0xff] %vm339_vm11, %v10579_v10  ;;  %v420_v27 = vsel %vm7610_vm10, %v412_v26, %v419_v23  ;;  %vm541_vm2 = vcmask 7168   ;;  %vm510_vm3 = vcmask 121856   ;;  %vm689_vm5 = vcmask 261120  }
  0x19   : > { %418 = vst [vmem:[#allocation2 + $0x8] sm:$0x3] %v417_v25  ;;  %421 = vst [vmem:[#allocation2 + $0x10] sm:$0x3] %v420_v27  ;;  %6984 = vmatprep.mubr.msk.bf16.mxu0 %vm689_vm5, %v7344_v6  ;;  %vm477_vm6 = vcmask 130048   ;;  %vm622_vm7 = vcmask 916480  }
  0x1b   : > { %491 = vrot.lane.b32.xlu1 %v406_v20, %s7497_s15  ;;  %439 = vrot.lane.b32.xlu0 %v398_v21, %s7498_s16 }
  0x1c   : > { %v7719_v53 = vld [vmem:[#allocation2 + $0x18] sm:$0xff] }
  0x1f   : > { %522 = vrot.lane.b32.xlu1 %v398_v21, %s7499_s17  ;;  %520 = vrot.lane.b32.xlu0 %v397_v15, %s7499_s17 }
  0x20   : > { %v425_v28 = vld [vmem:[#allocation2 + $0x8] sm:$0xfe]  ;;  %v428_v30 = vld [vmem:[#allocation2 + $0x10] sm:$0xfe] }
  0x21   : > { %v426_v29 = vsel %vm424_vm14, 0, %v425_v28  ;;  %v429_v31 = vsel %vm424_vm14, 0, %v428_v30 }
  0x22   : > { %427 = vst [vmem:[#allocation2 + $0x8] sm:$0xfe] %v426_v29  ;;  %430 = vst [vmem:[#allocation2 + $0x10] sm:$0xfe] %v429_v31 }
  0x23   : > { %557 = vrot.lane.b32.xlu1 %v406_v20, %s7500_s18  ;;  %555 = vrot.lane.b32.xlu0 %v405_v14, %s7500_s18 }
  0x27   : > { %586 = vrot.lane.b32.xlu1 %v398_v21, %s7501_s19  ;;  %584 = vrot.lane.b32.xlu0 %v397_v15, %s7501_s19 }
  0x29   : > { %v7646_v32 = vld [vmem:[#allocation2 + $0x8] sm:$0xff]  ;;  %v7648_v33 = vld [vmem:[#allocation2 + $0x10] sm:$0xff] }
  0x2b   : > { %634 = vrot.lane.b32.xlu1 %v406_v20, %s7502_s20  ;;  %632 = vrot.lane.b32.xlu0 %v405_v14, %s7502_s20 }
  0x2f   : > { %473 = vrot.lane.b32.xlu1 %v7646_v32, %s7503_s21  ;;  %475 = vrot.lane.b32.xlu0 %v7648_v33, %s7503_s21 }
  0x33   : > { %471 = vrot.lane.b32.xlu1 %v7654_v34, %s7503_s21 }
  0x89   : > { %v7658_v35 = vpop.permute.xlu1 %489  ;;  %v7660_v36 = vpop.permute.xlu0 %437 }
  0x8a   : > { %10613 = vst [vmem:[#allocation5_spill] sm:$0xff] %v7660_v36  ;;  %v7664_v37 = vmul.bf16 %v7654_v34, %v7660_v36  ;;  %v7670_v38 = vmul.bf16 %v7658_v35, %v7654_v34 }
  0x8c   : > { %452 = vrot.lane.b32.xlu0 %v7664_v37, %s7502_s20 }
  0x8d   : > { %v7672_v39 = vpop.permute.xlu1 %491  ;;  %v7674_v40 = vpop.permute.xlu0 %439 }
  0x8e   : > { %v448_v41 = vmul.bf16 %v7648_v33, %v7674_v40  ;;  %v7681_v42 = vsel %vm441_vm15, %v7660_v36, %v7674_v40  ;;  %v500_v43 = vmul.bf16 %v7672_v39, %v7648_v33  ;;  %v7705_v49 = vsel %vm493_vm0, %v7658_v35, %v7672_v39 }
  0x8f   : > { %v447_v46 = vmul.bf16 %v7646_v32, %v7681_v42  ;;  %v499_v54 = vmul.bf16 %v7705_v49, %v7646_v32 }
  0x90   : > { %504 = vrot.lane.b32.xlu0 %v7670_v38, %s7501_s19  ;;  %456 = vrot.lane.b32.xlu1 %v448_v41, %s7502_s20 }
  0x91   : > { %v7688_v44 = vpop.permute.xlu1 %522  ;;  %v7690_v45 = vpop.permute.xlu0 %520 }
  0x92   : > { %10614 = vst [vmem:[#allocation6_spill] sm:$0xff] %v7688_v44  ;;  %10615 = vst [vmem:[#allocation7_spill] sm:$0xff] %v7690_v45  ;;  %v531_v47 = vmul.bf16 %v7688_v44, %v7648_v33  ;;  %v7700_v48 = vmul.bf16 %v7690_v45, %v7654_v34  ;;  %v7710_v50 = vsel %vm524_vm1, %v7690_v45, %v7688_v44 }
  0x93   : > { %10616 = vst [vmem:[#allocation8_spill] sm:$0xff] %v7710_v50  ;;  %v530_v55 = vmul.bf16 %v7710_v50, %v7646_v32 }
  0x94   : > { %454 = vrot.lane.b32.xlu0 %v447_v46, %s7502_s20  ;;  %508 = vrot.lane.b32.xlu1 %v500_v43, %s7501_s19 }
  0x95   : > { %v7712_v51 = vpop.permute.xlu1 %557  ;;  %v7714_v52 = vpop.permute.xlu0 %555 }
  0x96   : > { %10617 = vst [vmem:[#allocation9_spill] sm:$0xff] %v7712_v51  ;;  %10618 = vst [vmem:[#allocation10_spill] sm:$0xff] %v7714_v52  ;;  %v563_v56 = vmul.bf16 %v7714_v52, %v7646_v32  ;;  %v7731_v57 = vmul.bf16 %v7712_v51, %v7719_v53  ;;  %v7749_v62 = vsel %vm541_vm2, %v7714_v52, %v7712_v51 }
  0x97   : > { %10621 = vst [vmem:[#allocation13_spill] sm:$0xff] %v7749_v62  ;;  %v564_v0 = vmul.bf16 %v7749_v62, %v7648_v33 }
  0x98   : > { %539 = vrot.lane.b32.xlu0 %v531_v47, %s7500_s18  ;;  %535 = vrot.lane.b32.xlu1 %v7700_v48, %s7500_s18 }
  0x99   : > { %v7733_v58 = vpop.permute.xlu1 %586  ;;  %v7735_v59 = vpop.permute.xlu0 %584 }
  0x9a   : > { %10619 = vst [vmem:[#allocation11_spill] sm:$0xff] %v7733_v58  ;;  %10620 = vst [vmem:[#allocation12_spill] sm:$0xff] %v7735_v59  ;;  %v7742_v60 = vmul.bf16 %v7733_v58, %v7719_v53  ;;  %v592_v61 = vmul.bf16 %v7735_v59, %v7646_v32  ;;  %v7754_v63 = vsel %vm510_vm3, %v7735_v59, %v7733_v58 }
  0x9b   : > { %10622 = vst [vmem:[#allocation14_spill] sm:$0xff] %v7754_v63  ;;  %v593_v1 = vmul.bf16 %v7754_v63, %v7648_v33 }
  0x9c   : > { %506 = vrot.lane.b32.xlu0 %v499_v54, %s7501_s19  ;;  %537 = vrot.lane.b32.xlu1 %v530_v55, %s7500_s18 }
  0x9d   : > { %v7763_v2 = vpop.permute.xlu1 %634  ;;  %v7765_v3 = vpop.permute.xlu0 %632 }
  0x9e   : > { %10623 = vst [vmem:[#allocation15_spill] sm:$0xff] %v7763_v2  ;;  %10624 = vst [vmem:[#allocation16_spill] sm:$0xff] %v7765_v3  ;;  %v7772_v5 = vsel %vm339_vm11, %v7765_v3, %v7763_v2  ;;  %v7789_v9 = vmul.bf16 %v7763_v2, %v7719_v53  ;;  %v640_v11 = vmul.bf16 %v7765_v3, %v7646_v32 }
  0x9f   : > { %10625 = vst [vmem:[#allocation17_spill] sm:$0xff] %v7772_v5  ;;  %v641_v7 = vmul.bf16 %v7772_v5, %v7648_v33 }
  0xa0   : > { %569 = vrot.lane.b32.xlu0 %v563_v56, %s7499_s17  ;;  %573 = vrot.lane.b32.xlu1 %v7731_v57, %s7499_s17 }
  0xa1   : > { %v474_v12 = vpop.permute.xlu1 %473  ;;  %v476_v13 = vpop.permute.xlu0 %475 }
  0xa2   : > { %v479_v22 = vsel %vm477_vm6, %v474_v12, %v476_v13 }
  0xa4   : > { %602 = vrot.lane.b32.xlu0 %v7742_v60, %s7497_s15  ;;  %598 = vrot.lane.b32.xlu1 %v592_v61, %s7497_s15 }
  0xa5   : > { %v472_v14 = vpop.permute.xlu1 %471 }
  0xa6   : > { %v478_v25 = vsel %vm477_vm6, %v472_v14, %v474_v12 }
  0xa8   : > { %571 = vrot.lane.b32.xlu0 %v564_v0, %s7499_s17  ;;  %600 = vrot.lane.b32.xlu1 %v593_v1, %s7497_s15 }
  0xac   : > { %618 = vrot.lane.b32.xlu0 %v7648_v33, %s7504_s24  ;;  %620 = vrot.lane.b32.xlu1 %v7719_v53, %s7504_s24 }
  0xb0   : > { %616 = vrot.lane.b32.xlu0 %v7646_v32, %s7504_s24  ;;  %648 = vrot.lane.b32.xlu1 %v641_v7, %s7498_s16 }
  0xb4   : > { %650 = vrot.lane.b32.xlu0 %v7789_v9, %s7498_s16  ;;  %646 = vrot.lane.b32.xlu1 %v640_v11, %s7498_s16 }
  0xfe   : > { %v453_v15 = vpop.permute.xlu0 %452 }
 0x102   : > { %v505_v16 = vpop.permute.xlu0 %504  ;;  %v457_v17 = vpop.permute.xlu1 %456 }
 0x106   : > { %v455_v18 = vpop.permute.xlu0 %454  ;;  %v509_v19 = vpop.permute.xlu1 %508 }
 0x107   : > { %v460_v20 = vsel %vm339_vm11, %v455_v18, %v457_v17  ;;  %v459_v21 = vsel %vm339_vm11, %v453_v15, %v455_v18  ;;  %v7342_v17 = vld [vmem:[%s10570_s1] ss:$8 sps:$4 sm:$0xff]  }
 0x108   : > { %695 = vmatprep.subr.bf16.mxu0 %v460_v20 }
 0x109   : > { %696 = vmatpush1.bf16.msra.mxu0 %v459_v21 }
 0x10a   : > { %v540_v23 = vpop.permute.xlu0 %539  ;;  %697 = vmatprep.subr.bf16.mxu0 %v479_v22  ;;  %v536_v24 = vpop.permute.xlu1 %535 }
 0x10d   : > { %698 = vmatpush1.bf16.msra.mxu0 %v478_v25 }
 0x10e   : > { %v507_v26 = vpop.permute.xlu0 %506  ;;  %v538_v27 = vpop.permute.xlu1 %537 }
 0x10f   : > { %v512_v28 = vsel %vm510_vm3, %v507_v26, %v509_v19  ;;  %v511_v29 = vsel %vm510_vm3, %v505_v16, %v507_v26  ;;  %v543_v30 = vsel %vm541_vm2, %v538_v27, %v540_v23  ;;  %v542_v43 = vsel %vm541_vm2, %v536_v24, %v538_v27 }
 0x110   : > { %699 = vmatprep.subr.bf16.mxu0 %v512_v28 }
 0x111   : > { %700 = vmatpush1.bf16.msra.mxu0 %v511_v29 }
 0x112   : > { %v570_v31 = vpop.permute.xlu0 %569  ;;  %701 = vmatprep.subr.bf16.mxu0 %v543_v30  ;;  %v574_v41 = vpop.permute.xlu1 %573 }
 0x115   : > { %702 = vmatpush1.bf16.msra.mxu0 %v542_v43 }
 0x116   : > { %v603_v46 = vpop.permute.xlu0 %602  ;;  %v599_v47 = vpop.permute.xlu1 %598  ;;  %703 = vmatprep.subr.bf16.mxu0 %v7648_v33 }
 0x119   : > { %704 = vmatpush1.bf16.msra.mxu0 %v7646_v32 }
 0x11a   : > { %v572_v54 = vpop.permute.xlu0 %571  ;;  %v601_v55 = vpop.permute.xlu1 %600 }
 0x11b   : > { %v576_v56 = vsel %vm524_vm1, %v572_v54, %v574_v41  ;;  %v575_v61 = vsel %vm524_vm1, %v570_v31, %v572_v54  ;;  %v605_v0 = vsel %vm493_vm0, %v601_v55, %v603_v46  ;;  %v604_v7 = vsel %vm493_vm0, %v599_v47, %v601_v55 }
 0x11c   : > { %705 = vmatprep.subr.bf16.mxu0 %v576_v56 }
 0x11d   : > { %706 = vmatpush1.bf16.msra.mxu0 %v575_v61 }
 0x11e   : > { %v619_v1 = vpop.permute.xlu0 %618  ;;  %707 = vmatprep.subr.bf16.mxu0 %v605_v0  ;;  %v621_v6 = vpop.permute.xlu1 %620 }
 0x11f   : > { %v624_v33 = vsel %vm622_vm7, %v619_v1, %v621_v6 }
 0x121   : > { %708 = vmatpush1.bf16.msra.mxu0 %v604_v7 }
 0x122   : > { %v617_v32 = vpop.permute.xlu0 %616  ;;  %709 = vmatprep.subr.bf16.mxu0 %v624_v33  ;;  %v649_v11 = vpop.permute.xlu1 %648 }
 0x123   : > { %v623_v12 = vsel %vm622_vm7, %v617_v32, %v619_v1 }
 0x125   : > { %710 = vmatpush1.bf16.msra.mxu0 %v623_v12 }
 0x126   : > { %v651_v13 = vpop.permute.xlu0 %650  ;;  %v647_v14 = vpop.permute.xlu1 %646 }
 0x127   : > { %v653_v15 = vsel %vm441_vm15, %v649_v11, %v651_v13  ;;  %v652_v16 = vsel %vm441_vm15, %v647_v14, %v649_v11 }
 0x128   : > { %711 = vmatprep.subr.bf16.mxu0 %v653_v15 }
 0x129   : > { %712 = vmatpush1.bf16.msra.mxu0 %v652_v16 }
 0x12c   : > { %726 = vmatmul.mubr.bf16.vlgmr.msra.gmra.mrb[0].mxu0 %v7342_v17 }
 0x1ff   : > { %v727_v18 = vpop.f32.mrb[0].mxu0 }
 0x200   : > { %v729_v19 = vpop.f32.mrb[1].mxu0 }
 0x201   : > { %v731_v20 = vpop.f32.mrb[2].mxu0  ;;  %v736_v21 = vadd.f32 %v729_v19, %v727_v18 }
 0x202   : > { %v733_v22 = vpop.f32.mrb[3].mxu0 }
 0x203   : > { %737 = vadd.xlane.f32.xlu0 %v736_v21  ;;  %v739_v23 = vadd.f32 %v733_v22, %v731_v20 }
 0x205   : > { %740 = vadd.xlane.f32.xlu1 %v739_v23 }
 0x216   : > { %794 = vrot.lane.b32.xlu1 %v7664_v37, %s7502_s20 }
 0x21a   : > { %812 = vrot.lane.b32.xlu1 %v7654_v34, %s7503_s21 }
 0x290   : > { %v738_v24 = vpop.xlane.xlu0 %737 }
 0x291   : > { %v743_v25 = vmul.f32 0.00390625, %v738_v24 }
 0x292   : > { %v741_v26 = vpop.xlane.xlu1 %740 }
 0x293   : > { %v745_v27 = vsub.f32 %v727_v18, %v743_v25  ;;  %v746_v28 = vsub.f32 %v729_v19, %v743_v25  ;;  %v744_v29 = vmul.f32 0.00390625, %v741_v26 }
 0x295   : > { %v747_v30 = vsub.f32 %v731_v20, %v744_v29  ;;  %v748_v31 = vsub.f32 %v733_v22, %v744_v29  ;;  %v749_v41 = vmul.f32 %v745_v27, %v745_v27  ;;  %v750_v43 = vmul.f32 %v746_v28, %v746_v28 }
 0x297   : > { %v753_v46 = vadd.f32 %v750_v43, %v749_v41  ;;  %v751_v47 = vmul.f32 %v747_v30, %v747_v30  ;;  %v752_v54 = vmul.f32 %v748_v31, %v748_v31  ;;  %v7347_v41 = vld [vmem:[%s10571_s2 + $0x4] ss:$8 sps:$4 sm:$0xff]  }
 0x298   : > { %6993 = vmatprep.mubr.msk.bf16.mxu1 %vm689_vm5, %v7347_v41 }
 0x299   : > { %754 = vadd.xlane.f32.xlu0 %v753_v46  ;;  %v756_v55 = vadd.f32 %v752_v54, %v751_v47  ;;  %v7882_v47 = vld [vmem:[#allocation2 + $0x60] sm:$0xff] }
 0x29a   : > { %v1425_v54 = vmul.bf16 %v7882_v47, %v7690_v45 }
 0x29d   : > { %757 = vadd.xlane.f32.xlu0 %v756_v55 }
 0x2b3   : > { %833 = vrot.lane.b32.xlu0 %v7670_v38, %s7501_s19 }
 0x326   : > { %v755_v56 = vpop.xlane.xlu0 %754 }
 0x327   : > { %v759_v61 = vmul.f32 0.00390625, %v755_v56  ;;  %v7888_v56 = vld [vmem:[#allocation2 + $0x38] sm:$0xff] }
 0x329   : > { %v761_v0 = vadd.f32 1e-05, %v759_v61  ;;  %v1521_v61 = vmul.bf16 %v7888_v56, %v7712_v51 }
 0x32a   : > { %v758_v1 = vpop.xlane.xlu0 %757 }
 0x32b   : > { %7477 = vrsqrt.f32 %v761_v0  ;;  %v760_v6 = vmul.f32 0.00390625, %v758_v1  ;;  %v7896_v0 = vld [vmem:[#allocation2 + $0x78] sm:$0xff] }
 0x32d   : > { %v762_v7 = vadd.f32 1e-05, %v760_v6  ;;  %v1527_v6 = vmul.bf16 %v7896_v0, %v7712_v51 }
 0x32f   : > { %7479 = vrsqrt.f32 %v762_v7  ;;  %v7907_v7 = vld [vmem:[#allocation2 + $0x20] sm:$0xff] }
 0x335   : > { %v7478_v33 = vpop.eup %7477 }
 0x336   : > { %v765_v32 = vmul.f32 %v7478_v33, %v745_v27  ;;  %v766_v11 = vmul.f32 %v7478_v33, %v746_v28  ;;  %v1179_v33 = vmul.bf16 %v7907_v7, %v7660_v36 }
 0x338   : > { %v773_v13 = vmul.f32 0.01, %v765_v32  ;;  %v774_v14 = vmul.f32 0.01, %v766_v11  ;;  %vm769_vm8 = vcmp.gt.f32.partialorder %v765_v32, 0.0  ;;  %vm770_vm9 = vcmp.gt.f32.partialorder %v766_v11, 0.0 }
 0x339   : > { %v7480_v12 = vpop.eup %7479 }
 0x33a   : > { %v767_v15 = vmul.f32 %v7480_v12, %v747_v30  ;;  %v768_v16 = vmul.f32 %v7480_v12, %v748_v31  ;;  %v777_v18 = vsel %vm769_vm8, %v765_v32, %v773_v13  ;;  %v778_v19 = vsel %vm770_vm9, %v766_v11, %v774_v14  ;;  %v7917_v32 = vld [vmem:[#allocation2 + $0x40] sm:$0xff]  ;;  %v795_v13 = vpop.permute.xlu1 %794 }
 0x33b   : > { %v1185_v12 = vmul.bf16 %v7882_v47, %v7660_v36 }
 0x33c   : > { %vm771_vm10 = vcmp.gt.f32.partialorder %v767_v15, 0.0  ;;  %vm772_vm12 = vcmp.gt.f32.partialorder %v768_v16, 0.0  ;;  %v775_v38 = vmul.f32 0.01, %v767_v15  ;;  %v776_v17 = vmul.f32 0.01, %v768_v16 }
 0x33e   : > { %v779_v20 = vsel %vm771_vm10, %v767_v15, %v775_v38  ;;  %v780_v21 = vsel %vm772_vm12, %v768_v16, %v776_v17  ;;  %v813_v14 = vpop.permute.xlu1 %812  ;;  %v834_v15 = vpop.permute.xlu0 %833 }
 0x33f   : > { %v7823_v22 = vpack.c.bf16 %v779_v20, %v777_v18  ;;  %v7825_v23 = vpack.c.bf16 %v780_v21, %v778_v19 }
 0x341   : > { %816 = vrot.lane.b32.xlu0 %v7825_v23, %s7503_s21  ;;  %814 = vrot.lane.b32.xlu1 %v7823_v22, %s7503_s21  ;;  %v790_v24 = vmul.bf16 %v7825_v23, %v7674_v40  ;;  %v789_v25 = vmul.bf16 %v7823_v22, %v7681_v42  ;;  %v828_v26 = vmul.bf16 %v7823_v22, %v7705_v49 }
 0x342   : > { %v829_v27 = vmul.bf16 %v7825_v23, %v7672_v39  ;;  %v850_v28 = vmul.bf16 %v7825_v23, %v7688_v44  ;;  %v849_v29 = vmul.bf16 %v7823_v22, %v7710_v50  ;;  %v873_v30 = vmul.bf16 %v7823_v22, %v7714_v52 }
 0x343   : > { %v895_v31 = vmul.bf16 %v7825_v23, %v7754_v63  ;;  %v894_v43 = vmul.bf16 %v7823_v22, %v7735_v59  ;;  %v934_v46 = vmul.bf16 %v7825_v23, %v7772_v5  ;;  %v933_v55 = vmul.bf16 %v7823_v22, %v7765_v3 }
 0x345   : > { %798 = vrot.lane.b32.xlu0 %v790_v24, %s7502_s20  ;;  %796 = vrot.lane.b32.xlu1 %v789_v25, %s7502_s20 }
 0x349   : > { %835 = vrot.lane.b32.xlu0 %v828_v26, %s7501_s19  ;;  %854 = vrot.lane.b32.xlu1 %v7700_v48, %s7500_s18  ;;  %v874_v48 = vmul.bf16 %v7825_v23, %v7749_v62 }
 0x34d   : > { %904 = vrot.lane.b32.xlu0 %v7742_v60, %s7497_s15  ;;  %837 = vrot.lane.b32.xlu1 %v829_v27, %s7501_s19 }
 0x351   : > { %858 = vrot.lane.b32.xlu0 %v850_v28, %s7500_s18  ;;  %856 = vrot.lane.b32.xlu1 %v849_v29, %s7500_s18 }
 0x355   : > { %881 = vrot.lane.b32.xlu0 %v874_v48, %s7499_s17  ;;  %883 = vrot.lane.b32.xlu1 %v7731_v57, %s7499_s17 }
 0x359   : > { %879 = vrot.lane.b32.xlu0 %v873_v30, %s7499_s17  ;;  %922 = vrot.lane.b32.xlu1 %v7719_v53, %s7504_s24 }
 0x35d   : > { %920 = vrot.lane.b32.xlu0 %v7825_v23, %s7504_s24  ;;  %902 = vrot.lane.b32.xlu1 %v895_v31, %s7497_s15 }
 0x361   : > { %918 = vrot.lane.b32.xlu0 %v7823_v22, %s7504_s24  ;;  %900 = vrot.lane.b32.xlu1 %v894_v43, %s7497_s15 }
 0x365   : > { %943 = vrot.lane.b32.xlu0 %v7789_v9, %s7498_s16  ;;  %941 = vrot.lane.b32.xlu1 %v934_v46, %s7498_s16  ;;  %v7894_v9 = vld [vmem:[#allocation2 + $0x58] sm:$0xff] }
 0x366   : > { %v1524_v1 = vmul.bf16 %v7894_v9, %v7712_v51  ;;  %v1608_v11 = vmul.bf16 %v7894_v9, %v7733_v58 }
 0x369   : > { %1458 = vrot.lane.b32.xlu0 %v1425_v54, %s7500_s18  ;;  %939 = vrot.lane.b32.xlu1 %v933_v55, %s7498_s16 }
 0x36d   : > { %1544 = vrot.lane.b32.xlu0 %v7731_v57, %s7499_s17  ;;  %1550 = vrot.lane.b32.xlu1 %v1521_v61, %s7499_s17  ;;  %v1605_v57 = vmul.bf16 %v7888_v56, %v7733_v58 }
 0x371   : > { %1556 = vrot.lane.b32.xlu0 %v1524_v1, %s7499_s17  ;;  %1562 = vrot.lane.b32.xlu1 %v1527_v6, %s7499_s17 }
 0x375   : > { %1628 = vrot.lane.b32.xlu0 %v7742_v60, %s7497_s15  ;;  %1200 = vrot.lane.b32.xlu1 %v7664_v37, %s7502_s20  ;;  %v1182_v60 = vmul.bf16 %v7917_v32, %v7660_v36  ;;  %v1611_v37 = vmul.bf16 %v7896_v0, %v7733_v58 }
 0x379   : > { %1634 = vrot.lane.b32.xlu0 %v1605_v57, %s7497_s15  ;;  %1206 = vrot.lane.b32.xlu1 %v1179_v33, %s7502_s20 }
 0x37d   : > { %1640 = vrot.lane.b32.xlu0 %v1608_v11, %s7497_s15  ;;  %1212 = vrot.lane.b32.xlu1 %v1182_v60, %s7502_s20 }
 0x381   : > { %1646 = vrot.lane.b32.xlu0 %v1611_v37, %s7497_s15  ;;  %1218 = vrot.lane.b32.xlu1 %v1185_v12, %s7502_s20 }
 0x385   : > { %1700 = vrot.lane.b32.xlu0 %v7719_v53, %s7504_s24  ;;  %1272 = vrot.lane.b32.xlu1 %v7654_v34, %s7503_s21 }
 0x389   : > { %1706 = vrot.lane.b32.xlu0 %v7888_v56, %s7504_s24  ;;  %1278 = vrot.lane.b32.xlu1 %v7907_v7, %s7503_s21 }
 0x3b3   : > { %v817_v16 = vpop.permute.xlu0 %816  ;;  %v815_v38 = vpop.permute.xlu1 %814 }
 0x3b4   : > { %v819_v34 = vsel %vm477_vm6, %v815_v38, %v817_v16  ;;  %v818_v24 = vsel %vm477_vm6, %v813_v14, %v815_v38  ;;  %v7345_v16 = vld [vmem:[%s10571_s2] ss:$8 sps:$4 sm:$0xff]   ;;  %v7348_v38 = vld [vmem:[%s10571_s2 + $0x14] ss:$8 sps:$4 sm:$0xff]  }
 0x3b7   : > { %v799_v17 = vpop.permute.xlu0 %798  ;;  %v797_v18 = vpop.permute.xlu1 %796 }
 0x3b8   : > { %v801_v19 = vsel %vm339_vm11, %v797_v18, %v799_v17  ;;  %v800_v53 = vsel %vm339_vm11, %v795_v13, %v797_v18  ;;  %v7350_v17 = vld [vmem:[%s10571_s2 + $0x10] ss:$8 sps:$4 sm:$0xff]   ;;  %v7351_v18 = vld [vmem:[%s10571_s2 + $0x24] ss:$8 sps:$4 sm:$0xff]  }
 0x3b9   : > { %1029 = vmatprep.subr.bf16.mxu1 %v801_v19  ;;  %v7353_v19 = vld [vmem:[%s10571_s2 + $0x20] ss:$8 sps:$4 sm:$0xff]  }
 0x3ba   : > { %1030 = vmatpush1.bf16.msra.mxu1 %v800_v53  ;;  %v7354_v53 = vld [vmem:[%s10571_s2 + $0x34] ss:$8 sps:$4 sm:$0xff]  }
 0x3bb   : > { %v836_v20 = vpop.permute.xlu0 %835  ;;  %1031 = vmatprep.subr.bf16.mxu1 %v819_v34  ;;  %v855_v21 = vpop.permute.xlu1 %854  ;;  %v7356_v34 = vld [vmem:[%s10571_s2 + $0x30] ss:$8 sps:$4 sm:$0xff]  }
 0x3bc   : > { %v839_v28 = vsel %vm510_vm3, %v834_v15, %v836_v20 }
 0x3be   : > { %1032 = vmatpush1.bf16.msra.mxu1 %v818_v24 }
 0x3bf   : > { %v905_v25 = vpop.permute.xlu0 %904  ;;  %v838_v26 = vpop.permute.xlu1 %837 }
 0x3c0   : > { %v840_v27 = vsel %vm510_vm3, %v836_v20, %v838_v26 }
 0x3c1   : > { %1033 = vmatprep.subr.bf16.mxu1 %v840_v27 }
 0x3c2   : > { %1034 = vmatpush1.bf16.msra.mxu1 %v839_v28 }
 0x3c3   : > { %v859_v29 = vpop.permute.xlu0 %858  ;;  %v857_v48 = vpop.permute.xlu1 %856 }
 0x3c4   : > { %v861_v30 = vsel %vm541_vm2, %v857_v48, %v859_v29  ;;  %v860_v31 = vsel %vm541_vm2, %v855_v21, %v857_v48 }
 0x3c5   : > { %1035 = vmatprep.subr.bf16.mxu1 %v861_v30 }
 0x3c6   : > { %1036 = vmatpush1.bf16.msra.mxu1 %v860_v31 }
 0x3c7   : > { %v882_v41 = vpop.permute.xlu0 %881  ;;  %1037 = vmatprep.subr.bf16.mxu1 %v7825_v23  ;;  %v884_v43 = vpop.permute.xlu1 %883 }
 0x3c8   : > { %v886_v46 = vsel %vm524_vm1, %v882_v41, %v884_v43 }
 0x3ca   : > { %1038 = vmatpush1.bf16.msra.mxu1 %v7823_v22 }
 0x3cb   : > { %v880_v54 = vpop.permute.xlu0 %879  ;;  %1039 = vmatprep.subr.bf16.mxu1 %v886_v46  ;;  %v923_v55 = vpop.permute.xlu1 %922 }
 0x3cc   : > { %v885_v61 = vsel %vm524_vm1, %v880_v54, %v882_v41 }
 0x3ce   : > { %1040 = vmatpush1.bf16.msra.mxu1 %v885_v61 }
 0x3cf   : > { %v921_v1 = vpop.permute.xlu0 %920  ;;  %v903_v6 = vpop.permute.xlu1 %902 }
 0x3d0   : > { %v907_v57 = vsel %vm493_vm0, %v903_v6, %v905_v25  ;;  %v925_v22 = vsel %vm622_vm7, %v921_v1, %v923_v55 }
 0x3d1   : > { %1041 = vmatprep.subr.bf16.mxu1 %v907_v57 }
 0x3d3   : > { %v919_v33 = vpop.permute.xlu0 %918  ;;  %v901_v11 = vpop.permute.xlu1 %900 }
 0x3d4   : > { %v906_v23 = vsel %vm493_vm0, %v901_v11, %v903_v6  ;;  %v924_v12 = vsel %vm622_vm7, %v919_v33, %v921_v1 }
 0x3d5   : > { %1042 = vmatpush1.bf16.msra.mxu1 %v906_v23 }
 0x3d6   : > { %1043 = vmatprep.subr.bf16.mxu1 %v925_v22 }
 0x3d7   : > { %v944_v60 = vpop.permute.xlu0 %943  ;;  %v942_v37 = vpop.permute.xlu1 %941 }
 0x3d8   : > { %v946_v13 = vsel %vm441_vm15, %v942_v37, %v944_v60 }
 0x3d9   : > { %1044 = vmatpush1.bf16.msra.mxu1 %v924_v12 }
 0x3da   : > { %1045 = vmatprep.subr.bf16.mxu1 %v946_v13 }
 0x3db   : > { %v940_v14 = vpop.permute.xlu1 %939 }
 0x3dc   : > { %v945_v15 = vsel %vm441_vm15, %v940_v14, %v942_v37 }
 0x3dd   : > { %1046 = vmatpush1.bf16.msra.mxu1 %v945_v15 }
 0x3de   : > { %7119 = vmatprep.subr.msk.bf16.mxu1 %vm7565_vm4, %v7563_v4 }
 0x3e0   : > { %1060 = vmatmul.mubr.bf16.vlgmr.msra.gmra.mrb[0].mxu1 %v7345_v16 }
 0x3e1   : > { %6994 = vmatprep.mubr.msk.bf16.mxu1 %vm689_vm5, %v7348_v38  ;;  %7122 = vmatpush1.bf16.msk.msra.mxu1 %vm7565_vm4, %v7563_v4 }
 0x3e8   : > { %1070 = vmatmul.mubr.bf16.gmra.mrb[4].mxu1 %v7350_v17 }
 0x3e9   : > { %6995 = vmatprep.mubr.msk.bf16.mxu1 %vm689_vm5, %v7351_v18 }
 0x3f0   : > { %1080 = vmatmul.mubr.bf16.gmra.mrb[8].mxu1 %v7353_v19 }
 0x3f1   : > { %6996 = vmatprep.mubr.msk.bf16.mxu1 %vm689_vm5, %v7354_v53 }
 0x3f8   : > { %1090 = vmatmul.mubr.bf16.gmra.mrb[12].mxu1 %v7356_v34 }
 0x4b3   : > { %v1061_v20 = vpop.f32.mrb[0].mxu1 }
 0x4b4   : > { %v1116_v21 = vmul.f32 0.01, %v1061_v20  ;;  %v1063_v24 = vpop.f32.mrb[1].mxu1  ;;  %vm1100_vm13 = vcmp.gt.f32.partialorder %v1061_v20, 0.0 }
 0x4b5   : > { %v1117_v25 = vmul.f32 0.01, %v1063_v24  ;;  %v1065_v26 = vpop.f32.mrb[2].mxu1  ;;  %vm1101_vm14 = vcmp.gt.f32.partialorder %v1063_v24, 0.0 }
 0x4b6   : > { %vm1102_vm8 = vcmp.gt.f32.partialorder %v1065_v26, 0.0  ;;  %v1118_v27 = vmul.f32 0.01, %v1065_v26  ;;  %v1067_v28 = vpop.f32.mrb[3].mxu1  ;;  %v1132_v48 = vsel %vm1100_vm13, %v1061_v20, %v1116_v21 }
 0x4b7   : > { %vm1103_vm9 = vcmp.gt.f32.partialorder %v1067_v28, 0.0  ;;  %v1119_v29 = vmul.f32 0.01, %v1067_v28  ;;  %v1133_v31 = vsel %vm1101_vm14, %v1063_v24, %v1117_v25 }
 0x4b8   : > { %v1134_v30 = vsel %vm1102_vm8, %v1065_v26, %v1118_v27 }
 0x4b9   : > { %v7989_v41 = vpack.c.bf16 %v1134_v30, %v1132_v48  ;;  %v1135_v43 = vsel %vm1103_vm9, %v1067_v28, %v1119_v29 }
 0x4ba   : > { %v7991_v46 = vpack.c.bf16 %v1135_v43, %v1133_v31 }
 0x4bb   : > { %1156 = vst [vmem:[#allocation2 + $0x8] sm:$0xff] %v7989_v41  ;;  %v1071_v54 = vpop.f32.mrb[4].mxu1  ;;  %1696 = vrot.lane.b32.xlu0 %v7989_v41, %s7504_s24  ;;  %1274 = vrot.lane.b32.xlu1 %v7989_v41, %s7503_s21  ;;  %v1516_v13 = vmul.bf16 %v7989_v41, %v7714_v52  ;;  %v1600_v14 = vmul.bf16 %v7989_v41, %v7735_v59 }
 0x4bc   : > { %1157 = vst [vmem:[#allocation2 + $0x10] sm:$0xff] %v7991_v46  ;;  %vm1104_vm10 = vcmp.gt.f32.partialorder %v1071_v54, 0.0  ;;  %v1120_v55 = vmul.f32 0.01, %v1071_v54  ;;  %v1073_v61 = vpop.f32.mrb[5].mxu1  ;;  %v1177_v53 = vmul.bf16 %v7989_v41, %v7681_v42  ;;  %v1178_v34 = vmul.bf16 %v7991_v46, %v7674_v40 }
 0x4bd   : > { %vm1105_vm12 = vcmp.gt.f32.partialorder %v1073_v61, 0.0  ;;  %v1121_v1 = vmul.f32 0.01, %v1073_v61  ;;  %v1075_v6 = vpop.f32.mrb[6].mxu1  ;;  %v1517_v48 = vmul.bf16 %v7991_v46, %v7749_v62 }
 0x4be   : > { %v1136_v57 = vsel %vm1104_vm10, %v1071_v54, %v1120_v55  ;;  %vm1106_vm13 = vcmp.gt.f32.partialorder %v1075_v6, 0.0  ;;  %v1122_v33 = vmul.f32 0.01, %v1075_v6  ;;  %v1077_v11 = vpop.f32.mrb[7].mxu1 }
 0x4bf   : > { %v1137_v23 = vsel %vm1105_vm12, %v1073_v61, %v1121_v1  ;;  %vm1107_vm14 = vcmp.gt.f32.partialorder %v1077_v11, 0.0  ;;  %v1123_v22 = vmul.f32 0.01, %v1077_v11  ;;  %1698 = vrot.lane.b32.xlu1 %v7991_v46, %s7504_s24  ;;  %1276 = vrot.lane.b32.xlu0 %v7991_v46, %s7503_s21  ;;  %v1601_v1 = vmul.bf16 %v7991_v46, %v7754_v63 }
 0x4c0   : > { %v1138_v60 = vsel %vm1106_vm13, %v1075_v6, %v1122_v33 }
 0x4c1   : > { %v8003_v37 = vpack.c.bf16 %v1138_v60, %v1136_v57  ;;  %v1139_v12 = vsel %vm1107_vm14, %v1077_v11, %v1123_v22 }
 0x4c2   : > { %v8009_v15 = vpack.c.bf16 %v1139_v12, %v1137_v23 }
 0x4c3   : > { %1158 = vst [vmem:[#allocation2 + $0x28] sm:$0xff] %v8003_v37  ;;  %v1081_v16 = vpop.f32.mrb[8].mxu1  ;;  %1540 = vrot.lane.b32.xlu1 %v1516_v13, %s7499_s17  ;;  %1624 = vrot.lane.b32.xlu0 %v1600_v14, %s7497_s15  ;;  %v1519_v13 = vmul.bf16 %v8003_v37, %v7714_v52 }
 0x4c4   : > { %1159 = vst [vmem:[#allocation2 + $0x30] sm:$0xff] %v8009_v15  ;;  %vm1108_vm8 = vcmp.gt.f32.partialorder %v1081_v16, 0.0  ;;  %v1124_v38 = vmul.f32 0.01, %v1081_v16  ;;  %v1083_v17 = vpop.f32.mrb[9].mxu1 }
 0x4c5   : > { %vm1109_vm9 = vcmp.gt.f32.partialorder %v1083_v17, 0.0  ;;  %v1125_v18 = vmul.f32 0.01, %v1083_v17  ;;  %v1085_v19 = vpop.f32.mrb[10].mxu1 }
 0x4c6   : > { %v1140_v20 = vsel %vm1108_vm8, %v1081_v16, %v1124_v38  ;;  %vm1110_vm10 = vcmp.gt.f32.partialorder %v1085_v19, 0.0  ;;  %v1126_v21 = vmul.f32 0.01, %v1085_v19  ;;  %v1087_v24 = vpop.f32.mrb[11].mxu1  ;;  %v1603_v16 = vmul.bf16 %v8003_v37, %v7735_v59 }
 0x4c7   : > { %v1141_v25 = vsel %vm1109_vm9, %v1083_v17, %v1125_v18  ;;  %vm1111_vm12 = vcmp.gt.f32.partialorder %v1087_v24, 0.0  ;;  %v1127_v26 = vmul.f32 0.01, %v1087_v24  ;;  %1202 = vrot.lane.b32.xlu1 %v1177_v53, %s7502_s20  ;;  %1204 = vrot.lane.b32.xlu0 %v1178_v34, %s7502_s20  ;;  %v1180_v38 = vmul.bf16 %v8003_v37, %v7681_v42 }
 0x4c8   : > { %v1142_v27 = vsel %vm1110_vm10, %v1085_v19, %v1126_v21  ;;  %v1520_v17 = vmul.bf16 %v8009_v15, %v7749_v62  ;;  %v1604_v18 = vmul.bf16 %v8009_v15, %v7754_v63  ;;  %v1181_v19 = vmul.bf16 %v8009_v15, %v7674_v40 }
 0x4c9   : > { %v8021_v28 = vpack.c.bf16 %v1142_v27, %v1140_v20  ;;  %v1143_v29 = vsel %vm1111_vm12, %v1087_v24, %v1127_v26  ;;  %vm2026_vm10 = vcmask 654336  }
 0x4ca   : > { %v8025_v30 = vpack.c.bf16 %v1143_v29, %v1141_v25 }
 0x4cb   : > { %1160 = vst [vmem:[#allocation2 + $0x48] sm:$0xff] %v8021_v28  ;;  %v1091_v31 = vpop.f32.mrb[12].mxu1  ;;  %1542 = vrot.lane.b32.xlu1 %v1517_v48, %s7499_s17  ;;  %1702 = vrot.lane.b32.xlu0 %v8003_v37, %s7504_s24  ;;  %v1606_v53 = vmul.bf16 %v8021_v28, %v7735_v59  ;;  %v1522_v34 = vmul.bf16 %v8021_v28, %v7714_v52 }
 0x4cc   : > { %1161 = vst [vmem:[#allocation2 + $0x50] sm:$0xff] %v8025_v30  ;;  %vm1112_vm13 = vcmp.gt.f32.partialorder %v1091_v31, 0.0  ;;  %v1128_v43 = vmul.f32 0.01, %v1091_v31  ;;  %v1093_v54 = vpop.f32.mrb[13].mxu1  ;;  %v1183_v20 = vmul.bf16 %v8021_v28, %v7681_v42  ;;  %v1184_v21 = vmul.bf16 %v8025_v30, %v7674_v40 }
 0x4cd   : > { %vm1113_vm14 = vcmp.gt.f32.partialorder %v1093_v54, 0.0  ;;  %v1129_v55 = vmul.f32 0.01, %v1093_v54  ;;  %v1095_v61 = vpop.f32.mrb[14].mxu1  ;;  %v1523_v24 = vmul.bf16 %v8025_v30, %v7749_v62  ;;  %v1607_v26 = vmul.bf16 %v8025_v30, %v7754_v63 }
 0x4ce   : > { %v1144_v6 = vsel %vm1112_vm13, %v1091_v31, %v1128_v43  ;;  %vm1114_vm8 = vcmp.gt.f32.partialorder %v1095_v61, 0.0  ;;  %v1130_v57 = vmul.f32 0.01, %v1095_v61  ;;  %v1097_v33 = vpop.f32.mrb[15].mxu1  ;;  %v8100_v43 = vpop.permute.xlu0 %1458 }
 0x4cf   : > { %v1145_v11 = vsel %vm1113_vm14, %v1093_v54, %v1129_v55  ;;  %vm1115_vm9 = vcmp.gt.f32.partialorder %v1097_v33, 0.0  ;;  %v1131_v23 = vmul.f32 0.01, %v1097_v33  ;;  %1626 = vrot.lane.b32.xlu1 %v1601_v1, %s7497_s15  ;;  %1282 = vrot.lane.b32.xlu0 %v8009_v15, %s7503_s21  ;;  %v8108_v55 = vpop.permute.xlu1 %1550 }
 0x4d0   : > { %v1146_v22 = vsel %vm1114_vm8, %v1095_v61, %v1130_v57  ;;  %v8124_v57 = vld [vmem:[#allocation2] sm:$0xff] }
 0x4d1   : > { %v8037_v60 = vpack.c.bf16 %v1146_v22, %v1144_v6  ;;  %v1147_v12 = vsel %vm1115_vm9, %v1097_v33, %v1131_v23  ;;  %v1333_v6 = vmul.bf16 %v7989_v41, %v7705_v49  ;;  %v1332_v33 = vmul.bf16 %v8124_v57, %v7658_v35 }
 0x4d2   : > { %v8041_v14 = vpack.c.bf16 %v1147_v12, %v1145_v11  ;;  %v8106_v54 = vpop.permute.xlu0 %1544  ;;  %v1334_v22 = vmul.bf16 %v7991_v46, %v7672_v39  ;;  %v1337_v12 = vmul.bf16 %v8009_v15, %v7672_v39 }
 0x4d3   : > { %1162 = vst [vmem:[#allocation2 + $0x68] sm:$0xff] %v8037_v60  ;;  %1280 = vrot.lane.b32.xlu1 %v8003_v37, %s7503_s21  ;;  %1546 = vrot.lane.b32.xlu0 %v1519_v13, %s7499_s17  ;;  %v1426_v25 = vmul.bf16 %v8037_v60, %v7710_v50  ;;  %v1525_v27 = vmul.bf16 %v8037_v60, %v7714_v52  ;;  %v8120_v1 = vpop.permute.xlu1 %1562 }
 0x4d4   : > { %1163 = vst [vmem:[#allocation2 + $0x70] sm:$0xff] %v8041_v14  ;;  %v1609_v29 = vmul.bf16 %v8037_v60, %v7735_v59  ;;  %v1186_v48 = vmul.bf16 %v8037_v60, %v7681_v42  ;;  %v1427_v31 = vmul.bf16 %v8041_v14, %v7688_v44  ;;  %v1421_v59 = vmul.bf16 %v8009_v15, %v7688_v44 }
 0x4d5   : > { %v1766_v58 = vmul.bf16 %v8041_v14, %v7772_v5 }
 0x4d6   : > { %v8118_v61 = vpop.permute.xlu0 %1556 }
 0x4d7   : > { %1704 = vrot.lane.b32.xlu1 %v8009_v15, %s7504_s24  ;;  %1630 = vrot.lane.b32.xlu0 %v1603_v16, %s7497_s15  ;;  %v8133_v23 = vpop.permute.xlu1 %1200 }
 0x4da   : > { %v8131_v11 = vpop.permute.xlu0 %1628 }
 0x4db   : > { %1208 = vrot.lane.b32.xlu1 %v1180_v38, %s7502_s20  ;;  %1548 = vrot.lane.b32.xlu0 %v1520_v17, %s7499_s17  ;;  %v8146_v16 = vpop.permute.xlu1 %1206  ;;  %v1336_v38 = vmul.bf16 %v8003_v37, %v7705_v49  ;;  %v1526_v17 = vmul.bf16 %v8041_v14, %v7749_v62  ;;  %v8302_v62 = vld [vmem:[#allocation3] sm:$0xff] }
 0x4de   : > { %v8144_v13 = vpop.permute.xlu0 %1634 }
 0x4df   : > { %1632 = vrot.lane.b32.xlu1 %v1604_v18, %s7497_s15  ;;  %1210 = vrot.lane.b32.xlu0 %v1181_v19, %s7502_s20  ;;  %v1335_v18 = vmul.bf16 %v7907_v7, %v7658_v35  ;;  %v1339_v19 = vmul.bf16 %v8021_v28, %v7705_v49 }
 0x4e3   : > { %1636 = vrot.lane.b32.xlu0 %v1606_v53, %s7497_s15  ;;  %1552 = vrot.lane.b32.xlu1 %v1522_v34, %s7499_s17  ;;  %v8158_v53 = vpop.permute.xlu0 %1640  ;;  %v8160_v34 = vpop.permute.xlu1 %1212 }
 0x4e7   : > { %1214 = vrot.lane.b32.xlu1 %v1183_v20, %s7502_s20  ;;  %1216 = vrot.lane.b32.xlu0 %v1184_v21, %s7502_s20  ;;  %v1340_v20 = vmul.bf16 %v8025_v30, %v7672_v39  ;;  %v8169_v21 = vpop.permute.xlu0 %1646 }
 0x4eb   : > { %1554 = vrot.lane.b32.xlu1 %v1523_v24, %s7499_s17  ;;  %1460 = vrot.lane.b32.xlu0 %v1426_v25, %s7500_s18  ;;  %v8171_v24 = vpop.permute.xlu1 %1218  ;;  %v1338_v25 = vmul.bf16 %v7917_v32, %v7658_v35 }
 0x4ef   : > { %1638 = vrot.lane.b32.xlu1 %v1607_v26, %s7497_s15  ;;  %1558 = vrot.lane.b32.xlu0 %v1525_v27, %s7499_s17  ;;  %v1187_v26 = vmul.bf16 %v8041_v14, %v7674_v40  ;;  %v8180_v27 = vpop.permute.xlu0 %1700 }
 0x4f3   : > { %1642 = vrot.lane.b32.xlu0 %v1609_v29, %s7497_s15  ;;  %1220 = vrot.lane.b32.xlu1 %v1186_v48, %s7502_s20  ;;  %v8182_v29 = vpop.permute.xlu1 %1272  ;;  %v1610_v48 = vmul.bf16 %v8041_v14, %v7754_v63  ;;  %v7371_v63 = vld [vmem:[%s10572_s3 + $0x4] ss:$20 sps:$4 sm:$0xff]  }
 0x4f4   : > { %2071 = vmatprep.mubr.bf16.mxu1 %v7371_v63  ;;  %v1422_v63 = vmul.bf16 %v7917_v32, %v7690_v45 }
 0x4f7   : > { %1288 = vrot.lane.b32.xlu0 %v8025_v30, %s7503_s21  ;;  %1462 = vrot.lane.b32.xlu1 %v1427_v31, %s7500_s18  ;;  %v1342_v31 = vmul.bf16 %v8037_v60, %v7705_v49 }
 0x4fb   : > { %1712 = vrot.lane.b32.xlu0 %v7894_v9, %s7504_s24  ;;  %1286 = vrot.lane.b32.xlu1 %v8021_v28, %s7503_s21 }
 0x4ff   : > { %1708 = vrot.lane.b32.xlu0 %v8021_v28, %s7504_s24  ;;  %1710 = vrot.lane.b32.xlu1 %v8025_v30, %s7504_s24 }
 0x503   : > { %1284 = vrot.lane.b32.xlu1 %v7917_v32, %s7503_s21  ;;  %1294 = vrot.lane.b32.xlu0 %v8041_v14, %s7503_s21  ;;  %v8316_v32 = vld [vmem:[#allocation3 + $0x20] sm:$0xff] }
 0x507   : > { %1292 = vrot.lane.b32.xlu1 %v8037_v60, %s7503_s21  ;;  %1358 = vrot.lane.b32.xlu0 %v1333_v6, %s7501_s19  ;;  %v1746_v6 = vld [vmem:[#allocation2 + $0x18] sm:$0xff] }
 0x50b   : > { %1290 = vrot.lane.b32.xlu1 %v7882_v47, %s7503_s21  ;;  %1356 = vrot.lane.b32.xlu0 %v1332_v33, %s7501_s19  ;;  %v8193_v33 = vpop.permute.xlu0 %1706 }
 0x50f   : > { %1360 = vrot.lane.b32.xlu1 %v1334_v22, %s7501_s19  ;;  %1366 = vrot.lane.b32.xlu0 %v1337_v12, %s7501_s19  ;;  %v8195_v22 = vpop.permute.xlu1 %1278  ;;  %v1758_v12 = vmul.bf16 %v1746_v6, %v7763_v2  ;;  %v1417_v6 = vmul.bf16 %v7989_v41, %v7710_v50 }
 0x513   : > { %1364 = vrot.lane.b32.xlu1 %v1336_v38, %s7501_s19  ;;  %1560 = vrot.lane.b32.xlu0 %v1526_v17, %s7499_s17  ;;  %v1757_v38 = vmul.bf16 %v7991_v46, %v7772_v5  ;;  %v7359_v17 = vld [vmem:[%s10572_s3 + $0xc] ss:$20 sps:$4 sm:$0xff]  }
 0x514   : > { %2144 = vmatprep.mubr.bf16.mxu0 %v7359_v17  ;;  %v1760_v17 = vmul.bf16 %v8009_v15, %v7772_v5 }
 0x517   : > { %1362 = vrot.lane.b32.xlu1 %v1335_v18, %s7501_s19  ;;  %1370 = vrot.lane.b32.xlu0 %v1339_v19, %s7501_s19 }
 0x51b   : > { %1372 = vrot.lane.b32.xlu1 %v1340_v20, %s7501_s19  ;;  %1716 = vrot.lane.b32.xlu0 %v8041_v14, %s7504_s24  ;;  %v1756_v20 = vmul.bf16 %v7989_v41, %v7765_v3 }
 0x51f   : > { %1718 = vrot.lane.b32.xlu1 %v7896_v0, %s7504_s24  ;;  %1368 = vrot.lane.b32.xlu0 %v1338_v25, %s7501_s19  ;;  %v1341_v25 = vmul.bf16 %v7882_v47, %v7658_v35 }
 0x523   : > { %1714 = vrot.lane.b32.xlu1 %v8037_v60, %s7504_s24  ;;  %1222 = vrot.lane.b32.xlu0 %v1187_v26, %s7502_s20 }
 0x527   : > { %1644 = vrot.lane.b32.xlu1 %v1610_v48, %s7497_s15  ;;  %1376 = vrot.lane.b32.xlu0 %v1342_v31, %s7501_s19  ;;  %v1418_v31 = vmul.bf16 %v7991_v46, %v7688_v44 }
 0x52b   : > { %1784 = vrot.lane.b32.xlu1 %v1758_v12, %s7498_s16  ;;  %1782 = vrot.lane.b32.xlu0 %v1757_v38, %s7498_s16  ;;  %v1761_v38 = vmul.bf16 %v7888_v56, %v7763_v2 }
 0x52d   : > { %v8205_v18 = vpop.permute.xlu0 %1696  ;;  %v8207_v19 = vpop.permute.xlu1 %1274 }
 0x52f   : > { %1780 = vrot.lane.b32.xlu1 %v1756_v20, %s7498_s16  ;;  %1374 = vrot.lane.b32.xlu0 %v1341_v25, %s7501_s19 }
 0x531   : > { %v8215_v26 = vpop.permute.xlu0 %1276  ;;  %v8217_v48 = vpop.permute.xlu1 %1698 }
 0x533   : > { %1444 = vrot.lane.b32.xlu1 %v1418_v31, %s7500_s18  ;;  %1442 = vrot.lane.b32.xlu0 %v1417_v6, %s7500_s18  ;;  %v1759_v31 = vmul.bf16 %v8003_v37, %v7765_v3  ;;  %v1416_v6 = vmul.bf16 %v8124_v57, %v7690_v45  ;;  %v1420_v57 = vmul.bf16 %v8003_v37, %v7710_v50 }
 0x535   : > { %v8225_v12 = vpop.permute.xlu0 %1624  ;;  %v8227_v47 = vpop.permute.xlu1 %1540 }
 0x537   : > { %1790 = vrot.lane.b32.xlu1 %v1761_v38, %s7498_s16  ;;  %1788 = vrot.lane.b32.xlu0 %v1760_v17, %s7498_s16 }
 0x539   : > { %v1205_v20 = vpop.permute.xlu0 %1204  ;;  %v1203_v25 = vpop.permute.xlu1 %1202 }
 0x53a   : > { %v1225_v10 = vsel %vm339_vm11, %v1203_v25, %v1205_v20  ;;  %v1224_v56 = vsel %vm339_vm11, %v8133_v23, %v1203_v25  ;;  %v1763_v25 = vmul.bf16 %v8025_v30, %v7772_v5 }
 0x53b   : > { %1786 = vrot.lane.b32.xlu1 %v1759_v31, %s7498_s16  ;;  %1440 = vrot.lane.b32.xlu0 %v1416_v6, %s7500_s18 }
 0x53c   : > { %2041 = vmatprep.subr.bf16.mxu1 %v1225_v10  ;;  %v1764_v10 = vmul.bf16 %v7894_v9, %v7763_v2 }
 0x53d   : > { %2042 = vmatpush1.bf16.msra.mxu1 %v1224_v56  ;;  %v8244_v38 = vpop.permute.xlu0 %1702  ;;  %v8246_v17 = vpop.permute.xlu1 %1542  ;;  %v1419_v56 = vmul.bf16 %v7907_v7, %v7690_v45 }
 0x53f   : > { %1450 = vrot.lane.b32.xlu1 %v1421_v59, %s7500_s18  ;;  %1448 = vrot.lane.b32.xlu0 %v1420_v57, %s7500_s18  ;;  %v1343_v59 = vmul.bf16 %v8041_v14, %v7672_v39 }
 0x541   : > { %v8254_v23 = vpop.permute.xlu0 %1282  ;;  %v8256_v20 = vpop.permute.xlu1 %1626 }
 0x543   : > { %1796 = vrot.lane.b32.xlu1 %v1764_v10, %s7498_s16  ;;  %1794 = vrot.lane.b32.xlu0 %v1763_v25, %s7498_s16  ;;  %v1762_v10 = vmul.bf16 %v8021_v28, %v7765_v3  ;;  %v1423_v25 = vmul.bf16 %v8021_v28, %v7710_v50 }
 0x545   : > { %v8264_v31 = vpop.permute.xlu0 %1546  ;;  %v8266_v6 = vpop.permute.xlu1 %1280 }
 0x547   : > { %1378 = vrot.lane.b32.xlu1 %v1343_v59, %s7501_s19  ;;  %1446 = vrot.lane.b32.xlu0 %v1419_v56, %s7500_s18  ;;  %v1424_v56 = vmul.bf16 %v8025_v30, %v7688_v44 }
 0x549   : > { %v8274_v9 = vpop.permute.xlu0 %1630  ;;  %v8276_v57 = vpop.permute.xlu1 %1704 }
 0x54b   : > { %1792 = vrot.lane.b32.xlu1 %v1762_v10, %s7498_s16  ;;  %1454 = vrot.lane.b32.xlu0 %v1423_v25, %s7500_s18  ;;  %v1767_v10 = vmul.bf16 %v7896_v0, %v7763_v2  ;;  %v1765_v0 = vmul.bf16 %v8037_v60, %v7765_v3  ;;  %v8329_v2 = vld [vmem:[#allocation3 + $0x60] sm:$0xff] }
 0x54c   : > { %10626 = vst [vmem:[#allocation18_spill] sm:$0xff] %v8329_v2  ;;  %v2343_v44 = vmul.bf16 %v8329_v2, %v7660_v36 }
 0x54d   : > { %v8287_v7 = vpop.permute.xlu0 %1548  ;;  %v1209_v59 = vpop.permute.xlu1 %1208 }
 0x54f   : > { %1456 = vrot.lane.b32.xlu1 %v1424_v56, %s7500_s18  ;;  %1800 = vrot.lane.b32.xlu0 %v1766_v58, %s7498_s16  ;;  %v1226_v58 = vsel %vm339_vm11, %v8146_v16, %v1209_v59 }
 0x551   : > { %v1211_v52 = vpop.permute.xlu0 %1210  ;;  %v8295_v51 = vpop.permute.xlu1 %1632 }
 0x552   : > { %v1227_v25 = vsel %vm339_vm11, %v1209_v59, %v1211_v52  ;;  %v2334_v52 = vmul.bf16 %v8302_v62, %v7660_v36 }
 0x553   : > { %1802 = vrot.lane.b32.xlu1 %v1767_v10, %s7498_s16  ;;  %1452 = vrot.lane.b32.xlu0 %v1422_v63, %s7500_s18  ;;  %v8318_v10 = vld [vmem:[#allocation3 + $0x40] sm:$0xff]  ;;  %v2337_v63 = vmul.bf16 %v8316_v32, %v7660_v36 }
 0x554   : > { %2043 = vmatprep.subr.bf16.mxu1 %v1227_v25  ;;  %v2340_v25 = vmul.bf16 %v8318_v10, %v7660_v36 }
 0x555   : > { %2044 = vmatpush1.bf16.msra.mxu1 %v1226_v58  ;;  %v8308_v56 = vpop.permute.xlu0 %1636  ;;  %v8310_v5 = vpop.permute.xlu1 %1552 }
 0x557   : > { %1798 = vrot.lane.b32.xlu1 %v1765_v0, %s7498_s16  ;;  %2358 = vrot.lane.b32.xlu0 %v2334_v52, %s7502_s20 }
 0x559   : > { %v1217_v16 = vpop.permute.xlu0 %1216  ;;  %v1215_v59 = vpop.permute.xlu1 %1214 }
 0x55a   : > { %v1229_v58 = vsel %vm339_vm11, %v1215_v59, %v1217_v16  ;;  %v1228_v3 = vsel %vm339_vm11, %v8160_v34, %v1215_v59 }
 0x55b   : > { %2364 = vrot.lane.b32.xlu1 %v2337_v63, %s7502_s20  ;;  %2370 = vrot.lane.b32.xlu0 %v2340_v25, %s7502_s20 }
 0x55c   : > { %2045 = vmatprep.subr.bf16.mxu1 %v1229_v58 }
 0x55d   : > { %2046 = vmatpush1.bf16.msra.mxu1 %v1228_v3  ;;  %v1461_v0 = vpop.permute.xlu0 %1460  ;;  %v1555_v52 = vpop.permute.xlu1 %1554 }
 0x55e   : > { %v1470_v58 = vsel %vm541_vm2, %v8100_v43, %v1461_v0 }
 0x55f   : > { %2376 = vrot.lane.b32.xlu1 %v2343_v44, %s7502_s20  ;;  %2430 = vrot.lane.b32.xlu0 %v8302_v62, %s7503_s21 }
 0x561   : > { %v1559_v16 = vpop.permute.xlu0 %1558  ;;  %v8338_v34 = vpop.permute.xlu1 %1638 }
 0x563   : > { %2436 = vrot.lane.b32.xlu1 %v8316_v32, %s7503_s21  ;;  %2442 = vrot.lane.b32.xlu0 %v8318_v10, %s7503_s21 }
 0x565   : > { %v8344_v3 = vpop.permute.xlu0 %1642  ;;  %v8346_v59 = vpop.permute.xlu1 %1220 }
 0x567   : > { %2448 = vrot.lane.b32.xlu1 %v8329_v2, %s7503_s21 }
 0x569   : > { %v8350_v44 = vpop.permute.xlu0 %1288  ;;  %v1463_v63 = vpop.permute.xlu1 %1462 }
 0x56a   : > { %v1471_v25 = vsel %vm541_vm2, %v1461_v0, %v1463_v63 }
 0x56b   : > { %2112 = vmatprep.subr.bf16.mxu0 %v1471_v25  ;;  %v1569_v25 = vsel %vm524_vm1, %v1555_v52, %v8118_v61  ;;  %v1649_v61 = vsel %vm493_vm0, %v8256_v20, %v8131_v11  ;;  %v1650_v11 = vsel %vm493_vm0, %v8274_v9, %v8295_v51 }
 0x56c   : > { %2113 = vmatpush1.bf16.msra.mxu0 %v1470_v58 }
 0x56d   : > { %v8355_v36 = vpop.permute.xlu0 %1712  ;;  %2114 = vmatprep.subr.bf16.mxu0 %v7991_v46  ;;  %v8358_v45 = vpop.permute.xlu1 %1286 }
 0x570   : > { %2115 = vmatpush1.bf16.msra.mxu0 %v7989_v41 }
 0x571   : > { %v8361_v50 = vpop.permute.xlu0 %1708  ;;  %2116 = vmatprep.subr.bf16.mxu0 %v8009_v15  ;;  %v8364_v2 = vpop.permute.xlu1 %1710 }
 0x574   : > { %2117 = vmatpush1.bf16.msra.mxu0 %v8003_v37  ;;  %v1565_v37 = vsel %vm524_vm1, %v8246_v17, %v8106_v54  ;;  %v1566_v54 = vsel %vm524_vm1, %v8264_v31, %v8287_v7 }
 0x575   : > { %v8367_v63 = vpop.permute.xlu0 %1294  ;;  %2118 = vmatprep.subr.bf16.mxu0 %v8025_v30  ;;  %v8370_v43 = vpop.permute.xlu1 %1284 }
 0x578   : > { %2119 = vmatpush1.bf16.msra.mxu0 %v8021_v28  ;;  %v1564_v28 = vsel %vm524_vm1, %v8227_v47, %v8246_v17 }
 0x579   : > { %v8373_v46 = vpop.permute.xlu0 %1358  ;;  %2120 = vmatprep.subr.bf16.mxu0 %v8041_v14  ;;  %v8376_v41 = vpop.permute.xlu1 %1292  ;;  %v1567_v14 = vsel %vm524_vm1, %v8287_v7, %v8108_v55  ;;  %v1568_v55 = vsel %vm524_vm1, %v8310_v5, %v1555_v52  ;;  %v1651_v52 = vsel %vm493_vm0, %v8295_v51, %v8144_v13  ;;  %v1230_v13 = vsel %vm339_vm11, %v8171_v24, %v8346_v59 }
 0x57a   : > { %v1652_v51 = vsel %vm493_vm0, %v8308_v56, %v8338_v34  ;;  %v1296_v56 = vsel %vm477_vm6, %v8182_v29, %v8207_v19  ;;  %v1720_v29 = vsel %vm622_vm7, %v8205_v18, %v8217_v48  ;;  %v1722_v18 = vsel %vm622_vm7, %v8244_v38, %v8276_v57 }
 0x57b   : > { %v1724_v38 = vsel %vm622_vm7, %v8361_v50, %v8364_v2  ;;  %v7360_v50 = vld [vmem:[%s10572_s3 + $0x34] ss:$20 sps:$4 sm:$0xff]  }
 0x57c   : > { %2121 = vmatpush1.bf16.msra.mxu0 %v8037_v60 }
 0x57d   : > { %v8382_v15 = vpop.permute.xlu0 %1356  ;;  %2122 = vmatprep.subr.bf16.mxu0 %v1565_v37  ;;  %v8384_v30 = vpop.permute.xlu1 %1290 }
 0x580   : > { %2123 = vmatpush1.bf16.msra.mxu0 %v1564_v28 }
 0x581   : > { %v8392_v0 = vpop.permute.xlu0 %1366  ;;  %2124 = vmatprep.subr.bf16.mxu0 %v1567_v14  ;;  %v8394_v60 = vpop.permute.xlu1 %1360 }
 0x584   : > { %2125 = vmatpush1.bf16.msra.mxu0 %v1566_v54  ;;  %v1653_v54 = vsel %vm493_vm0, %v8338_v34, %v8158_v53  ;;  %v1297_v53 = vsel %vm477_vm6, %v8207_v19, %v8215_v26  ;;  %v1299_v26 = vsel %vm477_vm6, %v8266_v6, %v8254_v23  ;;  %v1721_v34 = vsel %vm622_vm7, %v8217_v48, %v8180_v27 }
 0x585   : > { %v1561_v58 = vpop.permute.xlu0 %1560  ;;  %2126 = vmatprep.subr.bf16.mxu0 %v1569_v25  ;;  %v8401_v47 = vpop.permute.xlu1 %1364  ;;  %v1301_v19 = vsel %vm477_vm6, %v8358_v45, %v8350_v44  ;;  %v1723_v27 = vsel %vm622_vm7, %v8276_v57, %v8193_v33  ;;  %v1303_v48 = vsel %vm477_vm6, %v8376_v41, %v8367_v63  ;;  %v1725_v33 = vsel %vm622_vm7, %v8364_v2, %v8355_v36  ;;  %v7357_v57 = vld [vmem:[%s10572_s3 + $0x8] ss:$20 sps:$4 sm:$0xff]  }
 0x586   : > { %v1571_v17 = vsel %vm524_vm1, %v1561_v58, %v8120_v1  ;;  %v1570_v31 = vsel %vm524_vm1, %v1559_v16, %v1561_v58  ;;  %v1648_v1 = vsel %vm493_vm0, %v8225_v12, %v8256_v20  ;;  %v1381_v36 = vsel %vm510_vm3, %v8373_v46, %v8394_v60 }
 0x587   : > { %v1380_v2 = vsel %vm510_vm3, %v8382_v15, %v8373_v46  ;;  %v1383_v60 = vsel %vm510_vm3, %v8401_v47, %v8392_v0 }
 0x588   : > { %2127 = vmatpush1.bf16.msra.mxu0 %v1568_v55 }
 0x589   : > { %v8407_v37 = vpop.permute.xlu0 %1370  ;;  %2128 = vmatprep.subr.bf16.mxu0 %v1571_v17  ;;  %v8409_v28 = vpop.permute.xlu1 %1362 }
 0x58a   : > { %v1382_v46 = vsel %vm510_vm3, %v8409_v28, %v8401_v47  ;;  %v7363_v47 = vld [vmem:[%s10572_s3 + $0x5c] ss:$20 sps:$4 sm:$0xff]  }
 0x58c   : > { %2129 = vmatpush1.bf16.msra.mxu0 %v1570_v31 }
 0x58d   : > { %v8415_v7 = vpop.permute.xlu0 %1716  ;;  %2130 = vmatprep.subr.bf16.mxu0 %v1649_v61  ;;  %v8417_v5 = vpop.permute.xlu1 %1372 }
 0x58e   : > { %v1385_v0 = vsel %vm510_vm3, %v8407_v37, %v8417_v5 }
 0x590   : > { %2131 = vmatpush1.bf16.msra.mxu0 %v1648_v1 }
 0x591   : > { %v8425_v16 = vpop.permute.xlu0 %1368  ;;  %2132 = vmatprep.subr.bf16.mxu0 %v1651_v52  ;;  %v1719_v14 = vpop.permute.xlu1 %1718 }
 0x592   : > { %v1727_v63 = vsel %vm622_vm7, %v8415_v7, %v1719_v14  ;;  %v1384_v28 = vsel %vm510_vm3, %v8425_v16, %v8407_v37 }
 0x594   : > { %2133 = vmatpush1.bf16.msra.mxu0 %v1650_v11 }
 0x595   : > { %v1223_v25 = vpop.permute.xlu0 %1222  ;;  %2134 = vmatprep.subr.bf16.mxu0 %v1653_v54  ;;  %v1715_v12 = vpop.permute.xlu1 %1714 }
 0x596   : > { %v1231_v20 = vsel %vm339_vm11, %v8346_v59, %v1223_v25 }
 0x597   : > { %2047 = vmatprep.subr.bf16.mxu1 %v1231_v20  ;;  %v7365_v20 = vld [vmem:[%s10572_s3 + $0x58] ss:$20 sps:$4 sm:$0xff]  }
 0x598   : > { %2048 = vmatpush1.bf16.msra.mxu1 %v1230_v13  ;;  %2135 = vmatpush1.bf16.msra.mxu0 %v1652_v51  ;;  %v7366_v13 = vld [vmem:[%s10572_s3 + $0x84] ss:$20 sps:$4 sm:$0xff]  }
 0x599   : > { %v8444_v9 = vpop.permute.xlu0 %1376  ;;  %2049 = vmatprep.subr.bf16.mxu1 %v1297_v53  ;;  %v1645_v58 = vpop.permute.xlu1 %1644 }
 0x59a   : > { %v1655_v55 = vsel %vm493_vm0, %v1645_v58, %v8169_v21  ;;  %v1654_v24 = vsel %vm493_vm0, %v8344_v3, %v1645_v58  ;;  %v1298_v3 = vsel %vm477_vm6, %v8195_v22, %v8266_v6  ;;  %v1300_v22 = vsel %vm477_vm6, %v8370_v43, %v8358_v45 }
 0x59b   : > { %2136 = vmatprep.subr.bf16.mxu0 %v1655_v55  ;;  %v1302_v45 = vsel %vm477_vm6, %v8384_v30, %v8376_v41  ;;  %v1726_v30 = vsel %vm622_vm7, %v1715_v12, %v8415_v7  ;;  %v7362_v7 = vld [vmem:[%s10572_s3 + $0x30] ss:$20 sps:$4 sm:$0xff]  }
 0x59c   : > { %2050 = vmatpush1.bf16.msra.mxu1 %v1296_v56  ;;  %2137 = vmatpush1.bf16.msra.mxu0 %v1654_v24 }
 0x59d   : > { %v1783_v59 = vpop.permute.xlu0 %1782  ;;  %2051 = vmatprep.subr.bf16.mxu1 %v1299_v26  ;;  %2138 = vmatprep.subr.bf16.mxu0 %v1721_v34  ;;  %v1785_v21 = vpop.permute.xlu1 %1784 }
 0x59e   : > { %v1805_v31 = vsel %vm441_vm15, %v1783_v59, %v1785_v21 }
 0x5a0   : > { %2052 = vmatpush1.bf16.msra.mxu1 %v1298_v3  ;;  %2139 = vmatpush1.bf16.msra.mxu0 %v1720_v29 }
 0x5a1   : > { %v8471_v23 = vpop.permute.xlu0 %1374  ;;  %2053 = vmatprep.subr.bf16.mxu1 %v1301_v19  ;;  %2140 = vmatprep.subr.bf16.mxu0 %v1723_v27  ;;  %v1781_v17 = vpop.permute.xlu1 %1780  ;;  %v10627_v19 = vmov 0  }
 0x5a2   : > { %v1804_v15 = vsel %vm441_vm15, %v1781_v17, %v1783_v59  ;;  %v1386_v53 = vsel %vm510_vm3, %v8471_v23, %v8444_v9 }
 0x5a4   : > { %2054 = vmatpush1.bf16.msra.mxu1 %v1300_v22  ;;  %2141 = vmatpush1.bf16.msra.mxu0 %v1722_v18  ;;  %v7369_v18 = vld [vmem:[%s10572_s3] ss:$20 sps:$4 sm:$0xff]  }
 0x5a5   : > { %v8485_v6 = vpop.permute.xlu0 %1442  ;;  %2055 = vmatprep.subr.bf16.mxu1 %v1303_v48  ;;  %2142 = vmatprep.subr.bf16.mxu0 %v1725_v33  ;;  %v1445_v44 = vpop.permute.xlu1 %1444  ;;  %v7373_v48 = vld [vmem:[%s10572_s3 + $0x2c] ss:$20 sps:$4 sm:$0xff]  }
 0x5a6   : > { %v1465_v58 = vsel %vm541_vm2, %v8485_v6, %v1445_v44  ;;  %v7372_v44 = vld [vmem:[%s10572_s3 + $0x10] ss:$20 sps:$4 sm:$0xff]  }
 0x5a8   : > { %2056 = vmatpush1.bf16.msra.mxu1 %v1302_v45  ;;  %2143 = vmatpush1.bf16.msra.mxu0 %v1724_v38  ;;  %v7375_v45 = vld [vmem:[%s10572_s3 + $0x28] ss:$20 sps:$4 sm:$0xff]  }
 0x5a9   : > { %v1789_v43 = vpop.permute.xlu0 %1788  ;;  %2057 = vmatprep.subr.bf16.mxu1 %v1381_v36  ;;  %2185 = vmatprep.subr.bf16.mxu0 %v1727_v63  ;;  %v1791_v41 = vpop.permute.xlu1 %1790  ;;  %v7377_v38 = vld [vmem:[%s10572_s3 + $0x54] ss:$20 sps:$4 sm:$0xff]   ;;  %v7379_v36 = vld [vmem:[%s10572_s3 + $0x50] ss:$20 sps:$4 sm:$0xff]  }
 0x5aa   : > { %v1807_v52 = vsel %vm441_vm15, %v1789_v43, %v1791_v41  ;;  %v7381_v63 = vld [vmem:[%s10572_s3 + $0x7c] ss:$20 sps:$4 sm:$0xff]   ;;  %v7383_v41 = vld [vmem:[%s10572_s3 + $0x78] ss:$20 sps:$4 sm:$0xff]  }
 0x5ab   : > { %2145 = vmatmul.mubr.bf16.vlgmr.msra.gmra.mrb[4].mxu0 %v7357_v57  ;;  %v7376_v57 = vld [vmem:[%s10572_s3 + $0x38] ss:$20 sps:$4 sm:$0xff]  }
 0x5ac   : > { %2058 = vmatpush1.bf16.msra.mxu1 %v1380_v2  ;;  %2186 = vmatpush1.bf16.msra.mxu0 %v1726_v30 }
 0x5ad   : > { %v1441_v61 = vpop.permute.xlu0 %1440  ;;  %2059 = vmatprep.subr.bf16.mxu1 %v1383_v60  ;;  %2187 = vmatprep.subr.bf16.mxu0 %v1805_v31  ;;  %v1787_v1 = vpop.permute.xlu1 %1786 }
 0x5ae   : > { %2154 = vmatprep.mubr.bf16.mxu0 %v7360_v50  ;;  %v1806_v54 = vsel %vm441_vm15, %v1787_v1, %v1789_v43  ;;  %v1464_v26 = vsel %vm541_vm2, %v1441_v61, %v8485_v6  ;;  %v7380_v43 = vld [vmem:[%s10572_s3 + $0x60] ss:$20 sps:$4 sm:$0xff]   ;;  %v7384_v50 = vld [vmem:[%s10572_s3 + $0x88] ss:$20 sps:$4 sm:$0xff]  }
 0x5b0   : > { %2060 = vmatpush1.bf16.msra.mxu1 %v1382_v46  ;;  %2188 = vmatpush1.bf16.msra.mxu0 %v1804_v15 }
 0x5b1   : > { %v1449_v14 = vpop.permute.xlu0 %1448  ;;  %2061 = vmatprep.subr.bf16.mxu1 %v1385_v0  ;;  %2189 = vmatprep.subr.bf16.mxu0 %v1807_v52  ;;  %v1451_v11 = vpop.permute.xlu1 %1450 }
 0x5b2   : > { %v1467_v34 = vsel %vm541_vm2, %v1449_v14, %v1451_v11 }
 0x5b3   : > { %2155 = vmatmul.mubr.bf16.gmra.mrb[8].mxu0 %v7362_v7 }
 0x5b4   : > { %2062 = vmatpush1.bf16.msra.mxu1 %v1384_v28  ;;  %2190 = vmatpush1.bf16.msra.mxu0 %v1806_v54 }
 0x5b5   : > { %v1795_v5 = vpop.permute.xlu0 %1794  ;;  %v1797_v25 = vpop.permute.xlu1 %1796  ;;  %2164 = vmatprep.mubr.bf16.mxu0 %v7363_v47 }
 0x5b6   : > { %v1809_v12 = vsel %vm441_vm15, %v1795_v5, %v1797_v25 }
 0x5b7   : > { %2191 = vmatprep.subr.bf16.mxu0 %v1809_v12 }
 0x5b9   : > { %v1447_v37 = vpop.permute.xlu0 %1446  ;;  %v1379_v16 = vpop.permute.xlu1 %1378 }
 0x5ba   : > { %v1387_v51 = vsel %vm510_vm3, %v8444_v9, %v1379_v16  ;;  %v7368_v9 = vld [vmem:[%s10572_s3 + $0x80] ss:$20 sps:$4 sm:$0xff]   ;;  %v1466_v3 = vsel %vm541_vm2, %v1447_v37, %v1449_v14 }
 0x5bb   : > { %2063 = vmatprep.subr.bf16.mxu1 %v1387_v51  ;;  %2165 = vmatmul.mubr.bf16.gmra.mrb[12].mxu0 %v7365_v20 }
 0x5bc   : > { %2064 = vmatpush1.bf16.msra.mxu1 %v1386_v53  ;;  %2174 = vmatprep.mubr.bf16.mxu0 %v7366_v13 }
 0x5bd   : > { %v1455_v55 = vpop.permute.xlu0 %1454  ;;  %2065 = vmatprep.subr.bf16.mxu1 %v1465_v58  ;;  %v1793_v24 = vpop.permute.xlu1 %1792 }
 0x5be   : > { %v1808_v56 = vsel %vm441_vm15, %v1793_v24, %v1795_v5 }
 0x5bf   : > { %2192 = vmatpush1.bf16.msra.mxu0 %v1808_v56 }
 0x5c0   : > { %2066 = vmatpush1.bf16.msra.mxu1 %v1464_v26 }
 0x5c1   : > { %v1801_v59 = vpop.permute.xlu0 %1800  ;;  %2067 = vmatprep.subr.bf16.mxu1 %v1467_v34  ;;  %v1457_v21 = vpop.permute.xlu1 %1456 }
 0x5c2   : > { %v1469_v29 = vsel %vm541_vm2, %v1455_v55, %v1457_v21 }
 0x5c3   : > { %2175 = vmatmul.mubr.bf16.gmra.mrb[16].mxu0 %v7368_v9 }
 0x5c4   : > { %2068 = vmatpush1.bf16.msra.mxu1 %v1466_v3  ;;  %2217 = vmatprep.mubr.bf16.mxu0 %v10627_v19 }
 0x5c5   : > { %v1453_v27 = vpop.permute.xlu0 %1452  ;;  %2069 = vmatprep.subr.bf16.mxu1 %v1469_v29  ;;  %v1803_v23 = vpop.permute.xlu1 %1802 }
 0x5c6   : > { %v1468_v17 = vsel %vm541_vm2, %v1453_v27, %v1455_v55  ;;  %v1811_v22 = vsel %vm441_vm15, %v1801_v59, %v1803_v23 }
 0x5c7   : > { %2193 = vmatprep.subr.bf16.mxu0 %v1811_v22 }
 0x5c8   : > { %2070 = vmatpush1.bf16.msra.mxu1 %v1468_v17 }
 0x5c9   : > { %v1799_v33 = vpop.permute.xlu1 %1798  ;;  %7125 = vmatprep.subr.msk.bf16.mxu1 %vm7565_vm4, %v7563_v4 }
 0x5ca   : > { %v1810_v6 = vsel %vm441_vm15, %v1799_v33, %v1801_v59 }
 0x5cb   : > { %2194 = vmatpush1.bf16.msra.mxu0 %v1810_v6  ;;  %2072 = vmatmul.mubr.bf16.vlgmr.msra.gmra.mrb[16].mxu1 %v7369_v18 }
 0x5cc   : > { %2081 = vmatprep.mubr.bf16.mxu1 %v7373_v48  ;;  %7128 = vmatpush1.bf16.msk.msra.mxu1 %vm7565_vm4, %v7563_v4 }
 0x5cd   : > { %7131 = vmatprep.subr.msk.bf16.mxu0 %vm7565_vm4, %v7563_v4 }
 0x5ce   : > { %7017 = vmatmul.mubr.msk.bf16.vlgmr.msra.gmra.mrb[4].mxu0 %vm2026_vm10, %v7372_v44 }
 0x5cf   : > { %2227 = vmatprep.mubr.bf16.mxu0 %v10627_v19  ;;  %7134 = vmatpush1.bf16.msk.msra.mxu0 %vm7565_vm4, %v7563_v4 }
 0x5d3   : > { %2082 = vmatmul.mubr.bf16.gmra.mrb[20].mxu1 %v7375_v45 }
 0x5d4   : > { %2091 = vmatprep.mubr.bf16.mxu1 %v7377_v38 }
 0x5d6   : > { %7018 = vmatmul.mubr.msk.bf16.gmra.mrb[8].mxu0 %vm2026_vm10, %v7376_v57 }
 0x5d7   : > { %2237 = vmatprep.mubr.bf16.mxu0 %v10627_v19 }
 0x5db   : > { %2092 = vmatmul.mubr.bf16.gmra.mrb[24].mxu1 %v7379_v36 }
 0x5dc   : > { %2101 = vmatprep.mubr.bf16.mxu1 %v7381_v63 }
 0x5de   : > { %7019 = vmatmul.mubr.msk.bf16.gmra.mrb[12].mxu0 %vm2026_vm10, %v7380_v43 }
 0x5df   : > { %2247 = vmatprep.mubr.bf16.mxu0 %v10627_v19 }
 0x5e3   : > { %2102 = vmatmul.mubr.bf16.gmra.mrb[28].mxu1 %v7383_v41 }
 0x5e6   : > { %7020 = vmatmul.mubr.msk.bf16.gmra.mrb[16].mxu0 %vm2026_vm10, %v7384_v50 }
 0x69e   : > { %v2073_v2 = vpop.f32.mrb[16].mxu1 }
 0x69f   : > { %v2075_v30 = vpop.f32.mrb[17].mxu1 }
 0x6a0   : > { %v2077_v60 = vpop.f32.mrb[18].mxu1 }
 0x6a1   : > { %v2219_v31 = vpop.f32.mrb[4].mxu0  ;;  %v2079_v61 = vpop.f32.mrb[19].mxu1 }
 0x6a2   : > { %v7153_v1 = vadd.f32 %v2219_v31, %v2073_v2  ;;  %v2221_v46 = vpop.f32.mrb[5].mxu0 }
 0x6a3   : > { %v7154_v15 = vadd.f32 %v2221_v46, %v2075_v30  ;;  %v2223_v7 = vpop.f32.mrb[6].mxu0 }
 0x6a4   : > { %v2274_v0 = vmul.f32 0.01, %v7153_v1  ;;  %v7155_v52 = vadd.f32 %v2223_v7, %v2077_v60  ;;  %v2225_v14 = vpop.f32.mrb[7].mxu0  ;;  %vm2258_vm12 = vcmp.gt.f32.partialorder %v7153_v1, 0.0 }
 0x6a5   : > { %v2275_v11 = vmul.f32 0.01, %v7154_v15  ;;  %v7156_v47 = vadd.f32 %v2225_v14, %v2079_v61  ;;  %vm2259_vm13 = vcmp.gt.f32.partialorder %v7154_v15, 0.0 }
 0x6a6   : > { %vm2260_vm14 = vcmp.gt.f32.partialorder %v7155_v52, 0.0  ;;  %v2276_v28 = vmul.f32 0.01, %v7155_v52  ;;  %v2083_v54 = vpop.f32.mrb[20].mxu1  ;;  %v2290_v12 = vsel %vm2258_vm12, %v7153_v1, %v2274_v0 }
 0x6a7   : > { %vm2261_vm8 = vcmp.gt.f32.partialorder %v7156_v47, 0.0  ;;  %v2277_v5 = vmul.f32 0.01, %v7156_v47  ;;  %v2085_v25 = vpop.f32.mrb[21].mxu1  ;;  %v2291_v37 = vsel %vm2259_vm13, %v7154_v15, %v2275_v11 }
 0x6a8   : > { %v2292_v20 = vsel %vm2260_vm14, %v7155_v52, %v2276_v28  ;;  %v2087_v13 = vpop.f32.mrb[22].mxu1 }
 0x6a9   : > { %v8610_v16 = vpack.c.bf16 %v2292_v20, %v2290_v12  ;;  %v2293_v51 = vsel %vm2261_vm8, %v7156_v47, %v2277_v5  ;;  %v2229_v53 = vpop.f32.mrb[8].mxu0  ;;  %v2089_v58 = vpop.f32.mrb[23].mxu1 }
 0x6aa   : > { %v8612_v55 = vpack.c.bf16 %v2293_v51, %v2291_v37  ;;  %v7157_v24 = vadd.f32 %v2229_v53, %v2083_v54  ;;  %v2231_v56 = vpop.f32.mrb[9].mxu0 }
 0x6ab   : > { %v7158_v26 = vadd.f32 %v2231_v56, %v2085_v25  ;;  %v2233_v9 = vpop.f32.mrb[10].mxu0  ;;  %2432 = vrot.lane.b32.xlu0 %v8610_v16, %s7503_s21  ;;  %v2335_v27 = vmul.bf16 %v8610_v16, %v7681_v42  ;;  %v2491_v43 = vmul.bf16 %v8610_v16, %v7705_v49 }
 0x6ac   : > { %v2278_v34 = vmul.f32 0.01, %v7157_v24  ;;  %v7159_v59 = vadd.f32 %v2233_v9, %v2087_v13  ;;  %v2235_v21 = vpop.f32.mrb[11].mxu0  ;;  %2434 = vrot.lane.b32.xlu1 %v8612_v55, %s7503_s21  ;;  %vm2262_vm9 = vcmp.gt.f32.partialorder %v7157_v24, 0.0  ;;  %v2336_v22 = vmul.bf16 %v8612_v55, %v7674_v40 }
 0x6ad   : > { %v2279_v3 = vmul.f32 0.01, %v7158_v26  ;;  %v7160_v29 = vadd.f32 %v2235_v21, %v2089_v58  ;;  %vm2263_vm12 = vcmp.gt.f32.partialorder %v7158_v26, 0.0  ;;  %v2492_v30 = vmul.bf16 %v8612_v55, %v7672_v39 }
 0x6ae   : > { %vm2264_vm13 = vcmp.gt.f32.partialorder %v7159_v59, 0.0  ;;  %v2280_v23 = vmul.f32 0.01, %v7159_v59  ;;  %v2093_v17 = vpop.f32.mrb[24].mxu1  ;;  %v2294_v33 = vsel %vm2262_vm9, %v7157_v24, %v2278_v34 }
 0x6af   : > { %vm2265_vm14 = vcmp.gt.f32.partialorder %v7160_v29, 0.0  ;;  %v2281_v18 = vmul.f32 0.01, %v7160_v29  ;;  %v2095_v48 = vpop.f32.mrb[25].mxu1  ;;  %2360 = vrot.lane.b32.xlu0 %v2335_v27, %s7502_s20  ;;  %v2295_v45 = vsel %vm2263_vm12, %v7158_v26, %v2279_v3 }
 0x6b0   : > { %v2296_v6 = vsel %vm2264_vm13, %v7159_v59, %v2280_v23  ;;  %v2097_v44 = vpop.f32.mrb[26].mxu1  ;;  %2362 = vrot.lane.b32.xlu1 %v2336_v22, %s7502_s20 }
 0x6b1   : > { %v8624_v38 = vpack.c.bf16 %v2296_v6, %v2294_v33  ;;  %v2297_v57 = vsel %vm2265_vm14, %v7160_v29, %v2281_v18  ;;  %v2239_v36 = vpop.f32.mrb[12].mxu0  ;;  %v2099_v63 = vpop.f32.mrb[27].mxu1 }
 0x6b2   : > { %v8628_v41 = vpack.c.bf16 %v2297_v57, %v2295_v45  ;;  %v7161_v50 = vadd.f32 %v2239_v36, %v2093_v17  ;;  %v2241_v2 = vpop.f32.mrb[13].mxu0  ;;  %v2490_v36 = vmul.bf16 %v8302_v62, %v7658_v35 }
 0x6b3   : > { %v7162_v60 = vadd.f32 %v2241_v2, %v2095_v48  ;;  %v2243_v31 = vpop.f32.mrb[14].mxu0  ;;  %2516 = vrot.lane.b32.xlu0 %v2491_v43, %s7501_s19  ;;  %v2338_v24 = vmul.bf16 %v8624_v38, %v7681_v42 }
 0x6b4   : > { %v2282_v61 = vmul.f32 0.01, %v7161_v50  ;;  %v7163_v1 = vadd.f32 %v2243_v31, %v2097_v44  ;;  %v2245_v46 = vpop.f32.mrb[15].mxu0  ;;  %2518 = vrot.lane.b32.xlu1 %v2492_v30, %s7501_s19  ;;  %vm2266_vm8 = vcmp.gt.f32.partialorder %v7161_v50, 0.0  ;;  %v2339_v37 = vmul.bf16 %v8628_v41, %v7674_v40 }
 0x6b5   : > { %v2283_v15 = vmul.f32 0.01, %v7162_v60  ;;  %v7164_v7 = vadd.f32 %v2245_v46, %v2099_v63  ;;  %vm2267_vm9 = vcmp.gt.f32.partialorder %v7162_v60, 0.0  ;;  %v2494_v63 = vmul.bf16 %v8624_v38, %v7705_v49  ;;  %v10629_v46 = vld [vmem:[#allocation18_spill] sm:$0xff] }
 0x6b6   : > { %vm2268_vm12 = vcmp.gt.f32.partialorder %v7163_v1, 0.0  ;;  %v2284_v0 = vmul.f32 0.01, %v7163_v1  ;;  %v2103_v52 = vpop.f32.mrb[28].mxu1  ;;  %v2298_v47 = vsel %vm2266_vm8, %v7161_v50, %v2282_v61  ;;  %v2495_v43 = vmul.bf16 %v8628_v41, %v7672_v39  ;;  %v10628_v61 = vld [vmem:[#allocation8_spill] sm:$0xff] }
 0x6b7   : > { %vm2269_vm13 = vcmp.gt.f32.partialorder %v7164_v7, 0.0  ;;  %v2285_v14 = vmul.f32 0.01, %v7164_v7  ;;  %v2105_v11 = vpop.f32.mrb[29].mxu1  ;;  %2440 = vrot.lane.b32.xlu0 %v8628_v41, %s7503_s21  ;;  %v2299_v5 = vsel %vm2267_vm9, %v7162_v60, %v2283_v15  ;;  %v2493_v50 = vmul.bf16 %v8316_v32, %v7658_v35 }
 0x6b8   : > { %v2300_v28 = vsel %vm2268_vm12, %v7163_v1, %v2284_v0  ;;  %v2107_v54 = vpop.f32.mrb[30].mxu1  ;;  %2438 = vrot.lane.b32.xlu1 %v8624_v38, %s7503_s21  ;;  %v2496_v60 = vmul.bf16 %v8318_v10, %v7658_v35  ;;  %v2575_v1 = vmul.bf16 %v8610_v16, %v10628_v61  ;;  %v2499_v15 = vmul.bf16 %v10629_v46, %v7658_v35 }
 0x6b9   : > { %v8638_v25 = vpack.c.bf16 %v2300_v28, %v2298_v47  ;;  %v2301_v12 = vsel %vm2269_vm13, %v7164_v7, %v2285_v14  ;;  %v2249_v20 = vpop.f32.mrb[16].mxu0  ;;  %v2109_v13 = vpop.f32.mrb[31].mxu1  ;;  %v10630_v7 = vld [vmem:[#allocation7_spill] sm:$0xff]  ;;  %v2578_v47 = vmul.bf16 %v8624_v38, %v10628_v61 }
 0x6ba   : > { %v8642_v51 = vpack.c.bf16 %v2301_v12, %v2299_v5  ;;  %v7165_v53 = vadd.f32 %v2249_v20, %v2103_v52  ;;  %v2251_v58 = vpop.f32.mrb[17].mxu0  ;;  %v2574_v0 = vmul.bf16 %v8302_v62, %v10630_v7  ;;  %v10631_v52 = vld [vmem:[#allocation6_spill] sm:$0xff]  ;;  %v2577_v28 = vmul.bf16 %v8316_v32, %v10630_v7  ;;  %v7387_v12 = vld [vmem:[%s10573_s4 + $0x4] ss:$20 sps:$4 sm:$0xff]  }
 0x6bb   : > { %v7166_v56 = vadd.f32 %v2251_v58, %v2105_v11  ;;  %v2253_v26 = vpop.f32.mrb[18].mxu0  ;;  %2368 = vrot.lane.b32.xlu0 %v2339_v37, %s7502_s20  ;;  %v2341_v33 = vmul.bf16 %v8638_v25, %v7681_v42  ;;  %v2497_v2 = vmul.bf16 %v8638_v25, %v7705_v49  ;;  %v2576_v14 = vmul.bf16 %v8612_v55, %v10631_v52  ;;  %v8740_v58 = vld [vmem:[#allocation3 + $0x18] sm:$0xff] }
 0x6bc   : > { %v2286_v9 = vmul.f32 0.01, %v7165_v53  ;;  %v7167_v34 = vadd.f32 %v2253_v26, %v2107_v54  ;;  %v2255_v59 = vpop.f32.mrb[19].mxu0  ;;  %2366 = vrot.lane.b32.xlu1 %v2338_v24, %s7502_s20  ;;  %vm2270_vm14 = vcmp.gt.f32.partialorder %v7165_v53, 0.0  ;;  %v2342_v44 = vmul.bf16 %v8642_v51, %v7674_v40  ;;  %3252 = vmatprep.mubr.bf16.mxu1 %v7387_v12  ;;  %v10633_v24 = vld [vmem:[#allocation9_spill] sm:$0xff]  ;;  %v10634_v26 = vld [vmem:[#allocation10_spill] sm:$0xff] }
 0x6bd   : > { %v2287_v21 = vmul.f32 0.01, %v7166_v56  ;;  %v7168_v3 = vadd.f32 %v2255_v59, %v2109_v13  ;;  %vm2271_vm8 = vcmp.gt.f32.partialorder %v7166_v56, 0.0  ;;  %v2498_v30 = vmul.bf16 %v8642_v51, %v7672_v39  ;;  %v10632_v13 = vld [vmem:[#allocation13_spill] sm:$0xff]  ;;  %v8753_v59 = vld [vmem:[#allocation3 + $0x38] sm:$0xff] }
 0x6be   : > { %vm2272_vm9 = vcmp.gt.f32.partialorder %v7167_v34, 0.0  ;;  %v2288_v29 = vmul.f32 0.01, %v7167_v34  ;;  %v2302_v23 = vsel %vm2270_vm14, %v7165_v53, %v2286_v9  ;;  %v2579_v11 = vmul.bf16 %v8628_v41, %v10631_v52 }
 0x6bf   : > { %vm2273_vm12 = vcmp.gt.f32.partialorder %v7168_v3, 0.0  ;;  %v2289_v27 = vmul.f32 0.01, %v7168_v3  ;;  %2444 = vrot.lane.b32.xlu0 %v8638_v25, %s7503_s21  ;;  %v2303_v22 = vsel %vm2271_vm8, %v7166_v56, %v2287_v21  ;;  %v2581_v54 = vmul.bf16 %v8638_v25, %v10628_v61 }
 0x6c0   : > { %v2304_v17 = vsel %vm2272_vm9, %v7167_v34, %v2288_v29  ;;  %2446 = vrot.lane.b32.xlu1 %v8642_v51, %s7503_s21  ;;  %v2582_v5 = vmul.bf16 %v8642_v51, %v10631_v52  ;;  %v2580_v32 = vmul.bf16 %v8318_v10, %v10630_v7  ;;  %v2675_v37 = vmul.bf16 %v8612_v55, %v10632_v13  ;;  %v8762_v29 = vld [vmem:[#allocation3 + $0x58] sm:$0xff] }
 0x6c1   : > { %v8652_v18 = vpack.c.bf16 %v2304_v17, %v2302_v23  ;;  %v2305_v48 = vsel %vm2273_vm12, %v7168_v3, %v2289_v27  ;;  %v2583_v53 = vmul.bf16 %v10629_v46, %v10630_v7  ;;  %v2676_v56 = vmul.bf16 %v8740_v58, %v10633_v24  ;;  %v2359_v17 = vpop.permute.xlu0 %2358 }
 0x6c2   : > { %v8656_v6 = vpack.c.bf16 %v2305_v48, %v2303_v22  ;;  %v2674_v9 = vmul.bf16 %v8610_v16, %v10634_v26  ;;  %v2678_v34 = vmul.bf16 %v8628_v41, %v10632_v13  ;;  %v2679_v21 = vmul.bf16 %v8753_v59, %v10633_v24  ;;  %v2365_v22 = vpop.permute.xlu1 %2364 }
 0x6c3   : > { %2372 = vrot.lane.b32.xlu0 %v2341_v33, %s7502_s20  ;;  %v2344_v57 = vmul.bf16 %v8652_v18, %v7681_v42  ;;  %v2500_v31 = vmul.bf16 %v8652_v18, %v7705_v49  ;;  %v2584_v20 = vmul.bf16 %v8652_v18, %v10628_v61  ;;  %v2677_v3 = vmul.bf16 %v8624_v38, %v10634_v26 }
 0x6c4   : > { %2374 = vrot.lane.b32.xlu1 %v2342_v44, %s7502_s20  ;;  %v2345_v45 = vmul.bf16 %v8656_v6, %v7674_v40  ;;  %v2501_v62 = vmul.bf16 %v8656_v6, %v7672_v39  ;;  %v2585_v10 = vmul.bf16 %v8656_v6, %v10631_v52  ;;  %v2681_v27 = vmul.bf16 %v8642_v51, %v10632_v13  ;;  %v8775_v44 = vld [vmem:[#allocation3 + $0x78] sm:$0xff] }
 0x6c5   : > { %v2682_v23 = vmul.bf16 %v8762_v29, %v10633_v24  ;;  %v2680_v48 = vmul.bf16 %v8638_v25, %v10634_v26  ;;  %v2683_v33 = vmul.bf16 %v8652_v18, %v10634_v26 }
 0x6c7   : > { %2452 = vrot.lane.b32.xlu0 %v8656_v6, %s7503_s21 }
 0x6c8   : > { %2450 = vrot.lane.b32.xlu1 %v8652_v18, %s7503_s21 }
 0x6cb   : > { %2380 = vrot.lane.b32.xlu0 %v2345_v45, %s7502_s20  ;;  %v8779_v45 = vpop.permute.xlu0 %2370 }
 0x6cc   : > { %2378 = vrot.lane.b32.xlu1 %v2344_v57, %s7502_s20  ;;  %v2685_v57 = vmul.bf16 %v8775_v44, %v10633_v24 }
 0x6cf   : > { %2514 = vrot.lane.b32.xlu0 %v2490_v36, %s7501_s19  ;;  %v8783_v36 = vpop.permute.xlu1 %2376 }
 0x6d0   : > { %2522 = vrot.lane.b32.xlu1 %v2494_v63, %s7501_s19  ;;  %v10635_v63 = vld [vmem:[#allocation11_spill] sm:$0xff] }
 0x6d3   : > { %2524 = vrot.lane.b32.xlu0 %v2495_v43, %s7501_s19  ;;  %v2760_v43 = vmul.bf16 %v8740_v58, %v10635_v63 }
 0x6d4   : > { %2520 = vrot.lane.b32.xlu1 %v2493_v50, %s7501_s19  ;;  %v10636_v50 = vld [vmem:[#allocation14_spill] sm:$0xff] }
 0x6d7   : > { %2528 = vrot.lane.b32.xlu0 %v2497_v2, %s7501_s19  ;;  %v2759_v2 = vmul.bf16 %v8612_v55, %v10636_v50 }
 0x6d8   : > { %2530 = vrot.lane.b32.xlu1 %v2498_v30, %s7501_s19  ;;  %v8791_v30 = vpop.permute.xlu0 %2430 }
 0x6db   : > { %2526 = vrot.lane.b32.xlu0 %v2496_v60, %s7501_s19  ;;  %v2762_v60 = vmul.bf16 %v8628_v41, %v10636_v50 }
 0x6dc   : > { %2534 = vrot.lane.b32.xlu1 %v2500_v31, %s7501_s19  ;;  %v8795_v31 = vpop.permute.xlu1 %2436 }
 0x6df   : > { %2600 = vrot.lane.b32.xlu0 %v2575_v1, %s7500_s18  ;;  %v10637_v1 = vld [vmem:[#allocation12_spill] sm:$0xff] }
 0x6e0   : > { %2532 = vrot.lane.b32.xlu1 %v2499_v15, %s7501_s19  ;;  %v2758_v46 = vmul.bf16 %v8610_v16, %v10637_v1  ;;  %v2761_v15 = vmul.bf16 %v8624_v38, %v10637_v1 }
 0x6e3   : > { %2598 = vrot.lane.b32.xlu0 %v2574_v0, %s7500_s18  ;;  %v8804_v0 = vpop.permute.xlu0 %2442 }
 0x6e4   : > { %2602 = vrot.lane.b32.xlu1 %v2576_v14, %s7500_s18  ;;  %v8807_v14 = vpop.permute.xlu1 %2448 }
 0x6e7   : > { %2608 = vrot.lane.b32.xlu0 %v2579_v11, %s7500_s18  ;;  %v2763_v11 = vmul.bf16 %v8753_v59, %v10635_v63 }
 0x6e8   : > { %2606 = vrot.lane.b32.xlu1 %v2578_v47, %s7500_s18  ;;  %v2684_v47 = vmul.bf16 %v8656_v6, %v10632_v13 }
 0x6eb   : > { %2536 = vrot.lane.b32.xlu0 %v2501_v62, %s7501_s19 }
 0x6ec   : > { %2604 = vrot.lane.b32.xlu1 %v2577_v28, %s7500_s18  ;;  %v2765_v28 = vmul.bf16 %v8642_v51, %v10636_v50 }
 0x6ef   : > { %2612 = vrot.lane.b32.xlu0 %v2581_v54, %s7500_s18 }
 0x6f0   : > { %2614 = vrot.lane.b32.xlu1 %v2582_v5, %s7500_s18  ;;  %v2766_v5 = vmul.bf16 %v8762_v29, %v10635_v63 }
 0x6f3   : > { %2610 = vrot.lane.b32.xlu0 %v2580_v32, %s7500_s18  ;;  %v2764_v32 = vmul.bf16 %v8638_v25, %v10637_v1 }
 0x6f4   : > { %2618 = vrot.lane.b32.xlu1 %v2584_v20, %s7500_s18 }
 0x6f7   : > { %2700 = vrot.lane.b32.xlu0 %v2675_v37, %s7499_s17  ;;  %v2767_v37 = vmul.bf16 %v8652_v18, %v10637_v1 }
 0x6f8   : > { %2616 = vrot.lane.b32.xlu1 %v2583_v53, %s7500_s18 }
 0x6fb   : > { %2620 = vrot.lane.b32.xlu0 %v2585_v10, %s7500_s18 }
 0x6fc   : > { %2702 = vrot.lane.b32.xlu1 %v2676_v56, %s7499_s17 }
 0x6ff   : > { %2698 = vrot.lane.b32.xlu0 %v2674_v9, %s7499_s17  ;;  %v2769_v9 = vmul.bf16 %v8775_v44, %v10635_v63 }
 0x700   : > { %2706 = vrot.lane.b32.xlu1 %v2678_v34, %s7499_s17 }
 0x703   : > { %2708 = vrot.lane.b32.xlu0 %v2679_v21, %s7499_s17 }
 0x704   : > { %2704 = vrot.lane.b32.xlu1 %v2677_v3, %s7499_s17 }
 0x707   : > { %2712 = vrot.lane.b32.xlu0 %v2681_v27, %s7499_s17  ;;  %v2768_v27 = vmul.bf16 %v8656_v6, %v10636_v50 }
 0x708   : > { %2714 = vrot.lane.b32.xlu1 %v2682_v23, %s7499_s17 }
 0x70b   : > { %2710 = vrot.lane.b32.xlu0 %v2680_v48, %s7499_s17 }
 0x70c   : > { %2716 = vrot.lane.b32.xlu1 %v2683_v33, %s7499_s17 }
 0x70f   : > { %2720 = vrot.lane.b32.xlu0 %v2685_v57, %s7499_s17 }
 0x710   : > { %2786 = vrot.lane.b32.xlu1 %v2760_v43, %s7497_s15 }
 0x713   : > { %2784 = vrot.lane.b32.xlu0 %v2759_v2, %s7497_s15 }
 0x714   : > { %2790 = vrot.lane.b32.xlu1 %v2762_v60, %s7497_s15 }
 0x717   : > { %2782 = vrot.lane.b32.xlu0 %v2758_v46, %s7497_s15 }
 0x718   : > { %2788 = vrot.lane.b32.xlu1 %v2761_v15, %s7497_s15 }
 0x71b   : > { %2792 = vrot.lane.b32.xlu0 %v2763_v11, %s7497_s15 }
 0x71c   : > { %2718 = vrot.lane.b32.xlu1 %v2684_v47, %s7499_s17 }
 0x71d   : > { %v8815_v62 = vpop.permute.xlu0 %2432 }
 0x71e   : > { %v2435_v54 = vpop.permute.xlu1 %2434 }
 0x71f   : > { %2796 = vrot.lane.b32.xlu0 %v2765_v28, %s7497_s15 }
 0x720   : > { %2798 = vrot.lane.b32.xlu1 %v2766_v5, %s7497_s15 }
 0x721   : > { %v2361_v12 = vpop.permute.xlu0 %2360 }
 0x722   : > { %v2363_v20 = vpop.permute.xlu1 %2362  ;;  %v2382_v10 = vsel %vm339_vm11, %v2359_v17, %v2361_v12 }
 0x723   : > { %2794 = vrot.lane.b32.xlu0 %v2764_v32, %s7497_s15  ;;  %v2383_v53 = vsel %vm339_vm11, %v2361_v12, %v2363_v20  ;;  %v2455_v32 = vsel %vm477_vm6, %v8815_v62, %v2435_v54  ;;  %v10638_v20 = vld [vmem:[#allocation17_spill] sm:$0xff] }
 0x724   : > { %2800 = vrot.lane.b32.xlu1 %v2767_v37, %s7497_s15  ;;  %3222 = vmatprep.subr.bf16.mxu1 %v2383_v53  ;;  %v2915_v37 = vmul.bf16 %v8612_v55, %v10638_v20 }
 0x725   : > { %v8831_v56 = vpop.permute.xlu0 %2516  ;;  %3223 = vmatpush1.bf16.msra.mxu1 %v2382_v10  ;;  %v10639_v10 = vld [vmem:[#allocation15_spill] sm:$0xff] }
 0x726   : > { %v8835_v34 = vpop.permute.xlu1 %2518 }
 0x727   : > { %2804 = vrot.lane.b32.xlu0 %v2769_v9, %s7497_s15  ;;  %v2916_v9 = vmul.bf16 %v8740_v58, %v10639_v10 }
 0x728   : > { %2858 = vrot.lane.b32.xlu1 %v8740_v58, %s7504_s24  ;;  %v2918_v58 = vmul.bf16 %v8628_v41, %v10638_v20 }
 0x729   : > { %v2441_v21 = vpop.permute.xlu0 %2440 }
 0x72a   : > { %v2439_v3 = vpop.permute.xlu1 %2438 }
 0x72b   : > { %2856 = vrot.lane.b32.xlu0 %v8612_v55, %s7504_s24  ;;  %v2457_v54 = vsel %vm477_vm6, %v2439_v3, %v2441_v21  ;;  %v2919_v21 = vmul.bf16 %v8753_v59, %v10639_v10 }
 0x72c   : > { %2802 = vrot.lane.b32.xlu1 %v2768_v27, %s7497_s15 }
 0x72d   : > { %v2369_v23 = vpop.permute.xlu0 %2368 }
 0x72e   : > { %v2367_v17 = vpop.permute.xlu1 %2366 }
 0x72f   : > { %2854 = vrot.lane.b32.xlu0 %v8610_v16, %s7504_s24  ;;  %v2385_v48 = vsel %vm339_vm11, %v2367_v17, %v2369_v23  ;;  %v2384_v33 = vsel %vm339_vm11, %v2365_v22, %v2367_v17  ;;  %v10640_v23 = vld [vmem:[#allocation16_spill] sm:$0xff] }
 0x730   : > { %2862 = vrot.lane.b32.xlu1 %v8628_v41, %s7504_s24  ;;  %3224 = vmatprep.subr.bf16.mxu1 %v2385_v48  ;;  %v2914_v17 = vmul.bf16 %v8610_v16, %v10640_v23 }
 0x731   : > { %v2445_v57 = vpop.permute.xlu0 %2444  ;;  %3225 = vmatpush1.bf16.msra.mxu1 %v2384_v33  ;;  %v2456_v33 = vsel %vm477_vm6, %v8795_v31, %v2439_v3 }
 0x732   : > { %v2447_v43 = vpop.permute.xlu1 %2446 }
 0x733   : > { %2864 = vrot.lane.b32.xlu0 %v8753_v59, %s7504_s24 }
 0x734   : > { %2860 = vrot.lane.b32.xlu1 %v8624_v38, %s7504_s24 }
 0x735   : > { %v2373_v2 = vpop.permute.xlu0 %2372 }
 0x736   : > { %v2375_v60 = vpop.permute.xlu1 %2374  ;;  %v2386_v46 = vsel %vm339_vm11, %v8779_v45, %v2373_v2 }
 0x737   : > { %2868 = vrot.lane.b32.xlu0 %v8642_v51, %s7504_s24  ;;  %v2387_v22 = vsel %vm339_vm11, %v2373_v2, %v2375_v60  ;;  %v2917_v60 = vmul.bf16 %v8624_v38, %v10640_v23 }
 0x738   : > { %2870 = vrot.lane.b32.xlu1 %v8762_v29, %s7504_s24  ;;  %3226 = vmatprep.subr.bf16.mxu1 %v2387_v22  ;;  %v2458_v22 = vsel %vm477_vm6, %v8804_v0, %v2445_v57 }
 0x739   : > { %v2453_v15 = vpop.permute.xlu0 %2452  ;;  %3227 = vmatpush1.bf16.msra.mxu1 %v2386_v46  ;;  %v2922_v46 = vmul.bf16 %v8762_v29, %v10639_v10  ;;  %v2924_v29 = vmul.bf16 %v8656_v6, %v10638_v20 }
 0x73a   : > { %v2451_v11 = vpop.permute.xlu1 %2450 }
 0x73b   : > { %2866 = vrot.lane.b32.xlu0 %v8638_v25, %s7504_s24  ;;  %v2461_v3 = vsel %vm477_vm6, %v2451_v11, %v2453_v15  ;;  %v2920_v15 = vmul.bf16 %v8638_v25, %v10640_v23 }
 0x73c   : > { %2874 = vrot.lane.b32.xlu1 %v8656_v6, %s7504_s24 }
 0x73d   : > { %v2381_v47 = vpop.permute.xlu0 %2380 }
 0x73e   : > { %v2379_v28 = vpop.permute.xlu1 %2378 }
 0x73f   : > { %2876 = vrot.lane.b32.xlu0 %v8775_v44, %s7504_s24  ;;  %v2389_v5 = vsel %vm339_vm11, %v2379_v28, %v2381_v47  ;;  %v2388_v12 = vsel %vm339_vm11, %v8783_v36, %v2379_v28  ;;  %v2454_v36 = vsel %vm477_vm6, %v8791_v30, %v8815_v62  ;;  %v2459_v62 = vsel %vm477_vm6, %v2445_v57, %v2447_v43 }
 0x740   : > { %2872 = vrot.lane.b32.xlu1 %v8652_v18, %s7504_s24  ;;  %3228 = vmatprep.subr.bf16.mxu1 %v2389_v5  ;;  %v2921_v43 = vmul.bf16 %v8642_v51, %v10638_v20  ;;  %v2460_v47 = vsel %vm477_vm6, %v8807_v14, %v2451_v11  ;;  %v2539_v57 = vsel %vm510_vm3, %v8831_v56, %v8835_v34 }
 0x741   : > { %v2515_v45 = vpop.permute.xlu0 %2514  ;;  %3229 = vmatpush1.bf16.msra.mxu1 %v2388_v12  ;;  %v2925_v34 = vmul.bf16 %v8775_v44, %v10639_v10  ;;  %v10641_v44 = vld [vmem:[#allocation5_spill] sm:$0xff] }
 0x742   : > { %3230 = vmatprep.subr.bf16.mxu1 %v2455_v32  ;;  %v2523_v53 = vpop.permute.xlu1 %2522  ;;  %v2538_v5 = vsel %vm510_vm3, %v2515_v45, %v8831_v56  ;;  %v2923_v32 = vmul.bf16 %v8652_v18, %v10640_v23 }
 0x743   : > { %2940 = vrot.lane.b32.xlu0 %v2915_v37, %s7498_s16  ;;  %v8927_v37 = vld [vmem:[#allocation2] sm:$0xff] }
 0x744   : > { %2942 = vrot.lane.b32.xlu1 %v2916_v9, %s7498_s16  ;;  %v8930_v9 = vld [vmem:[#allocation2 + $0x20] sm:$0xff] }
 0x745   : > { %v2525_v27 = vpop.permute.xlu0 %2524  ;;  %3231 = vmatpush1.bf16.msra.mxu1 %v2454_v36 }
 0x746   : > { %3232 = vmatprep.subr.bf16.mxu1 %v2457_v54  ;;  %v2521_v48 = vpop.permute.xlu1 %2520  ;;  %v2541_v11 = vsel %vm510_vm3, %v2523_v53, %v2525_v27  ;;  %v3467_v27 = vmul.bf16 %v8927_v37, %v10641_v44 }
 0x747   : > { %2938 = vrot.lane.b32.xlu0 %v2914_v17, %s7498_s16  ;;  %v2540_v56 = vsel %vm510_vm3, %v2521_v48, %v2523_v53  ;;  %v3470_v17 = vmul.bf16 %v8930_v9, %v10641_v44 }
 0x748   : > { %2946 = vrot.lane.b32.xlu1 %v2918_v58, %s7498_s16  ;;  %v8939_v58 = vld [vmem:[#allocation2 + $0x40] sm:$0xff] }
 0x749   : > { %v2529_v30 = vpop.permute.xlu0 %2528  ;;  %3233 = vmatpush1.bf16.msra.mxu1 %v2456_v33  ;;  %v8942_v33 = vld [vmem:[#allocation2 + $0x60] sm:$0xff] }
 0x74a   : > { %3234 = vmatprep.subr.bf16.mxu1 %v2459_v62  ;;  %v2531_v2 = vpop.permute.xlu1 %2530  ;;  %v3473_v62 = vmul.bf16 %v8939_v58, %v10641_v44 }
 0x74b   : > { %2948 = vrot.lane.b32.xlu0 %v2919_v21, %s7498_s16  ;;  %v2543_v36 = vsel %vm510_vm3, %v2529_v30, %v2531_v2 }
 0x74c   : > { %2944 = vrot.lane.b32.xlu1 %v2917_v60, %s7498_s16  ;;  %v3476_v60 = vmul.bf16 %v8942_v33, %v10641_v44 }
 0x74d   : > { %v2527_v31 = vpop.permute.xlu0 %2526  ;;  %3235 = vmatpush1.bf16.msra.mxu1 %v2458_v22 }
 0x74e   : > { %3236 = vmatprep.subr.bf16.mxu1 %v2461_v3  ;;  %v2535_v59 = vpop.permute.xlu1 %2534  ;;  %v2542_v53 = vsel %vm510_vm3, %v2527_v31, %v2529_v30 }
 0x74f   : > { %2952 = vrot.lane.b32.xlu0 %v2921_v43, %s7498_s16 }
 0x750   : > { %2954 = vrot.lane.b32.xlu1 %v2922_v46, %s7498_s16 }
 0x751   : > { %v2601_v0 = vpop.permute.xlu0 %2600  ;;  %3237 = vmatpush1.bf16.msra.mxu1 %v2460_v47 }
 0x752   : > { %3238 = vmatprep.subr.bf16.mxu1 %v2539_v57  ;;  %v2533_v28 = vpop.permute.xlu1 %2532 }
 0x753   : > { %2950 = vrot.lane.b32.xlu0 %v2920_v15, %s7498_s16  ;;  %v2544_v22 = vsel %vm510_vm3, %v2533_v28, %v2535_v59 }
 0x754   : > { %2958 = vrot.lane.b32.xlu1 %v2924_v29, %s7498_s16 }
 0x755   : > { %v2599_v14 = vpop.permute.xlu0 %2598  ;;  %3239 = vmatpush1.bf16.msra.mxu1 %v2538_v5  ;;  %v7385_v5 = vld [vmem:[%s10573_s4] ss:$20 sps:$4 sm:$0xff]  }
 0x756   : > { %3240 = vmatprep.subr.bf16.mxu1 %v2541_v11  ;;  %v2603_v12 = vpop.permute.xlu1 %2602  ;;  %v2622_v43 = vsel %vm541_vm2, %v2599_v14, %v2601_v0  ;;  %v7388_v11 = vld [vmem:[%s10573_s4 + $0x2c] ss:$20 sps:$4 sm:$0xff]  }
 0x757   : > { %2960 = vrot.lane.b32.xlu0 %v2925_v34, %s7498_s16  ;;  %v2623_v31 = vsel %vm541_vm2, %v2601_v0, %v2603_v12 }
 0x758   : > { %2956 = vrot.lane.b32.xlu1 %v2923_v32, %s7498_s16 }
 0x759   : > { %v2609_v45 = vpop.permute.xlu0 %2608  ;;  %3241 = vmatpush1.bf16.msra.mxu1 %v2540_v56 }
 0x75a   : > { %3242 = vmatprep.subr.bf16.mxu1 %v2543_v36  ;;  %v2607_v54 = vpop.permute.xlu1 %2606  ;;  %v7390_v36 = vld [vmem:[%s10573_s4 + $0x28] ss:$20 sps:$4 sm:$0xff]  }
 0x75b   : > { %3491 = vrot.lane.b32.xlu0 %v3467_v27, %s7502_s20 }
 0x75c   : > { %3497 = vrot.lane.b32.xlu1 %v3470_v17, %s7502_s20 }
 0x75d   : > { %v2537_v48 = vpop.permute.xlu0 %2536  ;;  %3243 = vmatpush1.bf16.msra.mxu1 %v2542_v53 }
 0x75e   : > { %v2605_v21 = vpop.permute.xlu1 %2604  ;;  %v2545_v2 = vsel %vm510_vm3, %v2535_v59, %v2537_v48  ;;  %v2625_v59 = vsel %vm541_vm2, %v2607_v54, %v2609_v45  ;;  %v7393_v48 = vld [vmem:[%s10573_s4 + $0x50] ss:$20 sps:$4 sm:$0xff]  }
 0x75f   : > { %3503 = vrot.lane.b32.xlu0 %v3473_v62, %s7502_s20  ;;  %3244 = vmatprep.subr.bf16.mxu1 %v2545_v2  ;;  %v2624_v57 = vsel %vm541_vm2, %v2605_v21, %v2607_v54  ;;  %v7391_v54 = vld [vmem:[%s10573_s4 + $0x54] ss:$20 sps:$4 sm:$0xff]  }
 0x760   : > { %3509 = vrot.lane.b32.xlu1 %v3476_v60, %s7502_s20 }
 0x761   : > { %v2613_v30 = vpop.permute.xlu0 %2612  ;;  %3245 = vmatpush1.bf16.msra.mxu1 %v2544_v22  ;;  %v7399_v22 = vld [vmem:[%s10573_s4 + $0xc] ss:$20 sps:$4 sm:$0xff]  }
 0x762   : > { %3246 = vmatprep.subr.bf16.mxu1 %v2623_v31  ;;  %v2615_v3 = vpop.permute.xlu1 %2614 }
 0x763   : > { %3563 = vrot.lane.b32.xlu0 %v8927_v37, %s7503_s21  ;;  %v2627_v0 = vsel %vm541_vm2, %v2613_v30, %v2615_v3 }
 0x764   : > { %3569 = vrot.lane.b32.xlu1 %v8930_v9, %s7503_s21 }
 0x765   : > { %v2611_v46 = vpop.permute.xlu0 %2610  ;;  %3247 = vmatpush1.bf16.msra.mxu1 %v2622_v43 }
 0x766   : > { %3248 = vmatprep.subr.bf16.mxu1 %v2625_v59  ;;  %v2619_v47 = vpop.permute.xlu1 %2618  ;;  %v2626_v29 = vsel %vm541_vm2, %v2611_v46, %v2613_v30 }
 0x767   : > { %3575 = vrot.lane.b32.xlu0 %v8939_v58, %s7503_s21 }
 0x768   : > { %3581 = vrot.lane.b32.xlu1 %v8942_v33, %s7503_s21 }
 0x769   : > { %v2701_v15 = vpop.permute.xlu0 %2700  ;;  %3249 = vmatpush1.bf16.msra.mxu1 %v2624_v57 }
 0x76a   : > { %3250 = vmatprep.subr.bf16.mxu1 %v2627_v0  ;;  %v2617_v28 = vpop.permute.xlu1 %2616 }
 0x76b   : > { %v2628_v32 = vsel %vm541_vm2, %v2617_v28, %v2619_v47 }
 0x76d   : > { %v2621_v14 = vpop.permute.xlu0 %2620  ;;  %3251 = vmatpush1.bf16.msra.mxu1 %v2626_v29 }
 0x76e   : > { %v2703_v34 = vpop.permute.xlu1 %2702  ;;  %v2629_v12 = vsel %vm541_vm2, %v2619_v47, %v2621_v14 }
 0x76f   : > { %3293 = vmatprep.subr.bf16.mxu1 %v2629_v12 }
 0x770   : > { %3253 = vmatmul.mubr.bf16.vlgmr.msra.gmra.mrb[32].mxu1 %v7385_v5 }
 0x771   : > { %v2699_v56 = vpop.permute.xlu0 %2698  ;;  %3294 = vmatpush1.bf16.msra.mxu1 %v2628_v32  ;;  %3262 = vmatprep.mubr.bf16.mxu1 %v7388_v11 }
 0x772   : > { %3295 = vmatprep.subr.bf16.mxu1 %v8612_v55  ;;  %v2707_v45 = vpop.permute.xlu1 %2706  ;;  %v2722_v2 = vsel %vm524_vm1, %v2699_v56, %v2701_v15 }
 0x775   : > { %v2709_v27 = vpop.permute.xlu0 %2708  ;;  %3296 = vmatpush1.bf16.msra.mxu1 %v8610_v16 }
 0x776   : > { %3297 = vmatprep.subr.bf16.mxu1 %v8628_v41  ;;  %v2705_v17 = vpop.permute.xlu1 %2704  ;;  %v7394_v41 = vld [vmem:[%s10573_s4 + $0x7c] ss:$20 sps:$4 sm:$0xff]  }
 0x777   : > { %v2724_v30 = vsel %vm524_vm1, %v2705_v17, %v2707_v45 }
 0x778   : > { %3263 = vmatmul.mubr.bf16.gmra.mrb[36].mxu1 %v7390_v36 }
 0x779   : > { %v2713_v53 = vpop.permute.xlu0 %2712  ;;  %3298 = vmatpush1.bf16.msra.mxu1 %v8624_v38  ;;  %3272 = vmatprep.mubr.bf16.mxu1 %v7391_v54 }
 0x77a   : > { %3299 = vmatprep.subr.bf16.mxu1 %v8642_v51  ;;  %v2715_v55 = vpop.permute.xlu1 %2714  ;;  %v2723_v51 = vsel %vm524_vm1, %v2701_v15, %v2703_v34 }
 0x77b   : > { %v2727_v3 = vsel %vm524_vm1, %v2713_v53, %v2715_v55 }
 0x77d   : > { %v2711_v16 = vpop.permute.xlu0 %2710  ;;  %3300 = vmatpush1.bf16.msra.mxu1 %v8638_v25  ;;  %v7396_v25 = vld [vmem:[%s10573_s4 + $0x78] ss:$20 sps:$4 sm:$0xff]  }
 0x77e   : > { %3301 = vmatprep.subr.bf16.mxu1 %v8656_v6  ;;  %v2717_v62 = vpop.permute.xlu1 %2716  ;;  %v2725_v6 = vsel %vm524_vm1, %v2707_v45, %v2709_v27  ;;  %v2726_v46 = vsel %vm524_vm1, %v2711_v16, %v2713_v53 }
 0x780   : > { %3273 = vmatmul.mubr.bf16.gmra.mrb[40].mxu1 %v7393_v48 }
 0x781   : > { %v2721_v38 = vpop.permute.xlu0 %2720  ;;  %3302 = vmatpush1.bf16.msra.mxu1 %v8652_v18  ;;  %3282 = vmatprep.mubr.bf16.mxu1 %v7394_v41 }
 0x782   : > { %3303 = vmatprep.subr.bf16.mxu1 %v2723_v51  ;;  %v2787_v21 = vpop.permute.xlu1 %2786 }
 0x785   : > { %v2785_v60 = vpop.permute.xlu0 %2784  ;;  %3304 = vmatpush1.bf16.msra.mxu1 %v2722_v2 }
 0x786   : > { %3305 = vmatprep.subr.bf16.mxu1 %v2725_v6  ;;  %v2791_v18 = vpop.permute.xlu1 %2790  ;;  %v2807_v28 = vsel %vm493_vm0, %v2785_v60, %v2787_v21 }
 0x788   : > { %3283 = vmatmul.mubr.bf16.gmra.mrb[44].mxu1 %v7396_v25 }
 0x789   : > { %v2783_v31 = vpop.permute.xlu0 %2782  ;;  %3306 = vmatpush1.bf16.msra.mxu1 %v2724_v30  ;;  %3325 = vmatprep.mubr.bf16.mxu1 %v7399_v22  ;;  %v7397_v30 = vld [vmem:[%s10573_s4 + $0x8] ss:$20 sps:$4 sm:$0xff]  }
 0x78a   : > { %3307 = vmatprep.subr.bf16.mxu1 %v2727_v3  ;;  %v2789_v43 = vpop.permute.xlu1 %2788  ;;  %v2806_v5 = vsel %vm493_vm0, %v2783_v31, %v2785_v60  ;;  %v7400_v31 = vld [vmem:[%s10573_s4 + $0x34] ss:$20 sps:$4 sm:$0xff]  }
 0x78b   : > { %v2808_v12 = vsel %vm493_vm0, %v2789_v43, %v2791_v18 }
 0x78d   : > { %v2793_v59 = vpop.permute.xlu0 %2792  ;;  %3308 = vmatpush1.bf16.msra.mxu1 %v2726_v46 }
 0x78e   : > { %v2719_v47 = vpop.permute.xlu1 %2718  ;;  %v2809_v11 = vsel %vm493_vm0, %v2791_v18, %v2793_v59 }
 0x78f   : > { %v2729_v57 = vsel %vm524_vm1, %v2719_v47, %v2721_v38  ;;  %v2728_v15 = vsel %vm524_vm1, %v2717_v62, %v2719_v47 }
 0x790   : > { %3309 = vmatprep.subr.bf16.mxu1 %v2729_v57 }
 0x791   : > { %v2797_v0 = vpop.permute.xlu0 %2796  ;;  %3310 = vmatpush1.bf16.msra.mxu1 %v2728_v15  ;;  %v7402_v15 = vld [vmem:[%s10573_s4 + $0x30] ss:$20 sps:$4 sm:$0xff]  }
 0x792   : > { %3311 = vmatprep.subr.bf16.mxu1 %v2807_v28  ;;  %v2799_v29 = vpop.permute.xlu1 %2798  ;;  %v7403_v28 = vld [vmem:[%s10573_s4 + $0x5c] ss:$20 sps:$4 sm:$0xff]  }
 0x793   : > { %v2811_v56 = vsel %vm493_vm0, %v2797_v0, %v2799_v29 }
 0x795   : > { %v2795_v14 = vpop.permute.xlu0 %2794  ;;  %3312 = vmatpush1.bf16.msra.mxu1 %v2806_v5 }
 0x796   : > { %3313 = vmatprep.subr.bf16.mxu1 %v2809_v11  ;;  %v2801_v34 = vpop.permute.xlu1 %2800  ;;  %v2810_v36 = vsel %vm493_vm0, %v2795_v14, %v2797_v0 }
 0x799   : > { %v2805_v32 = vpop.permute.xlu0 %2804  ;;  %3314 = vmatpush1.bf16.msra.mxu1 %v2808_v12 }
 0x79a   : > { %3315 = vmatprep.subr.bf16.mxu1 %v2811_v56  ;;  %v2859_v45 = vpop.permute.xlu1 %2858 }
 0x79d   : > { %v2857_v27 = vpop.permute.xlu0 %2856  ;;  %3316 = vmatpush1.bf16.msra.mxu1 %v2810_v36 }
 0x79e   : > { %v2803_v54 = vpop.permute.xlu1 %2802  ;;  %v2879_v48 = vsel %vm622_vm7, %v2857_v27, %v2859_v45  ;;  %v7406_v45 = vld [vmem:[%s10573_s4 + $0x84] ss:$20 sps:$4 sm:$0xff]  }
 0x79f   : > { %v2813_v17 = vsel %vm493_vm0, %v2803_v54, %v2805_v32  ;;  %v2812_v53 = vsel %vm493_vm0, %v2801_v34, %v2803_v54  ;;  %v7405_v32 = vld [vmem:[%s10573_s4 + $0x58] ss:$20 sps:$4 sm:$0xff]  }
 0x7a0   : > { %3317 = vmatprep.subr.bf16.mxu1 %v2813_v17 }
 0x7a1   : > { %v2855_v55 = vpop.permute.xlu0 %2854  ;;  %3318 = vmatpush1.bf16.msra.mxu1 %v2812_v53 }
 0x7a2   : > { %3319 = vmatprep.subr.bf16.mxu1 %v2879_v48  ;;  %v2863_v16 = vpop.permute.xlu1 %2862  ;;  %v2878_v41 = vsel %vm622_vm7, %v2855_v55, %v2857_v27  ;;  %v7408_v48 = vld [vmem:[%s10573_s4 + $0x80] ss:$20 sps:$4 sm:$0xff]  }
 0x7a5   : > { %v2865_v62 = vpop.permute.xlu0 %2864  ;;  %3320 = vmatpush1.bf16.msra.mxu1 %v2878_v41 }
 0x7a6   : > { %v2861_v38 = vpop.permute.xlu1 %2860  ;;  %v2881_v51 = vsel %vm622_vm7, %v2863_v16, %v2865_v62 }
 0x7a7   : > { %v2880_v21 = vsel %vm622_vm7, %v2861_v38, %v2863_v16  ;;  %3321 = vmatprep.subr.bf16.mxu1 %v2881_v51  ;;  %v7409_v51 = vld [vmem:[%s10573_s4 + $0x10] ss:$20 sps:$4 sm:$0xff]  }
 0x7a9   : > { %v2869_v2 = vpop.permute.xlu0 %2868  ;;  %3322 = vmatpush1.bf16.msra.mxu1 %v2880_v21  ;;  %v7410_v21 = vld [vmem:[%s10573_s4 + $0x38] ss:$20 sps:$4 sm:$0xff]  }
 0x7aa   : > { %v2871_v25 = vpop.permute.xlu1 %2870 }
 0x7ab   : > { %v2883_v60 = vsel %vm622_vm7, %v2869_v2, %v2871_v25  ;;  %v7412_v25 = vld [vmem:[%s10573_s4 + $0x88] ss:$20 sps:$4 sm:$0xff]  }
 0x7ac   : > { %3323 = vmatprep.subr.bf16.mxu1 %v2883_v60  ;;  %v3084_v60 = vld [vmem:[#allocation2 + $0x8] sm:$0xff] }
 0x7ad   : > { %v2867_v6 = vpop.permute.xlu0 %2866 }
 0x7ae   : > { %v2882_v22 = vsel %vm622_vm7, %v2867_v6, %v2869_v2  ;;  %v2875_v18 = vpop.permute.xlu1 %2874  ;;  %v7411_v2 = vld [vmem:[%s10573_s4 + $0x60] ss:$20 sps:$4 sm:$0xff]  }
 0x7af   : > { %3324 = vmatpush1.bf16.msra.mxu1 %v2882_v22  ;;  %v3085_v6 = vld [vmem:[#allocation2 + $0x10] sm:$0xff] }
 0x7b1   : > { %v2877_v3 = vpop.permute.xlu0 %2876 }
 0x7b2   : > { %3326 = vmatmul.mubr.bf16.vlgmr.msra.gmra.mrb[32].mxu1 %v7397_v30  ;;  %v2873_v43 = vpop.permute.xlu1 %2872  ;;  %v2885_v46 = vsel %vm622_vm7, %v2875_v18, %v2877_v3  ;;  %v3093_v3 = vunpack.c.l.bf16 %v3085_v6 }
 0x7b3   : > { %v2884_v59 = vsel %vm622_vm7, %v2873_v43, %v2875_v18  ;;  %3366 = vmatprep.subr.bf16.mxu1 %v2885_v46  ;;  %3335 = vmatprep.mubr.bf16.mxu1 %v7400_v31  ;;  %v3092_v18 = vunpack.c.l.bf16 %v3084_v60  ;;  %v3094_v31 = vunpack.c.h.bf16 %v3084_v60  ;;  %v3095_v46 = vunpack.c.h.bf16 %v3085_v6 }
 0x7b4   : > { %3367 = vmatpush1.bf16.msra.mxu1 %v2884_v59 }
 0x7b5   : > { %v2941_v47 = vpop.permute.xlu0 %2940 }
 0x7b6   : > { %v2943_v57 = vpop.permute.xlu1 %2942 }
 0x7b7   : > { %v2963_v0 = vsel %vm441_vm15, %v2941_v47, %v2943_v57 }
 0x7b8   : > { %3368 = vmatprep.subr.bf16.mxu1 %v2963_v0 }
 0x7b9   : > { %v2939_v29 = vpop.permute.xlu0 %2938 }
 0x7ba   : > { %v2962_v5 = vsel %vm441_vm15, %v2939_v29, %v2941_v47  ;;  %3336 = vmatmul.mubr.bf16.gmra.mrb[36].mxu1 %v7402_v15  ;;  %v2947_v14 = vpop.permute.xlu1 %2946 }
 0x7bb   : > { %3369 = vmatpush1.bf16.msra.mxu1 %v2962_v5  ;;  %3345 = vmatprep.mubr.bf16.mxu1 %v7403_v28  ;;  %v3086_v5 = vld [vmem:[#allocation2 + $0x28] sm:$0xff] }
 0x7bd   : > { %v2949_v11 = vpop.permute.xlu0 %2948 }
 0x7be   : > { %v2945_v34 = vpop.permute.xlu1 %2944  ;;  %v2965_v12 = vsel %vm441_vm15, %v2947_v14, %v2949_v11 }
 0x7bf   : > { %v2964_v56 = vsel %vm441_vm15, %v2945_v34, %v2947_v14  ;;  %3370 = vmatprep.subr.bf16.mxu1 %v2965_v12  ;;  %v3087_v14 = vld [vmem:[#allocation2 + $0x30] sm:$0xff]  ;;  %v3096_v34 = vunpack.c.l.bf16 %v3086_v5 }
 0x7c0   : > { %3371 = vmatpush1.bf16.msra.mxu1 %v2964_v56 }
 0x7c1   : > { %v2953_v36 = vpop.permute.xlu0 %2952 }
 0x7c2   : > { %3346 = vmatmul.mubr.bf16.gmra.mrb[40].mxu1 %v7405_v32  ;;  %v2955_v27 = vpop.permute.xlu1 %2954  ;;  %v3098_v32 = vunpack.c.h.bf16 %v3086_v5  ;;  %v3090_v5 = vld [vmem:[#allocation2 + $0x68] sm:$0xff] }
 0x7c3   : > { %v2967_v54 = vsel %vm441_vm15, %v2953_v36, %v2955_v27  ;;  %3355 = vmatprep.mubr.bf16.mxu1 %v7406_v45  ;;  %v3097_v45 = vunpack.c.l.bf16 %v3087_v14  ;;  %v3099_v27 = vunpack.c.h.bf16 %v3087_v14 }
 0x7c4   : > { %3372 = vmatprep.subr.bf16.mxu1 %v2967_v54 }
 0x7c5   : > { %v2951_v17 = vpop.permute.xlu0 %2950 }
 0x7c6   : > { %v2966_v53 = vsel %vm441_vm15, %v2951_v17, %v2953_v36  ;;  %v2959_v55 = vpop.permute.xlu1 %2958 }
 0x7c7   : > { %3373 = vmatpush1.bf16.msra.mxu1 %v2966_v53 }
 0x7c9   : > { %v2961_v16 = vpop.permute.xlu0 %2960 }
 0x7ca   : > { %3356 = vmatmul.mubr.bf16.gmra.mrb[44].mxu1 %v7408_v48  ;;  %v2957_v41 = vpop.permute.xlu1 %2956  ;;  %v2969_v62 = vsel %vm441_vm15, %v2959_v55, %v2961_v16 }
 0x7cb   : > { %v2968_v38 = vsel %vm441_vm15, %v2957_v41, %v2959_v55  ;;  %3374 = vmatprep.subr.bf16.mxu1 %v2969_v62  ;;  %3398 = vmatprep.mubr.bf16.mxu1 %v10627_v19 }
 0x7cc   : > { %3375 = vmatpush1.bf16.msra.mxu1 %v2968_v38 }
 0x7cd   : > { %7137 = vmatprep.subr.msk.bf16.mxu1 %vm7565_vm4, %v7563_v4 }
 0x7d2   : > { %7041 = vmatmul.mubr.msk.bf16.vlgmr.msra.gmra.mrb[32].mxu1 %vm2026_vm10, %v7409_v51  ;;  %v3088_v51 = vld [vmem:[#allocation2 + $0x48] sm:$0xff] }
 0x7d3   : > { %3408 = vmatprep.mubr.bf16.mxu1 %v10627_v19  ;;  %7140 = vmatpush1.bf16.msk.msra.mxu1 %vm7565_vm4, %v7563_v4  ;;  %v3100_v60 = vunpack.c.l.bf16 %v3088_v51 }
 0x7da   : > { %7042 = vmatmul.mubr.msk.bf16.gmra.mrb[36].mxu1 %vm2026_vm10, %v7410_v21 }
 0x7db   : > { %3418 = vmatprep.mubr.bf16.mxu1 %v10627_v19 }
 0x7e2   : > { %7043 = vmatmul.mubr.msk.bf16.gmra.mrb[40].mxu1 %vm2026_vm10, %v7411_v2  ;;  %v3089_v2 = vld [vmem:[#allocation2 + $0x50] sm:$0xff] }
 0x7e3   : > { %3428 = vmatprep.mubr.bf16.mxu1 %v10627_v19 }
 0x7ea   : > { %7044 = vmatmul.mubr.msk.bf16.gmra.mrb[44].mxu1 %vm2026_vm10, %v7412_v25 }
 0x8a5   : > { %v3400_v22 = vpop.f32.mrb[32].mxu1 }
 0x8a6   : > { %v3402_v30 = vpop.f32.mrb[33].mxu1  ;;  %v7169_v59 = vadd.f32 %v3400_v22, %v3092_v18  ;;  %v3102_v22 = vunpack.c.h.bf16 %v3088_v51  ;;  %v3101_v18 = vunpack.c.l.bf16 %v3089_v2 }
 0x8a7   : > { %v3404_v43 = vpop.f32.mrb[34].mxu1  ;;  %v7170_v15 = vadd.f32 %v3402_v30, %v3093_v3 }
 0x8a8   : > { %v7171_v47 = vadd.f32 %v3404_v43, %v3094_v31  ;;  %v3406_v57 = vpop.f32.mrb[35].mxu1  ;;  %v3103_v31 = vunpack.c.h.bf16 %v3089_v2 }
 0x8a9   : > { %v7172_v0 = vadd.f32 %v3406_v57, %v3095_v46 }
 0x8aa   : > { %v9081_v28 = vpack.c.bf16 %v7171_v47, %v7169_v59 }
 0x8ab   : > { %v9083_v29 = vpack.c.bf16 %v7172_v0, %v7170_v15 }
 0x8ac   : > { %3447 = vst [vmem:[#allocation2 + $0x8] sm:$0xff] %v9081_v28  ;;  %3565 = vrot.lane.b32.xlu0 %v9081_v28, %s7503_s21  ;;  %v3468_v56 = vmul.bf16 %v9081_v28, %v7681_v42  ;;  %v3624_v62 = vmul.bf16 %v9081_v28, %v7705_v49 }
 0x8ad   : > { %3448 = vst [vmem:[#allocation2 + $0x10] sm:$0xff] %v9083_v29  ;;  %v3410_v11 = vpop.f32.mrb[36].mxu1  ;;  %3567 = vrot.lane.b32.xlu1 %v9083_v29, %s7503_s21  ;;  %v3469_v54 = vmul.bf16 %v9083_v29, %v7674_v40  ;;  %v3625_v21 = vmul.bf16 %v9083_v29, %v7672_v39 }
 0x8ae   : > { %v3412_v12 = vpop.f32.mrb[37].mxu1  ;;  %v7173_v17 = vadd.f32 %v3410_v11, %v3096_v34  ;;  %v3091_v11 = vld [vmem:[#allocation2 + $0x70] sm:$0xff] }
 0x8af   : > { %v3414_v36 = vpop.f32.mrb[38].mxu1  ;;  %v7174_v48 = vadd.f32 %v3412_v12, %v3097_v45  ;;  %v3104_v12 = vunpack.c.l.bf16 %v3090_v5  ;;  %v3105_v45 = vunpack.c.l.bf16 %v3091_v11 }
 0x8b0   : > { %v7175_v53 = vadd.f32 %v3414_v36, %v3098_v32  ;;  %v3416_v55 = vpop.f32.mrb[39].mxu1  ;;  %3493 = vrot.lane.b32.xlu0 %v3468_v56, %s7502_s20  ;;  %v3106_v56 = vunpack.c.h.bf16 %v3090_v5 }
 0x8b1   : > { %v7176_v16 = vadd.f32 %v3416_v55, %v3099_v27  ;;  %3495 = vrot.lane.b32.xlu1 %v3469_v54, %s7502_s20  ;;  %v3107_v27 = vunpack.c.h.bf16 %v3091_v11  ;;  %v3710_v11 = vmul.bf16 %v8930_v9, %v10630_v7 }
 0x8b2   : > { %v9097_v41 = vpack.c.bf16 %v7175_v53, %v7173_v17 }
 0x8b3   : > { %v9101_v38 = vpack.c.bf16 %v7176_v16, %v7174_v48  ;;  %v5374_v8 = vld [vmem:[#allocation2 + $0x8] sm:$0xff] }
 0x8b4   : > { %3449 = vst [vmem:[#allocation2 + $0x28] sm:$0xff] %v9097_v41  ;;  %3649 = vrot.lane.b32.xlu0 %v3624_v62, %s7501_s19  ;;  %v3471_v14 = vmul.bf16 %v9097_v41, %v7681_v42 }
 0x8b5   : > { %3450 = vst [vmem:[#allocation2 + $0x30] sm:$0xff] %v9101_v38  ;;  %v3420_v25 = vpop.f32.mrb[40].mxu1  ;;  %3651 = vrot.lane.b32.xlu1 %v3625_v21, %s7501_s19  ;;  %v3472_v15 = vmul.bf16 %v9101_v38, %v7674_v40  ;;  %v3712_v5 = vmul.bf16 %v9101_v38, %v10631_v52 }
 0x8b6   : > { %v3422_v6 = vpop.f32.mrb[41].mxu1  ;;  %v7177_v3 = vadd.f32 %v3420_v25, %v3100_v60  ;;  %v3623_v60 = vmul.bf16 %v8927_v37, %v7658_v35 }
 0x8b7   : > { %v3424_v30 = vpop.f32.mrb[42].mxu1  ;;  %v7178_v59 = vadd.f32 %v3422_v6, %v3101_v18  ;;  %v3627_v6 = vmul.bf16 %v9097_v41, %v7705_v49  ;;  %v3626_v18 = vmul.bf16 %v8930_v9, %v7658_v35  ;;  %v3713_v9 = vmul.bf16 %v8939_v58, %v10630_v7 }
 0x8b8   : > { %v7179_v43 = vadd.f32 %v3424_v30, %v3102_v22  ;;  %v3426_v46 = vpop.f32.mrb[43].mxu1  ;;  %3573 = vrot.lane.b32.xlu0 %v9101_v38, %s7503_s21  ;;  %v3628_v22 = vmul.bf16 %v9101_v38, %v7672_v39 }
 0x8b9   : > { %v7180_v47 = vadd.f32 %v3426_v46, %v3103_v31  ;;  %3571 = vrot.lane.b32.xlu1 %v9097_v41, %s7503_s21  ;;  %v3708_v46 = vmul.bf16 %v9081_v28, %v10628_v61 }
 0x8ba   : > { %v9113_v57 = vpack.c.bf16 %v7179_v43, %v7177_v3  ;;  %v3629_v3 = vmul.bf16 %v8939_v58, %v7658_v35 }
 0x8bb   : > { %v9117_v0 = vpack.c.bf16 %v7180_v47, %v7178_v59  ;;  %v3632_v59 = vmul.bf16 %v8942_v33, %v7658_v35  ;;  %v3707_v47 = vmul.bf16 %v8927_v37, %v10630_v7 }
 0x8bc   : > { %3451 = vst [vmem:[#allocation2 + $0x48] sm:$0xff] %v9113_v57  ;;  %3501 = vrot.lane.b32.xlu0 %v3472_v15, %s7502_s20  ;;  %v3474_v62 = vmul.bf16 %v9113_v57, %v7681_v42  ;;  %v3630_v30 = vmul.bf16 %v9113_v57, %v7705_v49  ;;  %v3709_v15 = vmul.bf16 %v9083_v29, %v10631_v52 }
 0x8bd   : > { %3452 = vst [vmem:[#allocation2 + $0x50] sm:$0xff] %v9117_v0  ;;  %v3430_v34 = vpop.f32.mrb[44].mxu1  ;;  %3499 = vrot.lane.b32.xlu1 %v3471_v14, %s7502_s20  ;;  %v3475_v21 = vmul.bf16 %v9117_v0, %v7674_v40  ;;  %v3631_v31 = vmul.bf16 %v9117_v0, %v7672_v39  ;;  %v3711_v14 = vmul.bf16 %v9097_v41, %v10628_v61 }
 0x8be   : > { %v3432_v32 = vpop.f32.mrb[45].mxu1  ;;  %v7181_v54 = vadd.f32 %v3430_v34, %v3104_v12  ;;  %v3714_v34 = vmul.bf16 %v9113_v57, %v10628_v61  ;;  %v3715_v12 = vmul.bf16 %v9117_v0, %v10631_v52 }
 0x8bf   : > { %v3434_v36 = vpop.f32.mrb[46].mxu1  ;;  %v7182_v55 = vadd.f32 %v3432_v32, %v3105_v45  ;;  %v7415_v32 = vld [vmem:[%s10574_s5 + $0x4] ss:$20 sps:$4 sm:$0xff]   ;;  %v3808_v45 = vmul.bf16 %v9083_v29, %v10632_v13 }
 0x8c0   : > { %v7183_v17 = vadd.f32 %v3434_v36, %v3106_v56  ;;  %v3436_v53 = vpop.f32.mrb[47].mxu1  ;;  %3577 = vrot.lane.b32.xlu0 %v9113_v57, %s7503_s21  ;;  %4361 = vmatprep.mubr.bf16.mxu0 %v7415_v32  ;;  %v3716_v36 = vmul.bf16 %v8942_v33, %v10630_v7  ;;  %v3811_v33 = vmul.bf16 %v9101_v38, %v10632_v13 }
 0x8c1   : > { %v7184_v48 = vadd.f32 %v3436_v53, %v3107_v27  ;;  %3579 = vrot.lane.b32.xlu1 %v9117_v0, %s7503_s21  ;;  %v9219_v27 = vld [vmem:[#allocation2 + $0x18] sm:$0xff] }
 0x8c2   : > { %v9129_v16 = vpack.c.bf16 %v7183_v17, %v7181_v54  ;;  %v3809_v54 = vmul.bf16 %v9219_v27, %v10633_v24  ;;  %v3807_v17 = vmul.bf16 %v9081_v28, %v10634_v26  ;;  %v9232_v53 = vld [vmem:[#allocation2 + $0x38] sm:$0xff] }
 0x8c3   : > { %v9133_v51 = vpack.c.bf16 %v7184_v48, %v7182_v55  ;;  %v3812_v55 = vmul.bf16 %v9232_v53, %v10633_v24  ;;  %v3810_v48 = vmul.bf16 %v9097_v41, %v10634_v26 }
 0x8c4   : > { %3453 = vst [vmem:[#allocation2 + $0x68] sm:$0xff] %v9129_v16  ;;  %3505 = vrot.lane.b32.xlu0 %v3474_v62, %s7502_s20  ;;  %v3477_v25 = vmul.bf16 %v9129_v16, %v7681_v42  ;;  %v3633_v43 = vmul.bf16 %v9129_v16, %v7705_v49  ;;  %v3717_v56 = vmul.bf16 %v9129_v16, %v10628_v61  ;;  %v9241_v62 = vld [vmem:[#allocation2 + $0x58] sm:$0xff] }
 0x8c5   : > { %3454 = vst [vmem:[#allocation2 + $0x70] sm:$0xff] %v9133_v51  ;;  %3507 = vrot.lane.b32.xlu1 %v3475_v21, %s7502_s20  ;;  %v3478_v2 = vmul.bf16 %v9133_v51, %v7674_v40  ;;  %v3634_v37 = vmul.bf16 %v9133_v51, %v7672_v39  ;;  %v3718_v58 = vmul.bf16 %v9133_v51, %v10631_v52 }
 0x8c6   : > { %v3814_v21 = vmul.bf16 %v9117_v0, %v10632_v13 }
 0x8c8   : > { %3585 = vrot.lane.b32.xlu0 %v9133_v51, %s7503_s21 }
 0x8c9   : > { %3583 = vrot.lane.b32.xlu1 %v9129_v16, %s7503_s21 }
 0x8cc   : > { %3513 = vrot.lane.b32.xlu0 %v3478_v2, %s7502_s20  ;;  %v3815_v2 = vmul.bf16 %v9241_v62, %v10633_v24 }
 0x8cd   : > { %3511 = vrot.lane.b32.xlu1 %v3477_v25, %s7502_s20  ;;  %v3492_v25 = vpop.permute.xlu0 %3491 }
 0x8d0   : > { %3647 = vrot.lane.b32.xlu0 %v3623_v60, %s7501_s19  ;;  %v3498_v60 = vpop.permute.xlu1 %3497 }
 0x8d1   : > { %3655 = vrot.lane.b32.xlu1 %v3627_v6, %s7501_s19  ;;  %v3813_v6 = vmul.bf16 %v9113_v57, %v10634_v26 }
 0x8d4   : > { %3657 = vrot.lane.b32.xlu0 %v3628_v22, %s7501_s19  ;;  %v3816_v22 = vmul.bf16 %v9129_v16, %v10634_v26 }
 0x8d5   : > { %3653 = vrot.lane.b32.xlu1 %v3626_v18, %s7501_s19  ;;  %v9254_v18 = vld [vmem:[#allocation2 + $0x78] sm:$0xff] }
 0x8d8   : > { %3661 = vrot.lane.b32.xlu0 %v3630_v30, %s7501_s19  ;;  %v9258_v30 = vpop.permute.xlu0 %3503 }
 0x8d9   : > { %3663 = vrot.lane.b32.xlu1 %v3631_v31, %s7501_s19  ;;  %v3818_v31 = vmul.bf16 %v9254_v18, %v10633_v24 }
 0x8dc   : > { %3659 = vrot.lane.b32.xlu0 %v3629_v3, %s7501_s19  ;;  %v9262_v3 = vpop.permute.xlu1 %3509 }
 0x8dd   : > { %3667 = vrot.lane.b32.xlu1 %v3633_v43, %s7501_s19  ;;  %v3893_v43 = vmul.bf16 %v9219_v27, %v10635_v63 }
 0x8e0   : > { %3733 = vrot.lane.b32.xlu0 %v3708_v46, %s7500_s18  ;;  %v3892_v46 = vmul.bf16 %v9083_v29, %v10636_v50 }
 0x8e1   : > { %3665 = vrot.lane.b32.xlu1 %v3632_v59, %s7501_s19  ;;  %v9270_v59 = vpop.permute.xlu0 %3563 }
 0x8e4   : > { %3731 = vrot.lane.b32.xlu0 %v3707_v47, %s7500_s18  ;;  %v3895_v47 = vmul.bf16 %v9101_v38, %v10636_v50 }
 0x8e5   : > { %3735 = vrot.lane.b32.xlu1 %v3709_v15, %s7500_s18  ;;  %v9274_v15 = vpop.permute.xlu1 %3569 }
 0x8e8   : > { %3741 = vrot.lane.b32.xlu0 %v3712_v5, %s7500_s18  ;;  %v3891_v5 = vmul.bf16 %v9081_v28, %v10637_v1 }
 0x8e9   : > { %3739 = vrot.lane.b32.xlu1 %v3711_v14, %s7500_s18  ;;  %v3894_v14 = vmul.bf16 %v9097_v41, %v10637_v1 }
 0x8ec   : > { %3669 = vrot.lane.b32.xlu0 %v3634_v37, %s7501_s19  ;;  %v9283_v37 = vpop.permute.xlu0 %3575 }
 0x8ed   : > { %3737 = vrot.lane.b32.xlu1 %v3710_v11, %s7500_s18  ;;  %v9286_v11 = vpop.permute.xlu1 %3581 }
 0x8f0   : > { %3745 = vrot.lane.b32.xlu0 %v3714_v34, %s7500_s18  ;;  %v3896_v34 = vmul.bf16 %v9232_v53, %v10635_v63 }
 0x8f1   : > { %3747 = vrot.lane.b32.xlu1 %v3715_v12, %s7500_s18  ;;  %v3817_v12 = vmul.bf16 %v9133_v51, %v10632_v13 }
 0x8f4   : > { %3743 = vrot.lane.b32.xlu0 %v3713_v9, %s7500_s18  ;;  %v3898_v9 = vmul.bf16 %v9117_v0, %v10636_v50 }
 0x8f5   : > { %3751 = vrot.lane.b32.xlu1 %v3717_v56, %s7500_s18 }
 0x8f8   : > { %3833 = vrot.lane.b32.xlu0 %v3808_v45, %s7499_s17  ;;  %v3899_v45 = vmul.bf16 %v9241_v62, %v10635_v63 }
 0x8f9   : > { %3749 = vrot.lane.b32.xlu1 %v3716_v36, %s7500_s18 }
 0x8fc   : > { %3753 = vrot.lane.b32.xlu0 %v3718_v58, %s7500_s18  ;;  %v3897_v58 = vmul.bf16 %v9113_v57, %v10637_v1 }
 0x8fd   : > { %3835 = vrot.lane.b32.xlu1 %v3809_v54, %s7499_s17 }
 0x900   : > { %3831 = vrot.lane.b32.xlu0 %v3807_v17, %s7499_s17  ;;  %v3900_v17 = vmul.bf16 %v9129_v16, %v10637_v1 }
 0x901   : > { %3839 = vrot.lane.b32.xlu1 %v3811_v33, %s7499_s17 }
 0x904   : > { %3841 = vrot.lane.b32.xlu0 %v3812_v55, %s7499_s17 }
 0x905   : > { %3837 = vrot.lane.b32.xlu1 %v3810_v48, %s7499_s17 }
 0x908   : > { %3845 = vrot.lane.b32.xlu0 %v3814_v21, %s7499_s17  ;;  %v3902_v21 = vmul.bf16 %v9254_v18, %v10635_v63 }
 0x909   : > { %3847 = vrot.lane.b32.xlu1 %v3815_v2, %s7499_s17 }
 0x90c   : > { %3843 = vrot.lane.b32.xlu0 %v3813_v6, %s7499_s17 }
 0x90d   : > { %3849 = vrot.lane.b32.xlu1 %v3816_v22, %s7499_s17 }
 0x910   : > { %3853 = vrot.lane.b32.xlu0 %v3818_v31, %s7499_s17  ;;  %v3901_v31 = vmul.bf16 %v9133_v51, %v10636_v50 }
 0x911   : > { %3919 = vrot.lane.b32.xlu1 %v3893_v43, %s7497_s15 }
 0x914   : > { %3917 = vrot.lane.b32.xlu0 %v3892_v46, %s7497_s15 }
 0x915   : > { %3923 = vrot.lane.b32.xlu1 %v3895_v47, %s7497_s15 }
 0x918   : > { %3915 = vrot.lane.b32.xlu0 %v3891_v5, %s7497_s15 }
 0x919   : > { %3921 = vrot.lane.b32.xlu1 %v3894_v14, %s7497_s15 }
 0x91c   : > { %3925 = vrot.lane.b32.xlu0 %v3896_v34, %s7497_s15 }
 0x91d   : > { %3851 = vrot.lane.b32.xlu1 %v3817_v12, %s7499_s17 }
 0x91e   : > { %v9294_v32 = vpop.permute.xlu0 %3565 }
 0x91f   : > { %v3568_v56 = vpop.permute.xlu1 %3567 }
 0x920   : > { %3929 = vrot.lane.b32.xlu0 %v3898_v9, %s7497_s15 }
 0x921   : > { %3931 = vrot.lane.b32.xlu1 %v3899_v45, %s7497_s15 }
 0x922   : > { %v3494_v36 = vpop.permute.xlu0 %3493 }
 0x923   : > { %v3496_v54 = vpop.permute.xlu1 %3495  ;;  %v3515_v55 = vsel %vm339_vm11, %v3492_v25, %v3494_v36 }
 0x924   : > { %3927 = vrot.lane.b32.xlu0 %v3897_v58, %s7497_s15  ;;  %v3516_v33 = vsel %vm339_vm11, %v3494_v36, %v3496_v54 }
 0x925   : > { %3933 = vrot.lane.b32.xlu1 %v3900_v17, %s7497_s15  ;;  %4331 = vmatprep.subr.bf16.mxu0 %v3516_v33 }
 0x926   : > { %v9310_v48 = vpop.permute.xlu0 %3649  ;;  %4332 = vmatpush1.bf16.msra.mxu0 %v3515_v55  ;;  %v3588_v55 = vsel %vm477_vm6, %v9294_v32, %v3568_v56 }
 0x927   : > { %v9314_v2 = vpop.permute.xlu1 %3651 }
 0x928   : > { %3937 = vrot.lane.b32.xlu0 %v3902_v21, %s7497_s15  ;;  %v4048_v21 = vmul.bf16 %v9083_v29, %v10638_v20 }
 0x929   : > { %3991 = vrot.lane.b32.xlu1 %v9219_v27, %s7504_s24 }
 0x92a   : > { %v3574_v6 = vpop.permute.xlu0 %3573 }
 0x92b   : > { %v3572_v22 = vpop.permute.xlu1 %3571 }
 0x92c   : > { %3989 = vrot.lane.b32.xlu0 %v9083_v29, %s7504_s24  ;;  %v3590_v56 = vsel %vm477_vm6, %v3572_v22, %v3574_v6  ;;  %v4052_v6 = vmul.bf16 %v9232_v53, %v10639_v10 }
 0x92d   : > { %3935 = vrot.lane.b32.xlu1 %v3901_v31, %s7497_s15 }
 0x92e   : > { %v3502_v25 = vpop.permute.xlu0 %3501 }
 0x92f   : > { %v3500_v43 = vpop.permute.xlu1 %3499 }
 0x930   : > { %3987 = vrot.lane.b32.xlu0 %v9081_v28, %s7504_s24  ;;  %v3518_v46 = vsel %vm339_vm11, %v3500_v43, %v3502_v25  ;;  %v3517_v47 = vsel %vm339_vm11, %v3498_v60, %v3500_v43  ;;  %v4049_v25 = vmul.bf16 %v9219_v27, %v10639_v10  ;;  %v4051_v27 = vmul.bf16 %v9101_v38, %v10638_v20 }
 0x931   : > { %3995 = vrot.lane.b32.xlu1 %v9101_v38, %s7504_s24  ;;  %4333 = vmatprep.subr.bf16.mxu0 %v3518_v46  ;;  %v4047_v46 = vmul.bf16 %v9081_v28, %v10640_v23 }
 0x932   : > { %v3578_v5 = vpop.permute.xlu0 %3577  ;;  %4334 = vmatpush1.bf16.msra.mxu0 %v3517_v47 }
 0x933   : > { %v3580_v14 = vpop.permute.xlu1 %3579 }
 0x934   : > { %3997 = vrot.lane.b32.xlu0 %v9232_v53, %s7504_s24 }
 0x935   : > { %3993 = vrot.lane.b32.xlu1 %v9097_v41, %s7504_s24 }
 0x936   : > { %v3506_v34 = vpop.permute.xlu0 %3505 }
 0x937   : > { %v3508_v12 = vpop.permute.xlu1 %3507  ;;  %v3519_v9 = vsel %vm339_vm11, %v9258_v30, %v3506_v34 }
 0x938   : > { %4001 = vrot.lane.b32.xlu0 %v9117_v0, %s7504_s24  ;;  %v3520_v60 = vsel %vm339_vm11, %v3506_v34, %v3508_v12  ;;  %v3589_v34 = vsel %vm477_vm6, %v9274_v15, %v3572_v22 }
 0x939   : > { %4003 = vrot.lane.b32.xlu1 %v9241_v62, %s7504_s24  ;;  %4335 = vmatprep.subr.bf16.mxu0 %v3520_v60  ;;  %v4050_v60 = vmul.bf16 %v9097_v41, %v10640_v23 }
 0x93a   : > { %v3586_v45 = vpop.permute.xlu0 %3585  ;;  %4336 = vmatpush1.bf16.msra.mxu0 %v3519_v9  ;;  %v3591_v9 = vsel %vm477_vm6, %v9283_v37, %v3578_v5 }
 0x93b   : > { %v3584_v36 = vpop.permute.xlu1 %3583 }
 0x93c   : > { %3999 = vrot.lane.b32.xlu0 %v9113_v57, %s7504_s24  ;;  %v3594_v22 = vsel %vm477_vm6, %v3584_v36, %v3586_v45  ;;  %v4053_v45 = vmul.bf16 %v9113_v57, %v10640_v23 }
 0x93d   : > { %4007 = vrot.lane.b32.xlu1 %v9133_v51, %s7504_s24 }
 0x93e   : > { %v3514_v58 = vpop.permute.xlu0 %3513 }
 0x93f   : > { %v3512_v54 = vpop.permute.xlu1 %3511 }
 0x940   : > { %4009 = vrot.lane.b32.xlu0 %v9254_v18, %s7504_s24  ;;  %v3522_v17 = vsel %vm339_vm11, %v3512_v54, %v3514_v58  ;;  %v3521_v33 = vsel %vm339_vm11, %v9262_v3, %v3512_v54  ;;  %v3587_v3 = vsel %vm477_vm6, %v9270_v59, %v9294_v32  ;;  %v3592_v32 = vsel %vm477_vm6, %v3578_v5, %v3580_v14 }
 0x941   : > { %4005 = vrot.lane.b32.xlu1 %v9129_v16, %s7504_s24  ;;  %4337 = vmatprep.subr.bf16.mxu0 %v3522_v17  ;;  %v4054_v14 = vmul.bf16 %v9117_v0, %v10638_v20  ;;  %v4055_v58 = vmul.bf16 %v9241_v62, %v10639_v10  ;;  %v3593_v54 = vsel %vm477_vm6, %v9286_v11, %v3584_v36 }
 0x942   : > { %v3648_v30 = vpop.permute.xlu0 %3647  ;;  %4338 = vmatpush1.bf16.msra.mxu0 %v3521_v33  ;;  %v3672_v5 = vsel %vm510_vm3, %v9310_v48, %v9314_v2  ;;  %v4057_v62 = vmul.bf16 %v9133_v51, %v10638_v20  ;;  %v4058_v2 = vmul.bf16 %v9254_v18, %v10639_v10 }
 0x943   : > { %4339 = vmatprep.subr.bf16.mxu0 %v3588_v55  ;;  %v3656_v31 = vpop.permute.xlu1 %3655  ;;  %v3671_v33 = vsel %vm510_vm3, %v3648_v30, %v9310_v48 }
 0x944   : > { %4073 = vrot.lane.b32.xlu0 %v4048_v21, %s7498_s16  ;;  %v4056_v21 = vmul.bf16 %v9129_v16, %v10640_v23 }
 0x945   : > { %4075 = vrot.lane.b32.xlu1 %v4049_v25, %s7498_s16  ;;  %v9406_v25 = vld [vmem:[#allocation3] sm:$0xff] }
 0x946   : > { %v3658_v43 = vpop.permute.xlu0 %3657  ;;  %4340 = vmatpush1.bf16.msra.mxu0 %v3587_v3  ;;  %v9409_v3 = vld [vmem:[#allocation3 + $0x20] sm:$0xff]  ;;  %v4624_v18 = vmul.bf16 %v9406_v25, %v10641_v44 }
 0x947   : > { %4341 = vmatprep.subr.bf16.mxu0 %v3590_v56  ;;  %v3654_v47 = vpop.permute.xlu1 %3653  ;;  %v3674_v36 = vsel %vm510_vm3, %v3656_v31, %v3658_v43 }
 0x948   : > { %4071 = vrot.lane.b32.xlu0 %v4047_v46, %s7498_s16  ;;  %v3673_v48 = vsel %vm510_vm3, %v3654_v47, %v3656_v31  ;;  %v4627_v46 = vmul.bf16 %v9409_v3, %v10641_v44 }
 0x949   : > { %4079 = vrot.lane.b32.xlu1 %v4051_v27, %s7498_s16  ;;  %v9418_v27 = vld [vmem:[#allocation3 + $0x40] sm:$0xff] }
 0x94a   : > { %v3662_v59 = vpop.permute.xlu0 %3661  ;;  %4342 = vmatpush1.bf16.msra.mxu0 %v3589_v34  ;;  %v9421_v34 = vld [vmem:[#allocation3 + $0x60] sm:$0xff] }
 0x94b   : > { %4343 = vmatprep.subr.bf16.mxu0 %v3592_v32  ;;  %v3664_v12 = vpop.permute.xlu1 %3663  ;;  %v4630_v32 = vmul.bf16 %v9418_v27, %v10641_v44 }
 0x94c   : > { %4081 = vrot.lane.b32.xlu0 %v4052_v6, %s7498_s16  ;;  %v3676_v43 = vsel %vm510_vm3, %v3662_v59, %v3664_v12 }
 0x94d   : > { %4077 = vrot.lane.b32.xlu1 %v4050_v60, %s7498_s16  ;;  %v4633_v60 = vmul.bf16 %v9421_v34, %v10641_v44 }
 0x94e   : > { %v3660_v15 = vpop.permute.xlu0 %3659  ;;  %4344 = vmatpush1.bf16.msra.mxu0 %v3591_v9 }
 0x94f   : > { %4345 = vmatprep.subr.bf16.mxu0 %v3594_v22  ;;  %v3668_v53 = vpop.permute.xlu1 %3667  ;;  %v3675_v31 = vsel %vm510_vm3, %v3660_v15, %v3662_v59 }
 0x950   : > { %4085 = vrot.lane.b32.xlu0 %v4054_v14, %s7498_s16 }
 0x951   : > { %4087 = vrot.lane.b32.xlu1 %v4055_v58, %s7498_s16 }
 0x952   : > { %v3734_v37 = vpop.permute.xlu0 %3733  ;;  %4346 = vmatpush1.bf16.msra.mxu0 %v3593_v54 }
 0x953   : > { %4347 = vmatprep.subr.bf16.mxu0 %v3672_v5  ;;  %v3666_v17 = vpop.permute.xlu1 %3665 }
 0x954   : > { %4083 = vrot.lane.b32.xlu0 %v4053_v45, %s7498_s16  ;;  %v3677_v9 = vsel %vm510_vm3, %v3666_v17, %v3668_v53 }
 0x955   : > { %4091 = vrot.lane.b32.xlu1 %v4057_v62, %s7498_s16 }
 0x956   : > { %v3732_v11 = vpop.permute.xlu0 %3731  ;;  %4348 = vmatpush1.bf16.msra.mxu0 %v3671_v33  ;;  %v7413_v33 = vld [vmem:[%s10574_s5] ss:$20 sps:$4 sm:$0xff]  }
 0x957   : > { %4349 = vmatprep.subr.bf16.mxu0 %v3674_v36  ;;  %v3736_v55 = vpop.permute.xlu1 %3735  ;;  %v3755_v14 = vsel %vm541_vm2, %v3732_v11, %v3734_v37  ;;  %v7416_v36 = vld [vmem:[%s10574_s5 + $0x2c] ss:$20 sps:$4 sm:$0xff]  }
 0x958   : > { %4093 = vrot.lane.b32.xlu0 %v4058_v2, %s7498_s16  ;;  %v3756_v15 = vsel %vm541_vm2, %v3734_v37, %v3736_v55 }
 0x959   : > { %4089 = vrot.lane.b32.xlu1 %v4056_v21, %s7498_s16 }
 0x95a   : > { %v3742_v30 = vpop.permute.xlu0 %3741  ;;  %4350 = vmatpush1.bf16.msra.mxu0 %v3673_v48 }
 0x95b   : > { %4351 = vmatprep.subr.bf16.mxu0 %v3676_v43  ;;  %v3740_v56 = vpop.permute.xlu1 %3739  ;;  %v7418_v43 = vld [vmem:[%s10574_s5 + $0x28] ss:$20 sps:$4 sm:$0xff]  }
 0x95c   : > { %4648 = vrot.lane.b32.xlu0 %v4624_v18, %s7502_s20 }
 0x95d   : > { %4654 = vrot.lane.b32.xlu1 %v4627_v46, %s7502_s20 }
 0x95e   : > { %v3670_v47 = vpop.permute.xlu0 %3669  ;;  %4352 = vmatpush1.bf16.msra.mxu0 %v3675_v31 }
 0x95f   : > { %v3738_v6 = vpop.permute.xlu1 %3737  ;;  %v3678_v12 = vsel %vm510_vm3, %v3668_v53, %v3670_v47  ;;  %v3758_v53 = vsel %vm541_vm2, %v3740_v56, %v3742_v30  ;;  %v7421_v47 = vld [vmem:[%s10574_s5 + $0x50] ss:$20 sps:$4 sm:$0xff]  }
 0x960   : > { %4660 = vrot.lane.b32.xlu0 %v4630_v32, %s7502_s20  ;;  %4353 = vmatprep.subr.bf16.mxu0 %v3678_v12  ;;  %v3757_v5 = vsel %vm541_vm2, %v3738_v6, %v3740_v56  ;;  %v7419_v56 = vld [vmem:[%s10574_s5 + $0x54] ss:$20 sps:$4 sm:$0xff]  }
 0x961   : > { %4666 = vrot.lane.b32.xlu1 %v4633_v60, %s7502_s20 }
 0x962   : > { %v3746_v59 = vpop.permute.xlu0 %3745  ;;  %4354 = vmatpush1.bf16.msra.mxu0 %v3677_v9  ;;  %v7427_v9 = vld [vmem:[%s10574_s5 + $0xc] ss:$20 sps:$4 sm:$0xff]  }
 0x963   : > { %4355 = vmatprep.subr.bf16.mxu0 %v3756_v15  ;;  %v3748_v22 = vpop.permute.xlu1 %3747 }
 0x964   : > { %4720 = vrot.lane.b32.xlu0 %v9406_v25, %s7503_s21  ;;  %v3760_v37 = vsel %vm541_vm2, %v3746_v59, %v3748_v22 }
 0x965   : > { %4726 = vrot.lane.b32.xlu1 %v9409_v3, %s7503_s21 }
 0x966   : > { %v3744_v58 = vpop.permute.xlu0 %3743  ;;  %4356 = vmatpush1.bf16.msra.mxu0 %v3755_v14 }
 0x967   : > { %4357 = vmatprep.subr.bf16.mxu0 %v3758_v53  ;;  %v3752_v54 = vpop.permute.xlu1 %3751  ;;  %v3759_v62 = vsel %vm541_vm2, %v3744_v58, %v3746_v59 }
 0x968   : > { %4732 = vrot.lane.b32.xlu0 %v9418_v27, %s7503_s21 }
 0x969   : > { %4738 = vrot.lane.b32.xlu1 %v9421_v34, %s7503_s21 }
 0x96a   : > { %v3834_v45 = vpop.permute.xlu0 %3833  ;;  %4358 = vmatpush1.bf16.msra.mxu0 %v3757_v5 }
 0x96b   : > { %4359 = vmatprep.subr.bf16.mxu0 %v3760_v37  ;;  %v3750_v17 = vpop.permute.xlu1 %3749 }
 0x96c   : > { %v3761_v21 = vsel %vm541_vm2, %v3750_v17, %v3752_v54 }
 0x96e   : > { %v3754_v11 = vpop.permute.xlu0 %3753  ;;  %4360 = vmatpush1.bf16.msra.mxu0 %v3759_v62 }
 0x96f   : > { %v3836_v2 = vpop.permute.xlu1 %3835  ;;  %v3762_v55 = vsel %vm541_vm2, %v3752_v54, %v3754_v11 }
 0x970   : > { %4402 = vmatprep.subr.bf16.mxu0 %v3762_v55 }
 0x971   : > { %4362 = vmatmul.mubr.bf16.vlgmr.msra.gmra.mrb[20].mxu0 %v7413_v33 }
 0x972   : > { %v3832_v48 = vpop.permute.xlu0 %3831  ;;  %4403 = vmatpush1.bf16.msra.mxu0 %v3761_v21  ;;  %4371 = vmatprep.mubr.bf16.mxu0 %v7416_v36 }
 0x973   : > { %4404 = vmatprep.subr.bf16.mxu0 %v9083_v29  ;;  %v3840_v30 = vpop.permute.xlu1 %3839  ;;  %v3855_v12 = vsel %vm524_vm1, %v3832_v48, %v3834_v45 }
 0x976   : > { %v3842_v18 = vpop.permute.xlu0 %3841  ;;  %4405 = vmatpush1.bf16.msra.mxu0 %v9081_v28 }
 0x977   : > { %4406 = vmatprep.subr.bf16.mxu0 %v9101_v38  ;;  %v3838_v46 = vpop.permute.xlu1 %3837  ;;  %v7422_v38 = vld [vmem:[%s10574_s5 + $0x7c] ss:$20 sps:$4 sm:$0xff]  }
 0x978   : > { %v3857_v59 = vsel %vm524_vm1, %v3838_v46, %v3840_v30 }
 0x979   : > { %4372 = vmatmul.mubr.bf16.gmra.mrb[24].mxu0 %v7418_v43 }
 0x97a   : > { %v3846_v31 = vpop.permute.xlu0 %3845  ;;  %4407 = vmatpush1.bf16.msra.mxu0 %v9097_v41  ;;  %4381 = vmatprep.mubr.bf16.mxu0 %v7419_v56 }
 0x97b   : > { %4408 = vmatprep.subr.bf16.mxu0 %v9117_v0  ;;  %v3848_v29 = vpop.permute.xlu1 %3847  ;;  %v3856_v0 = vsel %vm524_vm1, %v3834_v45, %v3836_v2 }
 0x97c   : > { %v3860_v22 = vsel %vm524_vm1, %v3846_v31, %v3848_v29 }
 0x97e   : > { %v3844_v28 = vpop.permute.xlu0 %3843  ;;  %4409 = vmatpush1.bf16.msra.mxu0 %v9113_v57  ;;  %v7424_v57 = vld [vmem:[%s10574_s5 + $0x78] ss:$20 sps:$4 sm:$0xff]  }
 0x97f   : > { %4410 = vmatprep.subr.bf16.mxu0 %v9133_v51  ;;  %v3850_v32 = vpop.permute.xlu1 %3849  ;;  %v3858_v51 = vsel %vm524_vm1, %v3840_v30, %v3842_v18  ;;  %v3859_v58 = vsel %vm524_vm1, %v3844_v28, %v3846_v31 }
 0x981   : > { %4382 = vmatmul.mubr.bf16.gmra.mrb[28].mxu0 %v7421_v47 }
 0x982   : > { %v3854_v41 = vpop.permute.xlu0 %3853  ;;  %4411 = vmatpush1.bf16.msra.mxu0 %v9129_v16  ;;  %4391 = vmatprep.mubr.bf16.mxu0 %v7422_v38 }
 0x983   : > { %4412 = vmatprep.subr.bf16.mxu0 %v3856_v0  ;;  %v3920_v6 = vpop.permute.xlu1 %3919 }
 0x986   : > { %v3918_v60 = vpop.permute.xlu0 %3917  ;;  %4413 = vmatpush1.bf16.msra.mxu0 %v3855_v12 }
 0x987   : > { %4414 = vmatprep.subr.bf16.mxu0 %v3858_v51  ;;  %v3924_v16 = vpop.permute.xlu1 %3923  ;;  %v3940_v17 = vsel %vm493_vm0, %v3918_v60, %v3920_v6 }
 0x989   : > { %4392 = vmatmul.mubr.bf16.gmra.mrb[32].mxu0 %v7424_v57 }
 0x98a   : > { %v3916_v15 = vpop.permute.xlu0 %3915  ;;  %4415 = vmatpush1.bf16.msra.mxu0 %v3857_v59  ;;  %4434 = vmatprep.mubr.bf16.mxu0 %v7427_v9  ;;  %v7425_v59 = vld [vmem:[%s10574_s5 + $0x8] ss:$20 sps:$4 sm:$0xff]  }
 0x98b   : > { %4416 = vmatprep.subr.bf16.mxu0 %v3860_v22  ;;  %v3922_v14 = vpop.permute.xlu1 %3921  ;;  %v3939_v33 = vsel %vm493_vm0, %v3916_v15, %v3918_v60  ;;  %v7428_v15 = vld [vmem:[%s10574_s5 + $0x34] ss:$20 sps:$4 sm:$0xff]  }
 0x98c   : > { %v3941_v55 = vsel %vm493_vm0, %v3922_v14, %v3924_v16 }
 0x98e   : > { %v3926_v53 = vpop.permute.xlu0 %3925  ;;  %4417 = vmatpush1.bf16.msra.mxu0 %v3859_v58 }
 0x98f   : > { %v3852_v54 = vpop.permute.xlu1 %3851  ;;  %v3942_v36 = vsel %vm493_vm0, %v3924_v16, %v3926_v53 }
 0x990   : > { %v3862_v5 = vsel %vm524_vm1, %v3852_v54, %v3854_v41  ;;  %v3861_v45 = vsel %vm524_vm1, %v3850_v32, %v3852_v54 }
 0x991   : > { %4418 = vmatprep.subr.bf16.mxu0 %v3862_v5 }
 0x992   : > { %v3930_v37 = vpop.permute.xlu0 %3929  ;;  %4419 = vmatpush1.bf16.msra.mxu0 %v3861_v45  ;;  %v7430_v45 = vld [vmem:[%s10574_s5 + $0x30] ss:$20 sps:$4 sm:$0xff]  }
 0x993   : > { %4420 = vmatprep.subr.bf16.mxu0 %v3940_v17  ;;  %v3932_v62 = vpop.permute.xlu1 %3931  ;;  %v7431_v17 = vld [vmem:[%s10574_s5 + $0x5c] ss:$20 sps:$4 sm:$0xff]  }
 0x994   : > { %v3944_v48 = vsel %vm493_vm0, %v3930_v37, %v3932_v62 }
 0x996   : > { %v3928_v11 = vpop.permute.xlu0 %3927  ;;  %4421 = vmatpush1.bf16.msra.mxu0 %v3939_v33 }
 0x997   : > { %4422 = vmatprep.subr.bf16.mxu0 %v3942_v36  ;;  %v3934_v2 = vpop.permute.xlu1 %3933  ;;  %v3943_v43 = vsel %vm493_vm0, %v3928_v11, %v3930_v37 }
 0x99a   : > { %v3938_v21 = vpop.permute.xlu0 %3937  ;;  %4423 = vmatpush1.bf16.msra.mxu0 %v3941_v55 }
 0x99b   : > { %4424 = vmatprep.subr.bf16.mxu0 %v3944_v48  ;;  %v3992_v30 = vpop.permute.xlu1 %3991 }
 0x99e   : > { %v3990_v18 = vpop.permute.xlu0 %3989  ;;  %4425 = vmatpush1.bf16.msra.mxu0 %v3943_v43 }
 0x99f   : > { %v3936_v56 = vpop.permute.xlu1 %3935  ;;  %v4012_v47 = vsel %vm622_vm7, %v3990_v18, %v3992_v30  ;;  %v7434_v30 = vld [vmem:[%s10574_s5 + $0x84] ss:$20 sps:$4 sm:$0xff]  }
 0x9a0   : > { %v3946_v46 = vsel %vm493_vm0, %v3936_v56, %v3938_v21  ;;  %v3945_v31 = vsel %vm493_vm0, %v3934_v2, %v3936_v56  ;;  %v7433_v21 = vld [vmem:[%s10574_s5 + $0x58] ss:$20 sps:$4 sm:$0xff]  }
 0x9a1   : > { %4426 = vmatprep.subr.bf16.mxu0 %v3946_v46 }
 0x9a2   : > { %v3988_v29 = vpop.permute.xlu0 %3987  ;;  %4427 = vmatpush1.bf16.msra.mxu0 %v3945_v31 }
 0x9a3   : > { %4428 = vmatprep.subr.bf16.mxu0 %v4012_v47  ;;  %v3996_v28 = vpop.permute.xlu1 %3995  ;;  %v4011_v38 = vsel %vm622_vm7, %v3988_v29, %v3990_v18  ;;  %v7436_v47 = vld [vmem:[%s10574_s5 + $0x80] ss:$20 sps:$4 sm:$0xff]  }
 0x9a6   : > { %v3998_v32 = vpop.permute.xlu0 %3997  ;;  %4429 = vmatpush1.bf16.msra.mxu0 %v4011_v38 }
 0x9a7   : > { %v3994_v41 = vpop.permute.xlu1 %3993  ;;  %v4014_v0 = vsel %vm622_vm7, %v3996_v28, %v3998_v32 }
 0x9a8   : > { %v4013_v6 = vsel %vm622_vm7, %v3994_v41, %v3996_v28  ;;  %4430 = vmatprep.subr.bf16.mxu0 %v4014_v0  ;;  %v7437_v0 = vld [vmem:[%s10574_s5 + $0x10] ss:$20 sps:$4 sm:$0xff]  }
 0x9aa   : > { %v4002_v12 = vpop.permute.xlu0 %4001  ;;  %4431 = vmatpush1.bf16.msra.mxu0 %v4013_v6  ;;  %v7438_v6 = vld [vmem:[%s10574_s5 + $0x38] ss:$20 sps:$4 sm:$0xff]  }
 0x9ab   : > { %v4004_v57 = vpop.permute.xlu1 %4003 }
 0x9ac   : > { %v4016_v60 = vsel %vm622_vm7, %v4002_v12, %v4004_v57  ;;  %v7440_v57 = vld [vmem:[%s10574_s5 + $0x88] ss:$20 sps:$4 sm:$0xff]  }
 0x9ad   : > { %4432 = vmatprep.subr.bf16.mxu0 %v4016_v60 }
 0x9ae   : > { %v4000_v51 = vpop.permute.xlu0 %3999 }
 0x9af   : > { %v4015_v9 = vsel %vm622_vm7, %v4000_v51, %v4002_v12  ;;  %v4008_v16 = vpop.permute.xlu1 %4007  ;;  %v7439_v12 = vld [vmem:[%s10574_s5 + $0x60] ss:$20 sps:$4 sm:$0xff]  }
 0x9b0   : > { %4433 = vmatpush1.bf16.msra.mxu0 %v4015_v9 }
 0x9b2   : > { %v4010_v22 = vpop.permute.xlu0 %4009 }
 0x9b3   : > { %4435 = vmatmul.mubr.bf16.vlgmr.msra.gmra.mrb[20].mxu0 %v7425_v59  ;;  %v4006_v14 = vpop.permute.xlu1 %4005  ;;  %v4018_v58 = vsel %vm622_vm7, %v4008_v16, %v4010_v22 }
 0x9b4   : > { %v4017_v53 = vsel %vm622_vm7, %v4006_v14, %v4008_v16  ;;  %4475 = vmatprep.subr.bf16.mxu0 %v4018_v58  ;;  %4444 = vmatprep.mubr.bf16.mxu0 %v7428_v15 }
 0x9b5   : > { %4476 = vmatpush1.bf16.msra.mxu0 %v4017_v53 }
 0x9b6   : > { %v4074_v54 = vpop.permute.xlu0 %4073 }
 0x9b7   : > { %v4076_v5 = vpop.permute.xlu1 %4075 }
 0x9b8   : > { %v4096_v37 = vsel %vm441_vm15, %v4074_v54, %v4076_v5 }
 0x9b9   : > { %4477 = vmatprep.subr.bf16.mxu0 %v4096_v37 }
 0x9ba   : > { %v4072_v62 = vpop.permute.xlu0 %4071 }
 0x9bb   : > { %v4095_v33 = vsel %vm441_vm15, %v4072_v62, %v4074_v54  ;;  %4445 = vmatmul.mubr.bf16.gmra.mrb[24].mxu0 %v7430_v45  ;;  %v4080_v11 = vpop.permute.xlu1 %4079 }
 0x9bc   : > { %4478 = vmatpush1.bf16.msra.mxu0 %v4095_v33  ;;  %4454 = vmatprep.mubr.bf16.mxu0 %v7431_v17 }
 0x9be   : > { %v4082_v36 = vpop.permute.xlu0 %4081 }
 0x9bf   : > { %v4078_v2 = vpop.permute.xlu1 %4077  ;;  %v4098_v55 = vsel %vm441_vm15, %v4080_v11, %v4082_v36 }
 0x9c0   : > { %v4097_v48 = vsel %vm441_vm15, %v4078_v2, %v4080_v11  ;;  %4479 = vmatprep.subr.bf16.mxu0 %v4098_v55 }
 0x9c1   : > { %4480 = vmatpush1.bf16.msra.mxu0 %v4097_v48 }
 0x9c2   : > { %v4086_v43 = vpop.permute.xlu0 %4085 }
 0x9c3   : > { %4455 = vmatmul.mubr.bf16.gmra.mrb[28].mxu0 %v7433_v21  ;;  %v4088_v18 = vpop.permute.xlu1 %4087 }
 0x9c4   : > { %v4100_v56 = vsel %vm441_vm15, %v4086_v43, %v4088_v18  ;;  %4464 = vmatprep.mubr.bf16.mxu0 %v7434_v30 }
 0x9c5   : > { %4481 = vmatprep.subr.bf16.mxu0 %v4100_v56 }
 0x9c6   : > { %v4084_v46 = vpop.permute.xlu0 %4083 }
 0x9c7   : > { %v4099_v31 = vsel %vm441_vm15, %v4084_v46, %v4086_v43  ;;  %v4092_v29 = vpop.permute.xlu1 %4091 }
 0x9c8   : > { %4482 = vmatpush1.bf16.msra.mxu0 %v4099_v31 }
 0x9ca   : > { %v4094_v28 = vpop.permute.xlu0 %4093 }
 0x9cb   : > { %4465 = vmatmul.mubr.bf16.gmra.mrb[32].mxu0 %v7436_v47  ;;  %v4090_v38 = vpop.permute.xlu1 %4089  ;;  %v4102_v32 = vsel %vm441_vm15, %v4092_v29, %v4094_v28 }
 0x9cc   : > { %v4101_v41 = vsel %vm441_vm15, %v4090_v38, %v4092_v29  ;;  %4483 = vmatprep.subr.bf16.mxu0 %v4102_v32  ;;  %4507 = vmatprep.mubr.bf16.mxu0 %v10627_v19 }
 0x9cd   : > { %4484 = vmatpush1.bf16.msra.mxu0 %v4101_v41 }
 0x9ce   : > { %7143 = vmatprep.subr.msk.bf16.mxu0 %vm7565_vm4, %v7563_v4 }
 0x9d3   : > { %7065 = vmatmul.mubr.msk.bf16.vlgmr.msra.gmra.mrb[20].mxu0 %vm2026_vm10, %v7437_v0 }
 0x9d4   : > { %4517 = vmatprep.mubr.bf16.mxu0 %v10627_v19  ;;  %7146 = vmatpush1.bf16.msk.msra.mxu0 %vm7565_vm4, %v7563_v4 }
 0x9db   : > { %7066 = vmatmul.mubr.msk.bf16.gmra.mrb[24].mxu0 %vm2026_vm10, %v7438_v6 }
 0x9dc   : > { %4527 = vmatprep.mubr.bf16.mxu0 %v10627_v19 }
 0x9e3   : > { %7067 = vmatmul.mubr.msk.bf16.gmra.mrb[28].mxu0 %vm2026_vm10, %v7439_v12 }
 0x9e4   : > { %4537 = vmatprep.mubr.bf16.mxu0 %v10627_v19 }
 0x9eb   : > { %7068 = vmatmul.mubr.msk.bf16.gmra.mrb[32].mxu0 %vm2026_vm10, %v7440_v57 }
 0xaa6   : > { %v4509_v60 = vpop.f32.mrb[20].mxu0 }
 0xaa7   : > { %v4564_v51 = vmul.f32 0.01, %v4509_v60  ;;  %v4511_v9 = vpop.f32.mrb[21].mxu0  ;;  %vm4548_vm13 = vcmp.gt.f32.partialorder %v4509_v60, 0.0 }
 0xaa8   : > { %v4565_v16 = vmul.f32 0.01, %v4511_v9  ;;  %v4513_v59 = vpop.f32.mrb[22].mxu0  ;;  %vm4549_vm14 = vcmp.gt.f32.partialorder %v4511_v9, 0.0 }
 0xaa9   : > { %vm4550_vm8 = vcmp.gt.f32.partialorder %v4513_v59, 0.0  ;;  %v4566_v15 = vmul.f32 0.01, %v4513_v59  ;;  %v4515_v22 = vpop.f32.mrb[23].mxu0  ;;  %v4580_v58 = vsel %vm4548_vm13, %v4509_v60, %v4564_v51 }
 0xaaa   : > { %vm4551_vm9 = vcmp.gt.f32.partialorder %v4515_v22, 0.0  ;;  %v4567_v14 = vmul.f32 0.01, %v4515_v22  ;;  %v4581_v54 = vsel %vm4549_vm14, %v4511_v9, %v4565_v16 }
 0xaab   : > { %v4582_v53 = vsel %vm4550_vm8, %v4513_v59, %v4566_v15 }
 0xaac   : > { %v9560_v5 = vpack.c.bf16 %v4582_v53, %v4580_v58  ;;  %v4583_v45 = vsel %vm4551_vm9, %v4515_v22, %v4567_v14 }
 0xaad   : > { %v9562_v37 = vpack.c.bf16 %v4583_v45, %v4581_v54 }
 0xaae   : > { %v4519_v17 = vpop.f32.mrb[24].mxu0  ;;  %4722 = vrot.lane.b32.xlu0 %v9560_v5, %s7503_s21  ;;  %v4625_v2 = vmul.bf16 %v9560_v5, %v7681_v42  ;;  %v4781_v29 = vmul.bf16 %v9560_v5, %v7705_v49 }
 0xaaf   : > { %v4568_v62 = vmul.f32 0.01, %v4519_v17  ;;  %v4521_v33 = vpop.f32.mrb[25].mxu0  ;;  %4724 = vrot.lane.b32.xlu1 %v9562_v37, %s7503_s21  ;;  %vm4552_vm12 = vcmp.gt.f32.partialorder %v4519_v17, 0.0  ;;  %v4626_v48 = vmul.bf16 %v9562_v37, %v7674_v40  ;;  %v4782_v28 = vmul.bf16 %v9562_v37, %v7672_v39 }
 0xab0   : > { %v4569_v11 = vmul.f32 0.01, %v4521_v33  ;;  %v4523_v36 = vpop.f32.mrb[26].mxu0  ;;  %vm4553_vm13 = vcmp.gt.f32.partialorder %v4521_v33, 0.0 }
 0xab1   : > { %vm4554_vm14 = vcmp.gt.f32.partialorder %v4523_v36, 0.0  ;;  %v4570_v55 = vmul.f32 0.01, %v4523_v36  ;;  %v4525_v21 = vpop.f32.mrb[27].mxu0  ;;  %v4584_v43 = vsel %vm4552_vm12, %v4519_v17, %v4568_v62 }
 0xab2   : > { %vm4555_vm8 = vcmp.gt.f32.partialorder %v4525_v21, 0.0  ;;  %v4571_v30 = vmul.f32 0.01, %v4525_v21  ;;  %4650 = vrot.lane.b32.xlu0 %v4625_v2, %s7502_s20  ;;  %v4585_v56 = vsel %vm4553_vm13, %v4521_v33, %v4569_v11 }
 0xab3   : > { %v4586_v18 = vsel %vm4554_vm14, %v4523_v36, %v4570_v55  ;;  %4652 = vrot.lane.b32.xlu1 %v4626_v48, %s7502_s20 }
 0xab4   : > { %v9574_v46 = vpack.c.bf16 %v4586_v18, %v4584_v43  ;;  %v4587_v31 = vsel %vm4555_vm8, %v4525_v21, %v4571_v30 }
 0xab5   : > { %v9578_v47 = vpack.c.bf16 %v4587_v31, %v4585_v56 }
 0xab6   : > { %v4529_v38 = vpop.f32.mrb[28].mxu0  ;;  %4806 = vrot.lane.b32.xlu0 %v4781_v29, %s7501_s19  ;;  %v4628_v58 = vmul.bf16 %v9574_v46, %v7681_v42 }
 0xab7   : > { %v4572_v32 = vmul.f32 0.01, %v4529_v38  ;;  %v4531_v41 = vpop.f32.mrb[29].mxu0  ;;  %4808 = vrot.lane.b32.xlu1 %v4782_v28, %s7501_s19  ;;  %vm4556_vm9 = vcmp.gt.f32.partialorder %v4529_v38, 0.0  ;;  %v4629_v22 = vmul.bf16 %v9578_v47, %v7674_v40  ;;  %v4780_v28 = vmul.bf16 %v9406_v25, %v7658_v35 }
 0xab8   : > { %v4573_v0 = vmul.f32 0.01, %v4531_v41  ;;  %v4533_v6 = vpop.f32.mrb[30].mxu0  ;;  %vm4557_vm12 = vcmp.gt.f32.partialorder %v4531_v41, 0.0 }
 0xab9   : > { %vm4558_vm13 = vcmp.gt.f32.partialorder %v4533_v6, 0.0  ;;  %v4574_v12 = vmul.f32 0.01, %v4533_v6  ;;  %v4535_v57 = vpop.f32.mrb[31].mxu0  ;;  %v4588_v51 = vsel %vm4556_vm9, %v4529_v38, %v4572_v32  ;;  %v4784_v38 = vmul.bf16 %v9574_v46, %v7705_v49 }
 0xaba   : > { %vm4559_vm14 = vcmp.gt.f32.partialorder %v4535_v57, 0.0  ;;  %v4575_v60 = vmul.f32 0.01, %v4535_v57  ;;  %4730 = vrot.lane.b32.xlu0 %v9578_v47, %s7503_s21  ;;  %v4589_v16 = vsel %vm4557_vm12, %v4531_v41, %v4573_v0  ;;  %v4785_v32 = vmul.bf16 %v9578_v47, %v7672_v39 }
 0xabb   : > { %v4590_v9 = vsel %vm4558_vm13, %v4533_v6, %v4574_v12  ;;  %4728 = vrot.lane.b32.xlu1 %v9574_v46, %s7503_s21  ;;  %v4783_v41 = vmul.bf16 %v9409_v3, %v7658_v35  ;;  %v4786_v12 = vmul.bf16 %v9418_v27, %v7658_v35 }
 0xabc   : > { %v9588_v59 = vpack.c.bf16 %v4590_v9, %v4588_v51  ;;  %v4591_v15 = vsel %vm4559_vm14, %v4535_v57, %v4575_v60  ;;  %v4865_v60 = vmul.bf16 %v9560_v5, %v10628_v61  ;;  %v4789_v51 = vmul.bf16 %v9421_v34, %v7658_v35 }
 0xabd   : > { %v9592_v14 = vpack.c.bf16 %v4591_v15, %v4589_v16  ;;  %v4864_v9 = vmul.bf16 %v9406_v25, %v10630_v7  ;;  %v4866_v16 = vmul.bf16 %v9562_v37, %v10631_v52  ;;  %v4869_v15 = vmul.bf16 %v9578_v47, %v10631_v52 }
 0xabe   : > { %v4539_v53 = vpop.f32.mrb[32].mxu0  ;;  %4658 = vrot.lane.b32.xlu0 %v4629_v22, %s7502_s20  ;;  %v4631_v43 = vmul.bf16 %v9588_v59, %v7681_v42  ;;  %v4787_v0 = vmul.bf16 %v9588_v59, %v7705_v49  ;;  %v4868_v22 = vmul.bf16 %v9574_v46, %v10628_v61 }
 0xabf   : > { %v4576_v54 = vmul.f32 0.01, %v4539_v53  ;;  %v4541_v45 = vpop.f32.mrb[33].mxu0  ;;  %4656 = vrot.lane.b32.xlu1 %v4628_v58, %s7502_s20  ;;  %vm4560_vm8 = vcmp.gt.f32.partialorder %v4539_v53, 0.0  ;;  %v4632_v56 = vmul.bf16 %v9592_v14, %v7674_v40  ;;  %v4788_v6 = vmul.bf16 %v9592_v14, %v7672_v39 }
 0xac0   : > { %v4577_v17 = vmul.f32 0.01, %v4541_v45  ;;  %v4543_v62 = vpop.f32.mrb[34].mxu0  ;;  %vm4561_vm9 = vcmp.gt.f32.partialorder %v4541_v45, 0.0  ;;  %v4867_v58 = vmul.bf16 %v9409_v3, %v10630_v7  ;;  %v4870_v3 = vmul.bf16 %v9418_v27, %v10630_v7 }
 0xac1   : > { %vm4562_vm12 = vcmp.gt.f32.partialorder %v4543_v62, 0.0  ;;  %v4578_v33 = vmul.f32 0.01, %v4543_v62  ;;  %v4545_v11 = vpop.f32.mrb[35].mxu0  ;;  %v4592_v2 = vsel %vm4560_vm8, %v4539_v53, %v4576_v54  ;;  %v4871_v53 = vmul.bf16 %v9588_v59, %v10628_v61 }
 0xac2   : > { %vm4563_vm13 = vcmp.gt.f32.partialorder %v4545_v11, 0.0  ;;  %v4579_v36 = vmul.f32 0.01, %v4545_v11  ;;  %4734 = vrot.lane.b32.xlu0 %v9588_v59, %s7503_s21  ;;  %v4593_v21 = vsel %vm4561_vm9, %v4541_v45, %v4577_v17  ;;  %v4872_v54 = vmul.bf16 %v9592_v14, %v10631_v52  ;;  %v7443_v45 = vld [vmem:[%s10575_s6 + $0x4] ss:$20 sps:$4 sm:$0xff]  }
 0xac3   : > { %v4594_v55 = vsel %vm4562_vm12, %v4543_v62, %v4578_v33  ;;  %4736 = vrot.lane.b32.xlu1 %v9592_v14, %s7503_s21  ;;  %5542 = vmatprep.mubr.bf16.mxu1 %v7443_v45  ;;  %v4965_v62 = vmul.bf16 %v9562_v37, %v10632_v13  ;;  %v4873_v33 = vmul.bf16 %v9421_v34, %v10630_v7 }
 0xac4   : > { %v9602_v48 = vpack.c.bf16 %v4594_v55, %v4592_v2  ;;  %v4595_v30 = vsel %vm4563_vm13, %v4545_v11, %v4579_v36  ;;  %v9690_v11 = vld [vmem:[#allocation3 + $0x18] sm:$0xff]  ;;  %v4964_v2 = vmul.bf16 %v9560_v5, %v10634_v26  ;;  %v4968_v34 = vmul.bf16 %v9578_v47, %v10632_v13 }
 0xac5   : > { %v9606_v18 = vpack.c.bf16 %v4595_v30, %v4593_v21  ;;  %v4966_v36 = vmul.bf16 %v9690_v11, %v10633_v24  ;;  %v9703_v55 = vld [vmem:[#allocation3 + $0x38] sm:$0xff]  ;;  %v4967_v30 = vmul.bf16 %v9574_v46, %v10634_v26 }
 0xac6   : > { %4662 = vrot.lane.b32.xlu0 %v4631_v43, %s7502_s20  ;;  %v4634_v29 = vmul.bf16 %v9602_v48, %v7681_v42  ;;  %v4790_v57 = vmul.bf16 %v9602_v48, %v7705_v49  ;;  %v4874_v17 = vmul.bf16 %v9602_v48, %v10628_v61  ;;  %v4969_v21 = vmul.bf16 %v9703_v55, %v10633_v24  ;;  %v9712_v43 = vld [vmem:[#allocation3 + $0x58] sm:$0xff] }
 0xac7   : > { %4664 = vrot.lane.b32.xlu1 %v4632_v56, %s7502_s20  ;;  %v4635_v31 = vmul.bf16 %v9606_v18, %v7674_v40  ;;  %v4791_v25 = vmul.bf16 %v9606_v18, %v7672_v39  ;;  %v4875_v27 = vmul.bf16 %v9606_v18, %v10631_v52  ;;  %v4971_v56 = vmul.bf16 %v9592_v14, %v10632_v13 }
 0xaca   : > { %4742 = vrot.lane.b32.xlu0 %v9606_v18, %s7503_s21 }
 0xacb   : > { %4740 = vrot.lane.b32.xlu1 %v9602_v48, %s7503_s21 }
 0xace   : > { %4670 = vrot.lane.b32.xlu0 %v4635_v31, %s7502_s20  ;;  %v4972_v31 = vmul.bf16 %v9712_v43, %v10633_v24 }
 0xacf   : > { %4668 = vrot.lane.b32.xlu1 %v4634_v29, %s7502_s20  ;;  %v4649_v29 = vpop.permute.xlu0 %4648 }
 0xad2   : > { %4804 = vrot.lane.b32.xlu0 %v4780_v28, %s7501_s19  ;;  %v4655_v28 = vpop.permute.xlu1 %4654 }
 0xad3   : > { %4812 = vrot.lane.b32.xlu1 %v4784_v38, %s7501_s19  ;;  %v4970_v38 = vmul.bf16 %v9588_v59, %v10634_v26 }
 0xad6   : > { %4814 = vrot.lane.b32.xlu0 %v4785_v32, %s7501_s19  ;;  %v4973_v32 = vmul.bf16 %v9602_v48, %v10634_v26 }
 0xad7   : > { %4810 = vrot.lane.b32.xlu1 %v4783_v41, %s7501_s19  ;;  %v9725_v41 = vld [vmem:[#allocation3 + $0x78] sm:$0xff] }
 0xada   : > { %4818 = vrot.lane.b32.xlu0 %v4787_v0, %s7501_s19  ;;  %v9729_v0 = vpop.permute.xlu0 %4660 }
 0xadb   : > { %4820 = vrot.lane.b32.xlu1 %v4788_v6, %s7501_s19  ;;  %v4975_v6 = vmul.bf16 %v9725_v41, %v10633_v24 }
 0xade   : > { %4816 = vrot.lane.b32.xlu0 %v4786_v12, %s7501_s19  ;;  %v9733_v12 = vpop.permute.xlu1 %4666 }
 0xadf   : > { %4824 = vrot.lane.b32.xlu1 %v4790_v57, %s7501_s19  ;;  %v5050_v57 = vmul.bf16 %v9690_v11, %v10635_v63 }
 0xae2   : > { %4890 = vrot.lane.b32.xlu0 %v4865_v60, %s7500_s18  ;;  %v5049_v60 = vmul.bf16 %v9562_v37, %v10636_v50 }
 0xae3   : > { %4822 = vrot.lane.b32.xlu1 %v4789_v51, %s7501_s19  ;;  %v9741_v51 = vpop.permute.xlu0 %4720 }
 0xae6   : > { %4888 = vrot.lane.b32.xlu0 %v4864_v9, %s7500_s18  ;;  %v5052_v9 = vmul.bf16 %v9578_v47, %v10636_v50 }
 0xae7   : > { %4892 = vrot.lane.b32.xlu1 %v4866_v16, %s7500_s18  ;;  %v9745_v16 = vpop.permute.xlu1 %4726 }
 0xaea   : > { %4898 = vrot.lane.b32.xlu0 %v4869_v15, %s7500_s18  ;;  %v5048_v15 = vmul.bf16 %v9560_v5, %v10637_v1 }
 0xaeb   : > { %4896 = vrot.lane.b32.xlu1 %v4868_v22, %s7500_s18  ;;  %v5051_v22 = vmul.bf16 %v9574_v46, %v10637_v1 }
 0xaee   : > { %4826 = vrot.lane.b32.xlu0 %v4791_v25, %s7501_s19  ;;  %v9754_v25 = vpop.permute.xlu0 %4732 }
 0xaef   : > { %4894 = vrot.lane.b32.xlu1 %v4867_v58, %s7500_s18  ;;  %v9757_v58 = vpop.permute.xlu1 %4738 }
 0xaf2   : > { %4902 = vrot.lane.b32.xlu0 %v4871_v53, %s7500_s18  ;;  %v5053_v53 = vmul.bf16 %v9703_v55, %v10635_v63 }
 0xaf3   : > { %4904 = vrot.lane.b32.xlu1 %v4872_v54, %s7500_s18  ;;  %v4974_v54 = vmul.bf16 %v9606_v18, %v10632_v13 }
 0xaf6   : > { %4900 = vrot.lane.b32.xlu0 %v4870_v3, %s7500_s18  ;;  %v5055_v3 = vmul.bf16 %v9592_v14, %v10636_v50 }
 0xaf7   : > { %4908 = vrot.lane.b32.xlu1 %v4874_v17, %s7500_s18 }
 0xafa   : > { %4990 = vrot.lane.b32.xlu0 %v4965_v62, %s7499_s17  ;;  %v5056_v62 = vmul.bf16 %v9712_v43, %v10635_v63 }
 0xafb   : > { %4906 = vrot.lane.b32.xlu1 %v4873_v33, %s7500_s18 }
 0xafe   : > { %4910 = vrot.lane.b32.xlu0 %v4875_v27, %s7500_s18  ;;  %v5054_v27 = vmul.bf16 %v9588_v59, %v10637_v1 }
 0xaff   : > { %4992 = vrot.lane.b32.xlu1 %v4966_v36, %s7499_s17 }
 0xb02   : > { %4988 = vrot.lane.b32.xlu0 %v4964_v2, %s7499_s17  ;;  %v5057_v2 = vmul.bf16 %v9602_v48, %v10637_v1 }
 0xb03   : > { %4996 = vrot.lane.b32.xlu1 %v4968_v34, %s7499_s17 }
 0xb06   : > { %4998 = vrot.lane.b32.xlu0 %v4969_v21, %s7499_s17 }
 0xb07   : > { %4994 = vrot.lane.b32.xlu1 %v4967_v30, %s7499_s17 }
 0xb0a   : > { %5002 = vrot.lane.b32.xlu0 %v4971_v56, %s7499_s17  ;;  %v5059_v56 = vmul.bf16 %v9725_v41, %v10635_v63 }
 0xb0b   : > { %5004 = vrot.lane.b32.xlu1 %v4972_v31, %s7499_s17 }
 0xb0e   : > { %5000 = vrot.lane.b32.xlu0 %v4970_v38, %s7499_s17 }
 0xb0f   : > { %5006 = vrot.lane.b32.xlu1 %v4973_v32, %s7499_s17 }
 0xb12   : > { %5010 = vrot.lane.b32.xlu0 %v4975_v6, %s7499_s17  ;;  %v5058_v6 = vmul.bf16 %v9606_v18, %v10636_v50 }
 0xb13   : > { %5076 = vrot.lane.b32.xlu1 %v5050_v57, %s7497_s15 }
 0xb16   : > { %5074 = vrot.lane.b32.xlu0 %v5049_v60, %s7497_s15 }
 0xb17   : > { %5080 = vrot.lane.b32.xlu1 %v5052_v9, %s7497_s15 }
 0xb1a   : > { %5072 = vrot.lane.b32.xlu0 %v5048_v15, %s7497_s15 }
 0xb1b   : > { %5078 = vrot.lane.b32.xlu1 %v5051_v22, %s7497_s15 }
 0xb1e   : > { %5082 = vrot.lane.b32.xlu0 %v5053_v53, %s7497_s15 }
 0xb1f   : > { %5008 = vrot.lane.b32.xlu1 %v4974_v54, %s7499_s17 }
 0xb20   : > { %v9765_v45 = vpop.permute.xlu0 %4722 }
 0xb21   : > { %v4725_v17 = vpop.permute.xlu1 %4724 }
 0xb22   : > { %5086 = vrot.lane.b32.xlu0 %v5055_v3, %s7497_s15 }
 0xb23   : > { %5088 = vrot.lane.b32.xlu1 %v5056_v62, %s7497_s15 }
 0xb24   : > { %v4651_v33 = vpop.permute.xlu0 %4650 }
 0xb25   : > { %v4653_v36 = vpop.permute.xlu1 %4652  ;;  %v4672_v21 = vsel %vm339_vm11, %v4649_v29, %v4651_v33 }
 0xb26   : > { %5084 = vrot.lane.b32.xlu0 %v5054_v27, %s7497_s15  ;;  %v4673_v34 = vsel %vm339_vm11, %v4651_v33, %v4653_v36 }
 0xb27   : > { %5090 = vrot.lane.b32.xlu1 %v5057_v2, %s7497_s15  ;;  %5512 = vmatprep.subr.bf16.mxu1 %v4673_v34 }
 0xb28   : > { %v9781_v30 = vpop.permute.xlu0 %4806  ;;  %5513 = vmatpush1.bf16.msra.mxu1 %v4672_v21  ;;  %v4745_v21 = vsel %vm477_vm6, %v9765_v45, %v4725_v17 }
 0xb29   : > { %v9785_v31 = vpop.permute.xlu1 %4808 }
 0xb2a   : > { %5094 = vrot.lane.b32.xlu0 %v5059_v56, %s7497_s15  ;;  %v5205_v56 = vmul.bf16 %v9562_v37, %v10638_v20 }
 0xb2b   : > { %5148 = vrot.lane.b32.xlu1 %v9690_v11, %s7504_s24 }
 0xb2c   : > { %v4731_v38 = vpop.permute.xlu0 %4730 }
 0xb2d   : > { %v4729_v32 = vpop.permute.xlu1 %4728 }
 0xb2e   : > { %5146 = vrot.lane.b32.xlu0 %v9562_v37, %s7504_s24  ;;  %v4747_v17 = vsel %vm477_vm6, %v4729_v32, %v4731_v38  ;;  %v5209_v38 = vmul.bf16 %v9703_v55, %v10639_v10 }
 0xb2f   : > { %5092 = vrot.lane.b32.xlu1 %v5058_v6, %s7497_s15 }
 0xb30   : > { %v4659_v29 = vpop.permute.xlu0 %4658 }
 0xb31   : > { %v4657_v57 = vpop.permute.xlu1 %4656 }
 0xb32   : > { %5144 = vrot.lane.b32.xlu0 %v9560_v5, %s7504_s24  ;;  %v4675_v60 = vsel %vm339_vm11, %v4657_v57, %v4659_v29  ;;  %v4674_v9 = vsel %vm339_vm11, %v4655_v28, %v4657_v57  ;;  %v5206_v29 = vmul.bf16 %v9690_v11, %v10639_v10  ;;  %v5208_v11 = vmul.bf16 %v9578_v47, %v10638_v20 }
 0xb33   : > { %5152 = vrot.lane.b32.xlu1 %v9578_v47, %s7504_s24  ;;  %5514 = vmatprep.subr.bf16.mxu1 %v4675_v60  ;;  %v5204_v60 = vmul.bf16 %v9560_v5, %v10640_v23 }
 0xb34   : > { %v4735_v15 = vpop.permute.xlu0 %4734  ;;  %5515 = vmatpush1.bf16.msra.mxu1 %v4674_v9 }
 0xb35   : > { %v4737_v22 = vpop.permute.xlu1 %4736 }
 0xb36   : > { %5154 = vrot.lane.b32.xlu0 %v9703_v55, %s7504_s24 }
 0xb37   : > { %5150 = vrot.lane.b32.xlu1 %v9574_v46, %s7504_s24 }
 0xb38   : > { %v4663_v53 = vpop.permute.xlu0 %4662 }
 0xb39   : > { %v4665_v54 = vpop.permute.xlu1 %4664  ;;  %v4676_v3 = vsel %vm339_vm11, %v9729_v0, %v4663_v53 }
 0xb3a   : > { %5158 = vrot.lane.b32.xlu0 %v9592_v14, %s7504_s24  ;;  %v4677_v28 = vsel %vm339_vm11, %v4663_v53, %v4665_v54  ;;  %v4746_v53 = vsel %vm477_vm6, %v9745_v16, %v4729_v32 }
 0xb3b   : > { %5160 = vrot.lane.b32.xlu1 %v9712_v43, %s7504_s24  ;;  %5516 = vmatprep.subr.bf16.mxu1 %v4677_v28  ;;  %v5207_v28 = vmul.bf16 %v9574_v46, %v10640_v23 }
 0xb3c   : > { %v4743_v62 = vpop.permute.xlu0 %4742  ;;  %5517 = vmatpush1.bf16.msra.mxu1 %v4676_v3  ;;  %v4748_v3 = vsel %vm477_vm6, %v9754_v25, %v4735_v15 }
 0xb3d   : > { %v4741_v33 = vpop.permute.xlu1 %4740 }
 0xb3e   : > { %5156 = vrot.lane.b32.xlu0 %v9588_v59, %s7504_s24  ;;  %v4751_v32 = vsel %vm477_vm6, %v4741_v33, %v4743_v62  ;;  %v5210_v62 = vmul.bf16 %v9588_v59, %v10640_v23 }
 0xb3f   : > { %5164 = vrot.lane.b32.xlu1 %v9606_v18, %s7504_s24 }
 0xb40   : > { %v4671_v27 = vpop.permute.xlu0 %4670 }
 0xb41   : > { %v4669_v36 = vpop.permute.xlu1 %4668 }
 0xb42   : > { %5166 = vrot.lane.b32.xlu0 %v9725_v41, %s7504_s24  ;;  %v4679_v2 = vsel %vm339_vm11, %v4669_v36, %v4671_v27  ;;  %v4678_v34 = vsel %vm339_vm11, %v9733_v12, %v4669_v36  ;;  %v4744_v12 = vsel %vm477_vm6, %v9741_v51, %v9765_v45  ;;  %v4749_v45 = vsel %vm477_vm6, %v4735_v15, %v4737_v22 }
 0xb43   : > { %5162 = vrot.lane.b32.xlu1 %v9602_v48, %s7504_s24  ;;  %5518 = vmatprep.subr.bf16.mxu1 %v4679_v2  ;;  %v5211_v22 = vmul.bf16 %v9592_v14, %v10638_v20  ;;  %v5212_v27 = vmul.bf16 %v9712_v43, %v10639_v10  ;;  %v4750_v36 = vsel %vm477_vm6, %v9757_v58, %v4741_v33 }
 0xb44   : > { %v4805_v0 = vpop.permute.xlu0 %4804  ;;  %5519 = vmatpush1.bf16.msra.mxu1 %v4678_v34  ;;  %v4829_v15 = vsel %vm510_vm3, %v9781_v30, %v9785_v31  ;;  %v5214_v43 = vmul.bf16 %v9606_v18, %v10638_v20  ;;  %v5215_v31 = vmul.bf16 %v9725_v41, %v10639_v10 }
 0xb45   : > { %5520 = vmatprep.subr.bf16.mxu1 %v4745_v21  ;;  %v4813_v6 = vpop.permute.xlu1 %4812  ;;  %v4828_v34 = vsel %vm510_vm3, %v4805_v0, %v9781_v30 }
 0xb46   : > { %5230 = vrot.lane.b32.xlu0 %v5205_v56, %s7498_s16  ;;  %v5213_v56 = vmul.bf16 %v9602_v48, %v10640_v23 }
 0xb47   : > { %5232 = vrot.lane.b32.xlu1 %v5206_v29, %s7498_s16  ;;  %v9877_v29 = vld [vmem:[#allocation2] sm:$0xff] }
 0xb48   : > { %v4815_v57 = vpop.permute.xlu0 %4814  ;;  %5521 = vmatpush1.bf16.msra.mxu1 %v4744_v12  ;;  %v9880_v12 = vld [vmem:[#allocation2 + $0x20] sm:$0xff]  ;;  %v5757_v41 = vmul.bf16 %v9877_v29, %v10641_v44 }
 0xb49   : > { %5522 = vmatprep.subr.bf16.mxu1 %v4747_v17  ;;  %v4811_v9 = vpop.permute.xlu1 %4810  ;;  %v4831_v33 = vsel %vm510_vm3, %v4813_v6, %v4815_v57 }
 0xb4a   : > { %5228 = vrot.lane.b32.xlu0 %v5204_v60, %s7498_s16  ;;  %v4830_v30 = vsel %vm510_vm3, %v4811_v9, %v4813_v6  ;;  %v5760_v60 = vmul.bf16 %v9880_v12, %v10641_v44 }
 0xb4b   : > { %5236 = vrot.lane.b32.xlu1 %v5208_v11, %s7498_s16  ;;  %v9889_v11 = vld [vmem:[#allocation2 + $0x40] sm:$0xff] }
 0xb4c   : > { %v4819_v51 = vpop.permute.xlu0 %4818  ;;  %5523 = vmatpush1.bf16.msra.mxu1 %v4746_v53  ;;  %v9892_v53 = vld [vmem:[#allocation2 + $0x60] sm:$0xff] }
 0xb4d   : > { %5524 = vmatprep.subr.bf16.mxu1 %v4749_v45  ;;  %v4821_v54 = vpop.permute.xlu1 %4820  ;;  %v5763_v45 = vmul.bf16 %v9889_v11, %v10641_v44 }
 0xb4e   : > { %5238 = vrot.lane.b32.xlu0 %v5209_v38, %s7498_s16  ;;  %v4833_v57 = vsel %vm510_vm3, %v4819_v51, %v4821_v54 }
 0xb4f   : > { %5234 = vrot.lane.b32.xlu1 %v5207_v28, %s7498_s16  ;;  %v5766_v28 = vmul.bf16 %v9892_v53, %v10641_v44 }
 0xb50   : > { %v4817_v16 = vpop.permute.xlu0 %4816  ;;  %5525 = vmatpush1.bf16.msra.mxu1 %v4748_v3 }
 0xb51   : > { %5526 = vmatprep.subr.bf16.mxu1 %v4751_v32  ;;  %v4825_v55 = vpop.permute.xlu1 %4824  ;;  %v4832_v6 = vsel %vm510_vm3, %v4817_v16, %v4819_v51 }
 0xb52   : > { %5242 = vrot.lane.b32.xlu0 %v5211_v22, %s7498_s16 }
 0xb53   : > { %5244 = vrot.lane.b32.xlu1 %v5212_v27, %s7498_s16 }
 0xb54   : > { %v4891_v25 = vpop.permute.xlu0 %4890  ;;  %5527 = vmatpush1.bf16.msra.mxu1 %v4750_v36 }
 0xb55   : > { %5528 = vmatprep.subr.bf16.mxu1 %v4829_v15  ;;  %v4823_v2 = vpop.permute.xlu1 %4822 }
 0xb56   : > { %5240 = vrot.lane.b32.xlu0 %v5210_v62, %s7498_s16  ;;  %v4834_v3 = vsel %vm510_vm3, %v4823_v2, %v4825_v55  ;;  %v5913_v2 = vmul.bf16 %v9877_v29, %v7658_v35 }
 0xb57   : > { %5248 = vrot.lane.b32.xlu1 %v5214_v43, %s7498_s16 }
 0xb58   : > { %v4889_v58 = vpop.permute.xlu0 %4888  ;;  %5529 = vmatpush1.bf16.msra.mxu1 %v4828_v34  ;;  %v5916_v34 = vmul.bf16 %v9880_v12, %v7658_v35 }
 0xb59   : > { %5530 = vmatprep.subr.bf16.mxu1 %v4831_v33  ;;  %v4893_v21 = vpop.permute.xlu1 %4892  ;;  %v4912_v22 = vsel %vm541_vm2, %v4889_v58, %v4891_v25  ;;  %v7441_v33 = vld [vmem:[%s10575_s6] ss:$20 sps:$4 sm:$0xff]  }
 0xb5a   : > { %5250 = vrot.lane.b32.xlu0 %v5215_v31, %s7498_s16  ;;  %v4913_v16 = vsel %vm541_vm2, %v4891_v25, %v4893_v21  ;;  %v7444_v21 = vld [vmem:[%s10575_s6 + $0x2c] ss:$20 sps:$4 sm:$0xff]  }
 0xb5b   : > { %5246 = vrot.lane.b32.xlu1 %v5213_v56, %s7498_s16 }
 0xb5c   : > { %v4899_v0 = vpop.permute.xlu0 %4898  ;;  %5531 = vmatpush1.bf16.msra.mxu1 %v4830_v30 }
 0xb5d   : > { %5532 = vmatprep.subr.bf16.mxu1 %v4833_v57  ;;  %v4897_v17 = vpop.permute.xlu1 %4896 }
 0xb5e   : > { %5781 = vrot.lane.b32.xlu0 %v5757_v41, %s7502_s20 }
 0xb5f   : > { %5787 = vrot.lane.b32.xlu1 %v5760_v60, %s7502_s20 }
 0xb60   : > { %v4827_v9 = vpop.permute.xlu0 %4826  ;;  %5533 = vmatpush1.bf16.msra.mxu1 %v4832_v6  ;;  %v7447_v6 = vld [vmem:[%s10575_s6 + $0x54] ss:$20 sps:$4 sm:$0xff]  }
 0xb61   : > { %v4895_v38 = vpop.permute.xlu1 %4894  ;;  %v4835_v54 = vsel %vm510_vm3, %v4825_v55, %v4827_v9  ;;  %v4915_v55 = vsel %vm541_vm2, %v4897_v17, %v4899_v0 }
 0xb62   : > { %5793 = vrot.lane.b32.xlu0 %v5763_v45, %s7502_s20  ;;  %5534 = vmatprep.subr.bf16.mxu1 %v4835_v54  ;;  %v4914_v15 = vsel %vm541_vm2, %v4895_v38, %v4897_v17  ;;  %v7446_v17 = vld [vmem:[%s10575_s6 + $0x28] ss:$20 sps:$4 sm:$0xff]   ;;  %v7449_v38 = vld [vmem:[%s10575_s6 + $0x50] ss:$20 sps:$4 sm:$0xff]  }
 0xb63   : > { %5799 = vrot.lane.b32.xlu1 %v5766_v28, %s7502_s20 }
 0xb64   : > { %v4903_v51 = vpop.permute.xlu0 %4902  ;;  %5535 = vmatpush1.bf16.msra.mxu1 %v4834_v3 }
 0xb65   : > { %5536 = vmatprep.subr.bf16.mxu1 %v4913_v16  ;;  %v4905_v32 = vpop.permute.xlu1 %4904  ;;  %v7455_v16 = vld [vmem:[%s10575_s6 + $0xc] ss:$20 sps:$4 sm:$0xff]  }
 0xb66   : > { %5853 = vrot.lane.b32.xlu0 %v9877_v29, %s7503_s21  ;;  %v4917_v25 = vsel %vm541_vm2, %v4903_v51, %v4905_v32 }
 0xb67   : > { %5859 = vrot.lane.b32.xlu1 %v9880_v12, %s7503_s21 }
 0xb68   : > { %v4901_v27 = vpop.permute.xlu0 %4900  ;;  %5537 = vmatpush1.bf16.msra.mxu1 %v4912_v22 }
 0xb69   : > { %5538 = vmatprep.subr.bf16.mxu1 %v4915_v55  ;;  %v4909_v36 = vpop.permute.xlu1 %4908  ;;  %v4916_v58 = vsel %vm541_vm2, %v4901_v27, %v4903_v51 }
 0xb6a   : > { %5865 = vrot.lane.b32.xlu0 %v9889_v11, %s7503_s21 }
 0xb6b   : > { %5871 = vrot.lane.b32.xlu1 %v9892_v53, %s7503_s21 }
 0xb6c   : > { %v4991_v62 = vpop.permute.xlu0 %4990  ;;  %5539 = vmatpush1.bf16.msra.mxu1 %v4914_v15 }
 0xb6d   : > { %5540 = vmatprep.subr.bf16.mxu1 %v4917_v25  ;;  %v4907_v43 = vpop.permute.xlu1 %4906 }
 0xb6e   : > { %5937 = vrot.lane.b32.xlu0 %v5913_v2, %s7501_s19  ;;  %v4918_v0 = vsel %vm541_vm2, %v4907_v43, %v4909_v36 }
 0xb6f   : > { %5943 = vrot.lane.b32.xlu1 %v5916_v34, %s7501_s19 }
 0xb70   : > { %v4911_v31 = vpop.permute.xlu0 %4910  ;;  %5541 = vmatpush1.bf16.msra.mxu1 %v4916_v58 }
 0xb71   : > { %v4993_v56 = vpop.permute.xlu1 %4992  ;;  %v4919_v30 = vsel %vm541_vm2, %v4909_v36, %v4911_v31 }
 0xb72   : > { %5583 = vmatprep.subr.bf16.mxu1 %v4919_v30 }
 0xb73   : > { %5543 = vmatmul.mubr.bf16.vlgmr.msra.gmra.mrb[48].mxu1 %v7441_v33 }
 0xb74   : > { %v4989_v57 = vpop.permute.xlu0 %4988  ;;  %5584 = vmatpush1.bf16.msra.mxu1 %v4918_v0  ;;  %5552 = vmatprep.mubr.bf16.mxu1 %v7444_v21 }
 0xb75   : > { %5585 = vmatprep.subr.bf16.mxu1 %v9562_v37  ;;  %v4997_v41 = vpop.permute.xlu1 %4996  ;;  %v5012_v3 = vsel %vm524_vm1, %v4989_v57, %v4991_v62 }
 0xb78   : > { %v4999_v60 = vpop.permute.xlu0 %4998  ;;  %5586 = vmatpush1.bf16.msra.mxu1 %v9560_v5 }
 0xb79   : > { %5587 = vmatprep.subr.bf16.mxu1 %v9578_v47  ;;  %v4995_v9 = vpop.permute.xlu1 %4994  ;;  %v7450_v47 = vld [vmem:[%s10575_s6 + $0x7c] ss:$20 sps:$4 sm:$0xff]  }
 0xb7a   : > { %v5014_v32 = vsel %vm524_vm1, %v4995_v9, %v4997_v41 }
 0xb7b   : > { %5553 = vmatmul.mubr.bf16.gmra.mrb[52].mxu1 %v7446_v17 }
 0xb7c   : > { %v5003_v45 = vpop.permute.xlu0 %5002  ;;  %5588 = vmatpush1.bf16.msra.mxu1 %v9574_v46  ;;  %5562 = vmatprep.mubr.bf16.mxu1 %v7447_v6 }
 0xb7d   : > { %5589 = vmatprep.subr.bf16.mxu1 %v9592_v14  ;;  %v5005_v37 = vpop.permute.xlu1 %5004  ;;  %v5013_v14 = vsel %vm524_vm1, %v4991_v62, %v4993_v56 }
 0xb7e   : > { %v5017_v27 = vsel %vm524_vm1, %v5003_v45, %v5005_v37 }
 0xb80   : > { %v5001_v5 = vpop.permute.xlu0 %5000  ;;  %5590 = vmatpush1.bf16.msra.mxu1 %v9588_v59  ;;  %v7452_v59 = vld [vmem:[%s10575_s6 + $0x78] ss:$20 sps:$4 sm:$0xff]  }
 0xb81   : > { %5591 = vmatprep.subr.bf16.mxu1 %v9606_v18  ;;  %v5007_v54 = vpop.permute.xlu1 %5006  ;;  %v5015_v18 = vsel %vm524_vm1, %v4997_v41, %v4999_v60  ;;  %v5016_v36 = vsel %vm524_vm1, %v5001_v5, %v5003_v45 }
 0xb83   : > { %5563 = vmatmul.mubr.bf16.gmra.mrb[56].mxu1 %v7449_v38 }
 0xb84   : > { %v5011_v46 = vpop.permute.xlu0 %5010  ;;  %5592 = vmatpush1.bf16.msra.mxu1 %v9602_v48  ;;  %5572 = vmatprep.mubr.bf16.mxu1 %v7450_v47 }
 0xb85   : > { %5593 = vmatprep.subr.bf16.mxu1 %v5013_v14  ;;  %v5077_v28 = vpop.permute.xlu1 %5076 }
 0xb88   : > { %v5075_v51 = vpop.permute.xlu0 %5074  ;;  %5594 = vmatpush1.bf16.msra.mxu1 %v5012_v3 }
 0xb89   : > { %5595 = vmatprep.subr.bf16.mxu1 %v5015_v18  ;;  %v5081_v48 = vpop.permute.xlu1 %5080  ;;  %v5097_v34 = vsel %vm493_vm0, %v5075_v51, %v5077_v28 }
 0xb8b   : > { %5573 = vmatmul.mubr.bf16.gmra.mrb[60].mxu1 %v7452_v59 }
 0xb8c   : > { %v5073_v22 = vpop.permute.xlu0 %5072  ;;  %5596 = vmatpush1.bf16.msra.mxu1 %v5014_v32  ;;  %5615 = vmatprep.mubr.bf16.mxu1 %v7455_v16  ;;  %v7453_v32 = vld [vmem:[%s10575_s6 + $0x8] ss:$20 sps:$4 sm:$0xff]  }
 0xb8d   : > { %5597 = vmatprep.subr.bf16.mxu1 %v5017_v27  ;;  %v5079_v55 = vpop.permute.xlu1 %5078  ;;  %v5096_v33 = vsel %vm493_vm0, %v5073_v22, %v5075_v51  ;;  %v7456_v22 = vld [vmem:[%s10575_s6 + $0x34] ss:$20 sps:$4 sm:$0xff]  }
 0xb8e   : > { %v5098_v30 = vsel %vm493_vm0, %v5079_v55, %v5081_v48 }
 0xb90   : > { %v5083_v15 = vpop.permute.xlu0 %5082  ;;  %5598 = vmatpush1.bf16.msra.mxu1 %v5016_v36 }
 0xb91   : > { %v5009_v62 = vpop.permute.xlu1 %5008  ;;  %v5099_v21 = vsel %vm493_vm0, %v5081_v48, %v5083_v15 }
 0xb92   : > { %v5019_v25 = vsel %vm524_vm1, %v5009_v62, %v5011_v46  ;;  %v5018_v2 = vsel %vm524_vm1, %v5007_v54, %v5009_v62 }
 0xb93   : > { %5599 = vmatprep.subr.bf16.mxu1 %v5019_v25 }
 0xb94   : > { %v5087_v43 = vpop.permute.xlu0 %5086  ;;  %5600 = vmatpush1.bf16.msra.mxu1 %v5018_v2  ;;  %v7458_v2 = vld [vmem:[%s10575_s6 + $0x30] ss:$20 sps:$4 sm:$0xff]  }
 0xb95   : > { %5601 = vmatprep.subr.bf16.mxu1 %v5097_v34  ;;  %v5089_v58 = vpop.permute.xlu1 %5088  ;;  %v7459_v34 = vld [vmem:[%s10575_s6 + $0x5c] ss:$20 sps:$4 sm:$0xff]  }
 0xb96   : > { %v5101_v57 = vsel %vm493_vm0, %v5087_v43, %v5089_v58 }
 0xb98   : > { %v5085_v31 = vpop.permute.xlu0 %5084  ;;  %5602 = vmatpush1.bf16.msra.mxu1 %v5096_v33 }
 0xb99   : > { %5603 = vmatprep.subr.bf16.mxu1 %v5099_v21  ;;  %v5091_v56 = vpop.permute.xlu1 %5090  ;;  %v5100_v17 = vsel %vm493_vm0, %v5085_v31, %v5087_v43 }
 0xb9c   : > { %v5095_v0 = vpop.permute.xlu0 %5094  ;;  %5604 = vmatpush1.bf16.msra.mxu1 %v5098_v30 }
 0xb9d   : > { %5605 = vmatprep.subr.bf16.mxu1 %v5101_v57  ;;  %v5149_v41 = vpop.permute.xlu1 %5148 }
 0xba0   : > { %v5147_v60 = vpop.permute.xlu0 %5146  ;;  %5606 = vmatpush1.bf16.msra.mxu1 %v5100_v17 }
 0xba1   : > { %v5093_v6 = vpop.permute.xlu1 %5092  ;;  %v5169_v38 = vsel %vm622_vm7, %v5147_v60, %v5149_v41  ;;  %v7462_v41 = vld [vmem:[%s10575_s6 + $0x84] ss:$20 sps:$4 sm:$0xff]  }
 0xba2   : > { %v5103_v9 = vsel %vm493_vm0, %v5093_v6, %v5095_v0  ;;  %v5102_v45 = vsel %vm493_vm0, %v5091_v56, %v5093_v6  ;;  %v7461_v0 = vld [vmem:[%s10575_s6 + $0x58] ss:$20 sps:$4 sm:$0xff]  }
 0xba3   : > { %5607 = vmatprep.subr.bf16.mxu1 %v5103_v9 }
 0xba4   : > { %v5145_v37 = vpop.permute.xlu0 %5144  ;;  %5608 = vmatpush1.bf16.msra.mxu1 %v5102_v45 }
 0xba5   : > { %5609 = vmatprep.subr.bf16.mxu1 %v5169_v38  ;;  %v5153_v5 = vpop.permute.xlu1 %5152  ;;  %v5168_v47 = vsel %vm622_vm7, %v5145_v37, %v5147_v60  ;;  %v7464_v38 = vld [vmem:[%s10575_s6 + $0x80] ss:$20 sps:$4 sm:$0xff]  }
 0xba8   : > { %v5155_v54 = vpop.permute.xlu0 %5154  ;;  %5610 = vmatpush1.bf16.msra.mxu1 %v5168_v47 }
 0xba9   : > { %v5151_v46 = vpop.permute.xlu1 %5150  ;;  %v5171_v14 = vsel %vm622_vm7, %v5153_v5, %v5155_v54 }
 0xbaa   : > { %v5170_v28 = vsel %vm622_vm7, %v5151_v46, %v5153_v5  ;;  %5611 = vmatprep.subr.bf16.mxu1 %v5171_v14  ;;  %v7465_v14 = vld [vmem:[%s10575_s6 + $0x10] ss:$20 sps:$4 sm:$0xff]  }
 0xbac   : > { %v5159_v3 = vpop.permute.xlu0 %5158  ;;  %5612 = vmatpush1.bf16.msra.mxu1 %v5170_v28  ;;  %v7466_v28 = vld [vmem:[%s10575_s6 + $0x38] ss:$20 sps:$4 sm:$0xff]  }
 0xbad   : > { %v5161_v59 = vpop.permute.xlu1 %5160 }
 0xbae   : > { %v5173_v51 = vsel %vm622_vm7, %v5159_v3, %v5161_v59  ;;  %v5375_v59 = vld [vmem:[#allocation2 + $0x10] sm:$0xff] }
 0xbaf   : > { %5613 = vmatprep.subr.bf16.mxu1 %v5173_v51 }
 0xbb0   : > { %v5157_v18 = vpop.permute.xlu0 %5156 }
 0xbb1   : > { %v5172_v16 = vsel %vm622_vm7, %v5157_v18, %v5159_v3  ;;  %v5165_v48 = vpop.permute.xlu1 %5164  ;;  %v7467_v3 = vld [vmem:[%s10575_s6 + $0x60] ss:$20 sps:$4 sm:$0xff]   ;;  %v5382_v18 = vunpack.c.l.bf16 %v5374_v8 }
 0xbb2   : > { %5614 = vmatpush1.bf16.msra.mxu1 %v5172_v16 }
 0xbb4   : > { %v5167_v27 = vpop.permute.xlu0 %5166 }
 0xbb5   : > { %5616 = vmatmul.mubr.bf16.vlgmr.msra.gmra.mrb[48].mxu1 %v7453_v32  ;;  %v5163_v55 = vpop.permute.xlu1 %5162  ;;  %v5175_v36 = vsel %vm622_vm7, %v5165_v48, %v5167_v27  ;;  %v5383_v32 = vunpack.c.l.bf16 %v5375_v59  ;;  %v5385_v27 = vunpack.c.h.bf16 %v5375_v59 }
 0xbb6   : > { %v5174_v15 = vsel %vm622_vm7, %v5163_v55, %v5165_v48  ;;  %5656 = vmatprep.subr.bf16.mxu1 %v5175_v36  ;;  %5625 = vmatprep.mubr.bf16.mxu1 %v7456_v22  ;;  %v5384_v48 = vunpack.c.h.bf16 %v5374_v8 }
 0xbb7   : > { %5657 = vmatpush1.bf16.msra.mxu1 %v5174_v15 }
 0xbb8   : > { %v5231_v62 = vpop.permute.xlu0 %5230 }
 0xbb9   : > { %v5233_v25 = vpop.permute.xlu1 %5232 }
 0xbba   : > { %v5253_v43 = vsel %vm441_vm15, %v5231_v62, %v5233_v25 }
 0xbbb   : > { %5658 = vmatprep.subr.bf16.mxu1 %v5253_v43 }
 0xbbc   : > { %v5229_v58 = vpop.permute.xlu0 %5228 }
 0xbbd   : > { %v5252_v33 = vsel %vm441_vm15, %v5229_v58, %v5231_v62  ;;  %5626 = vmatmul.mubr.bf16.gmra.mrb[52].mxu1 %v7458_v2  ;;  %v5237_v31 = vpop.permute.xlu1 %5236  ;;  %v5377_v58 = vld [vmem:[#allocation2 + $0x30] sm:$0xff] }
 0xbbe   : > { %5659 = vmatpush1.bf16.msra.mxu1 %v5252_v33  ;;  %5635 = vmatprep.mubr.bf16.mxu1 %v7459_v34  ;;  %v5376_v34 = vld [vmem:[#allocation2 + $0x28] sm:$0xff] }
 0xbc0   : > { %v5239_v21 = vpop.permute.xlu0 %5238 }
 0xbc1   : > { %v5235_v56 = vpop.permute.xlu1 %5234  ;;  %v5255_v30 = vsel %vm441_vm15, %v5237_v31, %v5239_v21 }
 0xbc2   : > { %v5254_v57 = vsel %vm441_vm15, %v5235_v56, %v5237_v31  ;;  %5660 = vmatprep.subr.bf16.mxu1 %v5255_v30  ;;  %v5386_v31 = vunpack.c.l.bf16 %v5376_v34  ;;  %v5388_v56 = vunpack.c.h.bf16 %v5376_v34  ;;  %v5381_v34 = vld [vmem:[#allocation2 + $0x70] sm:$0xff] }
 0xbc3   : > { %5661 = vmatpush1.bf16.msra.mxu1 %v5254_v57 }
 0xbc4   : > { %v5243_v17 = vpop.permute.xlu0 %5242 }
 0xbc5   : > { %5636 = vmatmul.mubr.bf16.gmra.mrb[56].mxu1 %v7461_v0  ;;  %v5245_v60 = vpop.permute.xlu1 %5244  ;;  %v5387_v0 = vunpack.c.l.bf16 %v5377_v58 }
 0xbc6   : > { %v5257_v6 = vsel %vm441_vm15, %v5243_v17, %v5245_v60  ;;  %5645 = vmatprep.mubr.bf16.mxu1 %v7462_v41  ;;  %v5389_v41 = vunpack.c.h.bf16 %v5377_v58 }
 0xbc7   : > { %5662 = vmatprep.subr.bf16.mxu1 %v5257_v6 }
 0xbc8   : > { %v5241_v9 = vpop.permute.xlu0 %5240 }
 0xbc9   : > { %v5256_v45 = vsel %vm441_vm15, %v5241_v9, %v5243_v17  ;;  %v5249_v37 = vpop.permute.xlu1 %5248 }
 0xbca   : > { %5663 = vmatpush1.bf16.msra.mxu1 %v5256_v45 }
 0xbcc   : > { %v5251_v5 = vpop.permute.xlu0 %5250 }
 0xbcd   : > { %5646 = vmatmul.mubr.bf16.gmra.mrb[60].mxu1 %v7464_v38  ;;  %v5247_v47 = vpop.permute.xlu1 %5246  ;;  %v5259_v54 = vsel %vm441_vm15, %v5249_v37, %v5251_v5 }
 0xbce   : > { %v5258_v46 = vsel %vm441_vm15, %v5247_v47, %v5249_v37  ;;  %5664 = vmatprep.subr.bf16.mxu1 %v5259_v54  ;;  %5688 = vmatprep.mubr.bf16.mxu1 %v10627_v19  ;;  %v5378_v54 = vld [vmem:[#allocation2 + $0x48] sm:$0xff] }
 0xbcf   : > { %5665 = vmatpush1.bf16.msra.mxu1 %v5258_v46  ;;  %v5392_v8 = vunpack.c.h.bf16 %v5378_v54 }
 0xbd0   : > { %7149 = vmatprep.subr.msk.bf16.mxu1 %vm7565_vm4, %v7563_v4 }
 0xbd5   : > { %7089 = vmatmul.mubr.msk.bf16.vlgmr.msra.gmra.mrb[48].mxu1 %vm2026_vm10, %v7465_v14  ;;  %v5379_v14 = vld [vmem:[#allocation2 + $0x50] sm:$0xff] }
 0xbd6   : > { %5698 = vmatprep.mubr.bf16.mxu1 %v10627_v19  ;;  %7152 = vmatpush1.bf16.msk.msra.mxu1 %vm7565_vm4, %v7563_v4  ;;  %v7468_v4 = vld [vmem:[%s10575_s6 + $0x88] ss:$20 sps:$4 sm:$0xff]   ;;  %v5391_v59 = vunpack.c.l.bf16 %v5379_v14 }
 0xbdd   : > { %7090 = vmatmul.mubr.msk.bf16.gmra.mrb[52].mxu1 %vm2026_vm10, %v7466_v28 }
 0xbde   : > { %5708 = vmatprep.mubr.bf16.mxu1 %v10627_v19 }
 0xbe5   : > { %7091 = vmatmul.mubr.msk.bf16.gmra.mrb[56].mxu1 %vm2026_vm10, %v7467_v3  ;;  %v5390_v3 = vunpack.c.l.bf16 %v5378_v54 }
 0xbe6   : > { %5718 = vmatprep.mubr.bf16.mxu1 %v10627_v19 }
 0xbed   : > { %7092 = vmatmul.mubr.msk.bf16.gmra.mrb[60].mxu1 %vm2026_vm10, %v7468_v4 }
 0xca8   : > { %v5690_v51 = vpop.f32.mrb[48].mxu1 }
 0xca9   : > { %v5692_v16 = vpop.f32.mrb[49].mxu1  ;;  %v7185_v55 = vadd.f32 %v5690_v51, %v5382_v18  ;;  %v5393_v18 = vunpack.c.h.bf16 %v5379_v14 }
 0xcaa   : > { %v5694_v22 = vpop.f32.mrb[50].mxu1  ;;  %v7186_v62 = vadd.f32 %v5692_v16, %v5383_v32 }
 0xcab   : > { %v7187_v36 = vadd.f32 %v5694_v22, %v5384_v48  ;;  %v5696_v15 = vpop.f32.mrb[51].mxu1 }
 0xcac   : > { %v7188_v25 = vadd.f32 %v5696_v15, %v5385_v27 }
 0xcad   : > { %v10037_v2 = vpack.c.bf16 %v7187_v36, %v7185_v55 }
 0xcae   : > { %v10039_v43 = vpack.c.bf16 %v7188_v25, %v7186_v62  ;;  %v5380_v62 = vld [vmem:[#allocation2 + $0x68] sm:$0xff] }
 0xcaf   : > { %5855 = vrot.lane.b32.xlu0 %v10037_v2, %s7503_s21  ;;  %v5758_v30 = vmul.bf16 %v10037_v2, %v7681_v42  ;;  %v5914_v5 = vmul.bf16 %v10037_v2, %v7705_v49 }
 0xcb0   : > { %v5700_v33 = vpop.f32.mrb[52].mxu1  ;;  %5857 = vrot.lane.b32.xlu1 %v10039_v43, %s7503_s21  ;;  %v5759_v17 = vmul.bf16 %v10039_v43, %v7674_v40  ;;  %v5915_v46 = vmul.bf16 %v10039_v43, %v7672_v39 }
 0xcb1   : > { %v5702_v21 = vpop.f32.mrb[53].mxu1  ;;  %v7189_v60 = vadd.f32 %v5700_v33, %v5386_v31  ;;  %v5394_v33 = vunpack.c.l.bf16 %v5380_v62 }
 0xcb2   : > { %v5704_v57 = vpop.f32.mrb[54].mxu1  ;;  %v7190_v45 = vadd.f32 %v5702_v21, %v5387_v0  ;;  %v5396_v21 = vunpack.c.h.bf16 %v5380_v62 }
 0xcb3   : > { %v7191_v6 = vadd.f32 %v5704_v57, %v5388_v56  ;;  %v5706_v9 = vpop.f32.mrb[55].mxu1  ;;  %5783 = vrot.lane.b32.xlu0 %v5758_v30, %s7502_s20  ;;  %v5395_v30 = vunpack.c.l.bf16 %v5381_v34  ;;  %v5397_v57 = vunpack.c.h.bf16 %v5381_v34  ;;  %v6006_v34 = vmul.bf16 %v9892_v53, %v10630_v7 }
 0xcb4   : > { %v7192_v37 = vadd.f32 %v5706_v9, %v5389_v41  ;;  %5785 = vrot.lane.b32.xlu1 %v5759_v17, %s7502_s20 }
 0xcb5   : > { %v10051_v38 = vpack.c.bf16 %v7191_v6, %v7189_v60 }
 0xcb6   : > { %v10055_v47 = vpack.c.bf16 %v7192_v37, %v7190_v45 }
 0xcb7   : > { %5739 = vst [vmem:[#allocation2 + $0x28] sm:$0xff] %v10051_v38  ;;  %5939 = vrot.lane.b32.xlu0 %v5914_v5, %s7501_s19  ;;  %v5761_v25 = vmul.bf16 %v10051_v38, %v7681_v42  ;;  %v5917_v41 = vmul.bf16 %v10051_v38, %v7705_v49 }
 0xcb8   : > { %5740 = vst [vmem:[#allocation2 + $0x30] sm:$0xff] %v10055_v47  ;;  %v5710_v28 = vpop.f32.mrb[56].mxu1  ;;  %5941 = vrot.lane.b32.xlu1 %v5915_v46, %s7501_s19  ;;  %v5762_v36 = vmul.bf16 %v10055_v47, %v7674_v40  ;;  %v5918_v56 = vmul.bf16 %v10055_v47, %v7672_v39 }
 0xcb9   : > { %v5712_v4 = vpop.f32.mrb[57].mxu1  ;;  %v7193_v16 = vadd.f32 %v5710_v28, %v5390_v3 }
 0xcba   : > { %v5714_v51 = vpop.f32.mrb[58].mxu1  ;;  %v7194_v22 = vadd.f32 %v5712_v4, %v5391_v59 }
 0xcbb   : > { %v7195_v48 = vadd.f32 %v5714_v51, %v5392_v8  ;;  %v5716_v32 = vpop.f32.mrb[59].mxu1  ;;  %5863 = vrot.lane.b32.xlu0 %v10055_v47, %s7503_s21  ;;  %v5919_v8 = vmul.bf16 %v9889_v11, %v7658_v35  ;;  %v5998_v51 = vmul.bf16 %v10037_v2, %v10628_v61 }
 0xcbc   : > { %v7196_v27 = vadd.f32 %v5716_v32, %v5393_v18  ;;  %5861 = vrot.lane.b32.xlu1 %v10051_v38, %s7503_s21  ;;  %v5922_v18 = vmul.bf16 %v9892_v53, %v7658_v35  ;;  %v6002_v32 = vmul.bf16 %v10055_v47, %v10631_v52 }
 0xcbd   : > { %v10067_v55 = vpack.c.bf16 %v7195_v48, %v7193_v16  ;;  %v5997_v16 = vmul.bf16 %v9877_v29, %v10630_v7  ;;  %v5999_v48 = vmul.bf16 %v10039_v43, %v10631_v52 }
 0xcbe   : > { %v10071_v15 = vpack.c.bf16 %v7196_v27, %v7194_v22  ;;  %v6001_v22 = vmul.bf16 %v10051_v38, %v10628_v61  ;;  %v6000_v27 = vmul.bf16 %v9880_v12, %v10630_v7 }
 0xcbf   : > { %5741 = vst [vmem:[#allocation2 + $0x48] sm:$0xff] %v10067_v55  ;;  %5791 = vrot.lane.b32.xlu0 %v5762_v36, %s7502_s20  ;;  %v5764_v54 = vmul.bf16 %v10067_v55, %v7681_v42  ;;  %v5920_v14 = vmul.bf16 %v10067_v55, %v7705_v49  ;;  %v6004_v29 = vmul.bf16 %v10067_v55, %v10628_v61 }
 0xcc0   : > { %5742 = vst [vmem:[#allocation2 + $0x50] sm:$0xff] %v10071_v15  ;;  %v5720_v58 = vpop.f32.mrb[60].mxu1  ;;  %5789 = vrot.lane.b32.xlu1 %v5761_v25, %s7502_s20  ;;  %v5765_v46 = vmul.bf16 %v10071_v15, %v7674_v40  ;;  %v5921_v4 = vmul.bf16 %v10071_v15, %v7672_v39  ;;  %v6003_v36 = vmul.bf16 %v9889_v11, %v10630_v7 }
 0xcc1   : > { %v5722_v31 = vpop.f32.mrb[61].mxu1  ;;  %v7197_v17 = vadd.f32 %v5720_v58, %v5394_v33  ;;  %v6005_v62 = vmul.bf16 %v10071_v15, %v10631_v52  ;;  %v6098_v25 = vmul.bf16 %v10039_v43, %v10632_v13  ;;  %v10164_v58 = vld [vmem:[#allocation2 + $0x18] sm:$0xff]  ;;  %v6097_v33 = vmul.bf16 %v10037_v2, %v10634_v26 }
 0xcc2   : > { %v5724_v0 = vpop.f32.mrb[62].mxu1  ;;  %v7198_v9 = vadd.f32 %v5722_v31, %v5395_v30  ;;  %v10171_v31 = vmul.bf16 %v10164_v58, %v10633_v24  ;;  %v6101_v30 = vmul.bf16 %v10055_v47, %v10632_v13 }
 0xcc3   : > { %v7199_v60 = vadd.f32 %v5724_v0, %v5396_v21  ;;  %v5726_v6 = vpop.f32.mrb[63].mxu1  ;;  %5947 = vrot.lane.b32.xlu0 %v5918_v56, %s7501_s19  ;;  %v10173_v21 = vld [vmem:[#allocation2 + $0x38] sm:$0xff]  ;;  %v6104_v0 = vmul.bf16 %v10071_v15, %v10632_v13 }
 0xcc4   : > { %v7200_v45 = vadd.f32 %v5726_v6, %v5397_v57  ;;  %5945 = vrot.lane.b32.xlu1 %v5917_v41, %s7501_s19  ;;  %v7471_v56 = vld [vmem:[%s10576_s7 + $0x4] ss:$20 sps:$4 sm:$0xff]   ;;  %v6102_v53 = vmul.bf16 %v10173_v21, %v10633_v24  ;;  %v6100_v57 = vmul.bf16 %v10051_v38, %v10634_v26  ;;  %v10197_v6 = vpop.permute.xlu1 %5787 }
 0xcc5   : > { %v10085_v37 = vpack.c.bf16 %v7199_v60, %v7197_v17  ;;  %6549 = vmatprep.mubr.bf16.mxu0 %v7471_v56  ;;  %v10192_v41 = vld [vmem:[#allocation2 + $0x58] sm:$0xff]  ;;  %v5782_v17 = vpop.permute.xlu0 %5781 }
 0xcc6   : > { %v10087_v5 = vpack.c.bf16 %v7200_v45, %v7198_v9  ;;  %v6105_v9 = vmul.bf16 %v10192_v41, %v10633_v24  ;;  %v6103_v45 = vmul.bf16 %v10067_v55, %v10634_v26 }
 0xcc7   : > { %5743 = vst [vmem:[#allocation2 + $0x68] sm:$0xff] %v10085_v37  ;;  %5867 = vrot.lane.b32.xlu0 %v10067_v55, %s7503_s21  ;;  %v5767_v28 = vmul.bf16 %v10085_v37, %v7681_v42  ;;  %v5923_v59 = vmul.bf16 %v10085_v37, %v7705_v49  ;;  %v6007_v12 = vmul.bf16 %v10085_v37, %v10628_v61 }
 0xcc8   : > { %5744 = vst [vmem:[#allocation2 + $0x70] sm:$0xff] %v10087_v5  ;;  %5869 = vrot.lane.b32.xlu1 %v10071_v15, %s7503_s21  ;;  %v5768_v3 = vmul.bf16 %v10087_v5, %v7674_v40  ;;  %v5924_v11 = vmul.bf16 %v10087_v5, %v7672_v39  ;;  %v6008_v60 = vmul.bf16 %v10087_v5, %v10631_v52 }
 0xccb   : > { %5795 = vrot.lane.b32.xlu0 %v5764_v54, %s7502_s20  ;;  %v6106_v54 = vmul.bf16 %v10085_v37, %v10634_v26 }
 0xccc   : > { %5797 = vrot.lane.b32.xlu1 %v5765_v46, %s7502_s20  ;;  %v10207_v46 = vld [vmem:[#allocation2 + $0x78] sm:$0xff] }
 0xccf   : > { %5951 = vrot.lane.b32.xlu0 %v5920_v14, %s7501_s19  ;;  %v10209_v14 = vpop.permute.xlu0 %5793 }
 0xcd0   : > { %5873 = vrot.lane.b32.xlu1 %v10085_v37, %s7503_s21 }
 0xcd3   : > { %5875 = vrot.lane.b32.xlu0 %v10087_v5, %s7503_s21 }
 0xcd4   : > { %5801 = vrot.lane.b32.xlu1 %v5767_v28, %s7502_s20  ;;  %v10212_v28 = vpop.permute.xlu1 %5799 }
 0xcd7   : > { %5803 = vrot.lane.b32.xlu0 %v5768_v3, %s7502_s20  ;;  %v6108_v3 = vmul.bf16 %v10207_v46, %v10633_v24  ;;  %v6181_v24 = vmul.bf16 %v10037_v2, %v10637_v1 }
 0xcd8   : > { %5953 = vrot.lane.b32.xlu1 %v5921_v4, %s7501_s19  ;;  %v10219_v4 = vmul.bf16 %v10164_v58, %v10635_v63 }
 0xcdb   : > { %5949 = vrot.lane.b32.xlu0 %v5919_v8, %s7501_s19  ;;  %v10224_v8 = vpop.permute.xlu0 %5853 }
 0xcdc   : > { %5957 = vrot.lane.b32.xlu1 %v5923_v59, %s7501_s19  ;;  %v6182_v59 = vmul.bf16 %v10039_v43, %v10636_v50 }
 0xcdf   : > { %6023 = vrot.lane.b32.xlu0 %v5998_v51, %s7500_s18  ;;  %v10228_v51 = vpop.permute.xlu1 %5859 }
 0xce0   : > { %5955 = vrot.lane.b32.xlu1 %v5922_v18, %s7501_s19  ;;  %v6185_v18 = vmul.bf16 %v10055_v47, %v10636_v50 }
 0xce3   : > { %6021 = vrot.lane.b32.xlu0 %v5997_v16, %s7500_s18  ;;  %v6184_v16 = vmul.bf16 %v10051_v38, %v10637_v1 }
 0xce4   : > { %6025 = vrot.lane.b32.xlu1 %v5999_v48, %s7500_s18  ;;  %v10238_v48 = vpop.permute.xlu0 %5865 }
 0xce7   : > { %6031 = vrot.lane.b32.xlu0 %v6002_v32, %s7500_s18  ;;  %v10241_v32 = vpop.permute.xlu1 %5871 }
 0xce8   : > { %6029 = vrot.lane.b32.xlu1 %v6001_v22, %s7500_s18  ;;  %v6186_v22 = vmul.bf16 %v10173_v21, %v10635_v63 }
 0xceb   : > { %6035 = vrot.lane.b32.xlu0 %v6004_v29, %s7500_s18  ;;  %v6189_v29 = vmul.bf16 %v10192_v41, %v10635_v63 }
 0xcec   : > { %6027 = vrot.lane.b32.xlu1 %v6000_v27, %s7500_s18  ;;  %v10250_v27 = vpop.permute.xlu0 %5937 }
 0xcef   : > { %6033 = vrot.lane.b32.xlu0 %v6003_v36, %s7500_s18  ;;  %v6188_v36 = vmul.bf16 %v10071_v15, %v10636_v50 }
 0xcf0   : > { %6037 = vrot.lane.b32.xlu1 %v6005_v62, %s7500_s18  ;;  %v10254_v62 = vpop.permute.xlu1 %5943 }
 0xcf3   : > { %6123 = vrot.lane.b32.xlu0 %v6098_v25, %s7499_s17  ;;  %v6190_v25 = vmul.bf16 %v10085_v37, %v10637_v1 }
 0xcf4   : > { %6041 = vrot.lane.b32.xlu1 %v6007_v12, %s7500_s18 }
 0xcf7   : > { %5959 = vrot.lane.b32.xlu0 %v5924_v11, %s7501_s19  ;;  %v6187_v11 = vmul.bf16 %v10067_v55, %v10637_v1 }
 0xcf8   : > { %6039 = vrot.lane.b32.xlu1 %v6006_v34, %s7500_s18 }
 0xcfb   : > { %6121 = vrot.lane.b32.xlu0 %v6097_v33, %s7499_s17  ;;  %v6107_v33 = vmul.bf16 %v10087_v5, %v10632_v13 }
 0xcfc   : > { %6125 = vrot.lane.b32.xlu1 %v10171_v31, %s7499_s17 }
 0xcff   : > { %6131 = vrot.lane.b32.xlu0 %v6102_v53, %s7499_s17  ;;  %v6192_v53 = vmul.bf16 %v10207_v46, %v10635_v63 }
 0xd00   : > { %6129 = vrot.lane.b32.xlu1 %v6101_v30, %s7499_s17 }
 0xd03   : > { %6135 = vrot.lane.b32.xlu0 %v6104_v0, %s7499_s17 }
 0xd04   : > { %6127 = vrot.lane.b32.xlu1 %v6100_v57, %s7499_s17 }
 0xd07   : > { %6043 = vrot.lane.b32.xlu0 %v6008_v60, %s7500_s18 }
 0xd08   : > { %6137 = vrot.lane.b32.xlu1 %v6105_v9, %s7499_s17 }
 0xd0b   : > { %6133 = vrot.lane.b32.xlu0 %v6103_v45, %s7499_s17 }
 0xd0c   : > { %6139 = vrot.lane.b32.xlu1 %v6106_v54, %s7499_s17 }
 0xd0f   : > { %6143 = vrot.lane.b32.xlu0 %v6108_v3, %s7499_s17  ;;  %v6191_v3 = vmul.bf16 %v10087_v5, %v10636_v50 }
 0xd10   : > { %6209 = vrot.lane.b32.xlu1 %v10219_v4, %s7497_s15 }
 0xd13   : > { %6207 = vrot.lane.b32.xlu0 %v6182_v59, %s7497_s15 }
 0xd14   : > { %6213 = vrot.lane.b32.xlu1 %v6185_v18, %s7497_s15 }
 0xd17   : > { %6205 = vrot.lane.b32.xlu0 %v6181_v24, %s7497_s15 }
 0xd18   : > { %6211 = vrot.lane.b32.xlu1 %v6184_v16, %s7497_s15 }
 0xd1b   : > { %6215 = vrot.lane.b32.xlu0 %v6186_v22, %s7497_s15 }
 0xd1c   : > { %6221 = vrot.lane.b32.xlu1 %v6189_v29, %s7497_s15 }
 0xd1f   : > { %6219 = vrot.lane.b32.xlu0 %v6188_v36, %s7497_s15 }
 0xd20   : > { %6223 = vrot.lane.b32.xlu1 %v6190_v25, %s7497_s15 }
 0xd21   : > { %v10260_v12 = vpop.permute.xlu0 %5855 }
 0xd22   : > { %v10264_v34 = vpop.permute.xlu1 %5857 }
 0xd23   : > { %6217 = vrot.lane.b32.xlu0 %v6187_v11, %s7497_s15 }
 0xd24   : > { %6141 = vrot.lane.b32.xlu1 %v6107_v33, %s7499_s17 }
 0xd25   : > { %v5784_v56 = vpop.permute.xlu0 %5783 }
 0xd26   : > { %v5786_v30 = vpop.permute.xlu1 %5785  ;;  %v5805_v57 = vsel %vm339_vm11, %v5782_v17, %v5784_v56 }
 0xd27   : > { %6227 = vrot.lane.b32.xlu0 %v6192_v53, %s7497_s15  ;;  %v5806_v0 = vsel %vm339_vm11, %v5784_v56, %v5786_v30  ;;  %v6338_v56 = vmul.bf16 %v10039_v43, %v10638_v20  ;;  %v10324_v30 = vmul.bf16 %v10164_v58, %v10639_v10 }
 0xd28   : > { %6281 = vrot.lane.b32.xlu1 %v10164_v58, %s7504_s24  ;;  %6519 = vmatprep.subr.bf16.mxu0 %v5806_v0  ;;  %v6337_v0 = vmul.bf16 %v10037_v2, %v10640_v23 }
 0xd29   : > { %v10277_v60 = vpop.permute.xlu0 %5939  ;;  %6520 = vmatpush1.bf16.msra.mxu0 %v5805_v57 }
 0xd2a   : > { %v10279_v9 = vpop.permute.xlu1 %5941 }
 0xd2b   : > { %6279 = vrot.lane.b32.xlu0 %v10039_v43, %s7504_s24 }
 0xd2c   : > { %6285 = vrot.lane.b32.xlu1 %v10055_v47, %s7504_s24 }
 0xd2d   : > { %v5864_v63 = vpop.permute.xlu0 %5863 }
 0xd2e   : > { %v10285_v45 = vpop.permute.xlu1 %5861 }
 0xd2f   : > { %6277 = vrot.lane.b32.xlu0 %v10037_v2, %s7504_s24 }
 0xd30   : > { %6283 = vrot.lane.b32.xlu1 %v10051_v38, %s7504_s24 }
 0xd31   : > { %v5792_v17 = vpop.permute.xlu0 %5791 }
 0xd32   : > { %v5790_v54 = vpop.permute.xlu1 %5789 }
 0xd33   : > { %6287 = vrot.lane.b32.xlu0 %v10173_v21, %s7504_s24  ;;  %v5808_v59 = vsel %vm339_vm11, %v5790_v54, %v5792_v17  ;;  %v5807_v18 = vsel %vm339_vm11, %v10197_v6, %v5790_v54  ;;  %v6341_v17 = vmul.bf16 %v10055_v47, %v10638_v20 }
 0xd34   : > { %6225 = vrot.lane.b32.xlu1 %v6191_v3, %s7497_s15  ;;  %6521 = vmatprep.subr.bf16.mxu0 %v5808_v59  ;;  %v6342_v3 = vmul.bf16 %v10173_v21, %v10639_v10  ;;  %v5878_v21 = vsel %vm477_vm6, %v10260_v12, %v10264_v34  ;;  %v5880_v34 = vsel %vm477_vm6, %v10285_v45, %v5864_v63 }
 0xd35   : > { %v10299_v24 = vpop.permute.xlu0 %5947  ;;  %6522 = vmatpush1.bf16.msra.mxu0 %v5807_v18 }
 0xd36   : > { %v10301_v16 = vpop.permute.xlu1 %5945 }
 0xd37   : > { %6291 = vrot.lane.b32.xlu0 %v10071_v15, %s7504_s24 }
 0xd38   : > { %6293 = vrot.lane.b32.xlu1 %v10192_v41, %s7504_s24 }
 0xd39   : > { %v5868_v22 = vpop.permute.xlu0 %5867 }
 0xd3a   : > { %v5870_v29 = vpop.permute.xlu1 %5869 }
 0xd3b   : > { %6289 = vrot.lane.b32.xlu0 %v10067_v55, %s7504_s24 }
 0xd3c   : > { %6297 = vrot.lane.b32.xlu1 %v10087_v5, %s7504_s24 }
 0xd3d   : > { %v5796_v6 = vpop.permute.xlu0 %5795 }
 0xd3e   : > { %v5798_v36 = vpop.permute.xlu1 %5797  ;;  %v5809_v11 = vsel %vm339_vm11, %v10209_v14, %v5796_v6 }
 0xd3f   : > { %6299 = vrot.lane.b32.xlu0 %v10207_v46, %s7504_s24  ;;  %v5810_v25 = vsel %vm339_vm11, %v5796_v6, %v5798_v36  ;;  %v6340_v6 = vmul.bf16 %v10051_v38, %v10640_v23 }
 0xd40   : > { %6295 = vrot.lane.b32.xlu1 %v10085_v37, %s7504_s24  ;;  %6523 = vmatprep.subr.bf16.mxu0 %v5810_v25 }
 0xd41   : > { %v10318_v33 = vpop.permute.xlu0 %5951  ;;  %6524 = vmatpush1.bf16.msra.mxu0 %v5809_v11  ;;  %v6344_v11 = vmul.bf16 %v10071_v15, %v10638_v20 }
 0xd42   : > { %v5874_v53 = vpop.permute.xlu1 %5873 }
 0xd43   : > { %6363 = vrot.lane.b32.xlu0 %v6338_v56, %s7498_s16 }
 0xd44   : > { %6365 = vrot.lane.b32.xlu1 %v10324_v30, %s7498_s16 }
 0xd45   : > { %v5876_v14 = vpop.permute.xlu0 %5875 }
 0xd46   : > { %v5802_v57 = vpop.permute.xlu1 %5801 }
 0xd47   : > { %6361 = vrot.lane.b32.xlu0 %v6337_v0, %s7498_s16  ;;  %v5811_v36 = vsel %vm339_vm11, %v10212_v28, %v5802_v57  ;;  %v6345_v0 = vmul.bf16 %v10192_v41, %v10639_v10  ;;  %v5877_v28 = vsel %vm477_vm6, %v10224_v8, %v10260_v12  ;;  %v6347_v41 = vmul.bf16 %v10087_v5, %v10638_v20 }
 0xd48   : > { %6369 = vrot.lane.b32.xlu1 %v6341_v17, %s7498_s16  ;;  %v6343_v17 = vmul.bf16 %v10067_v55, %v10640_v23  ;;  %v5879_v8 = vsel %vm477_vm6, %v10228_v51, %v10285_v45  ;;  %v5882_v12 = vsel %vm477_vm6, %v5868_v22, %v5870_v29  ;;  %v5884_v51 = vsel %vm477_vm6, %v5874_v53, %v5876_v14 }
 0xd49   : > { %v5804_v54 = vpop.permute.xlu0 %5803  ;;  %v5883_v29 = vsel %vm477_vm6, %v10241_v32, %v5874_v53  ;;  %v5961_v32 = vsel %vm510_vm3, %v10250_v27, %v10277_v60 }
 0xd4a   : > { %v10337_v59 = vpop.permute.xlu1 %5953  ;;  %v5812_v18 = vsel %vm339_vm11, %v5802_v57, %v5804_v54 }
 0xd4b   : > { %6371 = vrot.lane.b32.xlu0 %v6342_v3, %s7498_s16  ;;  %6525 = vmatprep.subr.bf16.mxu0 %v5812_v18  ;;  %v6348_v3 = vmul.bf16 %v10207_v46, %v10639_v10 }
 0xd4c   : > { %6367 = vrot.lane.b32.xlu1 %v6340_v6, %s7498_s16  ;;  %6526 = vmatpush1.bf16.msra.mxu0 %v5811_v36  ;;  %v6346_v6 = vmul.bf16 %v10085_v37, %v10640_v23  ;;  %v10374_v36 = vld [vmem:[#allocation2] sm:$0xff] }
 0xd4d   : > { %v5950_v25 = vpop.permute.xlu0 %5949  ;;  %6527 = vmatprep.subr.bf16.mxu0 %v5878_v21  ;;  %v5881_v21 = vsel %vm477_vm6, %v10238_v48, %v5868_v22  ;;  %v6665_v10 = vmul.bf16 %v10374_v36, %v10641_v44  ;;  %v5962_v48 = vsel %vm510_vm3, %v10277_v60, %v10279_v9  ;;  %v6704_v14 = vmul.bf16 %v10374_v36, %v7658_v35 }
 0xd4e   : > { %v5958_v56 = vpop.permute.xlu1 %5957  ;;  %v5964_v9 = vsel %vm510_vm3, %v10301_v16, %v10299_v24  ;;  %v5966_v35 = vsel %vm510_vm3, %v10318_v33, %v10337_v59  ;;  %v5965_v60 = vsel %vm510_vm3, %v5950_v25, %v10318_v33 }
 0xd4f   : > { %6375 = vrot.lane.b32.xlu0 %v6344_v11, %s7498_s16 }
 0xd50   : > { %6377 = vrot.lane.b32.xlu1 %v6345_v0, %s7498_s16  ;;  %6528 = vmatpush1.bf16.msra.mxu0 %v5877_v28  ;;  %v5963_v0 = vsel %vm510_vm3, %v10254_v62, %v10301_v16 }
 0xd51   : > { %v6024_v57 = vpop.permute.xlu0 %6023  ;;  %6529 = vmatprep.subr.bf16.mxu0 %v5880_v34 }
 0xd52   : > { %v5956_v54 = vpop.permute.xlu1 %5955 }
 0xd53   : > { %6373 = vrot.lane.b32.xlu0 %v6343_v17, %s7498_s16 }
 0xd54   : > { %6381 = vrot.lane.b32.xlu1 %v6347_v41, %s7498_s16  ;;  %6530 = vmatpush1.bf16.msra.mxu0 %v5879_v8  ;;  %v5967_v41 = vsel %vm510_vm3, %v5956_v54, %v5958_v56 }
 0xd55   : > { %v6022_v63 = vpop.permute.xlu0 %6021  ;;  %6531 = vmatprep.subr.bf16.mxu0 %v5882_v12 }
 0xd56   : > { %v6026_v18 = vpop.permute.xlu1 %6025  ;;  %v6045_v8 = vsel %vm541_vm2, %v6022_v63, %v6024_v57  ;;  %v7474_v63 = vld [vmem:[%s10576_s7 + $0xc] ss:$20 sps:$4 sm:$0xff]  }
 0xd57   : > { %6383 = vrot.lane.b32.xlu0 %v6348_v3, %s7498_s16  ;;  %v6046_v62 = vsel %vm541_vm2, %v6024_v57, %v6026_v18  ;;  %v7469_v57 = vld [vmem:[%s10576_s7] ss:$20 sps:$4 sm:$0xff]  }
 0xd58   : > { %6379 = vrot.lane.b32.xlu1 %v6346_v6, %s7498_s16  ;;  %6532 = vmatpush1.bf16.msra.mxu0 %v5881_v21 }
 0xd59   : > { %v6032_v45 = vpop.permute.xlu0 %6031  ;;  %6533 = vmatprep.subr.bf16.mxu0 %v5884_v51 }
 0xd5a   : > { %v6030_v46 = vpop.permute.xlu1 %6029 }
 0xd5b   : > { %6671 = vrot.lane.b32.xlu0 %v6665_v10, %s7502_s20  ;;  %v6048_v12 = vsel %vm541_vm2, %v6030_v46, %v6032_v45 }
 0xd5c   : > { %6534 = vmatpush1.bf16.msra.mxu0 %v5883_v29  ;;  %6689 = vrot.lane.b32.xlu1 %v10374_v36, %s7503_s21 }
 0xd5d   : > { %v6036_v22 = vpop.permute.xlu0 %6035  ;;  %6535 = vmatprep.subr.bf16.mxu0 %v5962_v48 }
 0xd5e   : > { %v6028_v44 = vpop.permute.xlu1 %6027 }
 0xd5f   : > { %6710 = vrot.lane.b32.xlu0 %v6704_v14, %s7501_s19  ;;  %v6047_v3 = vsel %vm541_vm2, %v6028_v44, %v6030_v46 }
 0xd60   : > { %6536 = vmatpush1.bf16.msra.mxu0 %v5961_v32 }
 0xd61   : > { %v6034_v53 = vpop.permute.xlu0 %6033  ;;  %6537 = vmatprep.subr.bf16.mxu0 %v5964_v9 }
 0xd62   : > { %v6038_v11 = vpop.permute.xlu1 %6037  ;;  %v6049_v18 = vsel %vm541_vm2, %v6034_v53, %v6036_v22 }
 0xd64   : > { %6538 = vmatpush1.bf16.msra.mxu0 %v5963_v0 }
 0xd65   : > { %v6124_v28 = vpop.permute.xlu0 %6123  ;;  %6539 = vmatprep.subr.bf16.mxu0 %v5966_v35 }
 0xd66   : > { %v6042_v27 = vpop.permute.xlu1 %6041 }
 0xd68   : > { %6540 = vmatpush1.bf16.msra.mxu0 %v5965_v60 }
 0xd69   : > { %v5960_v24 = vpop.permute.xlu0 %5959 }
 0xd6a   : > { %v6040_v34 = vpop.permute.xlu1 %6039  ;;  %v5968_v17 = vsel %vm510_vm3, %v5958_v56, %v5960_v24  ;;  %v6050_v56 = vsel %vm541_vm2, %v6036_v22, %v6038_v11 }
 0xd6b   : > { %6541 = vmatprep.subr.bf16.mxu0 %v5968_v17  ;;  %v6051_v10 = vsel %vm541_vm2, %v6040_v34, %v6042_v27 }
 0xd6c   : > { %6542 = vmatpush1.bf16.msra.mxu0 %v5967_v41 }
 0xd6d   : > { %v6122_v16 = vpop.permute.xlu0 %6121  ;;  %6543 = vmatprep.subr.bf16.mxu0 %v6046_v62 }
 0xd6e   : > { %v6126_v59 = vpop.permute.xlu1 %6125  ;;  %v6145_v53 = vsel %vm524_vm1, %v6122_v16, %v6124_v28 }
 0xd70   : > { %6544 = vmatpush1.bf16.msra.mxu0 %v6045_v8 }
 0xd71   : > { %v6132_v33 = vpop.permute.xlu0 %6131  ;;  %6545 = vmatprep.subr.bf16.mxu0 %v6048_v12 }
 0xd72   : > { %v6130_v25 = vpop.permute.xlu1 %6129 }
 0xd74   : > { %6546 = vmatpush1.bf16.msra.mxu0 %v6047_v3 }
 0xd75   : > { %v6136_v54 = vpop.permute.xlu0 %6135  ;;  %6547 = vmatprep.subr.bf16.mxu0 %v6050_v56 }
 0xd76   : > { %v6128_v6 = vpop.permute.xlu1 %6127 }
 0xd78   : > { %6548 = vmatpush1.bf16.msra.mxu0 %v6049_v18 }
 0xd79   : > { %v6044_v21 = vpop.permute.xlu0 %6043 }
 0xd7a   : > { %v6138_v51 = vpop.permute.xlu1 %6137  ;;  %v6052_v45 = vsel %vm541_vm2, %v6042_v27, %v6044_v21 }
 0xd7b   : > { %6560 = vmatprep.subr.bf16.mxu0 %v6052_v45  ;;  %6550 = vmatmul.mubr.bf16.vlgmr.msra.gmra.mrb[36].mxu0 %v7469_v57 }
 0xd7c   : > { %6561 = vmatpush1.bf16.msra.mxu0 %v6051_v10  ;;  %6592 = vmatprep.mubr.bf16.mxu0 %v7474_v63 }
 0xd7d   : > { %v6134_v46 = vpop.permute.xlu0 %6133  ;;  %6562 = vmatprep.subr.bf16.mxu0 %v10039_v43 }
 0xd7e   : > { %v6140_v29 = vpop.permute.xlu1 %6139  ;;  %v6149_v35 = vsel %vm524_vm1, %v6134_v46, %v6136_v54 }
 0xd80   : > { %6563 = vmatpush1.bf16.msra.mxu0 %v10037_v2  ;;  %v6146_v2 = vsel %vm524_vm1, %v6124_v28, %v6126_v59 }
 0xd81   : > { %v6144_v48 = vpop.permute.xlu0 %6143  ;;  %6564 = vmatprep.subr.bf16.mxu0 %v10055_v47 }
 0xd82   : > { %v6210_v22 = vpop.permute.xlu1 %6209 }
 0xd84   : > { %6565 = vmatpush1.bf16.msra.mxu0 %v10051_v38  ;;  %v6148_v38 = vsel %vm524_vm1, %v6130_v25, %v6132_v33 }
 0xd85   : > { %v6208_v14 = vpop.permute.xlu0 %6207  ;;  %6566 = vmatprep.subr.bf16.mxu0 %v10071_v15 }
 0xd86   : > { %v6214_v44 = vpop.permute.xlu1 %6213  ;;  %v6230_v34 = vsel %vm493_vm0, %v6208_v14, %v6210_v22 }
 0xd88   : > { %6567 = vmatpush1.bf16.msra.mxu0 %v10067_v55  ;;  %v6147_v55 = vsel %vm524_vm1, %v6128_v6, %v6130_v25 }
 0xd89   : > { %v6206_v32 = vpop.permute.xlu0 %6205  ;;  %6568 = vmatprep.subr.bf16.mxu0 %v10087_v5  ;;  %v6150_v5 = vsel %vm524_vm1, %v6136_v54, %v6138_v51 }
 0xd8a   : > { %v6212_v9 = vpop.permute.xlu1 %6211  ;;  %v6229_v62 = vsel %vm493_vm0, %v6206_v32, %v6208_v14 }
 0xd8b   : > { %v6231_v12 = vsel %vm493_vm0, %v6212_v9, %v6214_v44  ;;  %v7472_v9 = vld [vmem:[%s10576_s7 + $0x8] ss:$20 sps:$4 sm:$0xff]  }
 0xd8c   : > { %6569 = vmatpush1.bf16.msra.mxu0 %v10085_v37 }
 0xd8d   : > { %v6216_v43 = vpop.permute.xlu0 %6215  ;;  %6570 = vmatprep.subr.bf16.mxu0 %v6146_v2 }
 0xd8e   : > { %v6222_v47 = vpop.permute.xlu1 %6221  ;;  %v6232_v16 = vsel %vm493_vm0, %v6214_v44, %v6216_v43 }
 0xd90   : > { %6571 = vmatpush1.bf16.msra.mxu0 %v6145_v53 }
 0xd91   : > { %v6220_v15 = vpop.permute.xlu0 %6219  ;;  %6572 = vmatprep.subr.bf16.mxu0 %v6148_v38 }
 0xd92   : > { %v6224_v11 = vpop.permute.xlu1 %6223  ;;  %v6234_v33 = vsel %vm493_vm0, %v6220_v15, %v6222_v47 }
 0xd94   : > { %6573 = vmatpush1.bf16.msra.mxu0 %v6147_v55 }
 0xd95   : > { %v6218_v0 = vpop.permute.xlu0 %6217  ;;  %6574 = vmatprep.subr.bf16.mxu0 %v6150_v5 }
 0xd96   : > { %v6142_v37 = vpop.permute.xlu1 %6141  ;;  %v6233_v56 = vsel %vm493_vm0, %v6218_v0, %v6220_v15 }
 0xd97   : > { %v6152_v27 = vsel %vm524_vm1, %v6142_v37, %v6144_v48  ;;  %v6151_v24 = vsel %vm524_vm1, %v6140_v29, %v6142_v37 }
 0xd98   : > { %6575 = vmatpush1.bf16.msra.mxu0 %v6149_v35 }
 0xd99   : > { %v6228_v28 = vpop.permute.xlu0 %6227  ;;  %6576 = vmatprep.subr.bf16.mxu0 %v6152_v27 }
 0xd9a   : > { %v6282_v60 = vpop.permute.xlu1 %6281 }
 0xd9c   : > { %6577 = vmatpush1.bf16.msra.mxu0 %v6151_v24 }
 0xd9d   : > { %v6280_v17 = vpop.permute.xlu0 %6279  ;;  %6578 = vmatprep.subr.bf16.mxu0 %v6230_v34 }
 0xd9e   : > { %v6286_v41 = vpop.permute.xlu1 %6285  ;;  %v6302_v63 = vsel %vm622_vm7, %v6280_v17, %v6282_v60 }
 0xda0   : > { %6579 = vmatpush1.bf16.msra.mxu0 %v6229_v62  ;;  %v7475_v62 = vld [vmem:[%s10576_s7 + $0x10] ss:$20 sps:$4 sm:$0xff]  }
 0xda1   : > { %v6278_v59 = vpop.permute.xlu0 %6277  ;;  %6580 = vmatprep.subr.bf16.mxu0 %v6232_v16 }
 0xda2   : > { %v6284_v8 = vpop.permute.xlu1 %6283  ;;  %v6301_v45 = vsel %vm622_vm7, %v6278_v59, %v6280_v17 }
 0xda3   : > { %v6303_v48 = vsel %vm622_vm7, %v6284_v8, %v6286_v41 }
 0xda4   : > { %6581 = vmatpush1.bf16.msra.mxu0 %v6231_v12 }
 0xda5   : > { %v6288_v25 = vpop.permute.xlu0 %6287  ;;  %6582 = vmatprep.subr.bf16.mxu0 %v6234_v33 }
 0xda6   : > { %v6226_v3 = vpop.permute.xlu1 %6225  ;;  %v6304_v10 = vsel %vm622_vm7, %v6286_v41, %v6288_v25 }
 0xda7   : > { %v6236_v54 = vsel %vm493_vm0, %v6226_v3, %v6228_v28  ;;  %v6235_v57 = vsel %vm493_vm0, %v6224_v11, %v6226_v3 }
 0xda8   : > { %6583 = vmatpush1.bf16.msra.mxu0 %v6233_v56 }
 0xda9   : > { %v6292_v6 = vpop.permute.xlu0 %6291  ;;  %6584 = vmatprep.subr.bf16.mxu0 %v6236_v54 }
 0xdaa   : > { %v6294_v18 = vpop.permute.xlu1 %6293 }
 0xdab   : > { %v6306_v22 = vsel %vm622_vm7, %v6292_v6, %v6294_v18 }
 0xdac   : > { %6585 = vmatpush1.bf16.msra.mxu0 %v6235_v57 }
 0xdad   : > { %v6290_v21 = vpop.permute.xlu0 %6289  ;;  %6586 = vmatprep.subr.bf16.mxu0 %v6302_v63 }
 0xdae   : > { %v6298_v51 = vpop.permute.xlu1 %6297  ;;  %v6305_v32 = vsel %vm622_vm7, %v6290_v21, %v6292_v6 }
 0xdb0   : > { %6587 = vmatpush1.bf16.msra.mxu0 %v6301_v45 }
 0xdb1   : > { %v6300_v46 = vpop.permute.xlu0 %6299  ;;  %6588 = vmatprep.subr.bf16.mxu0 %v6304_v10 }
 0xdb2   : > { %v6296_v29 = vpop.permute.xlu1 %6295  ;;  %v6308_v2 = vsel %vm622_vm7, %v6298_v51, %v6300_v46 }
 0xdb3   : > { %v6307_v53 = vsel %vm622_vm7, %v6296_v29, %v6298_v51 }
 0xdb4   : > { %6589 = vmatpush1.bf16.msra.mxu0 %v6303_v48 }
 0xdb5   : > { %v6364_v14 = vpop.permute.xlu0 %6363  ;;  %6590 = vmatprep.subr.bf16.mxu0 %v6306_v22 }
 0xdb6   : > { %v6366_v44 = vpop.permute.xlu1 %6365 }
 0xdb7   : > { %v6386_v38 = vsel %vm441_vm15, %v6364_v14, %v6366_v44 }
 0xdb8   : > { %6591 = vmatpush1.bf16.msra.mxu0 %v6305_v32 }
 0xdb9   : > { %v6362_v43 = vpop.permute.xlu0 %6361  ;;  %6603 = vmatprep.subr.bf16.mxu0 %v6308_v2 }
 0xdba   : > { %v6370_v47 = vpop.permute.xlu1 %6369  ;;  %v6385_v55 = vsel %vm441_vm15, %v6362_v43, %v6364_v14 }
 0xdbb   : > { %6593 = vmatmul.mubr.bf16.vlgmr.msra.gmra.mrb[36].mxu0 %v7472_v9 }
 0xdbc   : > { %6604 = vmatpush1.bf16.msra.mxu0 %v6307_v53  ;;  %6635 = vmatprep.mubr.bf16.mxu0 %v10627_v19 }
 0xdbd   : > { %v6372_v15 = vpop.permute.xlu0 %6371  ;;  %6605 = vmatprep.subr.bf16.mxu0 %v6386_v38 }
 0xdbe   : > { %v6368_v11 = vpop.permute.xlu1 %6367  ;;  %v6388_v5 = vsel %vm441_vm15, %v6370_v47, %v6372_v15 }
 0xdbf   : > { %v6387_v35 = vsel %vm441_vm15, %v6368_v11, %v6370_v47 }
 0xdc0   : > { %6606 = vmatpush1.bf16.msra.mxu0 %v6385_v55 }
 0xdc1   : > { %v6376_v0 = vpop.permute.xlu0 %6375  ;;  %6607 = vmatprep.subr.bf16.mxu0 %v6388_v5 }
 0xdc2   : > { %v6378_v37 = vpop.permute.xlu1 %6377 }
 0xdc3   : > { %v6390_v27 = vsel %vm441_vm15, %v6376_v0, %v6378_v37 }
 0xdc4   : > { %6608 = vmatpush1.bf16.msra.mxu0 %v6387_v35 }
 0xdc5   : > { %v6374_v28 = vpop.permute.xlu0 %6373  ;;  %6609 = vmatprep.subr.bf16.mxu0 %v6390_v27 }
 0xdc6   : > { %v6389_v19 = vsel %vm441_vm15, %v6374_v28, %v6376_v0  ;;  %v6382_v60 = vpop.permute.xlu1 %6381 }
 0xdc8   : > { %6610 = vmatpush1.bf16.msra.mxu0 %v6389_v19 }
 0xdc9   : > { %v6384_v24 = vpop.permute.xlu0 %6383 }
 0xdca   : > { %v6380_v34 = vpop.permute.xlu1 %6379  ;;  %v6392_v17 = vsel %vm441_vm15, %v6382_v60, %v6384_v24 }
 0xdcb   : > { %v6391_v41 = vsel %vm441_vm15, %v6380_v34, %v6382_v60  ;;  %6611 = vmatprep.subr.bf16.mxu0 %v6392_v17 }
 0xdcc   : > { %6612 = vmatpush1.bf16.msra.mxu0 %v6391_v41 }
 0xdcf   : > { %7098 = vmatmul.mubr.msk.bf16.vlgmr.msra.gmra.mrb[36].mxu0 %vm2026_vm10, %v7475_v62 }
 0xea2   : > { %v6637_v16 = vpop.f32.mrb[36].mxu0 }
 0xea3   : > { %v6650_v59 = vmul.f32 0.01, %v6637_v16  ;;  %v6639_v8 = vpop.f32.mrb[37].mxu0  ;;  %vm6646_vm4 = vcmp.gt.f32.partialorder %v6637_v16, 0.0 }
 0xea4   : > { %v6651_v12 = vmul.f32 0.01, %v6639_v8  ;;  %v6641_v33 = vpop.f32.mrb[38].mxu0  ;;  %vm6647_vm14 = vcmp.gt.f32.partialorder %v6639_v8, 0.0 }
 0xea5   : > { %vm6648_vm8 = vcmp.gt.f32.partialorder %v6641_v33, 0.0  ;;  %v6652_v25 = vmul.f32 0.01, %v6641_v33  ;;  %v6643_v3 = vpop.f32.mrb[39].mxu0  ;;  %v6654_v54 = vsel %vm6646_vm4, %v6637_v16, %v6650_v59 }
 0xea6   : > { %vm6649_vm9 = vcmp.gt.f32.partialorder %v6643_v3, 0.0  ;;  %v6653_v56 = vmul.f32 0.01, %v6643_v3  ;;  %v6655_v18 = vsel %vm6647_vm14, %v6639_v8, %v6651_v12 }
 0xea7   : > { %v6656_v6 = vsel %vm6648_vm8, %v6641_v33, %v6652_v25  ;;  %v431_v25 = vld [vmem:[%s7605_s14] sm:$0x77] }
 0xea8   : > { %v10472_v57 = vpack.c.bf16 %v6656_v6, %v6654_v54  ;;  %v6657_v63 = vsel %vm6649_vm9, %v6643_v3, %v6653_v56  ;;  %v6860_v3 = vcombine.high %v431_v25, %v431_v25 }
 0xea9   : > { %v10474_v21 = vpack.c.bf16 %v6657_v63, %v6655_v18 }
 0xeaa   : > { %6660 = vst [vmem:[#allocation2 + $0x8] sm:$0xff] %v10472_v57  ;;  %6691 = vrot.lane.b32.xlu1 %v10472_v57, %s7503_s21  ;;  %v6666_v45 = vmul.bf16 %v10472_v57, %v7681_v42  ;;  %v6726_v10 = vmul.bf16 %v10472_v57, %v10628_v61  ;;  %v6705_v46 = vmul.bf16 %v10472_v57, %v7705_v49 }
 0xeab   : > { %6661 = vst [vmem:[#allocation2 + $0x10] sm:$0xff] %v10474_v21  ;;  %6693 = vrot.lane.b32.xlu0 %v10474_v21, %s7503_s21  ;;  %v6667_v51 = vmul.bf16 %v10474_v21, %v7674_v40  ;;  %v6706_v40 = vmul.bf16 %v10474_v21, %v7672_v39  ;;  %v6750_v42 = vmul.bf16 %v10472_v57, %v10634_v26 }
 0xeac   : > { %v6725_v61 = vmul.bf16 %v10374_v36, %v10630_v7  ;;  %v6727_v49 = vmul.bf16 %v10474_v21, %v10631_v52  ;;  %v6771_v39 = vmul.bf16 %v10472_v57, %v10637_v1  ;;  %v6751_v26 = vmul.bf16 %v10474_v21, %v10632_v13  ;;  %v10522_v52 = vld.sshfl [vmem:[%s10577_s8] sm:$0x33 pattern:$0x76325410] }
 0xead   : > { %v6772_v7 = vmul.bf16 %v10474_v21, %v10636_v50  ;;  %v6857_v13 = vcombine.high %v10522_v52, %v10522_v52  ;;  %v6811_v50 = vmul.bf16 %v10474_v21, %v10638_v20  ;;  %v6810_v1 = vmul.bf16 %v10472_v57, %v10640_v23 }
 0xeae   : > { %6675 = vrot.lane.b32.xlu1 %v6667_v51, %s7502_s20 }
 0xeaf   : > { %6673 = vrot.lane.b32.xlu0 %v6666_v45, %s7502_s20  ;;  %7100 = vmatprep.mubr.msk.bf16.mxu1 %vm689_vm5, %v6857_v13 }
 0xeb2   : > { %6733 = vrot.lane.b32.xlu1 %v6726_v10, %s7500_s18 }
 0xeb3   : > { %6712 = vrot.lane.b32.xlu0 %v6705_v46, %s7501_s19 }
 0xeb6   : > { %6714 = vrot.lane.b32.xlu1 %v6706_v40, %s7501_s19 }
 0xeb7   : > { %6756 = vrot.lane.b32.xlu0 %v6750_v42, %s7499_s17 }
 0xeba   : > { %6731 = vrot.lane.b32.xlu1 %v6725_v61, %s7500_s18 }
 0xebb   : > { %6735 = vrot.lane.b32.xlu0 %v6727_v49, %s7500_s18 }
 0xebe   : > { %6760 = vrot.lane.b32.xlu1 %v10171_v31, %s7499_s17  ;;  %v6672_v31 = vpop.permute.xlu0 %6671 }
 0xebf   : > { %6781 = vrot.lane.b32.xlu0 %v10219_v4, %s7497_s15  ;;  %v6690_v4 = vpop.permute.xlu1 %6689 }
 0xec2   : > { %6777 = vrot.lane.b32.xlu1 %v6771_v39, %s7497_s15  ;;  %v6711_v36 = vpop.permute.xlu0 %6710 }
 0xec3   : > { %6758 = vrot.lane.b32.xlu0 %v6751_v26, %s7499_s17  ;;  %s332_s17 = scalar_lea.vmem %s10578_s9, %s7103_s11 }
 0xec6   : > { %6779 = vrot.lane.b32.xlu1 %v6772_v7, %s7497_s15 }
 0xec7   : > { %6797 = vrot.lane.b32.xlu0 %v10474_v21, %s7504_s24 }
 0xeca   : > { %6799 = vrot.lane.b32.xlu1 %v10164_v58, %s7504_s24 }
 0xecb   : > { %6795 = vrot.lane.b32.xlu0 %v10472_v57, %s7504_s24 }
 0xece   : > { %6818 = vrot.lane.b32.xlu1 %v6811_v50, %s7498_s16 }
 0xecf   : > { %6820 = vrot.lane.b32.xlu0 %v10324_v30, %s7498_s16 }
 0xed2   : > { %6816 = vrot.lane.b32.xlu1 %v6810_v1, %s7498_s16 }
 0xf1c   : > { %v6692_v58 = vpop.permute.xlu1 %6691 }
 0xf1d   : > { %v6694_v29 = vpop.permute.xlu0 %6693  ;;  %v6695_v23 = vsel %vm477_vm6, %v6690_v4, %v6692_v58 }
 0xf1e   : > { %v6696_v30 = vsel %vm477_vm6, %v6692_v58, %v6694_v29 }
 0xf20   : > { %v6676_v48 = vpop.permute.xlu1 %6675 }
 0xf21   : > { %v6674_v22 = vpop.permute.xlu0 %6673 }
 0xf22   : > { %v6677_v14 = vsel %vm339_vm11, %v6672_v31, %v6674_v22  ;;  %v6678_v20 = vsel %vm339_vm11, %v6674_v22, %v6676_v48 }
 0xf23   : > { %6867 = vmatprep.subr.bf16.mxu1 %v6678_v20 }
 0xf24   : > { %6868 = vmatpush1.bf16.msra.mxu1 %v6677_v14  ;;  %v6734_v44 = vpop.permute.xlu1 %6733 }
 0xf25   : > { %v6713_v32 = vpop.permute.xlu0 %6712  ;;  %6869 = vmatprep.subr.bf16.mxu1 %v6696_v30 }
 0xf26   : > { %v6716_v47 = vsel %vm510_vm3, %v6711_v36, %v6713_v32 }
 0xf28   : > { %6870 = vmatpush1.bf16.msra.mxu1 %v6695_v23  ;;  %v6715_v9 = vpop.permute.xlu1 %6714 }
 0xf29   : > { %v6757_v2 = vpop.permute.xlu0 %6756  ;;  %v6717_v43 = vsel %vm510_vm3, %v6713_v32, %v6715_v9 }
 0xf2a   : > { %6871 = vmatprep.subr.bf16.mxu1 %v6717_v43 }
 0xf2c   : > { %6872 = vmatpush1.bf16.msra.mxu1 %v6716_v47  ;;  %v6732_v53 = vpop.permute.xlu1 %6731 }
 0xf2d   : > { %v6736_v38 = vpop.permute.xlu0 %6735  ;;  %v6737_v11 = vsel %vm541_vm2, %v6732_v53, %v6734_v44 }
 0xf2e   : > { %v6738_v15 = vsel %vm541_vm2, %v6734_v44, %v6736_v38 }
 0xf2f   : > { %6873 = vmatprep.subr.bf16.mxu1 %v6738_v15 }
 0xf30   : > { %6874 = vmatpush1.bf16.msra.mxu1 %v6737_v11  ;;  %v6761_v55 = vpop.permute.xlu1 %6760 }
 0xf31   : > { %v6782_v5 = vpop.permute.xlu0 %6781  ;;  %6875 = vmatprep.subr.bf16.mxu1 %v10474_v21 }
 0xf34   : > { %6876 = vmatpush1.bf16.msra.mxu1 %v10472_v57  ;;  %v6778_v0 = vpop.permute.xlu1 %6777 }
 0xf35   : > { %v6759_v37 = vpop.permute.xlu0 %6758 }
 0xf36   : > { %v6762_v35 = vsel %vm524_vm1, %v6757_v2, %v6759_v37  ;;  %v6763_v27 = vsel %vm524_vm1, %v6759_v37, %v6761_v55 }
 0xf37   : > { %6877 = vmatprep.subr.bf16.mxu1 %v6763_v27 }
 0xf38   : > { %6878 = vmatpush1.bf16.msra.mxu1 %v6762_v35  ;;  %v6780_v28 = vpop.permute.xlu1 %6779 }
 0xf39   : > { %v6798_v19 = vpop.permute.xlu0 %6797  ;;  %v6784_v60 = vsel %vm493_vm0, %v6780_v28, %v6782_v5  ;;  %v6783_v24 = vsel %vm493_vm0, %v6778_v0, %v6780_v28 }
 0xf3a   : > { %6879 = vmatprep.subr.bf16.mxu1 %v6784_v60 }
 0xf3c   : > { %6880 = vmatpush1.bf16.msra.mxu1 %v6783_v24  ;;  %v6800_v34 = vpop.permute.xlu1 %6799 }
 0xf3d   : > { %v6796_v17 = vpop.permute.xlu0 %6795  ;;  %v6802_v41 = vsel %vm622_vm7, %v6798_v19, %v6800_v34 }
 0xf3e   : > { %v6801_v62 = vsel %vm622_vm7, %v6796_v17, %v6798_v19  ;;  %6881 = vmatprep.subr.bf16.mxu1 %v6802_v41 }
 0xf40   : > { %6882 = vmatpush1.bf16.msra.mxu1 %v6801_v62  ;;  %v6819_v16 = vpop.permute.xlu1 %6818 }
 0xf41   : > { %v6821_v59 = vpop.permute.xlu0 %6820 }
 0xf42   : > { %v6823_v8 = vsel %vm441_vm15, %v6819_v16, %v6821_v59 }
 0xf43   : > { %6883 = vmatprep.subr.bf16.mxu1 %v6823_v8 }
 0xf44   : > { %v6817_v12 = vpop.permute.xlu1 %6816 }
 0xf45   : > { %v6822_v33 = vsel %vm441_vm15, %v6817_v12, %v6819_v16 }
 0xf46   : > { %6884 = vmatpush1.bf16.msra.mxu1 %v6822_v33 }
 0xf49   : > { %6898 = vmatmul.mubr.bf16.vlgmr.msra.gmra.mrb[64].mxu1 %v10522_v52 }
0x101c   : > { %v6899_v56 = vpop.f32.mrb[64].mxu1 }
0x101d   : > { %v6900_v54 = vadd.f32 %v6899_v56, %v431_v25  ;;  %v6901_v6 = vpop.f32.mrb[65].mxu1 }
0x101e   : > { %v6902_v18 = vadd.f32 %v6901_v6, %v6860_v3  ;;  %v6903_v57 = vpop.f32.mrb[66].mxu1 }
0x101f   : > { %7481 = vtanh.f32 %v6900_v54  ;;  %v6904_v63 = vpop.f32.mrb[67].mxu1 }
0x1020   : > { %7483 = vtanh.f32 %v6902_v18 }
0x1029   : > { %v7482_v21 = vpop.eup %7481 }
0x102a   : > { %v7484_v51 = vpop.eup %7483 }
0x102b   : > { %v6910_v45 = vcombine.low %v7482_v21, %v7484_v51 }
0x102d   : > { %6912 = vst [vmem:[%s332_s17] sm:$0x77] %v6910_v45 }
0x102e PF: > { %s19_s30 = sadd.s32 1, %s7491_s30  }
0x102f   : > { %p16_p4 = scmp.ge.s32.totalorder %s19_s30, 4  }
0x1031   :  { %18 = sbr.rel (!%p16_p4) target bundleno = 1 (0x1), region = 86 }

</bundles_post_ra>
